<compile_context>
chip_gen: v6e
topology: v6e:2x2x1
jax: 0.10.0
libtpu: 0.0.40
codegen_flags: <defaults>
</compile_context>

<pallas_src>
import math
import functools

import numpy as np
import jax
import jax.numpy as jnp
from jax import lax
from jax.scipy.linalg import block_diag as _block_diag
from jax.experimental import pallas as pl
from jax.experimental.pallas import tpu as pltpu


GROUP = 8  # scan unroll / y-store batching factor (sublane count)


# ---------------------------------------------------------------------------
# numerics helpers (used identically in kernel and reference)
# ---------------------------------------------------------------------------
def _silu(x):
    return x / (1.0 + jnp.exp(-x))


def _softplus(x):
    xc = jnp.minimum(x, 20.0)
    return jnp.where(x > 20.0, x, jnp.log(1.0 + jnp.exp(xc)))


# ---------------------------------------------------------------------------
# Pallas kernel: one (batch row, L-chunk) step; all heads fused
# ---------------------------------------------------------------------------
def _mamba_fused_kernel(x_ref, w_in_ref, conv_w_ref, conv_b_ref, w_xp_ref,
                        w_dt_ref, b_dt_ref, a_t_ref, bcexp_ref, dskip_ref,
                        w_out_ref, o_ref,
                        h_ref, tail_ref, da_ref, dbu_ref, cb_ref, y_ref,
                        *, Lc, head, d_inner, d_state, dt_rank, d_conv):
    N = head * d_inner          # fused inner width (lane axis everywhere)
    HS = head * d_state
    bf16 = jnp.bfloat16

    # reset carried SSM / conv state at the first chunk of every batch row
    @pl.when(pl.program_id(1) == 0)
    def _init():
        h_ref[...] = jnp.zeros_like(h_ref)
        tail_ref[...] = jnp.zeros_like(tail_ref)

    x = x_ref[...]                                               # (Lc, C) f32

    # ---- fused in_proj: all heads in one bf16 MXU matmul --------------------
    xz = jnp.dot(x.astype(bf16), w_in_ref[...],
                 preferred_element_type=jnp.float32)             # (Lc, 2N)
    xs = xz[:, :N]                                               # (Lc, N)
    z = xz[:, N:]                                                # (Lc, N)

    # ---- causal depthwise conv1d (tail carried across chunks) ---------------
    # TODO(synk): replace concat + shifted sublane slices with pltpu.roll taps.
    xp = jnp.concatenate([tail_ref[...], xs], axis=0)            # (Lc+dc-1, N)
    conv_w = conv_w_ref[...]                                     # (d_conv, N)
    acc = xp[0:Lc, :] * conv_w[0:1, :]
    for k in range(1, d_conv):                                   # static taps
        acc = acc + xp[k:k + Lc, :] * conv_w[k:k + 1, :]
    u = _silu(acc + conv_b_ref[...])                             # (Lc, N) f32
    tail_ref[...] = xs[Lc - (d_conv - 1):, :]

    # ---- fused x_proj (columns ordered [B | C | dt_in], B/C 128-aligned) ----
    x_dbl = jnp.dot(u.astype(bf16), w_xp_ref[...],
                    preferred_element_type=jnp.float32)          # (Lc, 2HS+HR)
    bm = x_dbl[:, :HS]                                           # (Lc, HS)
    cm = x_dbl[:, HS:2 * HS]                                     # (Lc, HS)
    dt_in = x_dbl[:, 2 * HS:]                                    # (Lc, H*r)
    dt = _softplus(
        jnp.dot(dt_in.astype(bf16), w_dt_ref[...],
                preferred_element_type=jnp.float32)
        + b_dt_ref[...])                                         # (Lc, N) f32
    du = dt * u                                                  # (Lc, N) f32

    # ---- discretization -------------------------------------------------------
    # dA = exp(dt * A^T) -> explicit bf16 VMEM scratch (bf16 exp on the EUP).
    dt_b = dt.astype(bf16)
    a_b = a_t_ref[...].astype(bf16)                              # (S, N)
    da_ref[...] = jnp.exp(dt_b[:, None, :] * a_b[None, :, :])    # (Lc, S, N)

    # B/C head->channel expansion: one K=head*d_state MXU matmul per tensor
    # against the 0/1 expansion matrix (replaces 2*d_state K=8 matmuls).
    b_exp = jnp.dot(bm.astype(bf16), bcexp_ref[...],
                    preferred_element_type=jnp.float32)          # (Lc, S*N)
    c_exp = jnp.dot(cm.astype(bf16), bcexp_ref[...],
                    preferred_element_type=jnp.float32)          # (Lc, S*N)
    # TODO(synk): full-block store via (Lc, S*N)->(Lc, S, N) reshape once the
    # lane->sublane relayout is verified; per-s stores kept for lowering safety.
    for s in range(d_state):                                     # static loop
        sl = slice(s * N, (s + 1) * N)
        dbu_ref[:, s:s + 1, :] = (du * b_exp[:, sl])[:, None, :].astype(bf16)
        cb_ref[:, s:s + 1, :] = c_exp[:, sl][:, None, :].astype(bf16)

    # ---- selective scan: serial over the chunk, state (d_state, N) f32 -------
    # unrolled in groups of 8 steps; one aligned (8, N) y store per group.
    def group_step(g, h):
        t0 = pl.multiple_of(g * GROUP, GROUP)
        rows = []
        for j in range(GROUP):                                   # static unroll
            t = t0 + j
            h = da_ref[t] * h + dbu_ref[t]                       # bf16*f32 -> f32
            rows.append(jnp.sum(h * cb_ref[t], axis=0, keepdims=True))
        y_ref[pl.ds(t0, GROUP), :] = jnp.concatenate(rows, axis=0)
        return h

    h = lax.fori_loop(0, Lc // GROUP, group_step, h_ref[...])
    h_ref[...] = h                                               # carry state

    # ---- D skip, SiLU gate, fused bf16 out_proj -------------------------------
    y = y_ref[...] + dskip_ref[...] * u
    y = y * _silu(z)
    o_ref[...] = jnp.dot(y.astype(bf16), w_out_ref[...],
                         preferred_element_type=jnp.float32)


# ---------------------------------------------------------------------------
# fuse the 8 per-head parameter sets into block-diagonal weights (bf16 for the
# MXU-facing weights, f32 for everything consumed element-wise)
# ---------------------------------------------------------------------------
def fuse_params(p, *, head):
    d_inner = p["w_in"].shape[-1] // 2
    d_state = p["a_log"].shape[-1]
    dt_rank = p["w_dt"].shape[1]
    N = head * d_inner
    bf16 = jnp.bfloat16

    w_in_x = _block_diag(*[p["w_in"][h, :, :d_inner] for h in range(head)])
    w_in_z = _block_diag(*[p["w_in"][h, :, d_inner:] for h in range(head)])
    w_in = jnp.concatenate([w_in_x, w_in_z], axis=1).astype(bf16)    # (C, 2N)

    conv_w = jnp.concatenate([p["conv_w"][h] for h in range(head)], axis=1)
    conv_b = jnp.concatenate([p["conv_b"][h] for h in range(head)], axis=1)

    # x_proj columns ordered [B | C | dt_in]; B/C reordered s-major
    # (col = s*head + h) so the expansion matmul is a pure 0/1 broadcast.
    eye = jnp.eye(head, dtype=jnp.float32)
    w_dt_in = _block_diag(*[p["w_xp"][h, :, :dt_rank] for h in range(head)])
    wB = p["w_xp"][:, :, dt_rank:dt_rank + d_state]                  # (H,di,S)
    wC = p["w_xp"][:, :, dt_rank + d_state:]
    wB_f = (wB[:, :, :, None] * eye[:, None, None, :]).reshape(N, d_state * head)
    wC_f = (wC[:, :, :, None] * eye[:, None, None, :]).reshape(N, d_state * head)
    w_xp = jnp.concatenate([wB_f, wC_f, w_dt_in], axis=1).astype(bf16)

    w_dt = _block_diag(*[p["w_dt"][h] for h in range(head)]).astype(bf16)
    b_dt = jnp.concatenate([p["b_dt"][h] for h in range(head)], axis=1)  # f32

    # A^T fused: (d_state, N), entry [s, h*d_inner+i] = -exp(a_log[h, i, s])
    a_t = (-jnp.exp(p["a_log"])).transpose(2, 0, 1).reshape(d_state, N)
    d = jnp.concatenate([p["d"][h] for h in range(head)], axis=1)        # (1, N)
    w_out = _block_diag(*[p["w_out"][h] for h in range(head)]).astype(bf16)

    # 0/1 expansion: bc_exp[s*head + h, s*N + h*d_inner + i] = 1
    rexp = jnp.kron(eye, jnp.ones((1, d_inner), jnp.float32))            # (H, N)
    bc_exp = _block_diag(*([rexp] * d_state)).astype(bf16)   # (H*S, S*N)

    return dict(w_in=w_in, conv_w=conv_w, conv_b=conv_b, w_xp=w_xp, w_dt=w_dt,
                b_dt=b_dt, a_t=a_t, bc_exp=bc_exp, d=d, w_out=w_out)


# ---------------------------------------------------------------------------
# wrapper
# ---------------------------------------------------------------------------
def multi_head_mamba(x, params, *, head=8, chunk=128):
    B, L, C = x.shape
    d_inner = params["w_in"].shape[-1] // 2
    d_state = params["a_log"].shape[-1]
    dt_rank = params["w_dt"].shape[1]
    d_conv = params["conv_w"].shape[1]
    N = head * d_inner

    Lc = min(chunk, L)
    if L % Lc != 0 or Lc % GROUP != 0:
        raise ValueError(f"L={L} must be a multiple of the chunk {Lc}, "
                         f"and the chunk a multiple of {GROUP}")
    nL = L // Lc

    f = fuse_params(params, head=head)

    kernel = functools.partial(
        _mamba_fused_kernel, Lc=Lc, head=head, d_inner=d_inner,
        d_state=d_state, dt_rank=dt_rank, d_conv=d_conv)

    io_map = lambda b, l: (b, l, 0)   # x / out: streamed (Lc, C) slabs
    w_map = lambda b, l: (0, 0)       # weights: constant -> stay VMEM-resident
    # TODO(synk): pipeline_mode=pl.Buffered(1) on the constant weight specs
    # (single-buffering) for v7x's 64 MiB VMEM once validated.

    out = pl.pallas_call(
        kernel,
        out_shape=jax.ShapeDtypeStruct((B, L, C), jnp.float32),
        grid_spec=pltpu.PrefetchScalarGridSpec(
            num_scalar_prefetch=0,
            grid=(B, nL),
            in_specs=[
                pl.BlockSpec((None, Lc, C), io_map),     # x (batch squeezed)
                pl.BlockSpec(f["w_in"].shape, w_map),
                pl.BlockSpec(f["conv_w"].shape, w_map),
                pl.BlockSpec(f["conv_b"].shape, w_map),
                pl.BlockSpec(f["w_xp"].shape, w_map),
                pl.BlockSpec(f["w_dt"].shape, w_map),
                pl.BlockSpec(f["b_dt"].shape, w_map),
                pl.BlockSpec(f["a_t"].shape, w_map),
                pl.BlockSpec(f["bc_exp"].shape, w_map),
                pl.BlockSpec(f["d"].shape, w_map),
                pl.BlockSpec(f["w_out"].shape, w_map),
            ],
            out_specs=pl.BlockSpec((None, Lc, C), io_map),
            scratch_shapes=[
                pltpu.VMEM((d_state, N), jnp.float32),        # SSM state h
                pltpu.VMEM((d_conv - 1, N), jnp.float32),     # conv tail carry
                pltpu.VMEM((Lc, d_state, N), jnp.bfloat16),   # dA    (chunk)
                pltpu.VMEM((Lc, d_state, N), jnp.bfloat16),   # dB*u  (chunk)
                pltpu.VMEM((Lc, d_state, N), jnp.bfloat16),   # C     (chunk)
                pltpu.VMEM((Lc, N), jnp.float32),             # y     (chunk)
            ]),
        # The L axis MUST stay "arbitrary": h/tail scratch is carried across
        # consecutive L-chunks of each batch row.
        compiler_params=pltpu.CompilerParams(
            dimension_semantics=("parallel", "arbitrary"),
            vmem_limit_bytes=64 * 1024 * 1024),
    )(x, f["w_in"], f["conv_w"], f["conv_b"], f["w_xp"], f["w_dt"], f["b_dt"],
      f["a_t"], f["bc_exp"], f["d"], f["w_out"])
    return out


# ---------------------------------------------------------------------------
# deterministic parameter init (shapes follow mamba_ssm.Mamba defaults:
# d_state=16, d_conv=4, expand=2, dt_rank=ceil(d_model/16))
# ---------------------------------------------------------------------------
def init_params(key, C, head):
    d_head = C // head
    d_inner = 2 * d_head
    d_state = 16
    d_conv = 4
    dt_rank = max(1, math.ceil(d_head / 16))

    ks = jax.random.split(key, 8)
    nrm = lambda k, s, sc: jax.random.normal(k, s, jnp.float32) * sc

    w_in = nrm(ks[0], (head, d_head, 2 * d_inner), 1.0 / math.sqrt(d_head))
    conv_w = nrm(ks[1], (head, d_conv, d_inner), 1.0 / math.sqrt(d_conv))
    conv_b = nrm(ks[2], (head, 1, d_inner), 0.1)
    w_xp = nrm(ks[3], (head, d_inner, dt_rank + 2 * d_state),
               1.0 / math.sqrt(d_inner))
    w_dt = nrm(ks[4], (head, dt_rank, d_inner), 0.5 / math.sqrt(dt_rank))
    dt = jnp.exp(jax.random.uniform(ks[5], (head, 1, d_inner), jnp.float32,
                                    minval=math.log(1e-3), maxval=math.log(1e-1)))
    b_dt = dt + jnp.log(-jnp.expm1(-dt))      # inverse softplus, like Mamba init
    a_log = jnp.broadcast_to(
        jnp.log(jnp.arange(1, d_state + 1, dtype=jnp.float32))[None, None, :],
        (head, d_inner, d_state)) + jnp.zeros((head, d_inner, d_state), jnp.float32)
    d = jnp.ones((head, 1, d_inner), jnp.float32)
    w_out = nrm(ks[6], (head, d_inner, d_head), 1.0 / math.sqrt(d_inner))

    return dict(w_in=w_in, conv_w=conv_w, conv_b=conv_b, w_xp=w_xp,
                w_dt=w_dt, b_dt=b_dt, a_log=a_log, d=d, w_out=w_out)


# ---------------------------------------------------------------------------
# pure-JAX reference (mirrors selective_scan_ref) for sanity checking
# ---------------------------------------------------------------------------
def _mamba_ref(x, p):
    B, L, _ = x.shape
    d_inner = p["w_in"].shape[-1] // 2
    d_state = p["a_log"].shape[-1]
    dt_rank = p["w_dt"].shape[0]
    d_conv = p["conv_w"].shape[0]

    xz = x @ p["w_in"]
    xs, z = xz[..., :d_inner], xz[..., d_inner:]
    xp = jnp.pad(xs, ((0, 0), (d_conv - 1, 0), (0, 0)))
    u = sum(xp[:, k:k + L, :] * p["conv_w"][k][None, None, :]
            for k in range(d_conv)) + p["conv_b"][None]
    u = _silu(u)
    x_dbl = u @ p["w_xp"]
    dt = _softplus(x_dbl[..., :dt_rank] @ p["w_dt"] + p["b_dt"])
    Bm = x_dbl[..., dt_rank:dt_rank + d_state]
    Cm = x_dbl[..., dt_rank + d_state:]
    A = -jnp.exp(p["a_log"])
    dA = jnp.exp(dt[..., None] * A[None, None])
    dBu = dt[..., None] * Bm[:, :, None, :] * u[..., None]

    def step(h, inp):
        dA_t, dBu_t, C_t = inp
        h = dA_t * h + dBu_t
        return h, (h * C_t[:, None, :]).sum(-1)

    h0 = jnp.zeros((B, d_inner, d_state), jnp.float32)
    _, ys = jax.lax.scan(step, h0, (dA.transpose(1, 0, 2, 3),
                                    dBu.transpose(1, 0, 2, 3),
                                    Cm.transpose(1, 0, 2)))
    y = ys.transpose(1, 0, 2) + p["d"] * u
    y = y * _silu(z)
    return y @ p["w_out"]


def multi_head_mamba_ref(x, params, *, head=8):
    B, L, C = x.shape
    d_head = C // head
    xh = x.reshape(B, L, head, d_head)
    outs = []
    for i in range(head):
        p_i = jax.tree.map(lambda a: a[i], params)
        outs.append(_mamba_ref(xh[:, :, i, :], p_i))
    return jnp.concatenate(outs, axis=2)


# ---------------------------------------------------------------------------
if __name__ == "__main__":
    B, L, C, head = 2, 32, 64, 8
    key = jax.random.PRNGKey(0)
    kx, kp = jax.random.split(key)
    x = jax.random.normal(kx, (B, L, C), jnp.float32)
    params = init_params(kp, C, head)

    # chunk=16 -> 2 L-chunks per batch row, exercising the carried SSM state
    # and conv tail across chunks as well as the re-init at chunk 0.
    y = multi_head_mamba(x, params, head=head, chunk=16)
    jax.block_until_ready(y)

    y_ref = multi_head_mamba_ref(x, params, head=head)
    np.testing.assert_allclose(np.asarray(y), np.asarray(y_ref),
                               rtol=2e-2, atol=2e-2)
    print("KERNEL_OK")
</pallas_src>

<mosaic_0001>
module attributes {stable_mosaic.version = 11 : i64} {
  func.func @_mamba_fused_kernel(%arg0: i32, %arg1: i32, %arg2: memref<1x16x64xf32, #tpu.memory_space<vmem>>, %arg3: memref<64x256xbf16, #tpu.memory_space<vmem>>, %arg4: memref<4x128xf32, #tpu.memory_space<vmem>>, %arg5: memref<1x128xf32, #tpu.memory_space<vmem>>, %arg6: memref<128x264xbf16, #tpu.memory_space<vmem>>, %arg7: memref<8x128xbf16, #tpu.memory_space<vmem>>, %arg8: memref<1x128xf32, #tpu.memory_space<vmem>>, %arg9: memref<16x128xf32, #tpu.memory_space<vmem>>, %arg10: memref<128x2048xbf16, #tpu.memory_space<vmem>>, %arg11: memref<1x128xf32, #tpu.memory_space<vmem>>, %arg12: memref<128x64xbf16, #tpu.memory_space<vmem>>, %arg13: memref<1x16x64xf32, #tpu.memory_space<vmem>>, %arg14: memref<16x128xf32, #tpu.memory_space<vmem>>, %arg15: memref<3x128xf32, #tpu.memory_space<vmem>>, %arg16: memref<16x16x128xbf16, #tpu.memory_space<vmem>>, %arg17: memref<16x16x128xbf16, #tpu.memory_space<vmem>>, %arg18: memref<16x16x128xbf16, #tpu.memory_space<vmem>>, %arg19: memref<16x128xf32, #tpu.memory_space<vmem>>) attributes {dimension_semantics = [#tpu.dimension_semantics<parallel>, #tpu.dimension_semantics<arbitrary>], iteration_bounds = array<i64: 2, 2>, scalar_prefetch = 0 : i64, scratch_operands = 6 : i64, tpu.core_type = #tpu.core_type<tc>, window_params = [{transform_indices = @transform_0, window_bounds = array<i64: 1, 16, 64>}, {pipeline_mode = #tpu.pipeline_mode<synchronous>, transform_indices = @transform_1, window_bounds = array<i64: 64, 256>}, {pipeline_mode = #tpu.pipeline_mode<synchronous>, transform_indices = @transform_2, window_bounds = array<i64: 4, 128>}, {pipeline_mode = #tpu.pipeline_mode<synchronous>, transform_indices = @transform_3, window_bounds = array<i64: 1, 128>}, {pipeline_mode = #tpu.pipeline_mode<synchronous>, transform_indices = @transform_4, window_bounds = array<i64: 128, 264>}, {pipeline_mode = #tpu.pipeline_mode<synchronous>, transform_indices = @transform_5, window_bounds = array<i64: 8, 128>}, {pipeline_mode = #tpu.pipeline_mode<synchronous>, transform_indices = @transform_6, window_bounds = array<i64: 1, 128>}, {pipeline_mode = #tpu.pipeline_mode<synchronous>, transform_indices = @transform_7, window_bounds = array<i64: 16, 128>}, {pipeline_mode = #tpu.pipeline_mode<synchronous>, transform_indices = @transform_8, window_bounds = array<i64: 128, 2048>}, {pipeline_mode = #tpu.pipeline_mode<synchronous>, transform_indices = @transform_9, window_bounds = array<i64: 1, 128>}, {pipeline_mode = #tpu.pipeline_mode<synchronous>, transform_indices = @transform_10, window_bounds = array<i64: 128, 64>}, {transform_indices = @transform_11, window_bounds = array<i64: 1, 16, 64>}]} {
    %c0_i32 = arith.constant 0 : i32
    %0 = arith.cmpi eq, %arg1, %c0_i32 : i32
    %1 = arith.extui %0 : i1 to i32
    %c0_i32_0 = arith.constant 0 : i32
    %2 = arith.cmpi ne, %1, %c0_i32_0 : i32
    scf.if %2 {
      %cst_136 = arith.constant 0.000000e+00 : f32
      %247 = vector.broadcast %cst_136 : f32 to vector<16x128xf32>
      %c0_137 = arith.constant 0 : index
      %c0_138 = arith.constant 0 : index
      %248 = vector.load %arg14[%c0_137, %c0_138] : memref<16x128xf32, #tpu.memory_space<vmem>>, vector<16x128xf32>
      tpu.vector_store %arg14[%c0_137, %c0_138], %247 {strides = array<i32>} : memref<16x128xf32, #tpu.memory_space<vmem>>, vector<16x128xf32>,
      %cst_139 = arith.constant 0.000000e+00 : f32
      %249 = vector.broadcast %cst_139 : f32 to vector<3x128xf32>
      %c0_140 = arith.constant 0 : index
      %c0_141 = arith.constant 0 : index
      %250 = vector.load %arg15[%c0_140, %c0_141] : memref<3x128xf32, #tpu.memory_space<vmem>>, vector<3x128xf32>
      tpu.vector_store %arg15[%c0_140, %c0_141], %249 {strides = array<i32>} : memref<3x128xf32, #tpu.memory_space<vmem>>, vector<3x128xf32>,
    } else {
    }
    %c0 = arith.constant 0 : index
    %c0_1 = arith.constant 0 : index
    %c0_2 = arith.constant 0 : index
    %3 = vector.load %arg2[%c0, %c0_1, %c0_2] : memref<1x16x64xf32, #tpu.memory_space<vmem>>, vector<1x16x64xf32>
    %4 = vector.shape_cast %3 : vector<1x16x64xf32> to vector<16x64xf32>
    %5 = arith.truncf %4 : vector<16x64xf32> to vector<16x64xbf16>
    %c0_3 = arith.constant 0 : index
    %c0_4 = arith.constant 0 : index
    %6 = vector.load %arg3[%c0_3, %c0_4] : memref<64x256xbf16, #tpu.memory_space<vmem>>, vector<64x256xbf16>
    %cst = arith.constant dense<0.000000e+00> : vector<16x256xf32>
    %7 = tpu.matmul %5, %6, %cst {dimension_numbers = #tpu.dot_dimension_numbers<[1], [0], [0], [1], [0, 0, 1, 1], [], []>} : vector<16x64xbf16>, vector<64x256xbf16>, vector<16x256xf32> -> vector<16x256xf32>
    %8 = vector.extract_strided_slice %7 {offsets = [0, 0], sizes = [16, 128], strides = [1, 1]} : vector<16x256xf32> to vector<16x128xf32>
    %9 = vector.extract_strided_slice %7 {offsets = [0, 128], sizes = [16, 128], strides = [1, 1]} : vector<16x256xf32> to vector<16x128xf32>
    %c0_5 = arith.constant 0 : index
    %c0_6 = arith.constant 0 : index
    %10 = vector.load %arg15[%c0_5, %c0_6] : memref<3x128xf32, #tpu.memory_space<vmem>>, vector<3x128xf32>
    %11 = tpu.concatenate %10, %8 in 0 : vector<3x128xf32>, vector<16x128xf32> -> vector<19x128xf32>
    %c0_7 = arith.constant 0 : index
    %c0_8 = arith.constant 0 : index
    %12 = vector.load %arg4[%c0_7, %c0_8] : memref<4x128xf32, #tpu.memory_space<vmem>>, vector<4x128xf32>
    %13 = vector.extract_strided_slice %11 {offsets = [0, 0], sizes = [16, 128], strides = [1, 1]} : vector<19x128xf32> to vector<16x128xf32>
    %14 = vector.extract_strided_slice %12 {offsets = [0, 0], sizes = [1, 128], strides = [1, 1]} : vector<4x128xf32> to vector<1x128xf32>
    %15 = vector.broadcast %14 : vector<1x128xf32> to vector<16x128xf32>
    %16 = arith.mulf %13, %15 : vector<16x128xf32>
    %17 = vector.extract_strided_slice %11 {offsets = [1, 0], sizes = [16, 128], strides = [1, 1]} : vector<19x128xf32> to vector<16x128xf32>
    %18 = vector.extract_strided_slice %12 {offsets = [1, 0], sizes = [1, 128], strides = [1, 1]} : vector<4x128xf32> to vector<1x128xf32>
    %19 = vector.broadcast %18 : vector<1x128xf32> to vector<16x128xf32>
    %20 = arith.mulf %17, %19 : vector<16x128xf32>
    %21 = arith.addf %16, %20 : vector<16x128xf32>
    %22 = vector.extract_strided_slice %11 {offsets = [2, 0], sizes = [16, 128], strides = [1, 1]} : vector<19x128xf32> to vector<16x128xf32>
    %23 = vector.extract_strided_slice %12 {offsets = [2, 0], sizes = [1, 128], strides = [1, 1]} : vector<4x128xf32> to vector<1x128xf32>
    %24 = vector.broadcast %23 : vector<1x128xf32> to vector<16x128xf32>
    %25 = arith.mulf %22, %24 : vector<16x128xf32>
    %26 = arith.addf %21, %25 : vector<16x128xf32>
    %27 = vector.extract_strided_slice %11 {offsets = [3, 0], sizes = [16, 128], strides = [1, 1]} : vector<19x128xf32> to vector<16x128xf32>
    %28 = vector.extract_strided_slice %12 {offsets = [3, 0], sizes = [1, 128], strides = [1, 1]} : vector<4x128xf32> to vector<1x128xf32>
    %29 = vector.broadcast %28 : vector<1x128xf32> to vector<16x128xf32>
    %30 = arith.mulf %27, %29 : vector<16x128xf32>
    %31 = arith.addf %26, %30 : vector<16x128xf32>
    %c0_9 = arith.constant 0 : index
    %c0_10 = arith.constant 0 : index
    %32 = vector.load %arg5[%c0_9, %c0_10] : memref<1x128xf32, #tpu.memory_space<vmem>>, vector<1x128xf32>
    %33 = vector.broadcast %32 : vector<1x128xf32> to vector<16x128xf32>
    %34 = arith.addf %31, %33 : vector<16x128xf32>
    %cst_11 = arith.constant 0.000000e+00 : f32
    %35 = vector.broadcast %cst_11 : f32 to vector<16x128xf32>
    %36 = arith.subf %35, %34 : vector<16x128xf32>
    %37 = math.exp %36 : vector<16x128xf32>
    %cst_12 = arith.constant 1.000000e+00 : f32
    %38 = vector.broadcast %cst_12 : f32 to vector<16x128xf32>
    %39 = arith.addf %38, %37 : vector<16x128xf32>
    %40 = arith.divf %34, %39 : vector<16x128xf32>
    %41 = vector.extract_strided_slice %8 {offsets = [13, 0], sizes = [3, 128], strides = [1, 1]} : vector<16x128xf32> to vector<3x128xf32>
    %c0_13 = arith.constant 0 : index
    %c0_14 = arith.constant 0 : index
    %42 = vector.load %arg15[%c0_13, %c0_14] : memref<3x128xf32, #tpu.memory_space<vmem>>, vector<3x128xf32>
    tpu.vector_store %arg15[%c0_13, %c0_14], %41 {strides = array<i32>} : memref<3x128xf32, #tpu.memory_space<vmem>>, vector<3x128xf32>,
    %43 = arith.truncf %40 : vector<16x128xf32> to vector<16x128xbf16>
    %c0_15 = arith.constant 0 : index
    %c0_16 = arith.constant 0 : index
    %44 = vector.load %arg6[%c0_15, %c0_16] : memref<128x264xbf16, #tpu.memory_space<vmem>>, vector<128x264xbf16>
    %cst_17 = arith.constant dense<0.000000e+00> : vector<16x264xf32>
    %45 = tpu.matmul %43, %44, %cst_17 {dimension_numbers = #tpu.dot_dimension_numbers<[1], [0], [0], [1], [0, 0, 1, 1], [], []>} : vector<16x128xbf16>, vector<128x264xbf16>, vector<16x264xf32> -> vector<16x264xf32>
    %46 = vector.extract_strided_slice %45 {offsets = [0, 0], sizes = [16, 128], strides = [1, 1]} : vector<16x264xf32> to vector<16x128xf32>
    %47 = vector.extract_strided_slice %45 {offsets = [0, 128], sizes = [16, 128], strides = [1, 1]} : vector<16x264xf32> to vector<16x128xf32>
    %48 = vector.extract_strided_slice %45 {offsets = [0, 256], sizes = [16, 8], strides = [1, 1]} : vector<16x264xf32> to vector<16x8xf32>
    %49 = arith.truncf %48 : vector<16x8xf32> to vector<16x8xbf16>
    %c0_18 = arith.constant 0 : index
    %c0_19 = arith.constant 0 : index
    %50 = vector.load %arg7[%c0_18, %c0_19] : memref<8x128xbf16, #tpu.memory_space<vmem>>, vector<8x128xbf16>
    %cst_20 = arith.constant dense<0.000000e+00> : vector<16x128xf32>
    %51 = tpu.matmul %49, %50, %cst_20 {dimension_numbers = #tpu.dot_dimension_numbers<[1], [0], [0], [1], [0, 0, 1, 1], [], []>} : vector<16x8xbf16>, vector<8x128xbf16>, vector<16x128xf32> -> vector<16x128xf32>
    %c0_21 = arith.constant 0 : index
    %c0_22 = arith.constant 0 : index
    %52 = vector.load %arg8[%c0_21, %c0_22] : memref<1x128xf32, #tpu.memory_space<vmem>>, vector<1x128xf32>
    %53 = vector.broadcast %52 : vector<1x128xf32> to vector<16x128xf32>
    %54 = arith.addf %51, %53 : vector<16x128xf32>
    %cst_23 = arith.constant 2.000000e+01 : f32
    %55 = vector.broadcast %cst_23 : f32 to vector<16x128xf32>
    %56 = arith.minimumf %54, %55 : vector<16x128xf32>
    %cst_24 = arith.constant 2.000000e+01 : f32
    %57 = vector.broadcast %cst_24 : f32 to vector<16x128xf32>
    %58 = arith.cmpf ogt, %54, %57 : vector<16x128xf32>
    %59 = math.exp %56 : vector<16x128xf32>
    %cst_25 = arith.constant 1.000000e+00 : f32
    %60 = vector.broadcast %cst_25 : f32 to vector<16x128xf32>
    %61 = arith.addf %60, %59 : vector<16x128xf32>
    %62 = math.log %61 : vector<16x128xf32>
    %63 = arith.select %58, %54, %62 : vector<16x128xi1>, vector<16x128xf32>
    %64 = arith.mulf %63, %40 : vector<16x128xf32>
    %65 = arith.truncf %63 : vector<16x128xf32> to vector<16x128xbf16>
    %c0_26 = arith.constant 0 : index
    %c0_27 = arith.constant 0 : index
    %66 = vector.load %arg9[%c0_26, %c0_27] : memref<16x128xf32, #tpu.memory_space<vmem>>, vector<16x128xf32>
    %67 = arith.truncf %66 : vector<16x128xf32> to vector<16x128xbf16>
    %68 = vector.shape_cast %65 : vector<16x128xbf16> to vector<16x1x128xbf16>
    %69 = vector.shape_cast %67 : vector<16x128xbf16> to vector<1x16x128xbf16>
    %70 = vector.broadcast %68 : vector<16x1x128xbf16> to vector<16x16x128xbf16>
    %71 = vector.broadcast %69 : vector<1x16x128xbf16> to vector<16x16x128xbf16>
    %72 = arith.mulf %70, %71 : vector<16x16x128xbf16>
    %73 = math.exp %72 : vector<16x16x128xbf16>
    %c0_28 = arith.constant 0 : index
    %c0_29 = arith.constant 0 : index
    %c0_30 = arith.constant 0 : index
    %74 = vector.load %arg16[%c0_28, %c0_29, %c0_30] : memref<16x16x128xbf16, #tpu.memory_space<vmem>>, vector<16x16x128xbf16>
    tpu.vector_store %arg16[%c0_28, %c0_29, %c0_30], %73 {strides = array<i32>} : memref<16x16x128xbf16, #tpu.memory_space<vmem>>, vector<16x16x128xbf16>,
    %75 = arith.truncf %46 : vector<16x128xf32> to vector<16x128xbf16>
    %c0_31 = arith.constant 0 : index
    %c0_32 = arith.constant 0 : index
    %76 = vector.load %arg10[%c0_31, %c0_32] : memref<128x2048xbf16, #tpu.memory_space<vmem>>, vector<128x2048xbf16>
    %cst_33 = arith.constant dense<0.000000e+00> : vector<16x2048xf32>
    %77 = tpu.matmul %75, %76, %cst_33 {dimension_numbers = #tpu.dot_dimension_numbers<[1], [0], [0], [1], [0, 0, 1, 1], [], []>} : vector<16x128xbf16>, vector<128x2048xbf16>, vector<16x2048xf32> -> vector<16x2048xf32>
    %78 = arith.truncf %47 : vector<16x128xf32> to vector<16x128xbf16>
    %c0_34 = arith.constant 0 : index
    %c0_35 = arith.constant 0 : index
    %79 = vector.load %arg10[%c0_34, %c0_35] : memref<128x2048xbf16, #tpu.memory_space<vmem>>, vector<128x2048xbf16>
    %cst_36 = arith.constant dense<0.000000e+00> : vector<16x2048xf32>
    %80 = tpu.matmul %78, %79, %cst_36 {dimension_numbers = #tpu.dot_dimension_numbers<[1], [0], [0], [1], [0, 0, 1, 1], [], []>} : vector<16x128xbf16>, vector<128x2048xbf16>, vector<16x2048xf32> -> vector<16x2048xf32>
    %81 = vector.extract_strided_slice %77 {offsets = [0, 0], sizes = [16, 128], strides = [1, 1]} : vector<16x2048xf32> to vector<16x128xf32>
    %82 = arith.mulf %64, %81 : vector<16x128xf32>
    %83 = vector.shape_cast %82 : vector<16x128xf32> to vector<16x1x128xf32>
    %84 = arith.truncf %83 : vector<16x1x128xf32> to vector<16x1x128xbf16>
    %c0_37 = arith.constant 0 : index
    %c0_38 = arith.constant 0 : index
    %c0_39 = arith.constant 0 : index
    %85 = vector.load %arg17[%c0_37, %c0_38, %c0_39] : memref<16x16x128xbf16, #tpu.memory_space<vmem>>, vector<16x1x128xbf16>
    tpu.vector_store %arg17[%c0_37, %c0_38, %c0_39], %84 {strides = array<i32>} : memref<16x16x128xbf16, #tpu.memory_space<vmem>>, vector<16x1x128xbf16>,
    %86 = vector.extract_strided_slice %80 {offsets = [0, 0], sizes = [16, 128], strides = [1, 1]} : vector<16x2048xf32> to vector<16x128xf32>
    %87 = vector.shape_cast %86 : vector<16x128xf32> to vector<16x1x128xf32>
    %88 = arith.truncf %87 : vector<16x1x128xf32> to vector<16x1x128xbf16>
    %c0_40 = arith.constant 0 : index
    %c0_41 = arith.constant 0 : index
    %c0_42 = arith.constant 0 : index
    %89 = vector.load %arg18[%c0_40, %c0_41, %c0_42] : memref<16x16x128xbf16, #tpu.memory_space<vmem>>, vector<16x1x128xbf16>
    tpu.vector_store %arg18[%c0_40, %c0_41, %c0_42], %88 {strides = array<i32>} : memref<16x16x128xbf16, #tpu.memory_space<vmem>>, vector<16x1x128xbf16>,
    %90 = vector.extract_strided_slice %77 {offsets = [0, 128], sizes = [16, 128], strides = [1, 1]} : vector<16x2048xf32> to vector<16x128xf32>
    %91 = arith.mulf %64, %90 : vector<16x128xf32>
    %92 = vector.shape_cast %91 : vector<16x128xf32> to vector<16x1x128xf32>
    %93 = arith.truncf %92 : vector<16x1x128xf32> to vector<16x1x128xbf16>
    %c0_43 = arith.constant 0 : index
    %c1 = arith.constant 1 : index
    %c0_44 = arith.constant 0 : index
    %94 = vector.load %arg17[%c0_43, %c1, %c0_44] : memref<16x16x128xbf16, #tpu.memory_space<vmem>>, vector<16x1x128xbf16>
    tpu.vector_store %arg17[%c0_43, %c1, %c0_44], %93 {strides = array<i32>} : memref<16x16x128xbf16, #tpu.memory_space<vmem>>, vector<16x1x128xbf16>,
    %95 = vector.extract_strided_slice %80 {offsets = [0, 128], sizes = [16, 128], strides = [1, 1]} : vector<16x2048xf32> to vector<16x128xf32>
    %96 = vector.shape_cast %95 : vector<16x128xf32> to vector<16x1x128xf32>
    %97 = arith.truncf %96 : vector<16x1x128xf32> to vector<16x1x128xbf16>
    %c0_45 = arith.constant 0 : index
    %c1_46 = arith.constant 1 : index
    %c0_47 = arith.constant 0 : index
    %98 = vector.load %arg18[%c0_45, %c1_46, %c0_47] : memref<16x16x128xbf16, #tpu.memory_space<vmem>>, vector<16x1x128xbf16>
    tpu.vector_store %arg18[%c0_45, %c1_46, %c0_47], %97 {strides = array<i32>} : memref<16x16x128xbf16, #tpu.memory_space<vmem>>, vector<16x1x128xbf16>,
    %99 = vector.extract_strided_slice %77 {offsets = [0, 256], sizes = [16, 128], strides = [1, 1]} : vector<16x2048xf32> to vector<16x128xf32>
    %100 = arith.mulf %64, %99 : vector<16x128xf32>
    %101 = vector.shape_cast %100 : vector<16x128xf32> to vector<16x1x128xf32>
    %102 = arith.truncf %101 : vector<16x1x128xf32> to vector<16x1x128xbf16>
    %c0_48 = arith.constant 0 : index
    %c2 = arith.constant 2 : index
    %c0_49 = arith.constant 0 : index
    %103 = vector.load %arg17[%c0_48, %c2, %c0_49] : memref<16x16x128xbf16, #tpu.memory_space<vmem>>, vector<16x1x128xbf16>
    tpu.vector_store %arg17[%c0_48, %c2, %c0_49], %102 {strides = array<i32>} : memref<16x16x128xbf16, #tpu.memory_space<vmem>>, vector<16x1x128xbf16>,
    %104 = vector.extract_strided_slice %80 {offsets = [0, 256], sizes = [16, 128], strides = [1, 1]} : vector<16x2048xf32> to vector<16x128xf32>
    %105 = vector.shape_cast %104 : vector<16x128xf32> to vector<16x1x128xf32>
    %106 = arith.truncf %105 : vector<16x1x128xf32> to vector<16x1x128xbf16>
    %c0_50 = arith.constant 0 : index
    %c2_51 = arith.constant 2 : index
    %c0_52 = arith.constant 0 : index
    %107 = vector.load %arg18[%c0_50, %c2_51, %c0_52] : memref<16x16x128xbf16, #tpu.memory_space<vmem>>, vector<16x1x128xbf16>
    tpu.vector_store %arg18[%c0_50, %c2_51, %c0_52], %106 {strides = array<i32>} : memref<16x16x128xbf16, #tpu.memory_space<vmem>>, vector<16x1x128xbf16>,
    %108 = vector.extract_strided_slice %77 {offsets = [0, 384], sizes = [16, 128], strides = [1, 1]} : vector<16x2048xf32> to vector<16x128xf32>
    %109 = arith.mulf %64, %108 : vector<16x128xf32>
    %110 = vector.shape_cast %109 : vector<16x128xf32> to vector<16x1x128xf32>
    %111 = arith.truncf %110 : vector<16x1x128xf32> to vector<16x1x128xbf16>
    %c0_53 = arith.constant 0 : index
    %c3 = arith.constant 3 : index
    %c0_54 = arith.constant 0 : index
    %112 = vector.load %arg17[%c0_53, %c3, %c0_54] : memref<16x16x128xbf16, #tpu.memory_space<vmem>>, vector<16x1x128xbf16>
    tpu.vector_store %arg17[%c0_53, %c3, %c0_54], %111 {strides = array<i32>} : memref<16x16x128xbf16, #tpu.memory_space<vmem>>, vector<16x1x128xbf16>,
    %113 = vector.extract_strided_slice %80 {offsets = [0, 384], sizes = [16, 128], strides = [1, 1]} : vector<16x2048xf32> to vector<16x128xf32>
    %114 = vector.shape_cast %113 : vector<16x128xf32> to vector<16x1x128xf32>
    %115 = arith.truncf %114 : vector<16x1x128xf32> to vector<16x1x128xbf16>
    %c0_55 = arith.constant 0 : index
    %c3_56 = arith.constant 3 : index
    %c0_57 = arith.constant 0 : index
    %116 = vector.load %arg18[%c0_55, %c3_56, %c0_57] : memref<16x16x128xbf16, #tpu.memory_space<vmem>>, vector<16x1x128xbf16>
    tpu.vector_store %arg18[%c0_55, %c3_56, %c0_57], %115 {strides = array<i32>} : memref<16x16x128xbf16, #tpu.memory_space<vmem>>, vector<16x1x128xbf16>,
    %117 = vector.extract_strided_slice %77 {offsets = [0, 512], sizes = [16, 128], strides = [1, 1]} : vector<16x2048xf32> to vector<16x128xf32>
    %118 = arith.mulf %64, %117 : vector<16x128xf32>
    %119 = vector.shape_cast %118 : vector<16x128xf32> to vector<16x1x128xf32>
    %120 = arith.truncf %119 : vector<16x1x128xf32> to vector<16x1x128xbf16>
    %c0_58 = arith.constant 0 : index
    %c4 = arith.constant 4 : index
    %c0_59 = arith.constant 0 : index
    %121 = vector.load %arg17[%c0_58, %c4, %c0_59] : memref<16x16x128xbf16, #tpu.memory_space<vmem>>, vector<16x1x128xbf16>
    tpu.vector_store %arg17[%c0_58, %c4, %c0_59], %120 {strides = array<i32>} : memref<16x16x128xbf16, #tpu.memory_space<vmem>>, vector<16x1x128xbf16>,
    %122 = vector.extract_strided_slice %80 {offsets = [0, 512], sizes = [16, 128], strides = [1, 1]} : vector<16x2048xf32> to vector<16x128xf32>
    %123 = vector.shape_cast %122 : vector<16x128xf32> to vector<16x1x128xf32>
    %124 = arith.truncf %123 : vector<16x1x128xf32> to vector<16x1x128xbf16>
    %c0_60 = arith.constant 0 : index
    %c4_61 = arith.constant 4 : index
    %c0_62 = arith.constant 0 : index
    %125 = vector.load %arg18[%c0_60, %c4_61, %c0_62] : memref<16x16x128xbf16, #tpu.memory_space<vmem>>, vector<16x1x128xbf16>
    tpu.vector_store %arg18[%c0_60, %c4_61, %c0_62], %124 {strides = array<i32>} : memref<16x16x128xbf16, #tpu.memory_space<vmem>>, vector<16x1x128xbf16>,
    %126 = vector.extract_strided_slice %77 {offsets = [0, 640], sizes = [16, 128], strides = [1, 1]} : vector<16x2048xf32> to vector<16x128xf32>
    %127 = arith.mulf %64, %126 : vector<16x128xf32>
    %128 = vector.shape_cast %127 : vector<16x128xf32> to vector<16x1x128xf32>
    %129 = arith.truncf %128 : vector<16x1x128xf32> to vector<16x1x128xbf16>
    %c0_63 = arith.constant 0 : index
    %c5 = arith.constant 5 : index
    %c0_64 = arith.constant 0 : index
    %130 = vector.load %arg17[%c0_63, %c5, %c0_64] : memref<16x16x128xbf16, #tpu.memory_space<vmem>>, vector<16x1x128xbf16>
    tpu.vector_store %arg17[%c0_63, %c5, %c0_64], %129 {strides = array<i32>} : memref<16x16x128xbf16, #tpu.memory_space<vmem>>, vector<16x1x128xbf16>,
    %131 = vector.extract_strided_slice %80 {offsets = [0, 640], sizes = [16, 128], strides = [1, 1]} : vector<16x2048xf32> to vector<16x128xf32>
    %132 = vector.shape_cast %131 : vector<16x128xf32> to vector<16x1x128xf32>
    %133 = arith.truncf %132 : vector<16x1x128xf32> to vector<16x1x128xbf16>
    %c0_65 = arith.constant 0 : index
    %c5_66 = arith.constant 5 : index
    %c0_67 = arith.constant 0 : index
    %134 = vector.load %arg18[%c0_65, %c5_66, %c0_67] : memref<16x16x128xbf16, #tpu.memory_space<vmem>>, vector<16x1x128xbf16>
    tpu.vector_store %arg18[%c0_65, %c5_66, %c0_67], %133 {strides = array<i32>} : memref<16x16x128xbf16, #tpu.memory_space<vmem>>, vector<16x1x128xbf16>,
    %135 = vector.extract_strided_slice %77 {offsets = [0, 768], sizes = [16, 128], strides = [1, 1]} : vector<16x2048xf32> to vector<16x128xf32>
    %136 = arith.mulf %64, %135 : vector<16x128xf32>
    %137 = vector.shape_cast %136 : vector<16x128xf32> to vector<16x1x128xf32>
    %138 = arith.truncf %137 : vector<16x1x128xf32> to vector<16x1x128xbf16>
    %c0_68 = arith.constant 0 : index
    %c6 = arith.constant 6 : index
    %c0_69 = arith.constant 0 : index
    %139 = vector.load %arg17[%c0_68, %c6, %c0_69] : memref<16x16x128xbf16, #tpu.memory_space<vmem>>, vector<16x1x128xbf16>
    tpu.vector_store %arg17[%c0_68, %c6, %c0_69], %138 {strides = array<i32>} : memref<16x16x128xbf16, #tpu.memory_space<vmem>>, vector<16x1x128xbf16>,
    %140 = vector.extract_strided_slice %80 {offsets = [0, 768], sizes = [16, 128], strides = [1, 1]} : vector<16x2048xf32> to vector<16x128xf32>
    %141 = vector.shape_cast %140 : vector<16x128xf32> to vector<16x1x128xf32>
    %142 = arith.truncf %141 : vector<16x1x128xf32> to vector<16x1x128xbf16>
    %c0_70 = arith.constant 0 : index
    %c6_71 = arith.constant 6 : index
    %c0_72 = arith.constant 0 : index
    %143 = vector.load %arg18[%c0_70, %c6_71, %c0_72] : memref<16x16x128xbf16, #tpu.memory_space<vmem>>, vector<16x1x128xbf16>
    tpu.vector_store %arg18[%c0_70, %c6_71, %c0_72], %142 {strides = array<i32>} : memref<16x16x128xbf16, #tpu.memory_space<vmem>>, vector<16x1x128xbf16>,
    %144 = vector.extract_strided_slice %77 {offsets = [0, 896], sizes = [16, 128], strides = [1, 1]} : vector<16x2048xf32> to vector<16x128xf32>
    %145 = arith.mulf %64, %144 : vector<16x128xf32>
    %146 = vector.shape_cast %145 : vector<16x128xf32> to vector<16x1x128xf32>
    %147 = arith.truncf %146 : vector<16x1x128xf32> to vector<16x1x128xbf16>
    %c0_73 = arith.constant 0 : index
    %c7 = arith.constant 7 : index
    %c0_74 = arith.constant 0 : index
    %148 = vector.load %arg17[%c0_73, %c7, %c0_74] : memref<16x16x128xbf16, #tpu.memory_space<vmem>>, vector<16x1x128xbf16>
    tpu.vector_store %arg17[%c0_73, %c7, %c0_74], %147 {strides = array<i32>} : memref<16x16x128xbf16, #tpu.memory_space<vmem>>, vector<16x1x128xbf16>,
    %149 = vector.extract_strided_slice %80 {offsets = [0, 896], sizes = [16, 128], strides = [1, 1]} : vector<16x2048xf32> to vector<16x128xf32>
    %150 = vector.shape_cast %149 : vector<16x128xf32> to vector<16x1x128xf32>
    %151 = arith.truncf %150 : vector<16x1x128xf32> to vector<16x1x128xbf16>
    %c0_75 = arith.constant 0 : index
    %c7_76 = arith.constant 7 : index
    %c0_77 = arith.constant 0 : index
    %152 = vector.load %arg18[%c0_75, %c7_76, %c0_77] : memref<16x16x128xbf16, #tpu.memory_space<vmem>>, vector<16x1x128xbf16>
    tpu.vector_store %arg18[%c0_75, %c7_76, %c0_77], %151 {strides = array<i32>} : memref<16x16x128xbf16, #tpu.memory_space<vmem>>, vector<16x1x128xbf16>,
    %153 = vector.extract_strided_slice %77 {offsets = [0, 1024], sizes = [16, 128], strides = [1, 1]} : vector<16x2048xf32> to vector<16x128xf32>
    %154 = arith.mulf %64, %153 : vector<16x128xf32>
    %155 = vector.shape_cast %154 : vector<16x128xf32> to vector<16x1x128xf32>
    %156 = arith.truncf %155 : vector<16x1x128xf32> to vector<16x1x128xbf16>
    %c0_78 = arith.constant 0 : index
    %c8 = arith.constant 8 : index
    %c0_79 = arith.constant 0 : index
    %157 = vector.load %arg17[%c0_78, %c8, %c0_79] : memref<16x16x128xbf16, #tpu.memory_space<vmem>>, vector<16x1x128xbf16>
    tpu.vector_store %arg17[%c0_78, %c8, %c0_79], %156 {strides = array<i32>} : memref<16x16x128xbf16, #tpu.memory_space<vmem>>, vector<16x1x128xbf16>,
    %158 = vector.extract_strided_slice %80 {offsets = [0, 1024], sizes = [16, 128], strides = [1, 1]} : vector<16x2048xf32> to vector<16x128xf32>
    %159 = vector.shape_cast %158 : vector<16x128xf32> to vector<16x1x128xf32>
    %160 = arith.truncf %159 : vector<16x1x128xf32> to vector<16x1x128xbf16>
    %c0_80 = arith.constant 0 : index
    %c8_81 = arith.constant 8 : index
    %c0_82 = arith.constant 0 : index
    %161 = vector.load %arg18[%c0_80, %c8_81, %c0_82] : memref<16x16x128xbf16, #tpu.memory_space<vmem>>, vector<16x1x128xbf16>
    tpu.vector_store %arg18[%c0_80, %c8_81, %c0_82], %160 {strides = array<i32>} : memref<16x16x128xbf16, #tpu.memory_space<vmem>>, vector<16x1x128xbf16>,
    %162 = vector.extract_strided_slice %77 {offsets = [0, 1152], sizes = [16, 128], strides = [1, 1]} : vector<16x2048xf32> to vector<16x128xf32>
    %163 = arith.mulf %64, %162 : vector<16x128xf32>
    %164 = vector.shape_cast %163 : vector<16x128xf32> to vector<16x1x128xf32>
    %165 = arith.truncf %164 : vector<16x1x128xf32> to vector<16x1x128xbf16>
    %c0_83 = arith.constant 0 : index
    %c9 = arith.constant 9 : index
    %c0_84 = arith.constant 0 : index
    %166 = vector.load %arg17[%c0_83, %c9, %c0_84] : memref<16x16x128xbf16, #tpu.memory_space<vmem>>, vector<16x1x128xbf16>
    tpu.vector_store %arg17[%c0_83, %c9, %c0_84], %165 {strides = array<i32>} : memref<16x16x128xbf16, #tpu.memory_space<vmem>>, vector<16x1x128xbf16>,
    %167 = vector.extract_strided_slice %80 {offsets = [0, 1152], sizes = [16, 128], strides = [1, 1]} : vector<16x2048xf32> to vector<16x128xf32>
    %168 = vector.shape_cast %167 : vector<16x128xf32> to vector<16x1x128xf32>
    %169 = arith.truncf %168 : vector<16x1x128xf32> to vector<16x1x128xbf16>
    %c0_85 = arith.constant 0 : index
    %c9_86 = arith.constant 9 : index
    %c0_87 = arith.constant 0 : index
    %170 = vector.load %arg18[%c0_85, %c9_86, %c0_87] : memref<16x16x128xbf16, #tpu.memory_space<vmem>>, vector<16x1x128xbf16>
    tpu.vector_store %arg18[%c0_85, %c9_86, %c0_87], %169 {strides = array<i32>} : memref<16x16x128xbf16, #tpu.memory_space<vmem>>, vector<16x1x128xbf16>,
    %171 = vector.extract_strided_slice %77 {offsets = [0, 1280], sizes = [16, 128], strides = [1, 1]} : vector<16x2048xf32> to vector<16x128xf32>
    %172 = arith.mulf %64, %171 : vector<16x128xf32>
    %173 = vector.shape_cast %172 : vector<16x128xf32> to vector<16x1x128xf32>
    %174 = arith.truncf %173 : vector<16x1x128xf32> to vector<16x1x128xbf16>
    %c0_88 = arith.constant 0 : index
    %c10 = arith.constant 10 : index
    %c0_89 = arith.constant 0 : index
    %175 = vector.load %arg17[%c0_88, %c10, %c0_89] : memref<16x16x128xbf16, #tpu.memory_space<vmem>>, vector<16x1x128xbf16>
    tpu.vector_store %arg17[%c0_88, %c10, %c0_89], %174 {strides = array<i32>} : memref<16x16x128xbf16, #tpu.memory_space<vmem>>, vector<16x1x128xbf16>,
    %176 = vector.extract_strided_slice %80 {offsets = [0, 1280], sizes = [16, 128], strides = [1, 1]} : vector<16x2048xf32> to vector<16x128xf32>
    %177 = vector.shape_cast %176 : vector<16x128xf32> to vector<16x1x128xf32>
    %178 = arith.truncf %177 : vector<16x1x128xf32> to vector<16x1x128xbf16>
    %c0_90 = arith.constant 0 : index
    %c10_91 = arith.constant 10 : index
    %c0_92 = arith.constant 0 : index
    %179 = vector.load %arg18[%c0_90, %c10_91, %c0_92] : memref<16x16x128xbf16, #tpu.memory_space<vmem>>, vector<16x1x128xbf16>
    tpu.vector_store %arg18[%c0_90, %c10_91, %c0_92], %178 {strides = array<i32>} : memref<16x16x128xbf16, #tpu.memory_space<vmem>>, vector<16x1x128xbf16>,
    %180 = vector.extract_strided_slice %77 {offsets = [0, 1408], sizes = [16, 128], strides = [1, 1]} : vector<16x2048xf32> to vector<16x128xf32>
    %181 = arith.mulf %64, %180 : vector<16x128xf32>
    %182 = vector.shape_cast %181 : vector<16x128xf32> to vector<16x1x128xf32>
    %183 = arith.truncf %182 : vector<16x1x128xf32> to vector<16x1x128xbf16>
    %c0_93 = arith.constant 0 : index
    %c11 = arith.constant 11 : index
    %c0_94 = arith.constant 0 : index
    %184 = vector.load %arg17[%c0_93, %c11, %c0_94] : memref<16x16x128xbf16, #tpu.memory_space<vmem>>, vector<16x1x128xbf16>
    tpu.vector_store %arg17[%c0_93, %c11, %c0_94], %183 {strides = array<i32>} : memref<16x16x128xbf16, #tpu.memory_space<vmem>>, vector<16x1x128xbf16>,
    %185 = vector.extract_strided_slice %80 {offsets = [0, 1408], sizes = [16, 128], strides = [1, 1]} : vector<16x2048xf32> to vector<16x128xf32>
    %186 = vector.shape_cast %185 : vector<16x128xf32> to vector<16x1x128xf32>
    %187 = arith.truncf %186 : vector<16x1x128xf32> to vector<16x1x128xbf16>
    %c0_95 = arith.constant 0 : index
    %c11_96 = arith.constant 11 : index
    %c0_97 = arith.constant 0 : index
    %188 = vector.load %arg18[%c0_95, %c11_96, %c0_97] : memref<16x16x128xbf16, #tpu.memory_space<vmem>>, vector<16x1x128xbf16>
    tpu.vector_store %arg18[%c0_95, %c11_96, %c0_97], %187 {strides = array<i32>} : memref<16x16x128xbf16, #tpu.memory_space<vmem>>, vector<16x1x128xbf16>,
    %189 = vector.extract_strided_slice %77 {offsets = [0, 1536], sizes = [16, 128], strides = [1, 1]} : vector<16x2048xf32> to vector<16x128xf32>
    %190 = arith.mulf %64, %189 : vector<16x128xf32>
    %191 = vector.shape_cast %190 : vector<16x128xf32> to vector<16x1x128xf32>
    %192 = arith.truncf %191 : vector<16x1x128xf32> to vector<16x1x128xbf16>
    %c0_98 = arith.constant 0 : index
    %c12 = arith.constant 12 : index
    %c0_99 = arith.constant 0 : index
    %193 = vector.load %arg17[%c0_98, %c12, %c0_99] : memref<16x16x128xbf16, #tpu.memory_space<vmem>>, vector<16x1x128xbf16>
    tpu.vector_store %arg17[%c0_98, %c12, %c0_99], %192 {strides = array<i32>} : memref<16x16x128xbf16, #tpu.memory_space<vmem>>, vector<16x1x128xbf16>,
    %194 = vector.extract_strided_slice %80 {offsets = [0, 1536], sizes = [16, 128], strides = [1, 1]} : vector<16x2048xf32> to vector<16x128xf32>
    %195 = vector.shape_cast %194 : vector<16x128xf32> to vector<16x1x128xf32>
    %196 = arith.truncf %195 : vector<16x1x128xf32> to vector<16x1x128xbf16>
    %c0_100 = arith.constant 0 : index
    %c12_101 = arith.constant 12 : index
    %c0_102 = arith.constant 0 : index
    %197 = vector.load %arg18[%c0_100, %c12_101, %c0_102] : memref<16x16x128xbf16, #tpu.memory_space<vmem>>, vector<16x1x128xbf16>
    tpu.vector_store %arg18[%c0_100, %c12_101, %c0_102], %196 {strides = array<i32>} : memref<16x16x128xbf16, #tpu.memory_space<vmem>>, vector<16x1x128xbf16>,
    %198 = vector.extract_strided_slice %77 {offsets = [0, 1664], sizes = [16, 128], strides = [1, 1]} : vector<16x2048xf32> to vector<16x128xf32>
    %199 = arith.mulf %64, %198 : vector<16x128xf32>
    %200 = vector.shape_cast %199 : vector<16x128xf32> to vector<16x1x128xf32>
    %201 = arith.truncf %200 : vector<16x1x128xf32> to vector<16x1x128xbf16>
    %c0_103 = arith.constant 0 : index
    %c13 = arith.constant 13 : index
    %c0_104 = arith.constant 0 : index
    %202 = vector.load %arg17[%c0_103, %c13, %c0_104] : memref<16x16x128xbf16, #tpu.memory_space<vmem>>, vector<16x1x128xbf16>
    tpu.vector_store %arg17[%c0_103, %c13, %c0_104], %201 {strides = array<i32>} : memref<16x16x128xbf16, #tpu.memory_space<vmem>>, vector<16x1x128xbf16>,
    %203 = vector.extract_strided_slice %80 {offsets = [0, 1664], sizes = [16, 128], strides = [1, 1]} : vector<16x2048xf32> to vector<16x128xf32>
    %204 = vector.shape_cast %203 : vector<16x128xf32> to vector<16x1x128xf32>
    %205 = arith.truncf %204 : vector<16x1x128xf32> to vector<16x1x128xbf16>
    %c0_105 = arith.constant 0 : index
    %c13_106 = arith.constant 13 : index
    %c0_107 = arith.constant 0 : index
    %206 = vector.load %arg18[%c0_105, %c13_106, %c0_107] : memref<16x16x128xbf16, #tpu.memory_space<vmem>>, vector<16x1x128xbf16>
    tpu.vector_store %arg18[%c0_105, %c13_106, %c0_107], %205 {strides = array<i32>} : memref<16x16x128xbf16, #tpu.memory_space<vmem>>, vector<16x1x128xbf16>,
    %207 = vector.extract_strided_slice %77 {offsets = [0, 1792], sizes = [16, 128], strides = [1, 1]} : vector<16x2048xf32> to vector<16x128xf32>
    %208 = arith.mulf %64, %207 : vector<16x128xf32>
    %209 = vector.shape_cast %208 : vector<16x128xf32> to vector<16x1x128xf32>
    %210 = arith.truncf %209 : vector<16x1x128xf32> to vector<16x1x128xbf16>
    %c0_108 = arith.constant 0 : index
    %c14 = arith.constant 14 : index
    %c0_109 = arith.constant 0 : index
    %211 = vector.load %arg17[%c0_108, %c14, %c0_109] : memref<16x16x128xbf16, #tpu.memory_space<vmem>>, vector<16x1x128xbf16>
    tpu.vector_store %arg17[%c0_108, %c14, %c0_109], %210 {strides = array<i32>} : memref<16x16x128xbf16, #tpu.memory_space<vmem>>, vector<16x1x128xbf16>,
    %212 = vector.extract_strided_slice %80 {offsets = [0, 1792], sizes = [16, 128], strides = [1, 1]} : vector<16x2048xf32> to vector<16x128xf32>
    %213 = vector.shape_cast %212 : vector<16x128xf32> to vector<16x1x128xf32>
    %214 = arith.truncf %213 : vector<16x1x128xf32> to vector<16x1x128xbf16>
    %c0_110 = arith.constant 0 : index
    %c14_111 = arith.constant 14 : index
    %c0_112 = arith.constant 0 : index
    %215 = vector.load %arg18[%c0_110, %c14_111, %c0_112] : memref<16x16x128xbf16, #tpu.memory_space<vmem>>, vector<16x1x128xbf16>
    tpu.vector_store %arg18[%c0_110, %c14_111, %c0_112], %214 {strides = array<i32>} : memref<16x16x128xbf16, #tpu.memory_space<vmem>>, vector<16x1x128xbf16>,
    %216 = vector.extract_strided_slice %77 {offsets = [0, 1920], sizes = [16, 128], strides = [1, 1]} : vector<16x2048xf32> to vector<16x128xf32>
    %217 = arith.mulf %64, %216 : vector<16x128xf32>
    %218 = vector.shape_cast %217 : vector<16x128xf32> to vector<16x1x128xf32>
    %219 = arith.truncf %218 : vector<16x1x128xf32> to vector<16x1x128xbf16>
    %c0_113 = arith.constant 0 : index
    %c15 = arith.constant 15 : index
    %c0_114 = arith.constant 0 : index
    %220 = vector.load %arg17[%c0_113, %c15, %c0_114] : memref<16x16x128xbf16, #tpu.memory_space<vmem>>, vector<16x1x128xbf16>
    tpu.vector_store %arg17[%c0_113, %c15, %c0_114], %219 {strides = array<i32>} : memref<16x16x128xbf16, #tpu.memory_space<vmem>>, vector<16x1x128xbf16>,
    %221 = vector.extract_strided_slice %80 {offsets = [0, 1920], sizes = [16, 128], strides = [1, 1]} : vector<16x2048xf32> to vector<16x128xf32>
    %222 = vector.shape_cast %221 : vector<16x128xf32> to vector<16x1x128xf32>
    %223 = arith.truncf %222 : vector<16x1x128xf32> to vector<16x1x128xbf16>
    %c0_115 = arith.constant 0 : index
    %c15_116 = arith.constant 15 : index
    %c0_117 = arith.constant 0 : index
    %224 = vector.load %arg18[%c0_115, %c15_116, %c0_117] : memref<16x16x128xbf16, #tpu.memory_space<vmem>>, vector<16x1x128xbf16>
    tpu.vector_store %arg18[%c0_115, %c15_116, %c0_117], %223 {strides = array<i32>} : memref<16x16x128xbf16, #tpu.memory_space<vmem>>, vector<16x1x128xbf16>,
    %c0_118 = arith.constant 0 : index
    %c0_119 = arith.constant 0 : index
    %225 = vector.load %arg14[%c0_118, %c0_119] : memref<16x128xf32, #tpu.memory_space<vmem>>, vector<16x128xf32>
    %c0_i32_120 = arith.constant 0 : i32
    %c2_i32 = arith.constant 2 : i32
    %226 = arith.addi %c0_i32_120, %c2_i32 : i32
    %c1_i32 = arith.constant 1 : i32
    %227 = scf.for %arg20 = %c0_i32_120 to %226 step %c1_i32 iter_args(%arg21 = %225) -> (vector<16x128xf32>)  : i32 {
      %c8_i32 = arith.constant 8 : i32
      %247 = arith.muli %arg20, %c8_i32 : i32
      %248 = tpu.assume_multiple %247, 8 : i32
      %c0_i32_136 = arith.constant 0 : i32
      %249 = arith.addi %248, %c0_i32_136 : i32
      %250 = arith.index_cast %249 : i32 to index
      %c0_137 = arith.constant 0 : index
      %c0_138 = arith.constant 0 : index
      %251 = vector.load %arg16[%250, %c0_137, %c0_138] : memref<16x16x128xbf16, #tpu.memory_space<vmem>>, vector<1x16x128xbf16>
      %252 = vector.shape_cast %251 : vector<1x16x128xbf16> to vector<16x128xbf16>
      %253 = arith.extf %252 : vector<16x128xbf16> to vector<16x128xf32>
      %254 = arith.mulf %253, %arg21 : vector<16x128xf32>
      %255 = arith.index_cast %249 : i32 to index
      %c0_139 = arith.constant 0 : index
      %c0_140 = arith.constant 0 : index
      %256 = vector.load %arg17[%255, %c0_139, %c0_140] : memref<16x16x128xbf16, #tpu.memory_space<vmem>>, vector<1x16x128xbf16>
      %257 = vector.shape_cast %256 : vector<1x16x128xbf16> to vector<16x128xbf16>
      %258 = arith.extf %257 : vector<16x128xbf16> to vector<16x128xf32>
      %259 = arith.addf %254, %258 : vector<16x128xf32>
      %260 = arith.index_cast %249 : i32 to index
      %c0_141 = arith.constant 0 : index
      %c0_142 = arith.constant 0 : index
      %261 = vector.load %arg18[%260, %c0_141, %c0_142] : memref<16x16x128xbf16, #tpu.memory_space<vmem>>, vector<1x16x128xbf16>
      %262 = vector.shape_cast %261 : vector<1x16x128xbf16> to vector<16x128xbf16>
      %263 = arith.extf %262 : vector<16x128xbf16> to vector<16x128xf32>
      %264 = arith.mulf %259, %263 : vector<16x128xf32>
      %cst_143 = arith.constant dense<0.000000e+00> : vector<128xf32>
      %265 = vector.multi_reduction <add>, %264, %cst_143 [0] : vector<16x128xf32> to vector<128xf32>
      %266 = vector.shape_cast %265 : vector<128xf32> to vector<1x128xf32>
      %c1_i32_144 = arith.constant 1 : i32
      %267 = arith.addi %248, %c1_i32_144 : i32
      %268 = arith.index_cast %267 : i32 to index
      %c0_145 = arith.constant 0 : index
      %c0_146 = arith.constant 0 : index
      %269 = vector.load %arg16[%268, %c0_145, %c0_146] : memref<16x16x128xbf16, #tpu.memory_space<vmem>>, vector<1x16x128xbf16>
      %270 = vector.shape_cast %269 : vector<1x16x128xbf16> to vector<16x128xbf16>
      %271 = arith.extf %270 : vector<16x128xbf16> to vector<16x128xf32>
      %272 = arith.mulf %271, %259 : vector<16x128xf32>
      %273 = arith.index_cast %267 : i32 to index
      %c0_147 = arith.constant 0 : index
      %c0_148 = arith.constant 0 : index
      %274 = vector.load %arg17[%273, %c0_147, %c0_148] : memref<16x16x128xbf16, #tpu.memory_space<vmem>>, vector<1x16x128xbf16>
      %275 = vector.shape_cast %274 : vector<1x16x128xbf16> to vector<16x128xbf16>
      %276 = arith.extf %275 : vector<16x128xbf16> to vector<16x128xf32>
      %277 = arith.addf %272, %276 : vector<16x128xf32>
      %278 = arith.index_cast %267 : i32 to index
      %c0_149 = arith.constant 0 : index
      %c0_150 = arith.constant 0 : index
      %279 = vector.load %arg18[%278, %c0_149, %c0_150] : memref<16x16x128xbf16, #tpu.memory_space<vmem>>, vector<1x16x128xbf16>
      %280 = vector.shape_cast %279 : vector<1x16x128xbf16> to vector<16x128xbf16>
      %281 = arith.extf %280 : vector<16x128xbf16> to vector<16x128xf32>
      %282 = arith.mulf %277, %281 : vector<16x128xf32>
      %cst_151 = arith.constant dense<0.000000e+00> : vector<128xf32>
      %283 = vector.multi_reduction <add>, %282, %cst_151 [0] : vector<16x128xf32> to vector<128xf32>
      %284 = vector.shape_cast %283 : vector<128xf32> to vector<1x128xf32>
      %c2_i32_152 = arith.constant 2 : i32
      %285 = arith.addi %248, %c2_i32_152 : i32
      %286 = arith.index_cast %285 : i32 to index
      %c0_153 = arith.constant 0 : index
      %c0_154 = arith.constant 0 : index
      %287 = vector.load %arg16[%286, %c0_153, %c0_154] : memref<16x16x128xbf16, #tpu.memory_space<vmem>>, vector<1x16x128xbf16>
      %288 = vector.shape_cast %287 : vector<1x16x128xbf16> to vector<16x128xbf16>
      %289 = arith.extf %288 : vector<16x128xbf16> to vector<16x128xf32>
      %290 = arith.mulf %289, %277 : vector<16x128xf32>
      %291 = arith.index_cast %285 : i32 to index
      %c0_155 = arith.constant 0 : index
      %c0_156 = arith.constant 0 : index
      %292 = vector.load %arg17[%291, %c0_155, %c0_156] : memref<16x16x128xbf16, #tpu.memory_space<vmem>>, vector<1x16x128xbf16>
      %293 = vector.shape_cast %292 : vector<1x16x128xbf16> to vector<16x128xbf16>
      %294 = arith.extf %293 : vector<16x128xbf16> to vector<16x128xf32>
      %295 = arith.addf %290, %294 : vector<16x128xf32>
      %296 = arith.index_cast %285 : i32 to index
      %c0_157 = arith.constant 0 : index
      %c0_158 = arith.constant 0 : index
      %297 = vector.load %arg18[%296, %c0_157, %c0_158] : memref<16x16x128xbf16, #tpu.memory_space<vmem>>, vector<1x16x128xbf16>
      %298 = vector.shape_cast %297 : vector<1x16x128xbf16> to vector<16x128xbf16>
      %299 = arith.extf %298 : vector<16x128xbf16> to vector<16x128xf32>
      %300 = arith.mulf %295, %299 : vector<16x128xf32>
      %cst_159 = arith.constant dense<0.000000e+00> : vector<128xf32>
      %301 = vector.multi_reduction <add>, %300, %cst_159 [0] : vector<16x128xf32> to vector<128xf32>
      %302 = vector.shape_cast %301 : vector<128xf32> to vector<1x128xf32>
      %c3_i32 = arith.constant 3 : i32
      %303 = arith.addi %248, %c3_i32 : i32
      %304 = arith.index_cast %303 : i32 to index
      %c0_160 = arith.constant 0 : index
      %c0_161 = arith.constant 0 : index
      %305 = vector.load %arg16[%304, %c0_160, %c0_161] : memref<16x16x128xbf16, #tpu.memory_space<vmem>>, vector<1x16x128xbf16>
      %306 = vector.shape_cast %305 : vector<1x16x128xbf16> to vector<16x128xbf16>
      %307 = arith.extf %306 : vector<16x128xbf16> to vector<16x128xf32>
      %308 = arith.mulf %307, %295 : vector<16x128xf32>
      %309 = arith.index_cast %303 : i32 to index
      %c0_162 = arith.constant 0 : index
      %c0_163 = arith.constant 0 : index
      %310 = vector.load %arg17[%309, %c0_162, %c0_163] : memref<16x16x128xbf16, #tpu.memory_space<vmem>>, vector<1x16x128xbf16>
      %311 = vector.shape_cast %310 : vector<1x16x128xbf16> to vector<16x128xbf16>
      %312 = arith.extf %311 : vector<16x128xbf16> to vector<16x128xf32>
      %313 = arith.addf %308, %312 : vector<16x128xf32>
      %314 = arith.index_cast %303 : i32 to index
      %c0_164 = arith.constant 0 : index
      %c0_165 = arith.constant 0 : index
      %315 = vector.load %arg18[%314, %c0_164, %c0_165] : memref<16x16x128xbf16, #tpu.memory_space<vmem>>, vector<1x16x128xbf16>
      %316 = vector.shape_cast %315 : vector<1x16x128xbf16> to vector<16x128xbf16>
      %317 = arith.extf %316 : vector<16x128xbf16> to vector<16x128xf32>
      %318 = arith.mulf %313, %317 : vector<16x128xf32>
      %cst_166 = arith.constant dense<0.000000e+00> : vector<128xf32>
      %319 = vector.multi_reduction <add>, %318, %cst_166 [0] : vector<16x128xf32> to vector<128xf32>
      %320 = vector.shape_cast %319 : vector<128xf32> to vector<1x128xf32>
      %c4_i32 = arith.constant 4 : i32
      %321 = arith.addi %248, %c4_i32 : i32
      %322 = arith.index_cast %321 : i32 to index
      %c0_167 = arith.constant 0 : index
      %c0_168 = arith.constant 0 : index
      %323 = vector.load %arg16[%322, %c0_167, %c0_168] : memref<16x16x128xbf16, #tpu.memory_space<vmem>>, vector<1x16x128xbf16>
      %324 = vector.shape_cast %323 : vector<1x16x128xbf16> to vector<16x128xbf16>
      %325 = arith.extf %324 : vector<16x128xbf16> to vector<16x128xf32>
      %326 = arith.mulf %325, %313 : vector<16x128xf32>
      %327 = arith.index_cast %321 : i32 to index
      %c0_169 = arith.constant 0 : index
      %c0_170 = arith.constant 0 : index
      %328 = vector.load %arg17[%327, %c0_169, %c0_170] : memref<16x16x128xbf16, #tpu.memory_space<vmem>>, vector<1x16x128xbf16>
      %329 = vector.shape_cast %328 : vector<1x16x128xbf16> to vector<16x128xbf16>
      %330 = arith.extf %329 : vector<16x128xbf16> to vector<16x128xf32>
      %331 = arith.addf %326, %330 : vector<16x128xf32>
      %332 = arith.index_cast %321 : i32 to index
      %c0_171 = arith.constant 0 : index
      %c0_172 = arith.constant 0 : index
      %333 = vector.load %arg18[%332, %c0_171, %c0_172] : memref<16x16x128xbf16, #tpu.memory_space<vmem>>, vector<1x16x128xbf16>
      %334 = vector.shape_cast %333 : vector<1x16x128xbf16> to vector<16x128xbf16>
      %335 = arith.extf %334 : vector<16x128xbf16> to vector<16x128xf32>
      %336 = arith.mulf %331, %335 : vector<16x128xf32>
      %cst_173 = arith.constant dense<0.000000e+00> : vector<128xf32>
      %337 = vector.multi_reduction <add>, %336, %cst_173 [0] : vector<16x128xf32> to vector<128xf32>
      %338 = vector.shape_cast %337 : vector<128xf32> to vector<1x128xf32>
      %c5_i32 = arith.constant 5 : i32
      %339 = arith.addi %248, %c5_i32 : i32
      %340 = arith.index_cast %339 : i32 to index
      %c0_174 = arith.constant 0 : index
      %c0_175 = arith.constant 0 : index
      %341 = vector.load %arg16[%340, %c0_174, %c0_175] : memref<16x16x128xbf16, #tpu.memory_space<vmem>>, vector<1x16x128xbf16>
      %342 = vector.shape_cast %341 : vector<1x16x128xbf16> to vector<16x128xbf16>
      %343 = arith.extf %342 : vector<16x128xbf16> to vector<16x128xf32>
      %344 = arith.mulf %343, %331 : vector<16x128xf32>
      %345 = arith.index_cast %339 : i32 to index
      %c0_176 = arith.constant 0 : index
      %c0_177 = arith.constant 0 : index
      %346 = vector.load %arg17[%345, %c0_176, %c0_177] : memref<16x16x128xbf16, #tpu.memory_space<vmem>>, vector<1x16x128xbf16>
      %347 = vector.shape_cast %346 : vector<1x16x128xbf16> to vector<16x128xbf16>
      %348 = arith.extf %347 : vector<16x128xbf16> to vector<16x128xf32>
      %349 = arith.addf %344, %348 : vector<16x128xf32>
      %350 = arith.index_cast %339 : i32 to index
      %c0_178 = arith.constant 0 : index
      %c0_179 = arith.constant 0 : index
      %351 = vector.load %arg18[%350, %c0_178, %c0_179] : memref<16x16x128xbf16, #tpu.memory_space<vmem>>, vector<1x16x128xbf16>
      %352 = vector.shape_cast %351 : vector<1x16x128xbf16> to vector<16x128xbf16>
      %353 = arith.extf %352 : vector<16x128xbf16> to vector<16x128xf32>
      %354 = arith.mulf %349, %353 : vector<16x128xf32>
      %cst_180 = arith.constant dense<0.000000e+00> : vector<128xf32>
      %355 = vector.multi_reduction <add>, %354, %cst_180 [0] : vector<16x128xf32> to vector<128xf32>
      %356 = vector.shape_cast %355 : vector<128xf32> to vector<1x128xf32>
      %c6_i32 = arith.constant 6 : i32
      %357 = arith.addi %248, %c6_i32 : i32
      %358 = arith.index_cast %357 : i32 to index
      %c0_181 = arith.constant 0 : index
      %c0_182 = arith.constant 0 : index
      %359 = vector.load %arg16[%358, %c0_181, %c0_182] : memref<16x16x128xbf16, #tpu.memory_space<vmem>>, vector<1x16x128xbf16>
      %360 = vector.shape_cast %359 : vector<1x16x128xbf16> to vector<16x128xbf16>
      %361 = arith.extf %360 : vector<16x128xbf16> to vector<16x128xf32>
      %362 = arith.mulf %361, %349 : vector<16x128xf32>
      %363 = arith.index_cast %357 : i32 to index
      %c0_183 = arith.constant 0 : index
      %c0_184 = arith.constant 0 : index
      %364 = vector.load %arg17[%363, %c0_183, %c0_184] : memref<16x16x128xbf16, #tpu.memory_space<vmem>>, vector<1x16x128xbf16>
      %365 = vector.shape_cast %364 : vector<1x16x128xbf16> to vector<16x128xbf16>
      %366 = arith.extf %365 : vector<16x128xbf16> to vector<16x128xf32>
      %367 = arith.addf %362, %366 : vector<16x128xf32>
      %368 = arith.index_cast %357 : i32 to index
      %c0_185 = arith.constant 0 : index
      %c0_186 = arith.constant 0 : index
      %369 = vector.load %arg18[%368, %c0_185, %c0_186] : memref<16x16x128xbf16, #tpu.memory_space<vmem>>, vector<1x16x128xbf16>
      %370 = vector.shape_cast %369 : vector<1x16x128xbf16> to vector<16x128xbf16>
      %371 = arith.extf %370 : vector<16x128xbf16> to vector<16x128xf32>
      %372 = arith.mulf %367, %371 : vector<16x128xf32>
      %cst_187 = arith.constant dense<0.000000e+00> : vector<128xf32>
      %373 = vector.multi_reduction <add>, %372, %cst_187 [0] : vector<16x128xf32> to vector<128xf32>
      %374 = vector.shape_cast %373 : vector<128xf32> to vector<1x128xf32>
      %c7_i32 = arith.constant 7 : i32
      %375 = arith.addi %248, %c7_i32 : i32
      %376 = arith.index_cast %375 : i32 to index
      %c0_188 = arith.constant 0 : index
      %c0_189 = arith.constant 0 : index
      %377 = vector.load %arg16[%376, %c0_188, %c0_189] : memref<16x16x128xbf16, #tpu.memory_space<vmem>>, vector<1x16x128xbf16>
      %378 = vector.shape_cast %377 : vector<1x16x128xbf16> to vector<16x128xbf16>
      %379 = arith.extf %378 : vector<16x128xbf16> to vector<16x128xf32>
      %380 = arith.mulf %379, %367 : vector<16x128xf32>
      %381 = arith.index_cast %375 : i32 to index
      %c0_190 = arith.constant 0 : index
      %c0_191 = arith.constant 0 : index
      %382 = vector.load %arg17[%381, %c0_190, %c0_191] : memref<16x16x128xbf16, #tpu.memory_space<vmem>>, vector<1x16x128xbf16>
      %383 = vector.shape_cast %382 : vector<1x16x128xbf16> to vector<16x128xbf16>
      %384 = arith.extf %383 : vector<16x128xbf16> to vector<16x128xf32>
      %385 = arith.addf %380, %384 : vector<16x128xf32>
      %386 = arith.index_cast %375 : i32 to index
      %c0_192 = arith.constant 0 : index
      %c0_193 = arith.constant 0 : index
      %387 = vector.load %arg18[%386, %c0_192, %c0_193] : memref<16x16x128xbf16, #tpu.memory_space<vmem>>, vector<1x16x128xbf16>
      %388 = vector.shape_cast %387 : vector<1x16x128xbf16> to vector<16x128xbf16>
      %389 = arith.extf %388 : vector<16x128xbf16> to vector<16x128xf32>
      %390 = arith.mulf %385, %389 : vector<16x128xf32>
      %cst_194 = arith.constant dense<0.000000e+00> : vector<128xf32>
      %391 = vector.multi_reduction <add>, %390, %cst_194 [0] : vector<16x128xf32> to vector<128xf32>
      %392 = vector.shape_cast %391 : vector<128xf32> to vector<1x128xf32>
      %393 = tpu.concatenate %266, %284, %302, %320, %338, %356, %374, %392 in 0 : vector<1x128xf32>, vector<1x128xf32>, vector<1x128xf32>, vector<1x128xf32>, vector<1x128xf32>, vector<1x128xf32>, vector<1x128xf32>, vector<1x128xf32> -> vector<8x128xf32>
      %394 = arith.index_cast %248 : i32 to index
      %c0_195 = arith.constant 0 : index
      %395 = vector.load %arg19[%394, %c0_195] : memref<16x128xf32, #tpu.memory_space<vmem>>, vector<8x128xf32>
      tpu.vector_store %arg19[%394, %c0_195], %393 {strides = array<i32>} : memref<16x128xf32, #tpu.memory_space<vmem>>, vector<8x128xf32>,
      scf.yield %385 : vector<16x128xf32>
    }
    %c2_i32_121 = arith.constant 2 : i32
    %c0_122 = arith.constant 0 : index
    %c0_123 = arith.constant 0 : index
    %228 = vector.load %arg14[%c0_122, %c0_123] : memref<16x128xf32, #tpu.memory_space<vmem>>, vector<16x128xf32>
    tpu.vector_store %arg14[%c0_122, %c0_123], %227 {strides = array<i32>} : memref<16x128xf32, #tpu.memory_space<vmem>>, vector<16x128xf32>,
    %c0_124 = arith.constant 0 : index
    %c0_125 = arith.constant 0 : index
    %229 = vector.load %arg19[%c0_124, %c0_125] : memref<16x128xf32, #tpu.memory_space<vmem>>, vector<16x128xf32>
    %c0_126 = arith.constant 0 : index
    %c0_127 = arith.constant 0 : index
    %230 = vector.load %arg11[%c0_126, %c0_127] : memref<1x128xf32, #tpu.memory_space<vmem>>, vector<1x128xf32>
    %231 = vector.broadcast %230 : vector<1x128xf32> to vector<16x128xf32>
    %232 = arith.mulf %231, %40 : vector<16x128xf32>
    %233 = arith.addf %229, %232 : vector<16x128xf32>
    %cst_128 = arith.constant 0.000000e+00 : f32
    %234 = vector.broadcast %cst_128 : f32 to vector<16x128xf32>
    %235 = arith.subf %234, %9 : vector<16x128xf32>
    %236 = math.exp %235 : vector<16x128xf32>
    %cst_129 = arith.constant 1.000000e+00 : f32
    %237 = vector.broadcast %cst_129 : f32 to vector<16x128xf32>
    %238 = arith.addf %237, %236 : vector<16x128xf32>
    %239 = arith.divf %9, %238 : vector<16x128xf32>
    %240 = arith.mulf %233, %239 : vector<16x128xf32>
    %241 = arith.truncf %240 : vector<16x128xf32> to vector<16x128xbf16>
    %c0_130 = arith.constant 0 : index
    %c0_131 = arith.constant 0 : index
    %242 = vector.load %arg12[%c0_130, %c0_131] : memref<128x64xbf16, #tpu.memory_space<vmem>>, vector<128x64xbf16>
    %cst_132 = arith.constant dense<0.000000e+00> : vector<16x64xf32>
    %243 = tpu.matmul %241, %242, %cst_132 {dimension_numbers = #tpu.dot_dimension_numbers<[1], [0], [0], [1], [0, 0, 1, 1], [], []>} : vector<16x128xbf16>, vector<128x64xbf16>, vector<16x64xf32> -> vector<16x64xf32>
    %c0_133 = arith.constant 0 : index
    %c0_134 = arith.constant 0 : index
    %c0_135 = arith.constant 0 : index
    %244 = vector.load %arg13[%c0_133, %c0_134, %c0_135] : memref<1x16x64xf32, #tpu.memory_space<vmem>>, vector<1x16x64xf32>
    %245 = vector.shape_cast %244 : vector<1x16x64xf32> to vector<16x64xf32>
    %246 = vector.shape_cast %243 : vector<16x64xf32> to vector<1x16x64xf32>
    tpu.vector_store %arg13[%c0_133, %c0_134, %c0_135], %246 {strides = array<i32>} : memref<1x16x64xf32, #tpu.memory_space<vmem>>, vector<1x16x64xf32>,
    return
  }
  func.func @transform_0(%arg0: i32, %arg1: i32) -> (i32, i32, i32) {
    %c0_i32 = arith.constant 0 : i32
    %c0_i32_0 = arith.constant 0 : i32
    return %arg0, %arg1, %c0_i32 : i32, i32, i32
  }
  func.func @transform_1(%arg0: i32, %arg1: i32) -> (i32, i32) {
    %c0_i32 = arith.constant 0 : i32
    %c0_i32_0 = arith.constant 0 : i32
    %c0_i32_1 = arith.constant 0 : i32
    return %c0_i32, %c0_i32_0 : i32, i32
  }
  func.func @transform_2(%arg0: i32, %arg1: i32) -> (i32, i32) {
    %c0_i32 = arith.constant 0 : i32
    %c0_i32_0 = arith.constant 0 : i32
    %c0_i32_1 = arith.constant 0 : i32
    return %c0_i32, %c0_i32_0 : i32, i32
  }
  func.func @transform_3(%arg0: i32, %arg1: i32) -> (i32, i32) {
    %c0_i32 = arith.constant 0 : i32
    %c0_i32_0 = arith.constant 0 : i32
    %c0_i32_1 = arith.constant 0 : i32
    return %c0_i32, %c0_i32_0 : i32, i32
  }
  func.func @transform_4(%arg0: i32, %arg1: i32) -> (i32, i32) {
    %c0_i32 = arith.constant 0 : i32
    %c0_i32_0 = arith.constant 0 : i32
    %c0_i32_1 = arith.constant 0 : i32
    return %c0_i32, %c0_i32_0 : i32, i32
  }
  func.func @transform_5(%arg0: i32, %arg1: i32) -> (i32, i32) {
    %c0_i32 = arith.constant 0 : i32
    %c0_i32_0 = arith.constant 0 : i32
    %c0_i32_1 = arith.constant 0 : i32
    return %c0_i32, %c0_i32_0 : i32, i32
  }
  func.func @transform_6(%arg0: i32, %arg1: i32) -> (i32, i32) {
    %c0_i32 = arith.constant 0 : i32
    %c0_i32_0 = arith.constant 0 : i32
    %c0_i32_1 = arith.constant 0 : i32
    return %c0_i32, %c0_i32_0 : i32, i32
  }
  func.func @transform_7(%arg0: i32, %arg1: i32) -> (i32, i32) {
    %c0_i32 = arith.constant 0 : i32
    %c0_i32_0 = arith.constant 0 : i32
    %c0_i32_1 = arith.constant 0 : i32
    return %c0_i32, %c0_i32_0 : i32, i32
  }
  func.func @transform_8(%arg0: i32, %arg1: i32) -> (i32, i32) {
    %c0_i32 = arith.constant 0 : i32
    %c0_i32_0 = arith.constant 0 : i32
    %c0_i32_1 = arith.constant 0 : i32
    return %c0_i32, %c0_i32_0 : i32, i32
  }
  func.func @transform_9(%arg0: i32, %arg1: i32) -> (i32, i32) {
    %c0_i32 = arith.constant 0 : i32
    %c0_i32_0 = arith.constant 0 : i32
    %c0_i32_1 = arith.constant 0 : i32
    return %c0_i32, %c0_i32_0 : i32, i32
  }
  func.func @transform_10(%arg0: i32, %arg1: i32) -> (i32, i32) {
    %c0_i32 = arith.constant 0 : i32
    %c0_i32_0 = arith.constant 0 : i32
    %c0_i32_1 = arith.constant 0 : i32
    return %c0_i32, %c0_i32_0 : i32, i32
  }
  func.func @transform_11(%arg0: i32, %arg1: i32) -> (i32, i32, i32) {
    %c0_i32 = arith.constant 0 : i32
    %c0_i32_0 = arith.constant 0 : i32
    return %arg0, %arg1, %c0_i32 : i32, i32, i32
  }
}

</mosaic_0001>

<bundles_post_ra>
// kernel: tpu_custom_call.1
= control target key start
LH: loop header
LB: loop body
LE: loop exit
PB: predicated region body
PF: predicated region fallthrough
CT: control target
= control target key end

     0   :  { %s17312_s0 = inlined_call_operand.vmem [shape: f32[2,32,64], index: 0, kind: input, shape index: {}]   ;;  %s17313_s1 = inlined_call_operand.vmem [shape: bf16[64,256], index: 1, kind: input, shape index: {}]   ;;  %s17314_s2 = inlined_call_operand.vmem [shape: f32[4,128], index: 2, kind: input, shape index: {}]   ;;  %s17315_s3 = inlined_call_operand.vmem [shape: f32[1,128], index: 3, kind: input, shape index: {}]   ;;  %s17316_s4 = inlined_call_operand.vmem [shape: bf16[128,264], index: 4, kind: input, shape index: {}]   ;;  %s17317_s5 = inlined_call_operand.vmem [shape: bf16[8,128], index: 5, kind: input, shape index: {}]   ;;  %s17318_s6 = inlined_call_operand.vmem [shape: f32[1,128], index: 6, kind: input, shape index: {}]   ;;  %s17319_s7 = inlined_call_operand.vmem [shape: f32[16,128], index: 7, kind: input, shape index: {}]   ;;  %s17320_s8 = inlined_call_operand.hbm [shape: bf16[128,2048], index: 8, kind: input, shape index: {}]   ;;  %s17321_s9 = inlined_call_operand.vmem [shape: f32[1,128], index: 9, kind: input, shape index: {}]   ;;  %s17322_s10 = inlined_call_operand.vmem [shape: bf16[128,64], index: 10, kind: input, shape index: {}]   ;;  %s17323_s11 = inlined_call_operand.hbm [shape: f32[2,32,64], index: 11, kind: output, shape index: {}]  }
   0x1   :  { %17405 = sst [smem:[#allocation88_spill]] %s17320_s8 }
   0x2   :  { %16 = vsyncpa [#allocation9], 0 }
   0x3   :  { %17 = vsyncpa [#allocation10], 0 }
   0x4   :  { %19 = vsyncpa [#allocation10 + $0x1], 0  ;;  %s14144_s17 = smov 0   ;;  %s14146_s18 = smov 0  }
   0x5   :  { %s14148_s19 = smov 0   ;;  %s14150_s20 = smov 0  }
   0x6   :  { %s14152_s21 = smov 0   ;;  %s14154_s22 = smov 0  }
   0x7   :  { %s14156_s23 = smov 0   ;;  %s14158_s24 = smov 0  }
   0x8 LB: > { %17406 = sst [smem:[#allocation14_spill]] %s14051_s22  ;;  %s12277_s25 = sadd.s32 4294967295, %s14059_s24   ;;  %s14059_s24 = sphi %s14158_s24, %s25_s24   ;;  %s14055_s23 = sphi %s14156_s23, %s17585_s23   ;;  %s14051_s22 = sphi %s14154_s22, %s17584_s22   ;;  %s14047_s21 = sphi %s14152_s21, %s17583_s21   ;;  %s14043_s20 = sphi %s14150_s20, %s17582_s20   ;;  %s14039_s19 = sphi %s14148_s19, %s17588_s19   ;;  %s14035_s18 = sphi %s14146_s18, %s17587_s18   ;;  %s14031_s17 = sphi %s14144_s17, %s17586_s17  }
   0x9   : > { %17407 = sst [smem:[#allocation15_spill]] %s14055_s23  ;;  %s12278_s26 = sadd.s32 4294967294, %s14059_s24  }
   0xa   : > { %s34_s27 = sadd.s32 1, %s14051_s22  ;;  %s37_s28 = sadd.s32 1, %s14055_s23 }
   0xb   : > { %p35_p0 = scmp.ge.s32.totalorder %s34_s27, 2  ;;  %s284_s29 = sadd.s32 1, %s14039_s19 }
   0xc   : > { %p294_p1 = scmp.ne.s32.totalorder %s14039_s19, %s14035_s18  ;;  %p295_p2 = scmp.eq.s32.totalorder %s12277_s25, 3 }
   0xd   : > { %s17590_s27 = smov (%p35_p0, %s34_s27), 0  ;;  %s17592_s28 = smov (!%p35_p0, %s37_s28), %s14055_s23 }
   0xe   : > { %17408 = sst [smem:[#allocation16_spill]] %s17590_s27  ;;  %s280_s30 = ssub.s32 %s14051_s22, %s17590_s27 }
   0xf   : > { %p14196_p3 = por %p295_p2, %p294_p1  ;;  %p39_p4 = scmp.ge.s32.totalorder %s17592_s28, 2 }
  0x10   : > { %p300_p5 = scmp.ne.s32.totalorder %s14035_s18, %s14031_s17  ;;  %p301_p6 = scmp.eq.s32.totalorder %s12278_s26, 3 }
  0x11   : > { %p12279_p7 = scmp.ge.s32.totalorder %s14059_s24, 1  ;;  %s17594_s28 = smov (%p39_p4, %s17592_s28), 0 }
  0x12   : > { %17410 = sst [smem:[#allocation17_spill]] %s17594_s28  ;;  %p14205_p8 = por %p301_p6, %p300_p5 }
  0x13   : > { %p308_p9 = scmp.lt.s32.totalorder %s14059_s24, 5  ;;  %s279_s14 = ssub.s32 %s14055_s23, %s17594_s28 }
  0x14   : > { %s17411_s13 = scalar_select %p14205_p8, 1, 0 }
  0x15   : > { %s281_s15 = sor.u32 %s280_s30, %s279_s14  ;;  %p14212_p10 = pnand %p12279_p7, %p308_p9 }
  0x16   : > { %17412 = sst [smem:[#allocation18_spill]] %s17411_s13  ;;  %p282_p11 = scmp.eq.s32.totalorder %s281_s15, 0 }
  0x17   : > { %p14216_p12 = scmp.eq.s32.totalorder %s12277_s25, 0  ;;  %p13708_p13 = pneg %p14212_p10 }
  0x18   : > { %s14223_s26 = scalar_select %p282_p11, %s14039_s19, %s284_s29  }
  0x19   : > { %s14073_s22 = smov [#allocation8]   ;;  %p14227_p0 = pnand %p14216_p12, %p13708_p13 }
  0x1a   : > { %17415 = sst [smem:[#allocation19_spill]] %s14223_s26  ;;  %s341_s13 = sshll.u32 %s14073_s22, 4  ;;  %s342_s13 = int_to_ptr.vmem [resolvable:$true] %s341_s13 }
  0x1b   : > { %p13927_p1 = pneg %p14227_p0  ;;  %s13936_s25 = scalar_lea.vmem %s342_s13, 16384 }
  0x1c   : > { %p13937_p2 = scmp.ne.s32.totalorder %s342_s13, %s13936_s25  ;;  %p13944_p6 = scmp.lt.s32.totalorder %s342_s13, %s342_s13 }
  0x1d   : > { %p13945_p7 = scmp.lt.s32.totalorder %s13936_s25, %s13936_s25 }
  0x1e   : > { %p13939_p4 = pnand %p13937_p2, %p13927_p1 }
  0x1f   : > { %p13946_p9 = por %p13945_p7, %p13944_p6 }
  0x20   : > { %p13940_p5 = pneg %p13939_p4 }
  0x22   : > { %p13947_p11 = pnand %p13946_p9, %p13940_p5 }
  0x24   : > { %13950 = shalt.err (!%p13947_p11)
}
  0x25   : > { %s14074_s29 = smov 1024   ;;  %s14075_s22 = smov 64  }
  0x26   : > { %s17417_s8 = sld [smem:[#allocation88_spill]] }
  0x28   : > { %376 = sbr.rel (%p14212_p10) target bundleno = 1780 (0x6f4), region = 64 }
  0x2c   : > { %13711 = dma.hbm_to_vmem [thread:$0]  (!%p14227_p0), %s17417_s8, 16384, %s342_s13, [#allocation9], %s14074_s29, %s14074_s29, %s14075_s22  }
  0x2d   : > { %14022 = dma.done.wait (%p14216_p12), [#allocation9], 16384  }
  0x2e   : > { %14024 = vsyncadd (%p14216_p12), [#allocation9], 4294950912  ;;  %s17329_s25 = sand.u32 1, %s14035_s18   ;;  %s14246_s30 = sshll.u32 %s14043_s20, 1 }
  0x2f   : > { %s12284_s13 = sshll.u32 %s17329_s25, 4  ;;  %p421_p13 = scmp.lt.s32.totalorder %s14047_s21, 1 }
  0x30   : > { %p423_p10 = scmp.lt.s32.totalorder %s14246_s30, 3  ;;  %s14257_s23 = scalar_lea.vmem [#allocation11], %s12284_s13 }
  0x31   : > { %s422_s16 = scalar_select %p421_p13, %s14047_s21, 1 }
  0x32   : > { %s424_s29 = scalar_select %p423_p10, %s14246_s30, 3 }
  0x33   : > { %s12286_s22 = sshll.u32 %s422_s16, 2  ;;  %p12288_p12 = scmp.ne.s32.totalorder %s14043_s20, 0 }
  0x34   : > { %s426_s14 = sadd.s32 %s12286_s22, %s424_s29 }
  0x35   : > { %s12287_s27 = sshll.u32 %s426_s14, 3  ;;  %435 = sbr.rel (%p12288_p12) target bundleno = 61 (0x3d), region = 72 }
  0x36   : > { %s428_s28 = scalar_lea.vmem %s17312_s0, %s12287_s27 }
  0x3a   : > { %v14076_v0 = vmov 0.0  }
  0x3b   : > { %436 = vst [vmem:[#allocation2] sm:$0xff] %v14076_v0  ;;  %437 = vst [vmem:[#allocation2 + $0x8] sm:$0xff] %v14076_v0 }
  0x3c   : > { %438 = vst [vmem:[#allocation3] sm:$0x7] %v14076_v0 }
  0x3d PF: > { %v13817_v1 = vld [vmem:[%s17313_s1 + $0x34] ss:$8 sps:$4 sm:$0xff]   ;;  %v13819_v2 = vld [vmem:[%s17313_s1 + $0x30] ss:$8 sps:$4 sm:$0xff]   ;;  %v17332_v3 = vmov 0   ;;  %v439_v10 = vld [vmem:[%s428_s28] sm:$0xff]  ;;  %v549_v42 = vlaneseq }
  0x3e   : > { %526 = vmatprep.mubr.bf16.mxu0 %v17332_v3  ;;  %830 = vmatprep.mubr.bf16.mxu1 %v17332_v3  ;;  %v13820_v4 = vld [vmem:[%s17313_s1 + $0x24] ss:$8 sps:$4 sm:$0xff]   ;;  %v13822_v5 = vld [vmem:[%s17313_s1 + $0x20] ss:$8 sps:$4 sm:$0xff]   ;;  %v13823_v6 = vld [vmem:[%s17313_s1 + $0x14] ss:$8 sps:$4 sm:$0xff]  }
  0x3f   : > { %502 = vmatprep.subr.bf16.mxu0 %v13817_v1  ;;  %v13825_v7 = vld [vmem:[%s17313_s1 + $0x10] ss:$8 sps:$4 sm:$0xff]   ;;  %v13826_v8 = vld [vmem:[%s17313_s1 + $0x4] ss:$8 sps:$4 sm:$0xff]   ;;  %v13828_v9 = vld [vmem:[%s17313_s1] ss:$8 sps:$4 sm:$0xff]  }
  0x40   : > { %503 = vmatpush1.bf16.msra.mxu0 %v13819_v2  ;;  %v440_v11 = vld [vmem:[%s428_s28 + $0x8] sm:$0xff]  ;;  %vm17403_vm0 = vcmask 523264   ;;  %v17330_v14 = vmov 0.0   ;;  %v13832_v16 = vld [vmem:[%s17316_s4 + $0xb0] ss:$12 sps:$4 sm:$0xff]   ;;  %vm17404_vm1 = vmmov 0  }
  0x41   : > { %504 = vmatprep.subr.bf16.mxu0 %v13820_v4  ;;  %v441_v12 = vpack.c.bf16 %v440_v11, %v439_v10  ;;  %v13829_v13 = vld [vmem:[%s17316_s4 + $0xac] ss:$12 sps:$4 sm:$0xff]   ;;  %v13831_v15 = vld [vmem:[%s17316_s4 + $0xa8] ss:$12 sps:$4 sm:$0xff]   ;;  %v13835_v18 = vld [vmem:[%s17316_s4 + $0x90] ss:$12 sps:$4 sm:$0xff]  }
  0x42   : > { %v13833_v17 = vld [vmem:[%s17316_s4 + $0x94] ss:$12 sps:$4 sm:$0xff]   ;;  %798 = vmatprep.subr.bf16.mxu1 %v13829_v13  ;;  %v13836_v19 = vld [vmem:[%s17316_s4 + $0x98] ss:$12 sps:$4 sm:$0xff]   ;;  %v13837_v20 = vld [vmem:[%s17316_s4 + $0x7c] ss:$12 sps:$4 sm:$0xff]  }
  0x43   : > { %799 = vmatpush1.bf16.msra.mxu1 %v13831_v15  ;;  %v13839_v21 = vld [vmem:[%s17316_s4 + $0x78] ss:$12 sps:$4 sm:$0xff]   ;;  %v13840_v22 = vld [vmem:[%s17316_s4 + $0x80] ss:$12 sps:$4 sm:$0xff]   ;;  %v13844_v25 = vld [vmem:[%s17316_s4 + $0x68] ss:$12 sps:$4 sm:$0xff]  }
  0x44   : > { %505 = vmatpush1.bf16.msra.mxu0 %v13822_v5  ;;  %800 = vmatprep.subr.bf16.mxu1 %v13833_v17  ;;  %v13841_v23 = vld [vmem:[%s17316_s4 + $0x64] ss:$12 sps:$4 sm:$0xff]   ;;  %v13843_v24 = vld [vmem:[%s17316_s4 + $0x60] ss:$12 sps:$4 sm:$0xff]   ;;  %v13847_v27 = vld [vmem:[%s17316_s4 + $0x48] ss:$12 sps:$4 sm:$0xff]  }
  0x45   : > { %506 = vmatprep.subr.bf16.mxu0 %v13823_v6  ;;  %v13845_v26 = vld [vmem:[%s17316_s4 + $0x4c] ss:$12 sps:$4 sm:$0xff]   ;;  %v13848_v28 = vld [vmem:[%s17316_s4 + $0x50] ss:$12 sps:$4 sm:$0xff]   ;;  %v13849_v29 = vld [vmem:[%s17316_s4 + $0x34] ss:$12 sps:$4 sm:$0xff]  }
  0x46   : > { %v13851_v30 = vld [vmem:[%s17316_s4 + $0x30] ss:$12 sps:$4 sm:$0xff]   ;;  %v13852_v31 = vld [vmem:[%s17316_s4 + $0x38] ss:$12 sps:$4 sm:$0xff]   ;;  %v13856_v34 = vld [vmem:[%s17316_s4 + $0x20] ss:$12 sps:$4 sm:$0xff]  }
  0x47   : > { %801 = vmatpush1.bf16.msra.mxu1 %v13835_v18  ;;  %v13853_v32 = vld [vmem:[%s17316_s4 + $0x1c] ss:$12 sps:$4 sm:$0xff]   ;;  %v13855_v33 = vld [vmem:[%s17316_s4 + $0x18] ss:$12 sps:$4 sm:$0xff]   ;;  %v13859_v36 = vld [vmem:[%s17316_s4] ss:$12 sps:$4 sm:$0xff]  }
  0x48   : > { %507 = vmatpush1.bf16.msra.mxu0 %v13825_v7  ;;  %802 = vmatprep.subr.bf16.mxu1 %v13837_v20  ;;  %v13857_v35 = vld [vmem:[%s17316_s4 + $0x4] ss:$12 sps:$4 sm:$0xff]   ;;  %v13860_v37 = vld [vmem:[%s17316_s4 + $0x8] ss:$12 sps:$4 sm:$0xff]   ;;  %v14375_v43 = vshrl.u32 %v549_v42, 7  ;;  %vm540_vm2 = vcmask 1042432  }
  0x49   : > { %508 = vmatprep.subr.bf16.mxu0 %v13826_v8  ;;  %v1541_v38 = vld [vmem:[#allocation8 + $0x380] sm:$0xff]  ;;  %v548_v45 = vld [vmem:[%s17314_s2] sm:$0xf]  ;;  %v537_v48 = vld [vmem:[#allocation3] sm:$0x7]  ;;  %vm565_vm3 = vcmask 1046528  }
  0x4a   : > { %v1549_v39 = vld [vmem:[#allocation8 + $0x3c0] sm:$0xff]  ;;  %17418 = vst [vmem:[#allocation20_spill] sm:$0xff] %v14375_v43  ;;  %v557_v44 = vsub.s32 1, %v14375_v43  ;;  %v577_v46 = vsub.s32 2, %v14375_v43  ;;  %v597_v50 = vsub.s32 3, %v14375_v43  ;;  %v14386_v52 = vsub.s32 0, %v14375_v43 }
  0x4b   : > { %803 = vmatpush1.bf16.msra.mxu1 %v13839_v21  ;;  %v14370_v40 = vcombine.low %v1541_v38, %v1549_v39  ;;  %v14372_v41 = vcombine.high %v1541_v38, %v1549_v39  ;;  %vm585_vm4 = vcmask 1045504   ;;  %vm605_vm5 = vcmask 1044480   ;;  %v1537_v43 = vld [vmem:[#allocation8 + $0x360] sm:$0xff]  ;;  %s17150_s20 = smov 0  }
  0x4c   : > { %509 = vmatpush1.bf16.msra.mxu0 %v13828_v9  ;;  %804 = vmatprep.subr.bf16.mxu1 %v13841_v23  ;;  %17420 = vst [vmem:[#allocation22_spill] sm:$0xff] %v14386_v52  ;;  %v558_v53 = vrot.slane %v548_v45, %v557_v44  ;;  %v578_v55 = vrot.slane %v548_v45, %v577_v46  ;;  %vm895_vm6 = vcmask 1043456   ;;  %vm891_vm7 = vcmask 64512  }
  0x4d   : > { %13656 = vmatprep.subr.bf16.mxu0 %v17330_v14  ;;  %v598_v58 = vrot.slane %v548_v45, %v597_v50  ;;  %v552_v59 = vrot.slane %v548_v45, %v14386_v52  ;;  %v1533_v50 = vld [vmem:[#allocation8 + $0x340] sm:$0xff]  ;;  %v1528_v52 = vld [vmem:[#allocation8 + $0x318] sm:$0xff]  ;;  %vm3020_vm9 = vcmask 1040384   ;;  %vm3021_vm10 = vsmask.f32 256 }
  0x4e   : > { %vm3497_vm12 = vsmask.f32 7938  ;;  %vm15020_vm13 = vmand %vm3020_vm9, %vm3021_vm10  ;;  %vm4053_vm15 = vcmask 1041409   ;;  %vm5199_vm10 = vsmask.f32 2304 }
  0x4f   : > { %12297 = vmatmul.mubr.msk.bf16.vlgmr.msra.gmra.mxu0 %vm17403_vm0, %v441_v12  ;;  %805 = vmatpush1.bf16.msra.mxu1 %v13843_v24  ;;  %vm15054_vm14 = vmand %vm3020_vm9, %vm3497_vm12  ;;  %vm5771_vm0 = vsmask.f32 7946 }
  0x50   : > { %13672 = vmatprep.mubr.msk.bf16.mxu0 %vm17404_vm1, %v17330_v14  ;;  %13657 = vmatpush3.bf16.msra.mxu0 %v13832_v16 }
  0x51   : > { %13658 = vmatprep.subr.bf16.mxu0 %v17330_v14  ;;  %806 = vmatprep.subr.bf16.mxu1 %v13845_v26 }
  0x53   : > { %807 = vmatpush1.bf16.msra.mxu1 %v13847_v27 }
  0x54   : > { %13659 = vmatpush3.bf16.msra.mxu0 %v13836_v19  ;;  %808 = vmatprep.subr.bf16.mxu1 %v13849_v29 }
  0x55   : > { %13660 = vmatprep.subr.bf16.mxu0 %v17330_v14 }
  0x57   : > { %809 = vmatpush1.bf16.msra.mxu1 %v13851_v30  ;;  %v12298_v30 = vld [vmem:[%s17315_s3] ss:$0 sm:$0xff] }
  0x58   : > { %13661 = vmatpush3.bf16.msra.mxu0 %v13840_v22  ;;  %810 = vmatprep.subr.bf16.mxu1 %v13853_v32 }
  0x59   : > { %13662 = vmatprep.subr.bf16.mxu0 %v17330_v14 }
  0x5b   : > { %811 = vmatpush1.bf16.msra.mxu1 %v13855_v33 }
  0x5c   : > { %13663 = vmatpush3.bf16.msra.mxu0 %v13844_v25  ;;  %812 = vmatprep.subr.bf16.mxu1 %v13857_v35 }
  0x5d   : > { %13664 = vmatprep.subr.bf16.mxu0 %v17330_v14 }
  0x5f   : > { %813 = vmatpush1.bf16.msra.mxu1 %v13859_v36 }
  0x60   : > { %13665 = vmatpush3.bf16.msra.mxu0 %v13848_v28  ;;  %2197 = vmatprep.subr.bf16.mxu1 %v14372_v41 }
  0x61   : > { %13666 = vmatprep.subr.bf16.mxu0 %v17330_v14 }
  0x64   : > { %13667 = vmatpush3.bf16.msra.mxu0 %v13852_v31 }
  0x65   : > { %13668 = vmatprep.subr.bf16.mxu0 %v17330_v14 }
  0x68   : > { %13669 = vmatpush3.bf16.msra.mxu0 %v13856_v34 }
  0x69   : > { %13670 = vmatprep.subr.bf16.mxu0 %v17330_v14 }
  0x6c   : > { %13671 = vmatpush3.bf16.msra.mxu0 %v13860_v37 }
  0x6d   : > { %13676 = vmatprep.subr.bf16.mxu0 %v17330_v14 }
 0x10f   : > { %v528_v47 = vpop.f32.mrf.mxu0 }
 0x110   : > { %v541_v49 = vrot.slane %v528_v47, 5 }
 0x111   : > { %v14383_v51 = vpop.f32.mrf.mxu0 }
 0x112   : > { %17419 = vst [vmem:[#allocation21_spill] sm:$0xff] %v14383_v51  ;;  %v547_v54 = vsel %vm540_vm2, %v537_v48, %v541_v49  ;;  %v1553_v51 = vld [vmem:[#allocation8 + $0x3e0] sm:$0xff] }
 0x113   : > { %v532_v56 = vpop.f32.mrf.mxu0  ;;  %v559_v60 = vmul.f32 %v558_v53, %v547_v54  ;;  %v579_v0 = vmul.f32 %v578_v55, %v547_v54  ;;  %v599_v8 = vmul.f32 %v598_v58, %v547_v54  ;;  %v553_v13 = vmul.f32 %v552_v59, %v547_v54 }
 0x114   : > { %v542_v57 = vrot.slane %v532_v56, 5  ;;  %636 = vst [vmem:[#allocation3 - $0x5] sm:$0xe0] %v532_v56 }
 0x115   : > { %v14390_v61 = vpop.f32.mrf.mxu0  ;;  %v566_v9 = vrot.slane %v559_v60, 1  ;;  %v586_v16 = vrot.slane %v579_v0, 2  ;;  %v606_v23 = vrot.slane %v599_v8, 3  ;;  %v1501_v0 = vld [vmem:[#allocation8 + $0x240] sm:$0xff] }
 0x116   : > { %17421 = vst [vmem:[#allocation23_spill] sm:$0xff] %v14390_v61  ;;  %v543_v62 = vsel %vm540_vm2, %v541_v49, %v542_v57  ;;  %v561_v63 = vmul.f32 %v558_v53, %v542_v57  ;;  %v581_v1 = vmul.f32 %v578_v55, %v542_v57  ;;  %v601_v6 = vmul.f32 %v598_v58, %v542_v57  ;;  %v1525_v49 = vld [vmem:[#allocation8 + $0x300] sm:$0xff] }
 0x117   : > { %v560_v2 = vmul.f32 %v558_v53, %v543_v62  ;;  %v580_v4 = vmul.f32 %v578_v55, %v543_v62  ;;  %v600_v5 = vmul.f32 %v598_v58, %v543_v62  ;;  %v554_v15 = vmul.f32 %v552_v59, %v543_v62  ;;  %v883_v53 = vld [vmem:[%s17317_s5] sm:$0xf]  ;;  %v1509_v58 = vld [vmem:[#allocation8 + $0x280] sm:$0xff] }
 0x118   : > { %v569_v7 = vrot.slane %v561_v63, 1  ;;  %v589_v12 = vrot.slane %v581_v1, 2  ;;  %v609_v20 = vrot.slane %v601_v6, 3  ;;  %v14411_v56 = vcombine.high %v1525_v49, %v1533_v50  ;;  %v1517_v59 = vld [vmem:[#allocation8 + $0x2c0] sm:$0xff] }
 0x119   : > { %v567_v10 = vrot.slane %v560_v2, 1  ;;  %v587_v11 = vrot.slane %v580_v4, 2  ;;  %v607_v19 = vrot.slane %v600_v5, 3  ;;  %v897_v57 = vsel %vm895_vm6, %v883_v53, 0  ;;  %v1493_v63 = vld [vmem:[#allocation8 + $0x200] sm:$0xff]  ;;  %v1511_v53 = vld [vmem:[#allocation8 + $0x290] sm:$0xff] }
 0x11a   : > { %v14415_v60 = vcombine.low %v1525_v49, %v1533_v50  ;;  %v14418_v62 = vcombine.high %v1509_v58, %v1517_v59  ;;  %v14424_v1 = vcombine.low %v1509_v58, %v1517_v59  ;;  %v14427_v2 = vcombine.high %v1493_v63, %v1501_v0  ;;  %v1477_v4 = vld [vmem:[#allocation8 + $0x180] sm:$0xff]  ;;  %v1518_v50 = vld [vmem:[#allocation8 + $0x2c8] sm:$0xff] }
 0x11b   : > { %v568_v17 = vsel %vm565_vm3, %v566_v9, %v567_v10  ;;  %v570_v18 = vsel %vm565_vm3, %v567_v10, %v569_v7  ;;  %v588_v24 = vsel %vm585_vm4, %v586_v16, %v587_v11  ;;  %v590_v25 = vsel %vm585_vm4, %v587_v11, %v589_v12  ;;  %v1485_v5 = vld [vmem:[#allocation8 + $0x1c0] sm:$0xff] }
 0x11c   : > { %v573_v21 = vadd.f32 %v568_v17, %v553_v13  ;;  %v574_v22 = vadd.f32 %v570_v18, %v554_v15  ;;  %v608_v28 = vsel %vm605_vm5, %v606_v23, %v607_v19  ;;  %v610_v29 = vsel %vm605_vm5, %v607_v19, %v609_v20  ;;  %v1461_v8 = vld [vmem:[#allocation8 + $0x100] sm:$0xff]  ;;  %v1550_v23 = vld [vmem:[#allocation8 + $0x3c8] sm:$0xff] }
 0x11d   : > { %v14430_v6 = vcombine.low %v1493_v63, %v1501_v0  ;;  %v14433_v7 = vcombine.high %v1477_v4, %v1485_v5  ;;  %v1469_v9 = vld [vmem:[#allocation8 + $0x140] sm:$0xff]  ;;  %v14436_v10 = vcombine.low %v1477_v4, %v1485_v5  ;;  %v1494_v0 = vld [vmem:[#allocation8 + $0x208] sm:$0xff]  ;;  %v1495_v5 = vld [vmem:[#allocation8 + $0x210] sm:$0xff] }
 0x11e   : > { %v593_v26 = vadd.f32 %v588_v24, %v573_v21  ;;  %v594_v27 = vadd.f32 %v590_v25, %v574_v22  ;;  %v14439_v11 = vcombine.high %v1461_v8, %v1469_v9  ;;  %v1445_v12 = vld [vmem:[#allocation8 + $0x80] sm:$0xff]  ;;  %v14442_v15 = vcombine.low %v1461_v8, %v1469_v9  ;;  %v1542_v22 = vld [vmem:[#allocation8 + $0x388] sm:$0xff]  ;;  %v1543_v24 = vld [vmem:[#allocation8 + $0x390] sm:$0xff] }
 0x11f   : > { %v1453_v13 = vld [vmem:[#allocation8 + $0xc0] sm:$0xff]  ;;  %v14458_v25 = vcombine.high %v1542_v22, %v1550_v23  ;;  %v1502_v4 = vld [vmem:[#allocation8 + $0x248] sm:$0xff]  ;;  %v1503_v8 = vld [vmem:[#allocation8 + $0x250] sm:$0xff] }
 0x120   : > { %v613_v31 = vadd.f32 %v608_v28, %v593_v26  ;;  %v614_v32 = vadd.f32 %v610_v29, %v594_v27  ;;  %v14445_v16 = vcombine.high %v1445_v12, %v1453_v13  ;;  %v14448_v17 = vcombine.low %v1445_v12, %v1453_v13  ;;  %v1429_v18 = vld [vmem:[#allocation8] sm:$0xff]  ;;  %v1551_v26 = vld [vmem:[#allocation8 + $0x3d0] sm:$0xff] }
 0x121   : > { %v1437_v19 = vld [vmem:[#allocation8 + $0x40] sm:$0xff]  ;;  %v14460_v27 = vcombine.low %v1542_v22, %v1550_v23  ;;  %v14462_v28 = vcombine.low %v1543_v24, %v1551_v26  ;;  %v14464_v29 = vcombine.high %v1543_v24, %v1551_v26  ;;  %v14499_v13 = vcombine.high %v1494_v0, %v1502_v4  ;;  %v1486_v22 = vld [vmem:[#allocation8 + $0x1c8] sm:$0xff]  ;;  %v1479_v23 = vld [vmem:[#allocation8 + $0x190] sm:$0xff] }
 0x122   : > { %v622_v33 = vadd.f32 %v12298_v30, %v613_v31  ;;  %v623_v34 = vadd.f32 %v12298_v30, %v614_v32  ;;  %v14452_v20 = vcombine.high %v1429_v18, %v1437_v19  ;;  %v14454_v21 = vcombine.low %v1429_v18, %v1437_v19  ;;  %v1526_v32 = vld [vmem:[#allocation8 + $0x308] sm:$0xff]  ;;  %v1487_v24 = vld [vmem:[#allocation8 + $0x1d0] sm:$0xff]  ;;  %v1545_v61 = vld [vmem:[#allocation8 + $0x3a0] sm:$0xff] }
 0x123   : > { %v14501_v18 = vcombine.high %v1495_v5, %v1503_v8  ;;  %v1478_v19 = vld [vmem:[#allocation8 + $0x188] sm:$0xff]  ;;  %v14505_v26 = vcombine.low %v1494_v0, %v1502_v4 }
 0x124   : > { %v624_v35 = vsub.f32 0.0, %v622_v33  ;;  %v625_v36 = vsub.f32 0.0, %v623_v34 }
 0x126   : > { %v626_v37 = vmul.f32 1.442695, %v624_v35  ;;  %v628_v38 = vmul.f32 1.442695, %v625_v36  ;;  %v1534_v35 = vld [vmem:[#allocation8 + $0x348] sm:$0xff]  ;;  %v1527_v36 = vld [vmem:[#allocation8 + $0x310] sm:$0xff] }
 0x128   : > { %13861 = vpow2.f32 %v626_v37  ;;  %v1535_v37 = vld [vmem:[#allocation8 + $0x350] sm:$0xff] }
 0x129   : > { %13863 = vpow2.f32 %v628_v38  ;;  %v14481_v58 = vcombine.low %v1527_v36, %v1535_v37 }
 0x135   : > { %v13862_v39 = vpop.eup %13861 }
 0x136   : > { %v13864_v42 = vpop.eup %13863  ;;  %v630_v44 = vadd.f32 1.0, %v13862_v39 }
 0x137   : > { %v631_v45 = vadd.f32 1.0, %v13864_v42 }
 0x138   : > { %13865 = vrcp.f32 %v630_v44 }
 0x139   : > { %13867 = vrcp.f32 %v631_v45  ;;  %v14472_v45 = vcombine.high %v1526_v32, %v1534_v35 }
 0x145   : > { %v13866_v46 = vpop.eup %13865 }
 0x146   : > { %v13868_v47 = vpop.eup %13867  ;;  %v14402_v48 = vmul.f32 %v13866_v46, %v622_v33  ;;  %v14474_v46 = vcombine.high %v1527_v36, %v1535_v37  ;;  %v1463_v36 = vld [vmem:[#allocation8 + $0x110] sm:$0xff] }
 0x147   : > { %v14407_v54 = vmul.f32 %v13868_v47, %v623_v34  ;;  %v1510_v47 = vld [vmem:[#allocation8 + $0x288] sm:$0xff]  ;;  %v1471_v37 = vld [vmem:[#allocation8 + $0x150] sm:$0xff] }
 0x148   : > { %17422 = vst [vmem:[#allocation24_spill] sm:$0xff] %v14402_v48  ;;  %v14485_v59 = vcombine.high %v1510_v47, %v1518_v50  ;;  %v14493_v9 = vcombine.low %v1510_v47, %v1518_v50  ;;  %v14525_v47 = vcombine.high %v1463_v36, %v1471_v37  ;;  %v1454_v50 = vld [vmem:[#allocation8 + $0xc8] sm:$0xff]  ;;  %v14531_v4 = vcombine.low %v1463_v36, %v1471_v37 }
 0x149   : > { %17423 = vst [vmem:[#allocation25_spill] sm:$0xff] %v14407_v54  ;;  %v637_v55 = vpack.c.bf16 %v14407_v54, %v14402_v48  ;;  %v1536_v54 = vld [vmem:[#allocation8 + $0x358] sm:$0xff]  ;;  %v1529_v48 = vld [vmem:[#allocation8 + $0x320] sm:$0xff] }
 0x14b   : > { %831 = vmatmul.mubr.bf16.vlgmr.msra.gmra.mxu1 %v637_v55  ;;  %13673 = vmatmul.mubr.bf16.vlgmr.msra.gmra.mxu0 %v637_v55  ;;  %v1519_v55 = vld [vmem:[#allocation8 + $0x2d0] sm:$0xff] }
 0x14c   : > { %2198 = vmatpush1.bf16.msra.mxu1 %v14370_v40  ;;  %13677 = vmatpush3.bf16.msra.mxu0 %v897_v57  ;;  %v14479_v57 = vcombine.low %v1526_v32, %v1534_v35  ;;  %v14487_v63 = vcombine.high %v1511_v53, %v1519_v55  ;;  %v14495_v12 = vcombine.low %v1511_v53, %v1519_v55  ;;  %v1470_v35 = vld [vmem:[#allocation8 + $0x148] sm:$0xff]  ;;  %v1447_v53 = vld [vmem:[#allocation8 + $0x90] sm:$0xff] }
 0x14d   : > { %2199 = vmatprep.subr.bf16.mxu1 %v14411_v56  ;;  %13678 = vmatprep.mubr.msk.bf16.mxu0 %vm17404_vm1, %v17330_v14  ;;  %v14513_v32 = vcombine.high %v1479_v23, %v1487_v24  ;;  %v1455_v55 = vld [vmem:[#allocation8 + $0xd0] sm:$0xff]  ;;  %v1544_v14 = vld [vmem:[#allocation8 + $0x398] sm:$0xff] }
 0x14e   : > { %2229 = vmatprep.mubr.bf16.mxu1 %v17332_v3  ;;  %2240 = vmatprep.subr.bf16.mxu0 %v14458_v25 }
 0x150   : > { %2200 = vmatpush1.bf16.msra.mxu1 %v14415_v60 }
 0x151   : > { %2201 = vmatprep.subr.bf16.mxu1 %v14418_v62 }
 0x154   : > { %2202 = vmatpush1.bf16.msra.mxu1 %v14424_v1 }
 0x155   : > { %2203 = vmatprep.subr.bf16.mxu1 %v14427_v2 }
 0x158   : > { %2204 = vmatpush1.bf16.msra.mxu1 %v14430_v6 }
 0x159   : > { %2205 = vmatprep.subr.bf16.mxu1 %v14433_v7 }
 0x15c   : > { %2206 = vmatpush1.bf16.msra.mxu1 %v14436_v10 }
 0x15d   : > { %2207 = vmatprep.subr.bf16.mxu1 %v14439_v11 }
 0x160   : > { %2208 = vmatpush1.bf16.msra.mxu1 %v14442_v15 }
 0x161   : > { %2209 = vmatprep.subr.bf16.mxu1 %v14445_v16 }
 0x164   : > { %2210 = vmatpush1.bf16.msra.mxu1 %v14448_v17 }
 0x165   : > { %2211 = vmatprep.subr.bf16.mxu1 %v14452_v20 }
 0x168   : > { %2212 = vmatpush1.bf16.msra.mxu1 %v14454_v21 }
 0x169   : > { %2283 = vmatprep.subr.bf16.mxu1 %v14464_v29 }
 0x20b   : > { %v832_v30 = vpop.f32.mrf.mxu1  ;;  %v875_v31 = vpop.f32.mrf.mxu0 }
 0x20d   : > { %v14468_v33 = vpop.f32.mrf.mxu1  ;;  %v13674_v34 = vpop.f32.mrf.mxu0 }
 0x20e   : > { %v1462_v34 = vld [vmem:[#allocation8 + $0x108] sm:$0xff] }
 0x20f   : > { %v836_v38 = vpop.f32.mrf.mxu1  ;;  %v878_v39 = vpop.f32.mrf.mxu0  ;;  %v14529_v0 = vcombine.low %v1462_v34, %v1470_v35 }
 0x210   : > { %v14470_v42 = vpack.c.bf16 %v836_v38, %v832_v30  ;;  %v882_v44 = vpack.c.bf16 %v878_v39, %v875_v31  ;;  %v14507_v30 = vcombine.low %v1495_v5, %v1503_v8  ;;  %v14511_v31 = vcombine.high %v1478_v19, %v1486_v22 }
 0x211   : > { %v13675_v49 = vpop.f32.mrf.mxu0  ;;  %v14517_v38 = vcombine.low %v1478_v19, %v1486_v22  ;;  %v14519_v39 = vcombine.low %v1479_v23, %v1487_v24  ;;  %v14537_v8 = vcombine.high %v1447_v53, %v1455_v55  ;;  %v1430_v19 = vld [vmem:[#allocation8 + $0x8] sm:$0xff]  ;;  %v1431_v23 = vld [vmem:[#allocation8 + $0x10] sm:$0xff] }
 0x212   : > { %13679 = vmatmul.mubr.msk.bf16.vlgmr.msra.gmra.mxu0 %vm891_vm7, %v882_v44  ;;  %2230 = vmatmul.mubr.bf16.vlgmr.msra.gmra.mxu1 %v14470_v42  ;;  %v14523_v44 = vcombine.high %v1462_v34, %v1470_v35  ;;  %v1446_v49 = vld [vmem:[#allocation8 + $0x88] sm:$0xff]  ;;  %v1439_v24 = vld [vmem:[#allocation8 + $0x50] sm:$0xff]  ;;  %v14543_v35 = vcombine.low %v1447_v53, %v1455_v55  ;;  %v14561_v55 = vcombine.high %v1545_v61, %v1553_v51  ;;  %vm4054_vm7 = vsmask.f32 1280 }
 0x213   : > { %2241 = vmatpush1.bf16.msra.mxu0 %v14460_v27  ;;  %2284 = vmatpush1.bf16.msra.mxu1 %v14462_v28  ;;  %v14535_v5 = vcombine.high %v1446_v49, %v1454_v50  ;;  %17424 = vst [vmem:[#allocation26_spill] sm:$0xff] %v14537_v8  ;;  %v1438_v22 = vld [vmem:[#allocation8 + $0x48] sm:$0xff]  ;;  %v14541_v34 = vcombine.low %v1446_v49, %v1454_v50 }
 0x214   : > { %2242 = vmatprep.subr.bf16.mxu0 %v14472_v45  ;;  %2285 = vmatprep.subr.bf16.mxu1 %v14474_v46  ;;  %17426 = vst [vmem:[#allocation28_spill] sm:$0xff] %v14543_v35  ;;  %v14547_v36 = vcombine.high %v1430_v19, %v1438_v22  ;;  %v14549_v37 = vcombine.high %v1431_v23, %v1439_v24  ;;  %17432 = vst [vmem:[#allocation34_spill] sm:$0xff] %v14561_v55 }
 0x215   : > { %2272 = vmatprep.mubr.bf16.mxu0 %v17332_v3  ;;  %2315 = vmatprep.mubr.bf16.mxu1 %v17332_v3  ;;  %17425 = vst [vmem:[#allocation27_spill] sm:$0xff] %v14541_v34  ;;  %v1552_v3 = vld [vmem:[#allocation8 + $0x3d8] sm:$0xff]  ;;  %v14553_v49 = vcombine.low %v1430_v19, %v1438_v22  ;;  %v14555_v50 = vcombine.low %v1431_v23, %v1439_v24 }
 0x216   : > { %17427 = vst [vmem:[#allocation29_spill] sm:$0xff] %v14547_v36  ;;  %17428 = vst [vmem:[#allocation30_spill] sm:$0xff] %v14549_v37  ;;  %v14559_v53 = vcombine.high %v1544_v14, %v1552_v3  ;;  %v14565_v19 = vcombine.low %v1544_v14, %v1552_v3  ;;  %v14567_v22 = vcombine.low %v1545_v61, %v1553_v51 }
 0x217   : > { %2243 = vmatpush1.bf16.msra.mxu0 %v14479_v57  ;;  %2286 = vmatpush1.bf16.msra.mxu1 %v14481_v58  ;;  %17429 = vst [vmem:[#allocation31_spill] sm:$0xff] %v14553_v49  ;;  %17430 = vst [vmem:[#allocation32_spill] sm:$0xff] %v14555_v50  ;;  %v14571_v23 = vcombine.high %v1528_v52, %v1536_v54  ;;  %v14573_v24 = vcombine.high %v1529_v48, %v1537_v43 }
 0x218   : > { %2244 = vmatprep.subr.bf16.mxu0 %v14485_v59  ;;  %2287 = vmatprep.subr.bf16.mxu1 %v14487_v63  ;;  %17431 = vst [vmem:[#allocation33_spill] sm:$0xff] %v14559_v53  ;;  %17433 = vst [vmem:[#allocation35_spill] sm:$0xff] %v14565_v19  ;;  %v14579_v3 = vcombine.low %v1528_v52, %v1536_v54  ;;  %v14581_v14 = vcombine.low %v1529_v48, %v1537_v43 }
 0x219   : > { %17434 = vst [vmem:[#allocation36_spill] sm:$0xff] %v14567_v22  ;;  %17435 = vst [vmem:[#allocation37_spill] sm:$0xff] %v14571_v23 }
 0x21a   : > { %17436 = vst [vmem:[#allocation38_spill] sm:$0xff] %v14573_v24  ;;  %17437 = vst [vmem:[#allocation39_spill] sm:$0xff] %v14579_v3 }
 0x21b   : > { %2245 = vmatpush1.bf16.msra.mxu0 %v14493_v9  ;;  %2288 = vmatpush1.bf16.msra.mxu1 %v14495_v12  ;;  %17438 = vst [vmem:[#allocation40_spill] sm:$0xff] %v14581_v14 }
 0x21c   : > { %2246 = vmatprep.subr.bf16.mxu0 %v14499_v13  ;;  %2289 = vmatprep.subr.bf16.mxu1 %v14501_v18 }
 0x21f   : > { %2247 = vmatpush1.bf16.msra.mxu0 %v14505_v26  ;;  %2290 = vmatpush1.bf16.msra.mxu1 %v14507_v30 }
 0x220   : > { %2248 = vmatprep.subr.bf16.mxu0 %v14511_v31  ;;  %2291 = vmatprep.subr.bf16.mxu1 %v14513_v32 }
 0x223   : > { %2249 = vmatpush1.bf16.msra.mxu0 %v14517_v38  ;;  %2292 = vmatpush1.bf16.msra.mxu1 %v14519_v39 }
 0x224   : > { %2250 = vmatprep.subr.bf16.mxu0 %v14523_v44  ;;  %2293 = vmatprep.subr.bf16.mxu1 %v14525_v47 }
 0x227   : > { %2251 = vmatpush1.bf16.msra.mxu0 %v14529_v0  ;;  %2294 = vmatpush1.bf16.msra.mxu1 %v14531_v4 }
 0x228   : > { %2252 = vmatprep.subr.bf16.mxu0 %v14535_v5  ;;  %2295 = vmatprep.subr.bf16.mxu1 %v14537_v8  ;;  %v17441_v8 = vmov 0  }
 0x22b   : > { %2253 = vmatpush1.bf16.msra.mxu0 %v14541_v34  ;;  %2296 = vmatpush1.bf16.msra.mxu1 %v14543_v35  ;;  %v1513_v35 = vld [vmem:[#allocation8 + $0x2a0] sm:$0xff] }
 0x22c   : > { %2254 = vmatprep.subr.bf16.mxu0 %v14547_v36  ;;  %2297 = vmatprep.subr.bf16.mxu1 %v14549_v37  ;;  %v1512_v37 = vld [vmem:[#allocation8 + $0x298] sm:$0xff]  ;;  %v1521_v34 = vld [vmem:[#allocation8 + $0x2e0] sm:$0xff] }
 0x22d   : > { %v1520_v36 = vld [vmem:[#allocation8 + $0x2d8] sm:$0xff]  ;;  %v14587_v61 = vcombine.high %v1513_v35, %v1521_v34  ;;  %v14595_v52 = vcombine.low %v1513_v35, %v1521_v34 }
 0x22e   : > { %v14585_v51 = vcombine.high %v1512_v37, %v1520_v36  ;;  %v14593_v43 = vcombine.low %v1512_v37, %v1520_v36 }
 0x22f   : > { %2255 = vmatpush1.bf16.msra.mxu0 %v14553_v49  ;;  %2298 = vmatpush1.bf16.msra.mxu1 %v14555_v50  ;;  %17440 = vst [vmem:[#allocation42_spill] sm:$0xff] %v14587_v61  ;;  %v1497_v50 = vld [vmem:[#allocation8 + $0x220] sm:$0xff]  ;;  %17443 = vst [vmem:[#allocation44_spill] sm:$0xff] %v14595_v52 }
 0x230   : > { %2326 = vmatprep.subr.bf16.mxu0 %v14559_v53  ;;  %2369 = vmatprep.subr.bf16.mxu1 %v14561_v55  ;;  %17439 = vst [vmem:[#allocation41_spill] sm:$0xff] %v14585_v51  ;;  %v1496_v55 = vld [vmem:[#allocation8 + $0x218] sm:$0xff]  ;;  %v1505_v49 = vld [vmem:[#allocation8 + $0x260] sm:$0xff]  ;;  %17442 = vst [vmem:[#allocation43_spill] sm:$0xff] %v14593_v43 }
 0x231   : > { %v1504_v53 = vld [vmem:[#allocation8 + $0x258] sm:$0xff]  ;;  %v14601_v54 = vcombine.high %v1497_v50, %v1505_v49  ;;  %v14607_v34 = vcombine.low %v1497_v50, %v1505_v49 }
 0x232   : > { %2273 = vmatmul.mubr.bf16.vlgmr.msra.gmra.mxu0 %v14470_v42  ;;  %2316 = vmatmul.mubr.bf16.vlgmr.msra.gmra.mxu1 %v14470_v42  ;;  %v14599_v48 = vcombine.high %v1496_v55, %v1504_v53  ;;  %v14605_v36 = vcombine.low %v1496_v55, %v1504_v53 }
 0x233   : > { %2327 = vmatpush1.bf16.msra.mxu0 %v14565_v19  ;;  %2370 = vmatpush1.bf16.msra.mxu1 %v14567_v22  ;;  %17445 = vst [vmem:[#allocation46_spill] sm:$0xff] %v14601_v54  ;;  %v1481_v22 = vld [vmem:[#allocation8 + $0x1a0] sm:$0xff]  ;;  %17447 = vst [vmem:[#allocation48_spill] sm:$0xff] %v14607_v34 }
 0x234   : > { %2328 = vmatprep.subr.bf16.mxu0 %v14571_v23  ;;  %2371 = vmatprep.subr.bf16.mxu1 %v14573_v24  ;;  %17444 = vst [vmem:[#allocation45_spill] sm:$0xff] %v14599_v48  ;;  %v1480_v24 = vld [vmem:[#allocation8 + $0x198] sm:$0xff]  ;;  %v1489_v19 = vld [vmem:[#allocation8 + $0x1e0] sm:$0xff]  ;;  %17446 = vst [vmem:[#allocation47_spill] sm:$0xff] %v14605_v36 }
 0x235   : > { %2358 = vmatprep.mubr.bf16.mxu0 %v17441_v8  ;;  %2401 = vmatprep.mubr.bf16.mxu1 %v17441_v8  ;;  %v1488_v23 = vld [vmem:[#allocation8 + $0x1d8] sm:$0xff]  ;;  %v14613_v37 = vcombine.high %v1481_v22, %v1489_v19  ;;  %v14619_v49 = vcombine.low %v1481_v22, %v1489_v19 }
 0x236   : > { %v14611_v35 = vcombine.high %v1480_v24, %v1488_v23  ;;  %v14617_v53 = vcombine.low %v1480_v24, %v1488_v23 }
 0x237   : > { %2329 = vmatpush1.bf16.msra.mxu0 %v14579_v3  ;;  %2372 = vmatpush1.bf16.msra.mxu1 %v14581_v14  ;;  %17449 = vst [vmem:[#allocation50_spill] sm:$0xff] %v14613_v37  ;;  %v1465_v14 = vld [vmem:[#allocation8 + $0x120] sm:$0xff]  ;;  %17451 = vst [vmem:[#allocation52_spill] sm:$0xff] %v14619_v49 }
 0x238   : > { %2330 = vmatprep.subr.bf16.mxu0 %v14585_v51  ;;  %2373 = vmatprep.subr.bf16.mxu1 %v14587_v61  ;;  %17448 = vst [vmem:[#allocation49_spill] sm:$0xff] %v14611_v35  ;;  %v1464_v61 = vld [vmem:[#allocation8 + $0x118] sm:$0xff]  ;;  %v1473_v3 = vld [vmem:[#allocation8 + $0x160] sm:$0xff]  ;;  %17450 = vst [vmem:[#allocation51_spill] sm:$0xff] %v14617_v53 }
 0x239   : > { %v1472_v51 = vld [vmem:[#allocation8 + $0x158] sm:$0xff]  ;;  %v14625_v55 = vcombine.high %v1465_v14, %v1473_v3  ;;  %v14631_v19 = vcombine.low %v1465_v14, %v1473_v3 }
 0x23a   : > { %v14623_v50 = vcombine.high %v1464_v61, %v1472_v51  ;;  %v14629_v23 = vcombine.low %v1464_v61, %v1472_v51 }
 0x23b   : > { %2331 = vmatpush1.bf16.msra.mxu0 %v14593_v43  ;;  %2374 = vmatpush1.bf16.msra.mxu1 %v14595_v52  ;;  %17453 = vst [vmem:[#allocation54_spill] sm:$0xff] %v14625_v55  ;;  %v1449_v52 = vld [vmem:[#allocation8 + $0xa0] sm:$0xff]  ;;  %17455 = vst [vmem:[#allocation56_spill] sm:$0xff] %v14631_v19 }
 0x23c   : > { %2332 = vmatprep.subr.bf16.mxu0 %v14599_v48  ;;  %2375 = vmatprep.subr.bf16.mxu1 %v14601_v54  ;;  %17452 = vst [vmem:[#allocation53_spill] sm:$0xff] %v14623_v50  ;;  %v1448_v54 = vld [vmem:[#allocation8 + $0x98] sm:$0xff]  ;;  %v1457_v43 = vld [vmem:[#allocation8 + $0xe0] sm:$0xff]  ;;  %17454 = vst [vmem:[#allocation55_spill] sm:$0xff] %v14629_v23 }
 0x23d   : > { %v1456_v48 = vld [vmem:[#allocation8 + $0xd8] sm:$0xff]  ;;  %v14637_v24 = vcombine.high %v1449_v52, %v1457_v43  ;;  %v14643_v3 = vcombine.low %v1449_v52, %v1457_v43 }
 0x23e   : > { %v14635_v22 = vcombine.high %v1448_v54, %v1456_v48  ;;  %v14641_v51 = vcombine.low %v1448_v54, %v1456_v48 }
 0x23f   : > { %2333 = vmatpush1.bf16.msra.mxu0 %v14605_v36  ;;  %2376 = vmatpush1.bf16.msra.mxu1 %v14607_v34  ;;  %17457 = vst [vmem:[#allocation58_spill] sm:$0xff] %v14637_v24  ;;  %v1433_v34 = vld [vmem:[#allocation8 + $0x20] sm:$0xff]  ;;  %17459 = vst [vmem:[#allocation60_spill] sm:$0xff] %v14643_v3 }
 0x240   : > { %2334 = vmatprep.subr.bf16.mxu0 %v14611_v35  ;;  %2377 = vmatprep.subr.bf16.mxu1 %v14613_v37  ;;  %17456 = vst [vmem:[#allocation57_spill] sm:$0xff] %v14635_v22  ;;  %v1432_v37 = vld [vmem:[#allocation8 + $0x18] sm:$0xff]  ;;  %v1441_v36 = vld [vmem:[#allocation8 + $0x60] sm:$0xff]  ;;  %17458 = vst [vmem:[#allocation59_spill] sm:$0xff] %v14641_v51 }
 0x241   : > { %v1440_v35 = vld [vmem:[#allocation8 + $0x58] sm:$0xff]  ;;  %v14649_v61 = vcombine.high %v1433_v34, %v1441_v36  ;;  %v14655_v43 = vcombine.low %v1433_v34, %v1441_v36 }
 0x242   : > { %v14647_v14 = vcombine.high %v1432_v37, %v1440_v35  ;;  %v14653_v48 = vcombine.low %v1432_v37, %v1440_v35 }
 0x243   : > { %2335 = vmatpush1.bf16.msra.mxu0 %v14617_v53  ;;  %2378 = vmatpush1.bf16.msra.mxu1 %v14619_v49  ;;  %17461 = vst [vmem:[#allocation62_spill] sm:$0xff] %v14649_v61  ;;  %v1547_v49 = vld [vmem:[#allocation8 + $0x3b0] sm:$0xff]  ;;  %17463 = vst [vmem:[#allocation64_spill] sm:$0xff] %v14655_v43 }
 0x244   : > { %2336 = vmatprep.subr.bf16.mxu0 %v14623_v50  ;;  %2379 = vmatprep.subr.bf16.mxu1 %v14625_v55  ;;  %17460 = vst [vmem:[#allocation61_spill] sm:$0xff] %v14647_v14  ;;  %v1546_v55 = vld [vmem:[#allocation8 + $0x3a8] sm:$0xff]  ;;  %v1555_v53 = vld [vmem:[#allocation8 + $0x3f0] sm:$0xff]  ;;  %17462 = vst [vmem:[#allocation63_spill] sm:$0xff] %v14653_v48 }
 0x245   : > { %v1554_v50 = vld [vmem:[#allocation8 + $0x3e8] sm:$0xff]  ;;  %v14661_v54 = vcombine.high %v1547_v49, %v1555_v53  ;;  %v14667_v36 = vcombine.low %v1547_v49, %v1555_v53 }
 0x246   : > { %v14659_v52 = vcombine.high %v1546_v55, %v1554_v50  ;;  %v14665_v35 = vcombine.low %v1546_v55, %v1554_v50 }
 0x247   : > { %2337 = vmatpush1.bf16.msra.mxu0 %v14629_v23  ;;  %2380 = vmatpush1.bf16.msra.mxu1 %v14631_v19  ;;  %17465 = vst [vmem:[#allocation66_spill] sm:$0xff] %v14661_v54  ;;  %v1531_v19 = vld [vmem:[#allocation8 + $0x330] sm:$0xff]  ;;  %17467 = vst [vmem:[#allocation68_spill] sm:$0xff] %v14667_v36 }
 0x248   : > { %2338 = vmatprep.subr.bf16.mxu0 %v14635_v22  ;;  %2381 = vmatprep.subr.bf16.mxu1 %v14637_v24  ;;  %17464 = vst [vmem:[#allocation65_spill] sm:$0xff] %v14659_v52  ;;  %v1530_v24 = vld [vmem:[#allocation8 + $0x328] sm:$0xff]  ;;  %v1539_v23 = vld [vmem:[#allocation8 + $0x370] sm:$0xff]  ;;  %17466 = vst [vmem:[#allocation67_spill] sm:$0xff] %v14665_v35 }
 0x249   : > { %v1538_v22 = vld [vmem:[#allocation8 + $0x368] sm:$0xff]  ;;  %v14673_v37 = vcombine.high %v1531_v19, %v1539_v23  ;;  %v14681_v49 = vcombine.low %v1531_v19, %v1539_v23 }
 0x24a   : > { %v14671_v34 = vcombine.high %v1530_v24, %v1538_v22  ;;  %v14679_v53 = vcombine.low %v1530_v24, %v1538_v22 }
 0x24b   : > { %2339 = vmatpush1.bf16.msra.mxu0 %v14641_v51  ;;  %2382 = vmatpush1.bf16.msra.mxu1 %v14643_v3  ;;  %17469 = vst [vmem:[#allocation70_spill] sm:$0xff] %v14673_v37  ;;  %v1515_v3 = vld [vmem:[#allocation8 + $0x2b0] sm:$0xff]  ;;  %17471 = vst [vmem:[#allocation72_spill] sm:$0xff] %v14681_v49 }
 0x24c   : > { %2340 = vmatprep.subr.bf16.mxu0 %v14647_v14  ;;  %2383 = vmatprep.subr.bf16.mxu1 %v14649_v61  ;;  %17468 = vst [vmem:[#allocation69_spill] sm:$0xff] %v14671_v34  ;;  %v1514_v61 = vld [vmem:[#allocation8 + $0x2a8] sm:$0xff]  ;;  %v1523_v51 = vld [vmem:[#allocation8 + $0x2f0] sm:$0xff]  ;;  %17470 = vst [vmem:[#allocation71_spill] sm:$0xff] %v14679_v53 }
 0x24d   : > { %v1522_v14 = vld [vmem:[#allocation8 + $0x2e8] sm:$0xff]  ;;  %v14687_v55 = vcombine.high %v1515_v3, %v1523_v51  ;;  %v14695_v19 = vcombine.low %v1515_v3, %v1523_v51 }
 0x24e   : > { %v14685_v50 = vcombine.high %v1514_v61, %v1522_v14  ;;  %v14693_v23 = vcombine.low %v1514_v61, %v1522_v14 }
 0x24f   : > { %2341 = vmatpush1.bf16.msra.mxu0 %v14653_v48  ;;  %2384 = vmatpush1.bf16.msra.mxu1 %v14655_v43  ;;  %17473 = vst [vmem:[#allocation74_spill] sm:$0xff] %v14687_v55  ;;  %v1499_v43 = vld [vmem:[#allocation8 + $0x230] sm:$0xff]  ;;  %17475 = vst [vmem:[#allocation76_spill] sm:$0xff] %v14695_v19 }
 0x250   : > { %2412 = vmatprep.subr.bf16.mxu0 %v14659_v52  ;;  %2455 = vmatprep.subr.bf16.mxu1 %v14661_v54  ;;  %17472 = vst [vmem:[#allocation73_spill] sm:$0xff] %v14685_v50  ;;  %v1498_v54 = vld [vmem:[#allocation8 + $0x228] sm:$0xff]  ;;  %v1507_v48 = vld [vmem:[#allocation8 + $0x270] sm:$0xff]  ;;  %17474 = vst [vmem:[#allocation75_spill] sm:$0xff] %v14693_v23 }
 0x251   : > { %v1506_v52 = vld [vmem:[#allocation8 + $0x268] sm:$0xff]  ;;  %v14701_v24 = vcombine.high %v1499_v43, %v1507_v48  ;;  %v14707_v51 = vcombine.low %v1499_v43, %v1507_v48 }
 0x252   : > { %2359 = vmatmul.mubr.bf16.vlgmr.msra.gmra.mxu0 %v14470_v42  ;;  %2402 = vmatmul.mubr.bf16.vlgmr.msra.gmra.mxu1 %v14470_v42  ;;  %v14699_v22 = vcombine.high %v1498_v54, %v1506_v52  ;;  %v14705_v14 = vcombine.low %v1498_v54, %v1506_v52 }
 0x253   : > { %2413 = vmatpush1.bf16.msra.mxu0 %v14665_v35  ;;  %2456 = vmatpush1.bf16.msra.mxu1 %v14667_v36  ;;  %17477 = vst [vmem:[#allocation78_spill] sm:$0xff] %v14701_v24  ;;  %v1483_v36 = vld [vmem:[#allocation8 + $0x1b0] sm:$0xff]  ;;  %17479 = vst [vmem:[#allocation80_spill] sm:$0xff] %v14707_v51 }
 0x254   : > { %2414 = vmatprep.subr.bf16.mxu0 %v14671_v34  ;;  %2457 = vmatprep.subr.bf16.mxu1 %v14673_v37  ;;  %17476 = vst [vmem:[#allocation77_spill] sm:$0xff] %v14699_v22  ;;  %v1482_v37 = vld [vmem:[#allocation8 + $0x1a8] sm:$0xff]  ;;  %v1491_v35 = vld [vmem:[#allocation8 + $0x1f0] sm:$0xff]  ;;  %17478 = vst [vmem:[#allocation79_spill] sm:$0xff] %v14705_v14 }
 0x255   : > { %2444 = vmatprep.mubr.bf16.mxu0 %v17441_v8  ;;  %2487 = vmatprep.mubr.bf16.mxu1 %v17441_v8  ;;  %v1490_v34 = vld [vmem:[#allocation8 + $0x1e8] sm:$0xff]  ;;  %v14713_v61 = vcombine.high %v1483_v36, %v1491_v35  ;;  %v14719_v48 = vcombine.low %v1483_v36, %v1491_v35 }
 0x256   : > { %v14711_v3 = vcombine.high %v1482_v37, %v1490_v34  ;;  %v14717_v52 = vcombine.low %v1482_v37, %v1490_v34 }
 0x257   : > { %2415 = vmatpush1.bf16.msra.mxu0 %v14679_v53  ;;  %2458 = vmatpush1.bf16.msra.mxu1 %v14681_v49  ;;  %17481 = vst [vmem:[#allocation82_spill] sm:$0xff] %v14713_v61  ;;  %v1467_v49 = vld [vmem:[#allocation8 + $0x130] sm:$0xff] }
 0x258   : > { %2416 = vmatprep.subr.bf16.mxu0 %v14685_v50  ;;  %2459 = vmatprep.subr.bf16.mxu1 %v14687_v55  ;;  %17480 = vst [vmem:[#allocation81_spill] sm:$0xff] %v14711_v3  ;;  %v1466_v55 = vld [vmem:[#allocation8 + $0x128] sm:$0xff]  ;;  %v1475_v53 = vld [vmem:[#allocation8 + $0x170] sm:$0xff] }
 0x259   : > { %v1474_v50 = vld [vmem:[#allocation8 + $0x168] sm:$0xff]  ;;  %v14725_v54 = vcombine.high %v1467_v49, %v1475_v53  ;;  %v14731_v35 = vcombine.low %v1467_v49, %v1475_v53 }
 0x25a   : > { %v14723_v43 = vcombine.high %v1466_v55, %v1474_v50  ;;  %v14729_v34 = vcombine.low %v1466_v55, %v1474_v50 }
 0x25b   : > { %2417 = vmatpush1.bf16.msra.mxu0 %v14693_v23  ;;  %2460 = vmatpush1.bf16.msra.mxu1 %v14695_v19  ;;  %17483 = vst [vmem:[#allocation84_spill] sm:$0xff] %v14725_v54  ;;  %v1451_v19 = vld [vmem:[#allocation8 + $0xb0] sm:$0xff] }
 0x25c   : > { %2418 = vmatprep.subr.bf16.mxu0 %v14699_v22  ;;  %2461 = vmatprep.subr.bf16.mxu1 %v14701_v24  ;;  %17482 = vst [vmem:[#allocation83_spill] sm:$0xff] %v14723_v43  ;;  %v1450_v24 = vld [vmem:[#allocation8 + $0xa8] sm:$0xff]  ;;  %v1459_v23 = vld [vmem:[#allocation8 + $0xf0] sm:$0xff]  ;;  %17484 = vst [vmem:[#allocation85_spill] sm:$0xff] %v14729_v34 }
 0x25d   : > { %v1458_v22 = vld [vmem:[#allocation8 + $0xe8] sm:$0xff]  ;;  %v14737_v37 = vcombine.high %v1451_v19, %v1459_v23  ;;  %v14743_v53 = vcombine.low %v1451_v19, %v1459_v23  ;;  %v1532_v19 = vld [vmem:[#allocation8 + $0x338] sm:$0xff] }
 0x25e   : > { %v14735_v36 = vcombine.high %v1450_v24, %v1458_v22  ;;  %v14741_v50 = vcombine.low %v1450_v24, %v1458_v22  ;;  %v1540_v24 = vld [vmem:[#allocation8 + $0x378] sm:$0xff] }
 0x25f   : > { %2419 = vmatpush1.bf16.msra.mxu0 %v14705_v14  ;;  %2462 = vmatpush1.bf16.msra.mxu1 %v14707_v51  ;;  %17485 = vst [vmem:[#allocation86_spill] sm:$0xff] %v14737_v37  ;;  %v1435_v51 = vld [vmem:[#allocation8 + $0x30] sm:$0xff] }
 0x260   : > { %2420 = vmatprep.subr.bf16.mxu0 %v14711_v3  ;;  %2463 = vmatprep.subr.bf16.mxu1 %v14713_v61  ;;  %v1434_v61 = vld [vmem:[#allocation8 + $0x28] sm:$0xff]  ;;  %v1443_v14 = vld [vmem:[#allocation8 + $0x70] sm:$0xff] }
 0x261   : > { %v1442_v3 = vld [vmem:[#allocation8 + $0x68] sm:$0xff]  ;;  %v14749_v55 = vcombine.high %v1435_v51, %v1443_v14  ;;  %v14755_v22 = vcombine.low %v1435_v51, %v1443_v14  ;;  %v14767_v14 = vcombine.high %v1532_v19, %v1540_v24  ;;  %v1516_v51 = vld [vmem:[#allocation8 + $0x2b8] sm:$0xff] }
 0x262   : > { %v14747_v49 = vcombine.high %v1434_v61, %v1442_v3 }
 0x263   : > { %2421 = vmatpush1.bf16.msra.mxu0 %v14717_v52  ;;  %2464 = vmatpush1.bf16.msra.mxu1 %v14719_v48 }
 0x264   : > { %2422 = vmatprep.subr.bf16.mxu0 %v14723_v43  ;;  %2465 = vmatprep.subr.bf16.mxu1 %v14725_v54  ;;  %v1548_v54 = vld [vmem:[#allocation8 + $0x3b8] sm:$0xff] }
 0x265   : > { %v1556_v43 = vld [vmem:[#allocation8 + $0x3f8] sm:$0xff] }
 0x266   : > { %v14759_v23 = vcombine.high %v1548_v54, %v1556_v43 }
 0x267   : > { %2423 = vmatpush1.bf16.msra.mxu0 %v14729_v34  ;;  %2466 = vmatpush1.bf16.msra.mxu1 %v14731_v35  ;;  %v14753_v34 = vcombine.low %v1434_v61, %v1442_v3  ;;  %v1524_v3 = vld [vmem:[#allocation8 + $0x2f8] sm:$0xff]  ;;  %v14773_v61 = vcombine.low %v1532_v19, %v1540_v24 }
 0x268   : > { %2424 = vmatprep.subr.bf16.mxu0 %v14735_v36  ;;  %2467 = vmatprep.subr.bf16.mxu1 %v14737_v37  ;;  %v14763_v37 = vcombine.low %v1548_v54, %v1556_v43  ;;  %v14777_v43 = vcombine.high %v1516_v51, %v1524_v3  ;;  %v1508_v54 = vld [vmem:[#allocation8 + $0x278] sm:$0xff] }
 0x269   : > { %v1492_v19 = vld [vmem:[#allocation8 + $0x1f8] sm:$0xff] }
 0x26a   : > { %17486 = vst [vmem:[#allocation87_spill] sm:$0xff] %v14763_v37 }
 0x26b   : > { %2425 = vmatpush1.bf16.msra.mxu0 %v14741_v50  ;;  %2468 = vmatpush1.bf16.msra.mxu1 %v14743_v53 }
 0x26c   : > { %2426 = vmatprep.subr.bf16.mxu0 %v14747_v49  ;;  %2469 = vmatprep.subr.bf16.mxu1 %v14749_v55 }
 0x26f   : > { %2427 = vmatpush1.bf16.msra.mxu0 %v14753_v34  ;;  %2470 = vmatpush1.bf16.msra.mxu1 %v14755_v22 }
 0x270   : > { %2498 = vmatprep.subr.bf16.mxu0 %v14759_v23  ;;  %2542 = vmatprep.subr.bf16.mxu1 %v14372_v41  ;;  %v1500_v41 = vld [vmem:[#allocation8 + $0x238] sm:$0xff] }
 0x271   : > { %v14791_v24 = vcombine.low %v1500_v41, %v1508_v54 }
 0x272   : > { %2445 = vmatmul.mubr.bf16.vlgmr.msra.gmra.mxu0 %v14470_v42  ;;  %2488 = vmatmul.mubr.bf16.vlgmr.msra.gmra.mxu1 %v14470_v42 }
 0x273   : > { %2499 = vmatpush1.bf16.msra.mxu0 %v14763_v37  ;;  %2543 = vmatpush1.bf16.msra.mxu1 %v14370_v40  ;;  %v14783_v37 = vcombine.low %v1516_v51, %v1524_v3  ;;  %v14787_v40 = vcombine.high %v1500_v41, %v1508_v54  ;;  %v1468_v51 = vld [vmem:[#allocation8 + $0x138] sm:$0xff] }
 0x274   : > { %2500 = vmatprep.subr.bf16.mxu0 %v14767_v14  ;;  %2544 = vmatprep.subr.bf16.mxu1 %v14411_v56  ;;  %v1484_v56 = vld [vmem:[#allocation8 + $0x1b8] sm:$0xff] }
 0x275   : > { %2530 = vmatprep.mubr.bf16.mxu0 %v17441_v8  ;;  %2574 = vmatprep.mubr.bf16.mxu1 %v17441_v8  ;;  %v1476_v3 = vld [vmem:[#allocation8 + $0x178] sm:$0xff] }
 0x276   : > { %v1452_v41 = vld [vmem:[#allocation8 + $0xb8] sm:$0xff] }
 0x277   : > { %2501 = vmatpush1.bf16.msra.mxu0 %v14773_v61  ;;  %2545 = vmatpush1.bf16.msra.mxu1 %v14415_v60  ;;  %v14795_v60 = vcombine.high %v1484_v56, %v1492_v19  ;;  %v1460_v54 = vld [vmem:[#allocation8 + $0xf8] sm:$0xff] }
 0x278   : > { %2502 = vmatprep.subr.bf16.mxu0 %v14777_v43  ;;  %2546 = vmatprep.subr.bf16.mxu1 %v14418_v62  ;;  %v14799_v62 = vcombine.low %v1484_v56, %v1492_v19  ;;  %v1436_v56 = vld [vmem:[#allocation8 + $0x38] sm:$0xff] }
 0x279   : > { %v1444_v19 = vld [vmem:[#allocation8 + $0x78] sm:$0xff] }
 0x27b   : > { %2503 = vmatpush1.bf16.msra.mxu0 %v14783_v37  ;;  %2547 = vmatpush1.bf16.msra.mxu1 %v14424_v1  ;;  %v14803_v1 = vcombine.high %v1468_v51, %v1476_v3 }
 0x27c   : > { %2504 = vmatprep.subr.bf16.mxu0 %v14787_v40  ;;  %2548 = vmatprep.subr.bf16.mxu1 %v14427_v2  ;;  %v14807_v2 = vcombine.low %v1468_v51, %v1476_v3  ;;  %v838_v51 = vpop.f32.mrf.mxu1  ;;  %v17518_v3 = vld [vmem:[#allocation57_spill] sm:$0xff] }
 0x27f   : > { %2505 = vmatpush1.bf16.msra.mxu0 %v14791_v24  ;;  %2549 = vmatpush1.bf16.msra.mxu1 %v14430_v6  ;;  %v14811_v6 = vcombine.high %v1452_v41, %v1460_v54 }
 0x280   : > { %2506 = vmatprep.subr.bf16.mxu0 %v14795_v60  ;;  %2550 = vmatprep.subr.bf16.mxu1 %v14433_v7  ;;  %v14815_v7 = vcombine.low %v1452_v41, %v1460_v54  ;;  %v17519_v41 = vld [vmem:[#allocation58_spill] sm:$0xff]  ;;  %v17520_v54 = vld [vmem:[#allocation59_spill] sm:$0xff] }
 0x283   : > { %2507 = vmatpush1.bf16.msra.mxu0 %v14799_v62  ;;  %2551 = vmatpush1.bf16.msra.mxu1 %v14436_v10  ;;  %v14819_v10 = vcombine.high %v1436_v56, %v1444_v19 }
 0x284   : > { %2508 = vmatprep.subr.bf16.mxu0 %v14803_v1  ;;  %2552 = vmatprep.subr.bf16.mxu1 %v14439_v11  ;;  %v14823_v11 = vcombine.low %v1436_v56, %v1444_v19  ;;  %v17521_v56 = vld [vmem:[#allocation60_spill] sm:$0xff]  ;;  %v17522_v19 = vld [vmem:[#allocation61_spill] sm:$0xff] }
 0x287   : > { %2509 = vmatpush1.bf16.msra.mxu0 %v14807_v2  ;;  %2553 = vmatpush1.bf16.msra.mxu1 %v14442_v15  ;;  %v14830_v15 = vpack.c.bf16 %v838_v51, %v14468_v33  ;;  %v17495_v33 = vld [vmem:[#allocation34_spill] sm:$0xff] }
 0x288   : > { %2510 = vmatprep.subr.bf16.mxu0 %v14811_v6  ;;  %2554 = vmatprep.subr.bf16.mxu1 %v14445_v16  ;;  %v17487_v16 = vld [vmem:[#allocation26_spill] sm:$0xff] }
 0x289   : > { %v17523_v51 = vld [vmem:[#allocation62_spill] sm:$0xff] }
 0x28b   : > { %2511 = vmatpush1.bf16.msra.mxu0 %v14815_v7  ;;  %2555 = vmatpush1.bf16.msra.mxu1 %v14448_v17  ;;  %v17488_v17 = vld [vmem:[#allocation27_spill] sm:$0xff] }
 0x28c   : > { %2512 = vmatprep.subr.bf16.mxu0 %v14819_v10  ;;  %2556 = vmatprep.subr.bf16.mxu1 %v14452_v20  ;;  %v17489_v20 = vld [vmem:[#allocation28_spill] sm:$0xff] }
 0x28f   : > { %2513 = vmatpush1.bf16.msra.mxu0 %v14823_v11  ;;  %2557 = vmatpush1.bf16.msra.mxu1 %v14454_v21  ;;  %v17490_v21 = vld [vmem:[#allocation29_spill] sm:$0xff] }
 0x290   : > { %2585 = vmatprep.subr.bf16.mxu0 %v14458_v25  ;;  %2628 = vmatprep.subr.bf16.mxu1 %v14464_v29  ;;  %v17491_v25 = vld [vmem:[#allocation30_spill] sm:$0xff]  ;;  %v17494_v29 = vld [vmem:[#allocation33_spill] sm:$0xff] }
 0x292   : > { %2531 = vmatmul.mubr.bf16.vlgmr.msra.gmra.mxu0 %v14470_v42  ;;  %2575 = vmatmul.mubr.bf16.vlgmr.msra.gmra.mxu1 %v14830_v15  ;;  %v17496_v42 = vld [vmem:[#allocation35_spill] sm:$0xff] }
 0x293   : > { %2586 = vmatpush1.bf16.msra.mxu0 %v14460_v27  ;;  %2629 = vmatpush1.bf16.msra.mxu1 %v14462_v28  ;;  %v17492_v27 = vld [vmem:[#allocation31_spill] sm:$0xff]  ;;  %v17493_v28 = vld [vmem:[#allocation32_spill] sm:$0xff] }
 0x294   : > { %2587 = vmatprep.subr.bf16.mxu0 %v14472_v45  ;;  %2630 = vmatprep.subr.bf16.mxu1 %v14474_v46  ;;  %v17497_v45 = vld [vmem:[#allocation36_spill] sm:$0xff]  ;;  %v17498_v46 = vld [vmem:[#allocation37_spill] sm:$0xff] }
 0x295   : > { %2617 = vmatprep.mubr.bf16.mxu0 %v17441_v8  ;;  %2660 = vmatprep.mubr.bf16.mxu1 %v17441_v8 }
 0x297   : > { %2588 = vmatpush1.bf16.msra.mxu0 %v14479_v57  ;;  %2631 = vmatpush1.bf16.msra.mxu1 %v14481_v58  ;;  %v17499_v57 = vld [vmem:[#allocation38_spill] sm:$0xff]  ;;  %v17500_v58 = vld [vmem:[#allocation39_spill] sm:$0xff] }
 0x298   : > { %2589 = vmatprep.subr.bf16.mxu0 %v14485_v59  ;;  %2632 = vmatprep.subr.bf16.mxu1 %v14487_v63  ;;  %v17501_v59 = vld [vmem:[#allocation40_spill] sm:$0xff]  ;;  %v17502_v63 = vld [vmem:[#allocation41_spill] sm:$0xff] }
 0x29b   : > { %2590 = vmatpush1.bf16.msra.mxu0 %v14493_v9  ;;  %2633 = vmatpush1.bf16.msra.mxu1 %v14495_v12  ;;  %v17503_v9 = vld [vmem:[#allocation42_spill] sm:$0xff]  ;;  %v17504_v12 = vld [vmem:[#allocation43_spill] sm:$0xff] }
 0x29c   : > { %2591 = vmatprep.subr.bf16.mxu0 %v14499_v13  ;;  %2634 = vmatprep.subr.bf16.mxu1 %v14501_v18  ;;  %v17505_v13 = vld [vmem:[#allocation44_spill] sm:$0xff]  ;;  %v17506_v18 = vld [vmem:[#allocation45_spill] sm:$0xff] }
 0x29f   : > { %2592 = vmatpush1.bf16.msra.mxu0 %v14505_v26  ;;  %2635 = vmatpush1.bf16.msra.mxu1 %v14507_v30  ;;  %v17507_v26 = vld [vmem:[#allocation46_spill] sm:$0xff]  ;;  %v17508_v30 = vld [vmem:[#allocation47_spill] sm:$0xff] }
 0x2a0   : > { %2593 = vmatprep.subr.bf16.mxu0 %v14511_v31  ;;  %2636 = vmatprep.subr.bf16.mxu1 %v14513_v32  ;;  %v17509_v31 = vld [vmem:[#allocation48_spill] sm:$0xff]  ;;  %v17510_v32 = vld [vmem:[#allocation49_spill] sm:$0xff] }
 0x2a3   : > { %2594 = vmatpush1.bf16.msra.mxu0 %v14517_v38  ;;  %2637 = vmatpush1.bf16.msra.mxu1 %v14519_v39  ;;  %v17511_v38 = vld [vmem:[#allocation50_spill] sm:$0xff]  ;;  %v17512_v39 = vld [vmem:[#allocation51_spill] sm:$0xff] }
 0x2a4   : > { %2595 = vmatprep.subr.bf16.mxu0 %v14523_v44  ;;  %2638 = vmatprep.subr.bf16.mxu1 %v14525_v47  ;;  %v17513_v44 = vld [vmem:[#allocation52_spill] sm:$0xff]  ;;  %v17514_v47 = vld [vmem:[#allocation53_spill] sm:$0xff] }
 0x2a7   : > { %2596 = vmatpush1.bf16.msra.mxu0 %v14529_v0  ;;  %2639 = vmatpush1.bf16.msra.mxu1 %v14531_v4  ;;  %v17515_v0 = vld [vmem:[#allocation54_spill] sm:$0xff]  ;;  %v17516_v4 = vld [vmem:[#allocation55_spill] sm:$0xff] }
 0x2a8   : > { %2597 = vmatprep.subr.bf16.mxu0 %v14535_v5  ;;  %2640 = vmatprep.subr.bf16.mxu1 %v17487_v16  ;;  %v17517_v5 = vld [vmem:[#allocation56_spill] sm:$0xff]  ;;  %v17524_v16 = vld [vmem:[#allocation63_spill] sm:$0xff] }
 0x2ab   : > { %2598 = vmatpush1.bf16.msra.mxu0 %v17488_v17  ;;  %2641 = vmatpush1.bf16.msra.mxu1 %v17489_v20  ;;  %v17525_v17 = vld [vmem:[#allocation64_spill] sm:$0xff]  ;;  %v17526_v20 = vld [vmem:[#allocation65_spill] sm:$0xff] }
 0x2ac   : > { %2599 = vmatprep.subr.bf16.mxu0 %v17490_v21  ;;  %2642 = vmatprep.subr.bf16.mxu1 %v17491_v25  ;;  %v17527_v21 = vld [vmem:[#allocation66_spill] sm:$0xff]  ;;  %v12323_v25 = vld [vmem:[%s17318_s6] ss:$0 sm:$0xff] }
 0x2af   : > { %2600 = vmatpush1.bf16.msra.mxu0 %v17492_v27  ;;  %2643 = vmatpush1.bf16.msra.mxu1 %v17493_v28 }
 0x2b0   : > { %2671 = vmatprep.subr.bf16.mxu0 %v17494_v29  ;;  %2714 = vmatprep.subr.bf16.mxu1 %v17495_v33  ;;  %v17528_v29 = vld [vmem:[#allocation67_spill] sm:$0xff]  ;;  %v17529_v33 = vld [vmem:[#allocation68_spill] sm:$0xff] }
 0x2b2   : > { %2618 = vmatmul.mubr.bf16.vlgmr.msra.gmra.mxu0 %v14830_v15  ;;  %2661 = vmatmul.mubr.bf16.vlgmr.msra.gmra.mxu1 %v14830_v15 }
 0x2b3   : > { %2672 = vmatpush1.bf16.msra.mxu0 %v17496_v42  ;;  %2715 = vmatpush1.bf16.msra.mxu1 %v17497_v45  ;;  %v17530_v45 = vld [vmem:[#allocation69_spill] sm:$0xff] }
 0x2b4   : > { %2673 = vmatprep.subr.bf16.mxu0 %v17498_v46  ;;  %2716 = vmatprep.subr.bf16.mxu1 %v17499_v57  ;;  %v17531_v46 = vld [vmem:[#allocation70_spill] sm:$0xff] }
 0x2b5   : > { %2703 = vmatprep.mubr.bf16.mxu0 %v17441_v8  ;;  %2746 = vmatprep.mubr.bf16.mxu1 %v17441_v8 }
 0x2b7   : > { %2674 = vmatpush1.bf16.msra.mxu0 %v17500_v58  ;;  %2717 = vmatpush1.bf16.msra.mxu1 %v17501_v59 }
 0x2b8   : > { %2675 = vmatprep.subr.bf16.mxu0 %v17502_v63  ;;  %2718 = vmatprep.subr.bf16.mxu1 %v17503_v9  ;;  %v17532_v9 = vld [vmem:[#allocation71_spill] sm:$0xff] }
 0x2bb   : > { %2676 = vmatpush1.bf16.msra.mxu0 %v17504_v12  ;;  %2719 = vmatpush1.bf16.msra.mxu1 %v17505_v13  ;;  %v17533_v12 = vld [vmem:[#allocation72_spill] sm:$0xff] }
 0x2bc   : > { %2677 = vmatprep.subr.bf16.mxu0 %v17506_v18  ;;  %2720 = vmatprep.subr.bf16.mxu1 %v17507_v26  ;;  %v17534_v18 = vld [vmem:[#allocation73_spill] sm:$0xff]  ;;  %v17535_v26 = vld [vmem:[#allocation74_spill] sm:$0xff] }
 0x2bf   : > { %2678 = vmatpush1.bf16.msra.mxu0 %v17508_v30  ;;  %2721 = vmatpush1.bf16.msra.mxu1 %v17509_v31 }
 0x2c0   : > { %2679 = vmatprep.subr.bf16.mxu0 %v17510_v32  ;;  %2722 = vmatprep.subr.bf16.mxu1 %v17511_v38  ;;  %v17536_v32 = vld [vmem:[#allocation75_spill] sm:$0xff]  ;;  %v17537_v38 = vld [vmem:[#allocation76_spill] sm:$0xff] }
 0x2c3   : > { %2680 = vmatpush1.bf16.msra.mxu0 %v17512_v39  ;;  %2723 = vmatpush1.bf16.msra.mxu1 %v17513_v44  ;;  %v17538_v39 = vld [vmem:[#allocation77_spill] sm:$0xff]  ;;  %v17539_v44 = vld [vmem:[#allocation78_spill] sm:$0xff] }
 0x2c4   : > { %2681 = vmatprep.subr.bf16.mxu0 %v17514_v47  ;;  %2724 = vmatprep.subr.bf16.mxu1 %v17515_v0  ;;  %v17540_v47 = vld [vmem:[#allocation79_spill] sm:$0xff]  ;;  %v17541_v0 = vld [vmem:[#allocation80_spill] sm:$0xff] }
 0x2c7   : > { %2682 = vmatpush1.bf16.msra.mxu0 %v17516_v4  ;;  %2725 = vmatpush1.bf16.msra.mxu1 %v17517_v5  ;;  %v17542_v4 = vld [vmem:[#allocation81_spill] sm:$0xff]  ;;  %v17543_v5 = vld [vmem:[#allocation82_spill] sm:$0xff] }
 0x2c8   : > { %2683 = vmatprep.subr.bf16.mxu0 %v17518_v3  ;;  %2726 = vmatprep.subr.bf16.mxu1 %v17519_v41  ;;  %v17544_v3 = vld [vmem:[#allocation83_spill] sm:$0xff]  ;;  %v17545_v41 = vld [vmem:[#allocation84_spill] sm:$0xff] }
 0x2cb   : > { %2684 = vmatpush1.bf16.msra.mxu0 %v17520_v54  ;;  %2727 = vmatpush1.bf16.msra.mxu1 %v17521_v56 }
 0x2cc   : > { %2685 = vmatprep.subr.bf16.mxu0 %v17522_v19  ;;  %2728 = vmatprep.subr.bf16.mxu1 %v17523_v51  ;;  %v17546_v19 = vld [vmem:[#allocation85_spill] sm:$0xff]  ;;  %v17547_v51 = vld [vmem:[#allocation86_spill] sm:$0xff] }
 0x2cf   : > { %2686 = vmatpush1.bf16.msra.mxu0 %v17524_v16  ;;  %2729 = vmatpush1.bf16.msra.mxu1 %v17525_v17 }
 0x2d0   : > { %2757 = vmatprep.subr.bf16.mxu0 %v17526_v20  ;;  %2800 = vmatprep.subr.bf16.mxu1 %v17527_v21 }
 0x2d2   : > { %2704 = vmatmul.mubr.bf16.vlgmr.msra.gmra.mxu0 %v14830_v15  ;;  %2747 = vmatmul.mubr.bf16.vlgmr.msra.gmra.mxu1 %v14830_v15  ;;  %v933_v27 = vpop.f32.mrf.mxu0  ;;  %v2231_v17 = vpop.f32.mrf.mxu1 }
 0x2d3   : > { %v14911_v28 = vadd.f32 %v12323_v25, %v933_v27  ;;  %2758 = vmatpush1.bf16.msra.mxu0 %v17528_v29  ;;  %2801 = vmatpush1.bf16.msra.mxu1 %v17529_v33  ;;  %v17549_v27 = vld [vmem:[#allocation20_spill] sm:$0xff] }
 0x2d4   : > { %v13680_v42 = vpop.f32.mrf.mxu0  ;;  %2759 = vmatprep.subr.bf16.mxu0 %v17530_v45  ;;  %2802 = vmatprep.subr.bf16.mxu1 %v17531_v46 }
 0x2d5   : > { %v940_v57 = vmin.f32 %v14911_v28, 20.0  ;;  %2789 = vmatprep.mubr.bf16.mxu0 %v17441_v8  ;;  %2832 = vmatprep.mubr.bf16.mxu1 %v17441_v8  ;;  %vm942_vm8 = vcmp.gt.f32.partialorder %v14911_v28, 20.0 }
 0x2d6   : > { %v936_v58 = vpop.f32.mrf.mxu0 }
 0x2d7   : > { %v944_v59 = vmul.f32 1.442695, %v940_v57  ;;  %v14920_v63 = vadd.f32 %v12323_v25, %v936_v58  ;;  %2760 = vmatpush1.bf16.msra.mxu0 %v17532_v9  ;;  %2803 = vmatpush1.bf16.msra.mxu1 %v17533_v12 }
 0x2d8   : > { %v13681_v13 = vpop.f32.mrf.mxu0  ;;  %2761 = vmatprep.subr.bf16.mxu0 %v17534_v18  ;;  %2804 = vmatprep.subr.bf16.mxu1 %v17535_v26 }
 0x2d9   : > { %13869 = vpow2.f32 %v944_v59  ;;  %v941_v30 = vmin.f32 %v14920_v63, 20.0  ;;  %vm943_vm11 = vcmp.gt.f32.partialorder %v14920_v63, 20.0 }
 0x2db   : > { %v946_v31 = vmul.f32 1.442695, %v941_v30  ;;  %2762 = vmatpush1.bf16.msra.mxu0 %v17536_v32  ;;  %2805 = vmatpush1.bf16.msra.mxu1 %v17537_v38 }
 0x2dc   : > { %2763 = vmatprep.subr.bf16.mxu0 %v17538_v39  ;;  %2806 = vmatprep.subr.bf16.mxu1 %v17539_v44 }
 0x2dd   : > { %13871 = vpow2.f32 %v946_v31  ;;  %v17551_v31 = vld [vmem:[#allocation25_spill] sm:$0xff] }
 0x2df   : > { %2764 = vmatpush1.bf16.msra.mxu0 %v17540_v47  ;;  %2807 = vmatpush1.bf16.msra.mxu1 %v17541_v0 }
 0x2e0   : > { %2765 = vmatprep.subr.bf16.mxu0 %v17542_v4  ;;  %2808 = vmatprep.subr.bf16.mxu1 %v17543_v5 }
 0x2e3   : > { %2766 = vmatpush1.bf16.msra.mxu0 %v14717_v52  ;;  %2809 = vmatpush1.bf16.msra.mxu1 %v14719_v48  ;;  %v2233_v48 = vpop.f32.mrf.mxu1 }
 0x2e4   : > { %2767 = vmatprep.subr.bf16.mxu0 %v17544_v3  ;;  %2810 = vmatprep.subr.bf16.mxu1 %v17545_v41 }
 0x2e5   : > { %v14950_v20 = vpop.f32.mrf.mxu1 }
 0x2e6   : > { %v13870_v54 = vpop.eup %13869 }
 0x2e7   : > { %v948_v56 = vadd.f32 1.0, %v13870_v54  ;;  %2768 = vmatpush1.bf16.msra.mxu0 %v17546_v19  ;;  %2811 = vmatpush1.bf16.msra.mxu1 %v14731_v35  ;;  %v14080_v35 = vmov 1966171168  }
 0x2e8   : > { %2769 = vmatprep.subr.bf16.mxu0 %v14735_v36  ;;  %2812 = vmatprep.subr.bf16.mxu1 %v17547_v51  ;;  %v965_v36 = vunpack.c.l.s4 %v14080_v35  ;;  %v3023_v51 = vld [vmem:[#allocation5] sm:$0x1] }
 0x2e9   : > { %13873 = vlog2.f32 %v948_v56 }
 0x2ea   : > { %v13872_v16 = vpop.eup %13871 }
 0x2eb   : > { %v949_v52 = vadd.f32 1.0, %v13872_v16  ;;  %2770 = vmatpush1.bf16.msra.mxu0 %v14741_v50  ;;  %2813 = vmatpush1.bf16.msra.mxu1 %v14743_v53  ;;  %v17548_v50 = vld [vmem:[#allocation87_spill] sm:$0xff] }
 0x2ec   : > { %2771 = vmatprep.subr.bf16.mxu0 %v14747_v49  ;;  %2814 = vmatprep.subr.bf16.mxu1 %v14749_v55  ;;  %v14957_v49 = vpop.f32.mrf.mxu1 }
 0x2ed   : > { %13875 = vlog2.f32 %v949_v52 }
 0x2ef   : > { %2772 = vmatpush1.bf16.msra.mxu0 %v14753_v34  ;;  %2815 = vmatpush1.bf16.msra.mxu1 %v14755_v22  ;;  %v966_v34 = vunpack.c.0.s8 %v965_v36  ;;  %v959_v22 = vld [vmem:[%s17319_s7] sm:$0xff] }
 0x2f0   : > { %2843 = vmatprep.subr.bf16.mxu0 %v14759_v23  ;;  %v960_v23 = vld [vmem:[%s17319_s7 + $0x8] sm:$0xff] }
 0x2f1   : > { %v14970_v29 = vsub.s32 %v966_v34, %v17549_v27  ;;  %v14975_v45 = vpack.c.bf16 %v960_v23, %v959_v22  ;;  %v3026_v34 = vld [vmem:[#allocation5 + $0x8] sm:$0x1]  ;;  %v3035_v22 = vld [vmem:[#allocation5 + $0x20] sm:$0x1]  ;;  %v3041_v27 = vld [vmem:[#allocation5 + $0x30] sm:$0x1] }
 0x2f2   : > { %2790 = vmatmul.mubr.bf16.vlgmr.msra.gmra.mxu0 %v14830_v15  ;;  %2833 = vmatmul.mubr.bf16.vlgmr.msra.gmra.mxu1 %v14830_v15  ;;  %v2317_v21 = vpop.f32.mrf.mxu1 }
 0x2f3   : > { %2844 = vmatpush1.bf16.msra.mxu0 %v17548_v50  ;;  %2875 = vmatprep.mubr.bf16.mxu0 %v17441_v8  ;;  %v2274_v8 = vpop.f32.mrf.mxu0 }
 0x2f4   : > { %2845 = vmatprep.subr.bf16.mxu0 %v14767_v14  ;;  %v2319_v58 = vpop.f32.mrf.mxu1 }
 0x2f5   : > { %v2276_v57 = vpop.f32.mrf.mxu0 }
 0x2f6   : > { %v13874_v53 = vpop.eup %13873 }
 0x2f7   : > { %v951_v55 = vmul.f32 0.6931472, %v13874_v53  ;;  %2846 = vmatpush1.bf16.msra.mxu0 %v14773_v61  ;;  %v17550_v61 = vld [vmem:[#allocation24_spill] sm:$0xff] }
 0x2f8   : > { %2847 = vmatprep.subr.bf16.mxu0 %v14777_v43 }
 0x2f9   : > { %v954_v14 = vsel %vm942_vm8, %v14911_v28, %v951_v55  ;;  %v3029_v55 = vld [vmem:[#allocation5 + $0x10] sm:$0x1]  ;;  %vm5198_vm8 = vcmask 1042434  }
 0x2fa   : > { %v13876_v25 = vpop.eup %13875  ;;  %v14973_v33 = vmul.f32 %v954_v14, %v17550_v61  ;;  %vm15285_vm12 = vmand %vm5198_vm8, %vm5199_vm10 }
 0x2fb   : > { %v953_v42 = vmul.f32 0.6931472, %v13876_v25  ;;  %2848 = vmatpush1.bf16.msra.mxu0 %v14783_v37  ;;  %v3038_v25 = vld [vmem:[#allocation5 + $0x28] sm:$0x1] }
 0x2fc   : > { %v2886_v46 = vmul.f32 %v2231_v17, %v14973_v33  ;;  %v3251_v43 = vmul.f32 %v2233_v48, %v14973_v33  ;;  %v14982_v28 = vmul.f32 %v2274_v8, %v14973_v33  ;;  %2849 = vmatprep.subr.bf16.mxu0 %v14787_v40  ;;  %v14987_v9 = vmul.f32 %v2317_v21, %v14973_v33 }
 0x2fd   : > { %v955_v59 = vsel %vm943_vm11, %v14920_v63, %v953_v42  ;;  %v14990_v37 = vmul.f32 %v2276_v57, %v14973_v33  ;;  %v14993_v12 = vmul.f32 %v2319_v58, %v14973_v33  ;;  %vm15258_vm11 = vmand %vm4053_vm15, %vm4054_vm7  ;;  %vm4626_vm7 = vsmask.f32 7942 }
 0x2fe   : > { %v2890_v13 = vcombine.high %v2886_v46, %v2886_v46  ;;  %v2897_v18 = vrot.slane %v2886_v46, %v14970_v29  ;;  %v3255_v26 = vcombine.high %v3251_v43, %v3251_v43  ;;  %v3262_v30 = vrot.slane %v3251_v43, %v14970_v29  ;;  %vm15318_vm10 = vmand %vm4053_vm15, %vm4626_vm7 }
 0x2ff   : > { %v14998_v32 = vmul.f32 %v955_v59, %v17551_v31  ;;  %v958_v40 = vpack.c.bf16 %v955_v59, %v954_v14  ;;  %v12325_v63 = vpack.c.bf16 %v955_v59, %v955_v59  ;;  %v3843_v38 = vcombine.high %v14982_v28, %v14982_v28  ;;  %2850 = vmatpush1.bf16.msra.mxu0 %v14791_v24  ;;  %v3032_v14 = vld [vmem:[#allocation5 + $0x18] sm:$0x1]  ;;  %vm15349_vm15 = vmand %vm5198_vm8, %vm5771_vm0 }
 0x300   : > { %v2904_v39 = vrot.slane %v2890_v13, %v14970_v29  ;;  %v2905_v44 = vcombine.high %v2897_v18, %v2897_v18  ;;  %v2913_v47 = vrot.slane %v2897_v18, %v14970_v29  ;;  %v3269_v0 = vrot.slane %v3255_v26, %v14970_v29  ;;  %2851 = vmatprep.subr.bf16.mxu0 %v14795_v60  ;;  %v3044_v59 = vld [vmem:[#allocation5 + $0x38] sm:$0x1] }
 0x301   : > { %v3270_v4 = vcombine.high %v3262_v30, %v3262_v30  ;;  %v15008_v5 = vrot.slane %v3262_v30, %v14970_v29  ;;  %v15011_v3 = vrot.slane %v958_v40, %v14970_v29  ;;  %v15014_v41 = vrot.slane %v12325_v63, %v14970_v29 }
 0x302   : > { %v2906_v24 = vcombine.high %v2904_v39, %v2904_v39  ;;  %v2920_v54 = vrot.slane %v2904_v39, %v14970_v29  ;;  %v2927_v56 = vrot.slane %v2905_v44, %v14970_v29  ;;  %v2935_v19 = vcombine.high %v2913_v47, %v2913_v47 }
 0x303   : > { %v3004_v16 = vpack.c.bf16 %v2913_v47, %v2913_v47  ;;  %v3271_v17 = vcombine.high %v3269_v0, %v3269_v0  ;;  %v3285_v52 = vrot.slane %v3269_v0, %v14970_v29  ;;  %v3292_v48 = vrot.slane %v3270_v4, %v14970_v29  ;;  %2852 = vmatpush1.bf16.msra.mxu0 %v14799_v62 }
 0x304   : > { %v2934_v35 = vrot.slane %v2906_v24, %v14970_v29  ;;  %v2936_v36 = vcombine.high %v2920_v54, %v2920_v54  ;;  %v2937_v50 = vcombine.high %v2927_v56, %v2927_v56  ;;  %v3005_v53 = vpack.c.bf16 %v2927_v56, %v2927_v56  ;;  %2853 = vmatprep.subr.bf16.mxu0 %v14803_v1 }
 0x305   : > { %v3006_v23 = vpack.c.bf16 %v2935_v19, %v2935_v19  ;;  %v3008_v8 = vpack.c.bf16 %v2920_v54, %v2920_v54  ;;  %v3024_v21 = vsel %vm15020_vm13, %v3004_v16, %v3023_v51  ;;  %v3299_v62 = vrot.slane %v3271_v17, %v14970_v29 }
 0x306   : > { %v2938_v61 = vcombine.high %v2934_v35, %v2934_v35  ;;  %v3007_v42 = vpack.c.bf16 %v2937_v50, %v2937_v50  ;;  %v3009_v46 = vpack.c.bf16 %v2934_v35, %v2934_v35  ;;  %v3010_v43 = vpack.c.bf16 %v2936_v36, %v2936_v36  ;;  %3025 = vst [vmem:[#allocation5] sm:$0x1] %v3024_v21 }
 0x307   : > { %v3027_v57 = vsel %vm15020_vm13, %v3005_v53, %v3026_v34  ;;  %v3030_v1 = vsel %vm15020_vm13, %v3006_v23, %v3029_v55  ;;  %v3036_v58 = vsel %vm15020_vm13, %v3008_v8, %v3035_v22  ;;  %v3300_v13 = vcombine.high %v15008_v5, %v15008_v5  ;;  %2854 = vmatpush1.bf16.msra.mxu0 %v14807_v2 }
 0x308   : > { %v3011_v18 = vpack.c.bf16 %v2938_v61, %v2938_v61  ;;  %3028 = vst [vmem:[#allocation5 + $0x8] sm:$0x1] %v3027_v57  ;;  %3031 = vst [vmem:[#allocation5 + $0x10] sm:$0x1] %v3030_v1  ;;  %v3033_v26 = vsel %vm15020_vm13, %v3007_v42, %v3032_v14  ;;  %v3039_v30 = vsel %vm15020_vm13, %v3009_v46, %v3038_v25  ;;  %2855 = vmatprep.subr.bf16.mxu0 %v14811_v6  ;;  %vm6343_vm0 = vcmask 1043459  }
 0x309   : > { %3037 = vst [vmem:[#allocation5 + $0x20] sm:$0x1] %v3036_v58  ;;  %v3042_v31 = vsel %vm15020_vm13, %v3010_v43, %v3041_v27  ;;  %3034 = vst [vmem:[#allocation5 + $0x18] sm:$0x1] %v3033_v26  ;;  %v3301_v40 = vcombine.high %v3285_v52, %v3285_v52  ;;  %v3302_v2 = vcombine.high %v3292_v48, %v3292_v48  ;;  %vm6344_vm8 = vsmask.f32 3328 }
 0x30a   : > { %3040 = vst [vmem:[#allocation5 + $0x28] sm:$0x1] %v3039_v30  ;;  %3043 = vst [vmem:[#allocation5 + $0x30] sm:$0x1] %v3042_v31  ;;  %v3303_v63 = vcombine.high %v3299_v62, %v3299_v62  ;;  %v13046_v39 = vpack.c.bf16 %v15008_v5, %v15008_v5  ;;  %v3045_v44 = vsel %vm15020_vm13, %v3011_v18, %v3044_v59 }
 0x30b   : > { %v13047_v47 = vpack.c.bf16 %v3292_v48, %v3292_v48  ;;  %v13048_v0 = vpack.c.bf16 %v3300_v13, %v3300_v13  ;;  %v13050_v4 = vpack.c.bf16 %v3285_v52, %v3285_v52  ;;  %3046 = vst [vmem:[#allocation5 + $0x38] sm:$0x1] %v3045_v44  ;;  %v13049_v24 = vpack.c.bf16 %v3302_v2, %v3302_v2  ;;  %vm15497_vm7 = vmand %vm6343_vm0, %vm6344_vm8 }
 0x30c   : > { %v13051_v54 = vpack.c.bf16 %v3299_v62, %v3299_v62  ;;  %v13052_v56 = vpack.c.bf16 %v3301_v40, %v3301_v40  ;;  %v13053_v6 = vpack.c.bf16 %v3303_v63, %v3303_v63  ;;  %2856 = vmatpush1.bf16.msra.mxu0 %v14815_v7  ;;  %v3434_v5 = vshll.u32 %v13046_v39, 16 }
 0x30d   : > { %v3437_v51 = vshll.u32 %v13047_v47, 16  ;;  %v3440_v16 = vshll.u32 %v13048_v0, 16  ;;  %v3446_v17 = vshll.u32 %v13050_v4, 16  ;;  %2857 = vmatprep.subr.bf16.mxu0 %v14819_v10  ;;  %v3443_v52 = vshll.u32 %v13049_v24, 16  ;;  %v3499_v50 = vld [vmem:[#allocation5] sm:$0x1] }
 0x30e   : > { %v3449_v48 = vshll.u32 %v13051_v54, 16  ;;  %v3452_v35 = vshll.u32 %v13052_v56, 16  ;;  %v3455_v36 = vshll.u32 %v13053_v6, 16  ;;  %v3500_v53 = vsel %vm15054_vm14, %v3434_v5, %v3499_v50  ;;  %v17556_v50 = vld [vmem:[#allocation22_spill] sm:$0xff] }
 0x30f   : > { %v978_v34 = vcombine.high %v15011_v3, %v15011_v3  ;;  %v979_v7 = vcombine.high %v15014_v41, %v15014_v41  ;;  %v986_v55 = vrot.slane %v15011_v3, %v14970_v29  ;;  %3501 = vst [vmem:[#allocation5] sm:$0x1] %v3500_v53  ;;  %v3502_v22 = vld [vmem:[#allocation5 + $0x8] sm:$0x1]  ;;  %v3505_v10 = vld [vmem:[#allocation5 + $0x10] sm:$0x1]  ;;  %v15070_v8 = vrot.slane %v15014_v41, %v14970_v29 }
 0x310   : > { %v3511_v23 = vld [vmem:[#allocation5 + $0x20] sm:$0x1]  ;;  %v15074_v21 = vmul.f32 %v14950_v20, %v14998_v32  ;;  %v15078_v14 = vmul.f32 %v14957_v49, %v14998_v32  ;;  %v15082_v25 = vrot.slane %v14982_v28, %v14970_v29  ;;  %2858 = vmatpush1.bf16.msra.mxu0 %v14823_v11  ;;  %v3503_v3 = vsel %vm15054_vm14, %v3437_v51, %v3502_v22  ;;  %v3508_v27 = vld [vmem:[#allocation5 + $0x18] sm:$0x1] }
 0x311   : > { %v3506_v41 = vsel %vm15054_vm14, %v3440_v16, %v3505_v10  ;;  %v3512_v20 = vsel %vm15054_vm14, %v3446_v17, %v3511_v23  ;;  %v3514_v62 = vld [vmem:[#allocation5 + $0x28] sm:$0x1]  ;;  %v3517_v61 = vld [vmem:[#allocation5 + $0x30] sm:$0x1]  ;;  %v1000_v49 = vrot.slane %v978_v34, %v14970_v29  ;;  %3504 = vst [vmem:[#allocation5 + $0x8] sm:$0x1] %v3503_v3  ;;  %v3509_v42 = vsel %vm15054_vm14, %v3443_v52, %v3508_v27 }
 0x312   : > { %3507 = vst [vmem:[#allocation5 + $0x10] sm:$0x1] %v3506_v41  ;;  %3513 = vst [vmem:[#allocation5 + $0x20] sm:$0x1] %v3512_v20  ;;  %v3515_v11 = vsel %vm15054_vm14, %v3449_v48, %v3514_v62  ;;  %v3518_v46 = vsel %vm15054_vm14, %v3452_v35, %v3517_v61  ;;  %v1007_v43 = vrot.slane %v979_v7, %v14970_v29  ;;  %v3520_v57 = vld [vmem:[#allocation5 + $0x38] sm:$0x1]  ;;  %v1013_v13 = vunpack.i.h.s16 %v986_v55 }
 0x313   : > { %3510 = vst [vmem:[#allocation5 + $0x18] sm:$0x1] %v3509_v42  ;;  %3516 = vst [vmem:[#allocation5 + $0x28] sm:$0x1] %v3515_v11  ;;  %v1008_v1 = vcombine.high %v986_v55, %v986_v55  ;;  %v1009_v58 = vcombine.high %v15070_v8, %v15070_v8  ;;  %v1010_v59 = vcombine.high %v1000_v49, %v1000_v49  ;;  %2876 = vmatmul.mubr.bf16.vlgmr.msra.gmra.mxu0 %v14830_v15  ;;  %vm6916_vm8 = vsmask.f32 7950 }
 0x314   : > { %3519 = vst [vmem:[#allocation5 + $0x30] sm:$0x1] %v3518_v46  ;;  %v3521_v18 = vsel %vm15054_vm14, %v3455_v36, %v3520_v57  ;;  %v1011_v26 = vcombine.high %v1007_v43, %v1007_v43  ;;  %v1015_v30 = vunpack.i.h.s16 %v1000_v49  ;;  %v1021_v31 = vunpack.i.h.s16 %v15070_v8  ;;  %vm15548_vm1 = vmand %vm6343_vm0, %vm6916_vm8 }
 0x315   : > { %3522 = vst [vmem:[#allocation5 + $0x38] sm:$0x1] %v3521_v18  ;;  %v1017_v40 = vunpack.i.h.s16 %v1008_v1  ;;  %v1019_v2 = vunpack.i.h.s16 %v1010_v59  ;;  %v1023_v63 = vunpack.i.h.s16 %v1007_v43  ;;  %v1025_v39 = vunpack.i.h.s16 %v1009_v58 }
 0x316   : > { %v1027_v44 = vunpack.i.h.s16 %v1011_v26  ;;  %v12326_v47 = vpack.i.b16 %v986_v55, %v986_v55  ;;  %v1029_v0 = vpack.i.b16 %v1013_v13, %v1013_v13  ;;  %v12327_v4 = vpack.i.b16 %v1000_v49, %v1000_v49 }
 0x317   : > { %v1031_v24 = vpack.i.b16 %v1015_v30, %v1015_v30  ;;  %v12328_v54 = vpack.i.b16 %v1008_v1, %v1008_v1  ;;  %v1033_v56 = vpack.i.b16 %v1017_v40, %v1017_v40  ;;  %v12329_v15 = vpack.i.b16 %v1010_v59, %v1010_v59 }
 0x318   : > { %v1035_v6 = vpack.i.b16 %v1019_v2, %v1019_v2  ;;  %v12330_v5 = vpack.i.b16 %v15070_v8, %v15070_v8  ;;  %v1037_v51 = vpack.i.b16 %v1021_v31, %v1021_v31  ;;  %v12331_v16 = vpack.i.b16 %v1007_v43, %v1007_v43 }
 0x319   : > { %v1039_v17 = vpack.i.b16 %v1023_v63, %v1023_v63  ;;  %v12332_v52 = vpack.i.b16 %v1009_v58, %v1009_v58  ;;  %v1041_v48 = vpack.i.b16 %v1025_v39, %v1025_v39  ;;  %v12333_v35 = vpack.i.b16 %v1011_v26, %v1011_v26 }
 0x31a   : > { %v1043_v36 = vpack.i.b16 %v1027_v44, %v1027_v44  ;;  %v1047_v53 = vrot.slane %v12326_v47, %v17556_v50  ;;  %v1051_v34 = vrot.slane %v1029_v0, %v17556_v50  ;;  %v1055_v7 = vrot.slane %v12327_v4, %v17556_v50 }
 0x31b   : > { %v1059_v55 = vrot.slane %v1031_v24, %v17556_v50  ;;  %v1063_v22 = vrot.slane %v12328_v54, %v17556_v50  ;;  %v1067_v10 = vrot.slane %v1033_v56, %v17556_v50  ;;  %v1071_v23 = vrot.slane %v12329_v15, %v17556_v50 }
 0x31c   : > { %v1075_v8 = vrot.slane %v1035_v6, %v17556_v50  ;;  %v1079_v3 = vrot.slane %v12330_v5, %v17556_v50  ;;  %v1083_v41 = vrot.slane %v1037_v51, %v17556_v50  ;;  %v1087_v27 = vrot.slane %v12331_v16, %v17556_v50 }
 0x31d   : > { %v1091_v20 = vrot.slane %v1039_v17, %v17556_v50  ;;  %v1095_v62 = vrot.slane %v12332_v52, %v17556_v50  ;;  %v1099_v61 = vrot.slane %v1041_v48, %v17556_v50  ;;  %v1103_v49 = vrot.slane %v12333_v35, %v17556_v50 }
 0x31e   : > { %v1107_v42 = vrot.slane %v1043_v36, %v17556_v50  ;;  %v1109_v11 = vpack.i.b16 %v1047_v53, %v1047_v53  ;;  %v1116_v46 = vpack.i.b16 %v1051_v34, %v1051_v34  ;;  %v1123_v43 = vpack.i.b16 %v1055_v7, %v1055_v7 }
 0x31f   : > { %v1130_v57 = vpack.i.b16 %v1059_v55, %v1059_v55  ;;  %v1137_v1 = vpack.i.b16 %v1063_v22, %v1063_v22  ;;  %v1144_v58 = vpack.i.b16 %v1067_v10, %v1067_v10  ;;  %v1151_v59 = vpack.i.b16 %v1071_v23, %v1071_v23 }
 0x320   : > { %v1114_v13 = vrot.slane %v1109_v11, %v17556_v50  ;;  %v1121_v18 = vrot.slane %v1116_v46, %v17556_v50  ;;  %v1128_v26 = vrot.slane %v1123_v43, %v17556_v50  ;;  %v1158_v30 = vpack.i.b16 %v1075_v8, %v1075_v8 }
 0x321   : > { %v1135_v31 = vrot.slane %v1130_v57, %v17556_v50  ;;  %v1142_v40 = vrot.slane %v1137_v1, %v17556_v50  ;;  %v1149_v2 = vrot.slane %v1144_v58, %v17556_v50  ;;  %v1156_v63 = vrot.slane %v1151_v59, %v17556_v50 }
 0x322   : > { %v1163_v39 = vrot.slane %v1158_v30, %v17556_v50  ;;  %v1165_v44 = vpack.i.b16 %v1079_v3, %v1079_v3  ;;  %v1172_v47 = vpack.i.b16 %v1083_v41, %v1083_v41  ;;  %v1179_v0 = vpack.i.b16 %v1087_v27, %v1087_v27 }
 0x323   : > { %v1186_v4 = vpack.i.b16 %v1091_v20, %v1091_v20  ;;  %v1193_v24 = vpack.i.b16 %v1095_v62, %v1095_v62  ;;  %v1200_v54 = vpack.i.b16 %v1099_v61, %v1099_v61  ;;  %v1207_v56 = vpack.i.b16 %v1103_v49, %v1103_v49 }
 0x324   : > { %v1170_v15 = vrot.slane %v1165_v44, %v17556_v50  ;;  %v1177_v6 = vrot.slane %v1172_v47, %v17556_v50  ;;  %v1184_v5 = vrot.slane %v1179_v0, %v17556_v50  ;;  %v1214_v51 = vpack.i.b16 %v1107_v42, %v1107_v42 }
 0x325   : > { %v1191_v16 = vrot.slane %v1186_v4, %v17556_v50  ;;  %v1198_v17 = vrot.slane %v1193_v24, %v17556_v50  ;;  %v1205_v52 = vrot.slane %v1200_v54, %v17556_v50  ;;  %v1212_v48 = vrot.slane %v1207_v56, %v17556_v50 }
 0x326   : > { %v1219_v35 = vrot.slane %v1214_v51, %v17556_v50  ;;  %v1220_v36 = vmul.bf16 %v1114_v13, %v14975_v45  ;;  %v1221_v53 = vmul.bf16 %v1121_v18, %v14975_v45  ;;  %v1222_v34 = vmul.bf16 %v1128_v26, %v14975_v45 }
 0x327   : > { %v1223_v7 = vmul.bf16 %v1135_v31, %v14975_v45  ;;  %v1224_v55 = vmul.bf16 %v1142_v40, %v14975_v45  ;;  %v1225_v22 = vmul.bf16 %v1149_v2, %v14975_v45  ;;  %v1226_v10 = vmul.bf16 %v1156_v63, %v14975_v45 }
 0x328   : > { %v1227_v23 = vmul.bf16 %v1163_v39, %v14975_v45  ;;  %v1228_v8 = vmul.bf16 %v1170_v15, %v14975_v45  ;;  %v1229_v50 = vmul.bf16 %v1177_v6, %v14975_v45  ;;  %v1230_v3 = vmul.bf16 %v1184_v5, %v14975_v45 }
 0x329   : > { %v1231_v41 = vmul.bf16 %v1191_v16, %v14975_v45  ;;  %v1232_v27 = vmul.bf16 %v1198_v17, %v14975_v45  ;;  %v1233_v20 = vmul.bf16 %v1205_v52, %v14975_v45  ;;  %v1234_v62 = vmul.bf16 %v1212_v48, %v14975_v45  ;;  %v3047_v16 = vld [vmem:[#allocation5 + $0x40] sm:$0x1] }
 0x32a   : > { %v1235_v61 = vmul.bf16 %v1219_v35, %v14975_v45  ;;  %v1237_v49 = vmul.bf16 1069105081, %v1220_v36  ;;  %v1240_v42 = vmul.bf16 1069105081, %v1221_v53  ;;  %v1243_v11 = vmul.bf16 1069105081, %v1222_v34 }
 0x32b   : > { %v1246_v46 = vmul.bf16 1069105081, %v1223_v7  ;;  %v1249_v43 = vmul.bf16 1069105081, %v1224_v55  ;;  %v1252_v57 = vmul.bf16 1069105081, %v1225_v22  ;;  %v2939_v1 = vcombine.high %v15074_v21, %v15074_v21 }
 0x32c   : > { %13877 = vpow.bf16 %v1237_v49  ;;  %v1255_v58 = vmul.bf16 1069105081, %v1226_v10  ;;  %v1258_v59 = vmul.bf16 1069105081, %v1227_v23  ;;  %v1261_v13 = vmul.bf16 1069105081, %v1228_v8 }
 0x32d   : > { %13879 = vpow.bf16 %v1240_v42  ;;  %v1264_v18 = vmul.bf16 1069105081, %v1229_v50  ;;  %v1267_v26 = vmul.bf16 1069105081, %v1230_v3  ;;  %v1270_v30 = vmul.bf16 1069105081, %v1231_v41 }
 0x32e   : > { %13881 = vpow.bf16 %v1243_v11  ;;  %v1273_v31 = vmul.bf16 1069105081, %v1232_v27  ;;  %v1276_v45 = vmul.bf16 1069105081, %v1233_v20  ;;  %v1279_v40 = vmul.bf16 1069105081, %v1234_v62 }
 0x32f   : > { %13883 = vpow.bf16 %v1246_v46  ;;  %v15157_v2 = vmul.bf16 1069105081, %v1235_v61  ;;  %v2946_v63 = vrot.slane %v15074_v21, %v14970_v29  ;;  %v2953_v39 = vrot.slane %v2939_v1, %v14970_v29  ;;  %v3050_v35 = vld [vmem:[#allocation5 + $0x48] sm:$0x1]  ;;  %v3053_v36 = vld [vmem:[#allocation5 + $0x50] sm:$0x1] }
 0x330   : > { %13885 = vpow.bf16 %v1249_v43  ;;  %v3304_v44 = vcombine.high %v15078_v14, %v15078_v14  ;;  %v15166_v47 = vrot.slane %v15078_v14, %v14970_v29  ;;  %v15172_v0 = vrot.slane %v3843_v38, %v14970_v29  ;;  %v3059_v53 = vld [vmem:[#allocation5 + $0x60] sm:$0x1]  ;;  %v3056_v22 = vld [vmem:[#allocation5 + $0x58] sm:$0x1]  ;;  %v3062_v10 = vld [vmem:[#allocation5 + $0x68] sm:$0x1] }
 0x331   : > { %13887 = vpow.bf16 %v1252_v57  ;;  %v2954_v4 = vcombine.high %v2946_v63, %v2946_v63  ;;  %v2955_v24 = vcombine.high %v2953_v39, %v2953_v39  ;;  %v2962_v21 = vrot.slane %v2946_v63, %v14970_v29  ;;  %v3065_v23 = vld [vmem:[#allocation5 + $0x70] sm:$0x1]  ;;  %v3068_v41 = vld [vmem:[#allocation5 + $0x78] sm:$0x1] }
 0x332   : > { %13889 = vpow.bf16 %v1255_v58  ;;  %v2969_v54 = vrot.slane %v2953_v39, %v14970_v29  ;;  %v3318_v56 = vrot.slane %v3304_v44, %v14970_v29  ;;  %v3319_v14 = vcombine.high %v15166_v47, %v15166_v47 }
 0x333   : > { %13891 = vpow.bf16 %v1258_v59  ;;  %v2976_v15 = vrot.slane %v2954_v4, %v14970_v29  ;;  %v2983_v28 = vrot.slane %v2955_v24, %v14970_v29  ;;  %v2984_v38 = vcombine.high %v2962_v21, %v2962_v21 }
 0x334   : > { %13893 = vpow.bf16 %v1261_v13  ;;  %v2985_v6 = vcombine.high %v2969_v54, %v2969_v54  ;;  %v3012_v5 = vpack.c.bf16 %v2962_v21, %v2962_v21  ;;  %v3016_v51 = vpack.c.bf16 %v2969_v54, %v2969_v54 }
 0x335   : > { %13895 = vpow.bf16 %v1264_v18  ;;  %v2986_v17 = vcombine.high %v2976_v15, %v2976_v15  ;;  %v2987_v52 = vcombine.high %v2983_v28, %v2983_v28  ;;  %v3013_v48 = vpack.c.bf16 %v2976_v15, %v2976_v15 }
 0x336   : > { %13897 = vpow.bf16 %v1267_v26  ;;  %v3014_v34 = vpack.c.bf16 %v2984_v38, %v2984_v38  ;;  %v3017_v7 = vpack.c.bf16 %v2983_v28, %v2983_v28  ;;  %v3018_v55 = vpack.c.bf16 %v2985_v6, %v2985_v6 }
 0x337   : > { %13899 = vpow.bf16 %v1270_v30  ;;  %v3015_v8 = vpack.c.bf16 %v2986_v17, %v2986_v17  ;;  %v3019_v50 = vpack.c.bf16 %v2987_v52, %v2987_v52  ;;  %v3048_v3 = vsel %vm15020_vm13, %v3012_v5, %v3047_v16 }
 0x338   : > { %13901 = vpow.bf16 %v1273_v31  ;;  %3049 = vst [vmem:[#allocation5 + $0x40] sm:$0x1] %v3048_v3  ;;  %v3051_v27 = vsel %vm15020_vm13, %v3013_v48, %v3050_v35  ;;  %v3054_v20 = vsel %vm15020_vm13, %v3014_v34, %v3053_v36  ;;  %v3060_v62 = vsel %vm15020_vm13, %v3016_v51, %v3059_v53 }
 0x339   : > { %13903 = vpow.bf16 %v1276_v45  ;;  %3052 = vst [vmem:[#allocation5 + $0x48] sm:$0x1] %v3051_v27  ;;  %3055 = vst [vmem:[#allocation5 + $0x50] sm:$0x1] %v3054_v20  ;;  %v3057_v61 = vsel %vm15020_vm13, %v3015_v8, %v3056_v22  ;;  %v3063_v49 = vsel %vm15020_vm13, %v3017_v7, %v3062_v10  ;;  %v3066_v42 = vsel %vm15020_vm13, %v3018_v55, %v3065_v23 }
 0x33a   : > { %3061 = vst [vmem:[#allocation5 + $0x60] sm:$0x1] %v3060_v62  ;;  %v13878_v11 = vpop.eup %13877  ;;  %13905 = vpow.bf16 %v1279_v40  ;;  %3058 = vst [vmem:[#allocation5 + $0x58] sm:$0x1] %v3057_v61  ;;  %v3069_v46 = vsel %vm15020_vm13, %v3019_v50, %v3068_v41  ;;  %v3320_v43 = vcombine.high %v3318_v56, %v3318_v56  ;;  %v3327_v57 = vrot.slane %v15166_v47, %v14970_v29 }
 0x33b   : > { %3064 = vst [vmem:[#allocation5 + $0x68] sm:$0x1] %v3063_v49  ;;  %3067 = vst [vmem:[#allocation5 + $0x70] sm:$0x1] %v3066_v42  ;;  %v13880_v1 = vpop.eup %13879  ;;  %13907 = vpow.bf16 %v15157_v2  ;;  %v12334_v58 = vcombine.low %v13878_v11, %v13878_v11  ;;  %v12335_v59 = vcombine.high %v13878_v11, %v13878_v11  ;;  %v15201_v13 = vrot.slane %v3318_v56, %v14970_v29 }
 0x33c   : > { %3070 = vst [vmem:[#allocation5 + $0x78] sm:$0x1] %v3069_v46  ;;  %v13882_v18 = vpop.eup %13881  ;;  %v12336_v26 = vcombine.low %v13880_v1, %v13880_v1  ;;  %v12337_v30 = vcombine.high %v13880_v1, %v13880_v1  ;;  %v3341_v31 = vrot.slane %v3319_v14, %v14970_v29  ;;  %v15205_v45 = vrot.slane %v3320_v43, %v14970_v29 }
 0x33d   : > { %v13884_v40 = vpop.eup %13883  ;;  %v12338_v63 = vcombine.low %v13882_v18, %v13882_v18  ;;  %v12339_v39 = vcombine.high %v13882_v18, %v13882_v18  ;;  %1396 = vst [vmem:[#allocation4] sm:$0xf] %v12334_v58  ;;  %1397 = vst [vmem:[#allocation4 + $0x4] sm:$0xf] %v12335_v59  ;;  %v3349_v2 = vcombine.high %v3327_v57, %v3327_v57 }
 0x33e   : > { %v15209_v44 = vcombine.high %v15201_v13, %v15201_v13  ;;  %v13886_v47 = vpop.eup %13885  ;;  %v12340_v4 = vcombine.low %v13884_v40, %v13884_v40  ;;  %v12341_v24 = vcombine.high %v13884_v40, %v13884_v40  ;;  %1398 = vst [vmem:[#allocation4 + $0x8] sm:$0xf] %v12336_v26  ;;  %1399 = vst [vmem:[#allocation4 + $0xc] sm:$0xf] %v12337_v30 }
 0x33f   : > { %v3351_v21 = vcombine.high %v3341_v31, %v3341_v31  ;;  %v3352_v54 = vcombine.high %v15205_v45, %v15205_v45  ;;  %v13888_v56 = vpop.eup %13887  ;;  %v12342_v14 = vcombine.low %v13886_v47, %v13886_v47  ;;  %v12343_v15 = vcombine.high %v13886_v47, %v13886_v47  ;;  %1400 = vst [vmem:[#allocation4 + $0x10] sm:$0xf] %v12338_v63  ;;  %v3523_v42 = vld [vmem:[#allocation5 + $0x40] sm:$0x1] }
 0x340   : > { %1401 = vst [vmem:[#allocation4 + $0x14] sm:$0xf] %v12339_v39  ;;  %v13054_v28 = vpack.c.bf16 %v3327_v57, %v3327_v57  ;;  %v13055_v38 = vpack.c.bf16 %v3341_v31, %v3341_v31  ;;  %v13890_v6 = vpop.eup %13889  ;;  %v12344_v5 = vcombine.low %v13888_v56, %v13888_v56  ;;  %v12345_v51 = vcombine.high %v13888_v56, %v13888_v56  ;;  %v3526_v11 = vld [vmem:[#allocation5 + $0x48] sm:$0x1]  ;;  %v3529_v59 = vld [vmem:[#allocation5 + $0x50] sm:$0x1] }
 0x341   : > { %1402 = vst [vmem:[#allocation4 + $0x18] sm:$0xf] %v12340_v4  ;;  %1403 = vst [vmem:[#allocation4 + $0x1c] sm:$0xf] %v12341_v24  ;;  %v13056_v16 = vpack.c.bf16 %v3349_v2, %v3349_v2  ;;  %v13057_v17 = vpack.c.bf16 %v3351_v21, %v3351_v21  ;;  %v13892_v52 = vpop.eup %13891  ;;  %v12346_v48 = vcombine.low %v13890_v6, %v13890_v6  ;;  %v3535_v40 = vld [vmem:[#allocation5 + $0x60] sm:$0x1] }
 0x342   : > { %v12347_v35 = vcombine.high %v13890_v6, %v13890_v6  ;;  %1404 = vst [vmem:[#allocation4 + $0x20] sm:$0xf] %v12342_v14  ;;  %1405 = vst [vmem:[#allocation4 + $0x24] sm:$0xf] %v12343_v15  ;;  %v13058_v36 = vpack.c.bf16 %v15201_v13, %v15201_v13  ;;  %v13059_v53 = vpack.c.bf16 %v15205_v45, %v15205_v45  ;;  %v13894_v34 = vpop.eup %13893  ;;  %v3458_v3 = vshll.u32 %v13054_v28, 16 }
 0x343   : > { %v12348_v7 = vcombine.low %v13892_v52, %v13892_v52  ;;  %v12349_v55 = vcombine.high %v13892_v52, %v13892_v52  ;;  %1406 = vst [vmem:[#allocation4 + $0x28] sm:$0xf] %v12344_v5  ;;  %1407 = vst [vmem:[#allocation4 + $0x2c] sm:$0xf] %v12345_v51  ;;  %v13060_v22 = vpack.c.bf16 %v15209_v44, %v15209_v44  ;;  %v13896_v23 = vpop.eup %13895  ;;  %v3461_v41 = vshll.u32 %v13055_v38, 16 }
 0x344   : > { %v13061_v10 = vpack.c.bf16 %v3352_v54, %v3352_v54  ;;  %v12350_v8 = vcombine.low %v13894_v34, %v13894_v34  ;;  %v12351_v50 = vcombine.high %v13894_v34, %v13894_v34  ;;  %1408 = vst [vmem:[#allocation4 + $0x30] sm:$0xf] %v12346_v48  ;;  %1409 = vst [vmem:[#allocation4 + $0x34] sm:$0xf] %v12347_v35  ;;  %v13898_v27 = vpop.eup %13897  ;;  %v3464_v61 = vshll.u32 %v13056_v16, 16 }
 0x345   : > { %v12352_v20 = vcombine.low %v13896_v23, %v13896_v23  ;;  %v12353_v62 = vcombine.high %v13896_v23, %v13896_v23  ;;  %1410 = vst [vmem:[#allocation4 + $0x38] sm:$0xf] %v12348_v7  ;;  %1411 = vst [vmem:[#allocation4 + $0x3c] sm:$0xf] %v12349_v55  ;;  %v3467_v49 = vshll.u32 %v13057_v17, 16  ;;  %v13900_v46 = vpop.eup %13899  ;;  %v12354_v43 = vcombine.low %v13898_v27, %v13898_v27 }
 0x346   : > { %v12355_v57 = vcombine.high %v13898_v27, %v13898_v27  ;;  %1412 = vst [vmem:[#allocation4 + $0x40] sm:$0xf] %v12350_v8  ;;  %1413 = vst [vmem:[#allocation4 + $0x44] sm:$0xf] %v12351_v50  ;;  %v3470_v1 = vshll.u32 %v13058_v36, 16  ;;  %v3473_v58 = vshll.u32 %v13059_v53, 16  ;;  %v13902_v18 = vpop.eup %13901  ;;  %v12356_v26 = vcombine.low %v13900_v46, %v13900_v46 }
 0x347   : > { %v3532_v13 = vld [vmem:[#allocation5 + $0x58] sm:$0x1]  ;;  %v12357_v30 = vcombine.high %v13900_v46, %v13900_v46  ;;  %1414 = vst [vmem:[#allocation4 + $0x48] sm:$0xf] %v12352_v20  ;;  %1415 = vst [vmem:[#allocation4 + $0x4c] sm:$0xf] %v12353_v62  ;;  %v13904_v39 = vpop.eup %13903  ;;  %v12358_v2 = vcombine.low %v13902_v18, %v13902_v18  ;;  %v12359_v44 = vcombine.high %v13902_v18, %v13902_v18 }
 0x348   : > { %v3476_v31 = vshll.u32 %v13060_v22, 16  ;;  %v3479_v45 = vshll.u32 %v13061_v10, 16  ;;  %v3538_v63 = vld [vmem:[#allocation5 + $0x68] sm:$0x1]  ;;  %1416 = vst [vmem:[#allocation4 + $0x50] sm:$0xf] %v12354_v43  ;;  %v3524_v47 = vsel %vm15054_vm14, %v3458_v3, %v3523_v42  ;;  %v3527_v4 = vsel %vm15054_vm14, %v3461_v41, %v3526_v11  ;;  %v13906_v54 = vpop.eup %13905 }
 0x349   : > { %1417 = vst [vmem:[#allocation4 + $0x54] sm:$0xf] %v12355_v57  ;;  %v3541_v24 = vld [vmem:[#allocation5 + $0x70] sm:$0x1]  ;;  %v3544_v21 = vld [vmem:[#allocation5 + $0x78] sm:$0x1]  ;;  %v12360_v56 = vcombine.low %v13904_v39, %v13904_v39  ;;  %v12361_v14 = vcombine.high %v13904_v39, %v13904_v39  ;;  %v3530_v15 = vsel %vm15054_vm14, %v3464_v61, %v3529_v59  ;;  %v3533_v28 = vsel %vm15054_vm14, %v3467_v49, %v3532_v13  ;;  %v13908_v38 = vpop.eup %13907 }
 0x34a   : > { %1418 = vst [vmem:[#allocation4 + $0x58] sm:$0xf] %v12356_v26  ;;  %1419 = vst [vmem:[#allocation4 + $0x5c] sm:$0xf] %v12357_v30  ;;  %v12362_v6 = vcombine.low %v13906_v54, %v13906_v54  ;;  %v12363_v5 = vcombine.high %v13906_v54, %v13906_v54  ;;  %v3536_v51 = vsel %vm15054_vm14, %v3470_v1, %v3535_v40  ;;  %v4056_v42 = vld [vmem:[#allocation5] sm:$0x2] }
 0x34b   : > { %3525 = vst [vmem:[#allocation5 + $0x40] sm:$0x1] %v3524_v47  ;;  %3528 = vst [vmem:[#allocation5 + $0x48] sm:$0x1] %v3527_v4  ;;  %v3539_v16 = vsel %vm15054_vm14, %v3473_v58, %v3538_v63  ;;  %v12364_v17 = vcombine.low %v13908_v38, %v13908_v38  ;;  %v12365_v52 = vcombine.high %v13908_v38, %v13908_v38  ;;  %v4068_v11 = vld [vmem:[#allocation5 + $0x20] sm:$0x2] }
 0x34c   : > { %1420 = vst [vmem:[#allocation4 + $0x60] sm:$0xf] %v12358_v2  ;;  %1421 = vst [vmem:[#allocation4 + $0x64] sm:$0xf] %v12359_v44  ;;  %v3542_v48 = vsel %vm15054_vm14, %v3476_v31, %v3541_v24  ;;  %v3545_v35 = vsel %vm15054_vm14, %v3479_v45, %v3544_v21  ;;  %v3858_v36 = vcombine.high %v15082_v25, %v15082_v25  ;;  %v4059_v58 = vld [vmem:[#allocation5 + $0x8] sm:$0x2] }
 0x34d   : > { %3531 = vst [vmem:[#allocation5 + $0x50] sm:$0x1] %v3530_v15  ;;  %3534 = vst [vmem:[#allocation5 + $0x58] sm:$0x1] %v3533_v28  ;;  %v3859_v53 = vcombine.high %v15172_v0, %v15172_v0  ;;  %v3866_v34 = vrot.slane %v15082_v25, %v14970_v29  ;;  %v3873_v7 = vrot.slane %v15172_v0, %v14970_v29  ;;  %v4062_v59 = vld [vmem:[#allocation5 + $0x10] sm:$0x2] }
 0x34e   : > { %1422 = vst [vmem:[#allocation4 + $0x68] sm:$0xf] %v12360_v56  ;;  %1423 = vst [vmem:[#allocation4 + $0x6c] sm:$0xf] %v12361_v14  ;;  %v4988_v55 = vcombine.high %v14987_v9, %v14987_v9  ;;  %v4995_v22 = vrot.slane %v14987_v9, %v14970_v29  ;;  %v4368_v10 = vcombine.high %v14990_v37, %v14990_v37  ;;  %v4071_v31 = vld [vmem:[#allocation5 + $0x28] sm:$0x2] }
 0x34f   : > { %3537 = vst [vmem:[#allocation5 + $0x60] sm:$0x1] %v3536_v51  ;;  %3540 = vst [vmem:[#allocation5 + $0x68] sm:$0x1] %v3539_v16  ;;  %v15251_v23 = vrot.slane %v14990_v37, %v14970_v29  ;;  %v3880_v25 = vrot.slane %v3858_v36, %v14970_v29  ;;  %v3887_v0 = vrot.slane %v3859_v53, %v14970_v29  ;;  %v4074_v45 = vld [vmem:[#allocation5 + $0x30] sm:$0x2] }
 0x350   : > { %1424 = vst [vmem:[#allocation4 + $0x70] sm:$0xf] %v12362_v6  ;;  %1425 = vst [vmem:[#allocation4 + $0x74] sm:$0xf] %v12363_v5  ;;  %v3888_v8 = vcombine.high %v3866_v34, %v3866_v34  ;;  %v3889_v50 = vcombine.high %v3873_v7, %v3873_v7  ;;  %v13078_v3 = vpack.c.bf16 %v3866_v34, %v3866_v34  ;;  %v4065_v2 = vld [vmem:[#allocation5 + $0x18] sm:$0x2] }
 0x351   : > { %3543 = vst [vmem:[#allocation5 + $0x70] sm:$0x1] %v3542_v48  ;;  %3546 = vst [vmem:[#allocation5 + $0x78] sm:$0x1] %v3545_v35  ;;  %v13082_v41 = vpack.c.bf16 %v3873_v7, %v3873_v7  ;;  %v5002_v27 = vrot.slane %v4988_v55, %v14970_v29  ;;  %v5003_v9 = vcombine.high %v4995_v22, %v4995_v22  ;;  %v4077_v47 = vld [vmem:[#allocation5 + $0x38] sm:$0x2] }
 0x352   : > { %1426 = vst [vmem:[#allocation4 + $0x78] sm:$0xf] %v12364_v17  ;;  %1427 = vst [vmem:[#allocation4 + $0x7c] sm:$0xf] %v12365_v52  ;;  %v3890_v20 = vcombine.high %v3880_v25, %v3880_v25  ;;  %v3891_v62 = vcombine.high %v3887_v0, %v3887_v0  ;;  %v13079_v61 = vpack.c.bf16 %v3880_v25, %v3880_v25  ;;  %v4021_v57 = vrot.slane %v13078_v3, 7 }
 0x353   : > { %v13080_v49 = vpack.c.bf16 %v3888_v8, %v3888_v8  ;;  %v13083_v46 = vpack.c.bf16 %v3887_v0, %v3887_v0  ;;  %v13084_v43 = vpack.c.bf16 %v3889_v50, %v3889_v50  ;;  %v4025_v1 = vrot.slane %v13082_v41, 7  ;;  %v5201_v55 = vld [vmem:[#allocation5] sm:$0x4]  ;;  %v5204_v50 = vld [vmem:[#allocation5 + $0x8] sm:$0x4] }
 0x354   : > { %v13081_v13 = vpack.c.bf16 %v3890_v20, %v3890_v20  ;;  %v13085_v18 = vpack.c.bf16 %v3891_v62, %v3891_v62  ;;  %v4022_v26 = vrot.slane %v13079_v61, 7  ;;  %v4057_v39 = vsel %vm15258_vm11, %v4021_v57, %v4056_v42  ;;  %v5213_v3 = vld [vmem:[#allocation5 + $0x20] sm:$0x4]  ;;  %v5207_v20 = vld [vmem:[#allocation5 + $0x10] sm:$0x4] }
 0x355   : > { %v4023_v30 = vrot.slane %v13080_v49, 7  ;;  %v4026_v40 = vrot.slane %v13083_v46, 7  ;;  %v4027_v63 = vrot.slane %v13084_v43, 7  ;;  %v4069_v44 = vsel %vm15258_vm11, %v4025_v1, %v4068_v11  ;;  %4058 = vst [vmem:[#allocation5] sm:$0x2] %v4057_v39 }
 0x356   : > { %v4024_v4 = vrot.slane %v13081_v13, 7  ;;  %v4028_v24 = vrot.slane %v13085_v18, 7  ;;  %v4060_v21 = vsel %vm15258_vm11, %v4022_v26, %v4059_v58  ;;  %4070 = vst [vmem:[#allocation5 + $0x20] sm:$0x2] %v4069_v44  ;;  %v5004_v15 = vcombine.high %v5002_v27, %v5002_v27  ;;  %v5216_v62 = vld [vmem:[#allocation5 + $0x28] sm:$0x4] }
 0x357   : > { %v4063_v54 = vsel %vm15258_vm11, %v4023_v30, %v4062_v59  ;;  %4061 = vst [vmem:[#allocation5 + $0x8] sm:$0x2] %v4060_v21  ;;  %v4072_v56 = vsel %vm15258_vm11, %v4026_v40, %v4071_v31  ;;  %v4075_v14 = vsel %vm15258_vm11, %v4027_v63, %v4074_v45  ;;  %v5011_v28 = vrot.slane %v4995_v22, %v14970_v29  ;;  %v5210_v46 = vld [vmem:[#allocation5 + $0x18] sm:$0x4]  ;;  %v5219_v43 = vld [vmem:[#allocation5 + $0x30] sm:$0x4] }
 0x358   : > { %4064 = vst [vmem:[#allocation5 + $0x10] sm:$0x2] %v4063_v54  ;;  %v4066_v38 = vsel %vm15258_vm11, %v4024_v4, %v4065_v2  ;;  %4073 = vst [vmem:[#allocation5 + $0x28] sm:$0x2] %v4072_v56  ;;  %v4078_v6 = vsel %vm15258_vm11, %v4028_v24, %v4077_v47  ;;  %v5018_v5 = vrot.slane %v5002_v27, %v14970_v29  ;;  %v5222_v13 = vld [vmem:[#allocation5 + $0x38] sm:$0x4] }
 0x359   : > { %4076 = vst [vmem:[#allocation5 + $0x30] sm:$0x2] %v4075_v14  ;;  %v5025_v51 = vrot.slane %v5003_v9, %v14970_v29  ;;  %4067 = vst [vmem:[#allocation5 + $0x18] sm:$0x2] %v4066_v38  ;;  %v5032_v16 = vrot.slane %v5004_v15, %v14970_v29  ;;  %v5033_v17 = vcombine.high %v5011_v28, %v5011_v28 }
 0x35a   : > { %4079 = vst [vmem:[#allocation5 + $0x38] sm:$0x2] %v4078_v6  ;;  %v13142_v52 = vpack.c.bf16 %v5011_v28, %v5011_v28  ;;  %v4382_v48 = vrot.slane %v4368_v10, %v14970_v29  ;;  %v5034_v35 = vcombine.high %v5018_v5, %v5018_v5  ;;  %v13146_v34 = vpack.c.bf16 %v5018_v5, %v5018_v5 }
 0x35b   : > { %v5035_v36 = vcombine.high %v5025_v51, %v5025_v51  ;;  %v13143_v53 = vpack.c.bf16 %v5025_v51, %v5025_v51  ;;  %v5036_v22 = vcombine.high %v5032_v16, %v5032_v16  ;;  %v13144_v25 = vpack.c.bf16 %v5033_v17, %v5033_v17 }
 0x35c   : > { %v13147_v0 = vpack.c.bf16 %v5032_v16, %v5032_v16  ;;  %v5166_v8 = vrot.slane %v13142_v52, 6  ;;  %v13148_v10 = vpack.c.bf16 %v5034_v35, %v5034_v35  ;;  %v5170_v9 = vrot.slane %v13146_v34, 6  ;;  %v4628_v16 = vld [vmem:[#allocation5] sm:$0x2] }
 0x35d   : > { %v13145_v41 = vpack.c.bf16 %v5035_v36, %v5035_v36  ;;  %v5167_v27 = vrot.slane %v13143_v53, 6  ;;  %v13149_v61 = vpack.c.bf16 %v5036_v22, %v5036_v22  ;;  %v5168_v49 = vrot.slane %v13144_v25, 6  ;;  %v4640_v17 = vld [vmem:[#allocation5 + $0x20] sm:$0x2] }
 0x35e   : > { %v5171_v42 = vrot.slane %v13147_v0, 6  ;;  %v5202_v11 = vsel %vm15285_vm12, %v5166_v8, %v5201_v55  ;;  %v5172_v1 = vrot.slane %v13148_v10, 6  ;;  %v5214_v59 = vsel %vm15285_vm12, %v5170_v9, %v5213_v3 }
 0x35f   : > { %v5169_v57 = vrot.slane %v13145_v41, 6  ;;  %5203 = vst [vmem:[#allocation5] sm:$0x4] %v5202_v11  ;;  %v5205_v58 = vsel %vm15285_vm12, %v5167_v27, %v5204_v50  ;;  %v5173_v18 = vrot.slane %v13149_v61, 6  ;;  %v5208_v26 = vsel %vm15285_vm12, %v5168_v49, %v5207_v20  ;;  %5215 = vst [vmem:[#allocation5 + $0x20] sm:$0x4] %v5214_v59 }
 0x360   : > { %5206 = vst [vmem:[#allocation5 + $0x8] sm:$0x4] %v5205_v58  ;;  %v5217_v30 = vsel %vm15285_vm12, %v5171_v42, %v5216_v62  ;;  %v4383_v31 = vcombine.high %v15251_v23, %v15251_v23  ;;  %5209 = vst [vmem:[#allocation5 + $0x10] sm:$0x4] %v5208_v26  ;;  %v5220_v40 = vsel %vm15285_vm12, %v5172_v1, %v5219_v43  ;;  %v4634_v34 = vld [vmem:[#allocation5 + $0x10] sm:$0x2] }
 0x361   : > { %v5211_v45 = vsel %vm15285_vm12, %v5169_v57, %v5210_v46  ;;  %5218 = vst [vmem:[#allocation5 + $0x28] sm:$0x4] %v5217_v30  ;;  %v4384_v63 = vcombine.high %v4382_v48, %v4382_v48  ;;  %v4391_v39 = vrot.slane %v15251_v23, %v14970_v29  ;;  %5221 = vst [vmem:[#allocation5 + $0x30] sm:$0x4] %v5220_v40  ;;  %v4643_v8 = vld [vmem:[#allocation5 + $0x28] sm:$0x2] }
 0x362   : > { %5212 = vst [vmem:[#allocation5 + $0x18] sm:$0x4] %v5211_v45  ;;  %v5223_v2 = vsel %vm15285_vm12, %v5173_v18, %v5222_v13  ;;  %v4398_v44 = vrot.slane %v4382_v48, %v14970_v29  ;;  %v4405_v47 = vrot.slane %v4383_v31, %v14970_v29  ;;  %v5513_v4 = vcombine.high %v14993_v12, %v14993_v12  ;;  %v4646_v27 = vld [vmem:[#allocation5 + $0x30] sm:$0x2]  ;;  %v4637_v49 = vld [vmem:[#allocation5 + $0x18] sm:$0x2]  ;;  %v2278_v45 = vpop.f32.mrf.mxu0 }
 0x363   : > { %5224 = vst [vmem:[#allocation5 + $0x38] sm:$0x4] %v5223_v2  ;;  %v4412_v24 = vrot.slane %v4384_v63, %v14970_v29  ;;  %v4413_v21 = vcombine.high %v4391_v39, %v4391_v39  ;;  %v13110_v54 = vpack.c.bf16 %v4391_v39, %v4391_v39  ;;  %v5520_v23 = vrot.slane %v14993_v12, %v14970_v29  ;;  %v4631_v12 = vld [vmem:[#allocation5 + $0x8] sm:$0x2]  ;;  %v4649_v57 = vld [vmem:[#allocation5 + $0x38] sm:$0x2] }
 0x364   : > { %v4414_v56 = vcombine.high %v4398_v44, %v4398_v44  ;;  %v4415_v14 = vcombine.high %v4405_v47, %v4405_v47  ;;  %v13111_v15 = vpack.c.bf16 %v4405_v47, %v4405_v47  ;;  %v13114_v28 = vpack.c.bf16 %v4398_v44, %v4398_v44  ;;  %v2321_v44 = vpop.f32.mrf.mxu1 }
 0x365   : > { %v4416_v38 = vcombine.high %v4412_v24, %v4412_v24  ;;  %v13112_v6 = vpack.c.bf16 %v4413_v21, %v4413_v21  ;;  %v13115_v5 = vpack.c.bf16 %v4412_v24, %v4412_v24  ;;  %v4547_v51 = vshll.u32 %v13110_v54, 16 }
 0x366   : > { %v13113_v52 = vpack.c.bf16 %v4415_v14, %v4415_v14  ;;  %v13116_v48 = vpack.c.bf16 %v4414_v56, %v4414_v56  ;;  %v4551_v35 = vshll.u32 %v13111_v15, 16  ;;  %v4563_v36 = vshll.u32 %v13114_v28, 16 }
 0x367   : > { %v13117_v55 = vpack.c.bf16 %v4416_v38, %v4416_v38  ;;  %v4549_v22 = vrot.slane %v4547_v51, 7  ;;  %v4555_v25 = vshll.u32 %v13112_v6, 16  ;;  %v4567_v0 = vshll.u32 %v13115_v5, 16  ;;  %v5773_v5 = vld [vmem:[#allocation5] sm:$0x4] }
 0x368   : > { %v4553_v50 = vrot.slane %v4551_v35, 7  ;;  %v4559_v3 = vshll.u32 %v13113_v52, 16  ;;  %v4565_v41 = vrot.slane %v4563_v36, 7  ;;  %v4571_v10 = vshll.u32 %v13116_v48, 16  ;;  %v5776_v35 = vld [vmem:[#allocation5 + $0x8] sm:$0x4] }
 0x369   : > { %v4557_v9 = vrot.slane %v4555_v25, 7  ;;  %v4569_v20 = vrot.slane %v4567_v0, 7  ;;  %v4575_v62 = vshll.u32 %v13117_v55, 16  ;;  %v4629_v61 = vsel %vm15318_vm10, %v4549_v22, %v4628_v16  ;;  %v5779_v36 = vld [vmem:[#allocation5 + $0x10] sm:$0x4] }
 0x36a   : > { %v4561_v42 = vrot.slane %v4559_v3, 7  ;;  %v4573_v11 = vrot.slane %v4571_v10, 7  ;;  %4630 = vst [vmem:[#allocation5] sm:$0x2] %v4629_v61  ;;  %v4632_v46 = vsel %vm15318_vm10, %v4553_v50, %v4631_v12  ;;  %v4641_v43 = vsel %vm15318_vm10, %v4565_v41, %v4640_v17  ;;  %v5785_v25 = vld [vmem:[#allocation5 + $0x20] sm:$0x4] }
 0x36b   : > { %v4577_v1 = vrot.slane %v4575_v62, 7  ;;  %4633 = vst [vmem:[#allocation5 + $0x8] sm:$0x2] %v4632_v46  ;;  %v4635_v58 = vsel %vm15318_vm10, %v4557_v9, %v4634_v34  ;;  %4642 = vst [vmem:[#allocation5 + $0x20] sm:$0x2] %v4641_v43  ;;  %v4644_v59 = vsel %vm15318_vm10, %v4569_v20, %v4643_v8  ;;  %v5527_v13 = vrot.slane %v5513_v4, %v14970_v29 }
 0x36c   : > { %4636 = vst [vmem:[#allocation5 + $0x10] sm:$0x2] %v4635_v58  ;;  %v4638_v18 = vsel %vm15318_vm10, %v4561_v42, %v4637_v49  ;;  %4645 = vst [vmem:[#allocation5 + $0x28] sm:$0x2] %v4644_v59  ;;  %v4647_v26 = vsel %vm15318_vm10, %v4573_v11, %v4646_v27  ;;  %v5528_v30 = vcombine.high %v5520_v23, %v5520_v23  ;;  %v5788_v41 = vld [vmem:[#allocation5 + $0x28] sm:$0x4] }
 0x36d   : > { %v5536_v31 = vrot.slane %v5520_v23, %v14970_v29  ;;  %4639 = vst [vmem:[#allocation5 + $0x18] sm:$0x2] %v4638_v18  ;;  %4648 = vst [vmem:[#allocation5 + $0x30] sm:$0x2] %v4647_v26  ;;  %v4650_v40 = vsel %vm15318_vm10, %v4577_v1, %v4649_v57  ;;  %v5529_v63 = vcombine.high %v5527_v13, %v5527_v13  ;;  %v5791_v62 = vld [vmem:[#allocation5 + $0x30] sm:$0x4] }
 0x36e   : > { %v5543_v39 = vrot.slane %v5527_v13, %v14970_v29  ;;  %v3840_v2 = vmul.f32 %v2278_v45, %v14998_v32  ;;  %4651 = vst [vmem:[#allocation5 + $0x38] sm:$0x2] %v4650_v40  ;;  %v5550_v47 = vrot.slane %v5528_v30, %v14970_v29  ;;  %v15344_v21 = vmul.f32 %v2321_v44, %v14998_v32  ;;  %v5782_v11 = vld [vmem:[#allocation5 + $0x18] sm:$0x4] }
 0x36f   : > { %v5558_v4 = vcombine.high %v5536_v31, %v5536_v31  ;;  %v13174_v24 = vpack.c.bf16 %v5536_v31, %v5536_v31  ;;  %v5557_v54 = vrot.slane %v5529_v63, %v14970_v29  ;;  %v5794_v58 = vld [vmem:[#allocation5 + $0x38] sm:$0x4] }
 0x370   : > { %v5559_v23 = vcombine.high %v5543_v39, %v5543_v39  ;;  %v13178_v56 = vpack.c.bf16 %v5543_v39, %v5543_v39  ;;  %v3892_v14 = vcombine.high %v3840_v2, %v3840_v2  ;;  %v5560_v15 = vcombine.high %v5550_v47, %v5550_v47 }
 0x371   : > { %v13175_v28 = vpack.c.bf16 %v5550_v47, %v5550_v47  ;;  %v13176_v38 = vpack.c.bf16 %v5558_v4, %v5558_v4  ;;  %v5692_v6 = vshll.u32 %v13174_v24, 16  ;;  %v5561_v51 = vcombine.high %v5557_v54, %v5557_v54 }
 0x372   : > { %v13179_v16 = vpack.c.bf16 %v5557_v54, %v5557_v54  ;;  %v13180_v17 = vpack.c.bf16 %v5559_v23, %v5559_v23  ;;  %v5708_v52 = vshll.u32 %v13178_v56, 16  ;;  %v13177_v12 = vpack.c.bf16 %v5560_v15, %v5560_v15 }
 0x373   : > { %v5694_v34 = vrot.slane %v5692_v6, 6  ;;  %v5696_v55 = vshll.u32 %v13175_v28, 16  ;;  %v5700_v22 = vshll.u32 %v13176_v38, 16  ;;  %v13181_v0 = vpack.c.bf16 %v5561_v51, %v5561_v51  ;;  %v4080_v28 = vld [vmem:[#allocation5 + $0x40] sm:$0x2] }
 0x374   : > { %v5710_v8 = vrot.slane %v5708_v52, 6  ;;  %v5712_v50 = vshll.u32 %v13179_v16, 16  ;;  %v5716_v3 = vshll.u32 %v13180_v17, 16  ;;  %v5704_v9 = vshll.u32 %v13177_v12, 16  ;;  %v4092_v17 = vld [vmem:[#allocation5 + $0x60] sm:$0x2] }
 0x375   : > { %v5698_v10 = vrot.slane %v5696_v55, 6  ;;  %v5702_v27 = vrot.slane %v5700_v22, 6  ;;  %v5774_v20 = vsel %vm15349_vm15, %v5694_v34, %v5773_v5  ;;  %v5720_v42 = vshll.u32 %v13181_v0, 16  ;;  %v4083_v12 = vld [vmem:[#allocation5 + $0x48] sm:$0x2] }
 0x376   : > { %v5714_v61 = vrot.slane %v5712_v50, 6  ;;  %v5718_v49 = vrot.slane %v5716_v3, 6  ;;  %5775 = vst [vmem:[#allocation5] sm:$0x4] %v5774_v20  ;;  %v5786_v46 = vsel %vm15349_vm15, %v5710_v8, %v5785_v25  ;;  %v5706_v43 = vrot.slane %v5704_v9, 6 }
 0x377   : > { %v5777_v57 = vsel %vm15349_vm15, %v5698_v10, %v5776_v35  ;;  %v5780_v1 = vsel %vm15349_vm15, %v5702_v27, %v5779_v36  ;;  %5787 = vst [vmem:[#allocation5 + $0x20] sm:$0x4] %v5786_v46  ;;  %v3899_v59 = vrot.slane %v3840_v2, %v14970_v29  ;;  %v5722_v13 = vrot.slane %v5720_v42, 6  ;;  %v4086_v34 = vld [vmem:[#allocation5 + $0x50] sm:$0x2] }
 0x378   : > { %5778 = vst [vmem:[#allocation5 + $0x8] sm:$0x4] %v5777_v57  ;;  %5781 = vst [vmem:[#allocation5 + $0x10] sm:$0x4] %v5780_v1  ;;  %v5789_v18 = vsel %vm15349_vm15, %v5714_v61, %v5788_v41  ;;  %v5792_v26 = vsel %vm15349_vm15, %v5718_v49, %v5791_v62  ;;  %v3906_v30 = vrot.slane %v3892_v14, %v14970_v29  ;;  %v4095_v8 = vld [vmem:[#allocation5 + $0x68] sm:$0x2] }
 0x379   : > { %v5783_v31 = vsel %vm15349_vm15, %v5706_v43, %v5782_v11  ;;  %5790 = vst [vmem:[#allocation5 + $0x28] sm:$0x4] %v5789_v18  ;;  %5793 = vst [vmem:[#allocation5 + $0x30] sm:$0x4] %v5792_v26  ;;  %v3907_v45 = vcombine.high %v3899_v59, %v3899_v59  ;;  %v3915_v40 = vrot.slane %v3899_v59, %v14970_v29  ;;  %v4098_v50 = vld [vmem:[#allocation5 + $0x70] sm:$0x2]  ;;  %v2280_v18 = vpop.f32.mrf.mxu0 }
 0x37a   : > { %v5037_v63 = vcombine.high %v15344_v21, %v15344_v21  ;;  %5784 = vst [vmem:[#allocation5 + $0x18] sm:$0x4] %v5783_v31  ;;  %v5795_v39 = vsel %vm15349_vm15, %v5722_v13, %v5794_v58  ;;  %v3908_v2 = vcombine.high %v3906_v30, %v3906_v30  ;;  %v3922_v44 = vrot.slane %v3906_v30, %v14970_v29  ;;  %v4089_v27 = vld [vmem:[#allocation5 + $0x58] sm:$0x2] }
 0x37b   : > { %v5044_v47 = vrot.slane %v15344_v21, %v14970_v29  ;;  %5796 = vst [vmem:[#allocation5 + $0x38] sm:$0x4] %v5795_v39  ;;  %v3929_v4 = vrot.slane %v3907_v45, %v14970_v29  ;;  %v3937_v24 = vcombine.high %v3915_v40, %v3915_v40  ;;  %v13086_v54 = vpack.c.bf16 %v3915_v40, %v3915_v40  ;;  %v4101_v49 = vld [vmem:[#allocation5 + $0x78] sm:$0x2] }
 0x37c   : > { %v5051_v23 = vrot.slane %v5037_v63, %v14970_v29  ;;  %v3936_v56 = vrot.slane %v3908_v2, %v14970_v29  ;;  %v3938_v14 = vcombine.high %v3922_v44, %v3922_v44  ;;  %v13090_v15 = vpack.c.bf16 %v3922_v44, %v3922_v44  ;;  %v5225_v44 = vld [vmem:[#allocation5 + $0x40] sm:$0x4] }
 0x37d   : > { %v5052_v38 = vcombine.high %v5044_v47, %v5044_v47  ;;  %v3939_v6 = vcombine.high %v3929_v4, %v3929_v4  ;;  %v13087_v5 = vpack.c.bf16 %v3929_v4, %v3929_v4  ;;  %v13088_v51 = vpack.c.bf16 %v3937_v24, %v3937_v24  ;;  %v5231_v4 = vld [vmem:[#allocation5 + $0x50] sm:$0x4] }
 0x37e   : > { %v4029_v16 = vrot.slane %v13086_v54, 7  ;;  %v3940_v52 = vcombine.high %v3936_v56, %v3936_v56  ;;  %v13091_v21 = vpack.c.bf16 %v3936_v56, %v3936_v56  ;;  %v13092_v35 = vpack.c.bf16 %v3938_v14, %v3938_v14  ;;  %v5234_v14 = vld [vmem:[#allocation5 + $0x58] sm:$0x4] }
 0x37f   : > { %v4033_v36 = vrot.slane %v13090_v15, 7  ;;  %v13089_v55 = vpack.c.bf16 %v3939_v6, %v3939_v6  ;;  %v4030_v22 = vrot.slane %v13087_v5, 7  ;;  %v4031_v25 = vrot.slane %v13088_v51, 7  ;;  %v5237_v15 = vld [vmem:[#allocation5 + $0x60] sm:$0x4] }
 0x380   : > { %v4081_v0 = vsel %vm15258_vm11, %v4029_v16, %v4080_v28  ;;  %v13093_v3 = vpack.c.bf16 %v3940_v52, %v3940_v52  ;;  %v4034_v41 = vrot.slane %v13091_v21, 7  ;;  %v4035_v10 = vrot.slane %v13092_v35, 7  ;;  %v5240_v51 = vld [vmem:[#allocation5 + $0x68] sm:$0x4]  ;;  %v5243_v16 = vld [vmem:[#allocation5 + $0x70] sm:$0x4] }
 0x381   : > { %4082 = vst [vmem:[#allocation5 + $0x40] sm:$0x2] %v4081_v0  ;;  %v4093_v9 = vsel %vm15258_vm11, %v4033_v36, %v4092_v17  ;;  %v4032_v20 = vrot.slane %v13089_v55, 7  ;;  %v4084_v62 = vsel %vm15258_vm11, %v4030_v22, %v4083_v12  ;;  %v4087_v61 = vsel %vm15258_vm11, %v4031_v25, %v4086_v34  ;;  %v5246_v36 = vld [vmem:[#allocation5 + $0x78] sm:$0x4]  ;;  %v2323_v12 = vpop.f32.mrf.mxu1  ;;  %v2360_v0 = vpop.f32.mrf.mxu0 }
 0x382   : > { %4094 = vst [vmem:[#allocation5 + $0x60] sm:$0x2] %v4093_v9  ;;  %v5053_v42 = vcombine.high %v5051_v23, %v5051_v23  ;;  %v4036_v11 = vrot.slane %v13093_v3, 7  ;;  %4085 = vst [vmem:[#allocation5 + $0x48] sm:$0x2] %v4084_v62  ;;  %v4096_v46 = vsel %vm15258_vm11, %v4034_v41, %v4095_v8  ;;  %v4099_v43 = vsel %vm15258_vm11, %v4035_v10, %v4098_v50 }
 0x383   : > { %4088 = vst [vmem:[#allocation5 + $0x50] sm:$0x2] %v4087_v61  ;;  %v5060_v57 = vrot.slane %v5044_v47, %v14970_v29  ;;  %v4090_v1 = vsel %vm15258_vm11, %v4032_v20, %v4089_v27  ;;  %4097 = vst [vmem:[#allocation5 + $0x68] sm:$0x2] %v4096_v46  ;;  %v5067_v58 = vrot.slane %v5051_v23, %v14970_v29  ;;  %v5228_v47 = vld [vmem:[#allocation5 + $0x48] sm:$0x4]  ;;  %v2403_v10 = vpop.f32.mrf.mxu1 }
 0x384   : > { %4100 = vst [vmem:[#allocation5 + $0x70] sm:$0x2] %v4099_v43  ;;  %v5074_v59 = vrot.slane %v5052_v38, %v14970_v29  ;;  %v5081_v13 = vrot.slane %v5053_v42, %v14970_v29  ;;  %4091 = vst [vmem:[#allocation5 + $0x58] sm:$0x2] %v4090_v1  ;;  %v4102_v26 = vsel %vm15258_vm11, %v4036_v11, %v4101_v49 }
 0x385   : > { %v5082_v30 = vcombine.high %v5060_v57, %v5060_v57  ;;  %v13150_v31 = vpack.c.bf16 %v5060_v57, %v5060_v57  ;;  %v4365_v45 = vmul.f32 %v2280_v18, %v14998_v32  ;;  %4103 = vst [vmem:[#allocation5 + $0x78] sm:$0x2] %v4102_v26  ;;  %v5083_v40 = vcombine.high %v5067_v58, %v5067_v58 }
 0x386   : > { %v5084_v63 = vcombine.high %v5074_v59, %v5074_v59  ;;  %v5085_v39 = vcombine.high %v5081_v13, %v5081_v13  ;;  %v13151_v2 = vpack.c.bf16 %v5074_v59, %v5074_v59  ;;  %v13154_v54 = vpack.c.bf16 %v5067_v58, %v5067_v58 }
 0x387   : > { %v13152_v24 = vpack.c.bf16 %v5082_v30, %v5082_v30  ;;  %v13155_v23 = vpack.c.bf16 %v5081_v13, %v5081_v13  ;;  %v5174_v56 = vrot.slane %v13150_v31, 6  ;;  %v13156_v38 = vpack.c.bf16 %v5083_v40, %v5083_v40 }
 0x388   : > { %v13153_v28 = vpack.c.bf16 %v5084_v63, %v5084_v63  ;;  %v13157_v6 = vpack.c.bf16 %v5085_v39, %v5085_v39  ;;  %v5175_v5 = vrot.slane %v13151_v2, 6  ;;  %v5178_v52 = vrot.slane %v13154_v54, 6 }
 0x389   : > { %v5176_v17 = vrot.slane %v13152_v24, 6  ;;  %v5179_v21 = vrot.slane %v13155_v23, 6  ;;  %v5226_v35 = vsel %vm15285_vm12, %v5174_v56, %v5225_v44  ;;  %v5180_v55 = vrot.slane %v13156_v38, 6 }
 0x38a   : > { %v5177_v34 = vrot.slane %v13153_v28, 6  ;;  %v5181_v22 = vrot.slane %v13157_v6, 6  ;;  %5227 = vst [vmem:[#allocation5 + $0x40] sm:$0x4] %v5226_v35  ;;  %v5229_v25 = vsel %vm15285_vm12, %v5175_v5, %v5228_v47  ;;  %v5238_v50 = vsel %vm15285_vm12, %v5178_v52, %v5237_v15  ;;  %v4664_v15 = vld [vmem:[#allocation5 + $0x60] sm:$0x2] }
 0x38b   : > { %5230 = vst [vmem:[#allocation5 + $0x48] sm:$0x4] %v5229_v25  ;;  %v5232_v8 = vsel %vm15285_vm12, %v5176_v17, %v5231_v4  ;;  %v5241_v3 = vsel %vm15285_vm12, %v5179_v21, %v5240_v51  ;;  %v4417_v41 = vcombine.high %v4365_v45, %v4365_v45  ;;  %5239 = vst [vmem:[#allocation5 + $0x60] sm:$0x4] %v5238_v50  ;;  %v4652_v4 = vld [vmem:[#allocation5 + $0x40] sm:$0x2] }
 0x38c   : > { %5233 = vst [vmem:[#allocation5 + $0x50] sm:$0x4] %v5232_v8  ;;  %v5235_v27 = vsel %vm15285_vm12, %v5177_v34, %v5234_v14  ;;  %5242 = vst [vmem:[#allocation5 + $0x68] sm:$0x4] %v5241_v3  ;;  %v5244_v9 = vsel %vm15285_vm12, %v5180_v55, %v5243_v16  ;;  %v5247_v20 = vsel %vm15285_vm12, %v5181_v22, %v5246_v36  ;;  %v4655_v14 = vld [vmem:[#allocation5 + $0x48] sm:$0x2] }
 0x38d   : > { %v4424_v62 = vrot.slane %v4365_v45, %v14970_v29  ;;  %5236 = vst [vmem:[#allocation5 + $0x58] sm:$0x4] %v5235_v27  ;;  %5245 = vst [vmem:[#allocation5 + $0x70] sm:$0x4] %v5244_v9  ;;  %v4431_v61 = vrot.slane %v4417_v41, %v14970_v29  ;;  %v5510_v49 = vmul.f32 %v2323_v12, %v14998_v32  ;;  %v4658_v51 = vld [vmem:[#allocation5 + $0x50] sm:$0x2] }
 0x38e   : > { %5248 = vst [vmem:[#allocation5 + $0x78] sm:$0x4] %v5247_v20  ;;  %v15421_v42 = vmul.f32 %v2360_v0, %v14973_v33  ;;  %v15425_v43 = vmul.f32 %v2403_v10, %v14973_v33  ;;  %v4667_v35 = vld [vmem:[#allocation5 + $0x68] sm:$0x2]  ;;  %v4670_v22 = vld [vmem:[#allocation5 + $0x70] sm:$0x2] }
 0x38f   : > { %v4432_v11 = vcombine.high %v4424_v62, %v4424_v62  ;;  %v4440_v46 = vrot.slane %v4424_v62, %v14970_v29  ;;  %v4433_v57 = vcombine.high %v4431_v61, %v4431_v61  ;;  %v4447_v1 = vrot.slane %v4431_v61, %v14970_v29  ;;  %v4661_v50 = vld [vmem:[#allocation5 + $0x58] sm:$0x2] }
 0x390   : > { %v5562_v58 = vcombine.high %v5510_v49, %v5510_v49  ;;  %v5569_v59 = vrot.slane %v5510_v49, %v14970_v29  ;;  %v6133_v30 = vcombine.high %v15421_v42, %v15421_v42  ;;  %v4673_v9 = vld [vmem:[#allocation5 + $0x78] sm:$0x2] }
 0x391   : > { %v4454_v13 = vrot.slane %v4432_v11, %v14970_v29  ;;  %v4462_v18 = vcombine.high %v4440_v46, %v4440_v46  ;;  %v13118_v26 = vpack.c.bf16 %v4440_v46, %v4440_v46  ;;  %v4461_v31 = vrot.slane %v4433_v57, %v14970_v29 }
 0x392   : > { %v4463_v45 = vcombine.high %v4447_v1, %v4447_v1  ;;  %v13122_v40 = vpack.c.bf16 %v4447_v1, %v4447_v1  ;;  %v5576_v63 = vrot.slane %v5562_v58, %v14970_v29  ;;  %v5577_v20 = vcombine.high %v5569_v59, %v5569_v59 }
 0x393   : > { %v4464_v39 = vcombine.high %v4454_v13, %v4454_v13  ;;  %v13119_v2 = vpack.c.bf16 %v4454_v13, %v4454_v13  ;;  %v13120_v44 = vpack.c.bf16 %v4462_v18, %v4462_v18  ;;  %v4579_v47 = vshll.u32 %v13118_v26, 16 }
 0x394   : > { %v4465_v24 = vcombine.high %v4461_v31, %v4461_v31  ;;  %v13123_v54 = vpack.c.bf16 %v4461_v31, %v4461_v31  ;;  %v13124_v23 = vpack.c.bf16 %v4463_v45, %v4463_v45  ;;  %v4595_v56 = vshll.u32 %v13122_v40, 16 }
 0x395   : > { %v13121_v28 = vpack.c.bf16 %v4464_v39, %v4464_v39  ;;  %v4581_v38 = vrot.slane %v4579_v47, 7  ;;  %v4583_v6 = vshll.u32 %v13119_v2, 16  ;;  %v4587_v5 = vshll.u32 %v13120_v44, 16 }
 0x396   : > { %v13125_v16 = vpack.c.bf16 %v4465_v24, %v4465_v24  ;;  %v4597_v17 = vrot.slane %v4595_v56, 7  ;;  %v4599_v52 = vshll.u32 %v13123_v54, 16  ;;  %v4603_v21 = vshll.u32 %v13124_v23, 16 }
 0x397   : > { %v4585_v36 = vrot.slane %v4583_v6, 7  ;;  %v4589_v12 = vrot.slane %v4587_v5, 7  ;;  %v4591_v34 = vshll.u32 %v13121_v28, 16  ;;  %v4653_v55 = vsel %vm15318_vm10, %v4581_v38, %v4652_v4  ;;  %v5797_v4 = vld [vmem:[#allocation5 + $0x40] sm:$0x4] }
 0x398   : > { %v4601_v25 = vrot.slane %v4599_v52, 7  ;;  %v4605_v0 = vrot.slane %v4603_v21, 7  ;;  %v4607_v8 = vshll.u32 %v13125_v16, 16  ;;  %4654 = vst [vmem:[#allocation5 + $0x40] sm:$0x2] %v4653_v55  ;;  %v4665_v3 = vsel %vm15318_vm10, %v4597_v17, %v4664_v15 }
 0x399   : > { %v4593_v41 = vrot.slane %v4591_v34, 7  ;;  %v4656_v10 = vsel %vm15318_vm10, %v4585_v36, %v4655_v14  ;;  %v4659_v27 = vsel %vm15318_vm10, %v4589_v12, %v4658_v51  ;;  %4666 = vst [vmem:[#allocation5 + $0x60] sm:$0x2] %v4665_v3  ;;  %v5578_v11 = vcombine.high %v5576_v63, %v5576_v63  ;;  %v5800_v14 = vld [vmem:[#allocation5 + $0x48] sm:$0x4] }
 0x39a   : > { %v4609_v62 = vrot.slane %v4607_v8, 7  ;;  %4657 = vst [vmem:[#allocation5 + $0x48] sm:$0x2] %v4656_v10  ;;  %4660 = vst [vmem:[#allocation5 + $0x50] sm:$0x2] %v4659_v27  ;;  %v4668_v61 = vsel %vm15318_vm10, %v4601_v25, %v4667_v35  ;;  %v4671_v49 = vsel %vm15318_vm10, %v4605_v0, %v4670_v22  ;;  %v5585_v57 = vrot.slane %v5569_v59, %v14970_v29 }
 0x39b   : > { %v4662_v46 = vsel %vm15318_vm10, %v4593_v41, %v4661_v50  ;;  %4669 = vst [vmem:[#allocation5 + $0x68] sm:$0x2] %v4668_v61  ;;  %4672 = vst [vmem:[#allocation5 + $0x70] sm:$0x2] %v4671_v49  ;;  %v5592_v1 = vrot.slane %v5576_v63, %v14970_v29  ;;  %v5599_v58 = vrot.slane %v5577_v20, %v14970_v29  ;;  %v5803_v6 = vld [vmem:[#allocation5 + $0x50] sm:$0x4] }
 0x39c   : > { %4663 = vst [vmem:[#allocation5 + $0x58] sm:$0x2] %v4662_v46  ;;  %v4674_v13 = vsel %vm15318_vm10, %v4609_v62, %v4673_v9  ;;  %v5606_v18 = vrot.slane %v5578_v11, %v14970_v29  ;;  %v15456_v26 = vrot.slane %v15421_v42, %v14970_v29  ;;  %v15459_v31 = vrot.slane %v6133_v30, %v14970_v29  ;;  %v5809_v42 = vld [vmem:[#allocation5 + $0x60] sm:$0x4]  ;;  %v5806_v5 = vld [vmem:[#allocation5 + $0x58] sm:$0x4]  ;;  %v2362_v9 = vpop.f32.mrf.mxu0 }
 0x39d   : > { %4675 = vst [vmem:[#allocation5 + $0x78] sm:$0x2] %v4674_v13  ;;  %v5607_v45 = vcombine.high %v5585_v57, %v5585_v57  ;;  %v5608_v59 = vcombine.high %v5592_v1, %v5592_v1  ;;  %v5609_v40 = vcombine.high %v5599_v58, %v5599_v58  ;;  %v13182_v63 = vpack.c.bf16 %v5585_v57, %v5585_v57  ;;  %v5812_v21 = vld [vmem:[#allocation5 + $0x68] sm:$0x4]  ;;  %v5815_v55 = vld [vmem:[#allocation5 + $0x70] sm:$0x4] }
 0x39e   : > { %v5610_v39 = vcombine.high %v5606_v18, %v5606_v18  ;;  %v13183_v2 = vpack.c.bf16 %v5599_v58, %v5599_v58  ;;  %v13186_v44 = vpack.c.bf16 %v5592_v1, %v5592_v1  ;;  %v13187_v47 = vpack.c.bf16 %v5606_v18, %v5606_v18  ;;  %v5818_v50 = vld [vmem:[#allocation5 + $0x78] sm:$0x4] }
 0x39f   : > { %v13184_v24 = vpack.c.bf16 %v5607_v45, %v5607_v45  ;;  %v13185_v54 = vpack.c.bf16 %v5609_v40, %v5609_v40  ;;  %v13188_v23 = vpack.c.bf16 %v5608_v59, %v5608_v59  ;;  %v5724_v56 = vshll.u32 %v13182_v63, 16 }
 0x3a0   : > { %v13189_v30 = vpack.c.bf16 %v5610_v39, %v5610_v39  ;;  %v5728_v15 = vshll.u32 %v13183_v2, 16  ;;  %v5740_v28 = vshll.u32 %v13186_v44, 16  ;;  %v5744_v38 = vshll.u32 %v13187_v47, 16  ;;  %v6346_v44 = vld [vmem:[#allocation5] sm:$0x8] }
 0x3a1   : > { %v5726_v51 = vrot.slane %v5724_v56, 6  ;;  %v5732_v16 = vshll.u32 %v13184_v24, 16  ;;  %v5736_v17 = vshll.u32 %v13185_v54, 16  ;;  %v5748_v52 = vshll.u32 %v13188_v23, 16  ;;  %v6349_v47 = vld [vmem:[#allocation5 + $0x8] sm:$0x8] }
 0x3a2   : > { %v5730_v35 = vrot.slane %v5728_v15, 6  ;;  %v5742_v36 = vrot.slane %v5740_v28, 6  ;;  %v5746_v12 = vrot.slane %v5744_v38, 6  ;;  %v5752_v34 = vshll.u32 %v13189_v30, 16  ;;  %v6361_v30 = vld [vmem:[#allocation5 + $0x28] sm:$0x8] }
 0x3a3   : > { %v5734_v22 = vrot.slane %v5732_v16, 6  ;;  %v5738_v25 = vrot.slane %v5736_v17, 6  ;;  %v5750_v0 = vrot.slane %v5748_v52, 6  ;;  %v5798_v8 = vsel %vm15349_vm15, %v5726_v51, %v5797_v4  ;;  %v6352_v4 = vld [vmem:[#allocation5 + $0x10] sm:$0x8] }
 0x3a4   : > { %v5754_v3 = vrot.slane %v5752_v34, 6  ;;  %5799 = vst [vmem:[#allocation5 + $0x40] sm:$0x4] %v5798_v8  ;;  %v5801_v41 = vsel %vm15349_vm15, %v5730_v35, %v5800_v14  ;;  %v5810_v10 = vsel %vm15349_vm15, %v5742_v36, %v5809_v42  ;;  %v5813_v27 = vsel %vm15349_vm15, %v5746_v12, %v5812_v21  ;;  %v6358_v42 = vld [vmem:[#allocation5 + $0x20] sm:$0x8] }
 0x3a5   : > { %5802 = vst [vmem:[#allocation5 + $0x48] sm:$0x4] %v5801_v41  ;;  %v5804_v20 = vsel %vm15349_vm15, %v5734_v22, %v5803_v6  ;;  %v5807_v62 = vsel %vm15349_vm15, %v5738_v25, %v5806_v5  ;;  %5811 = vst [vmem:[#allocation5 + $0x60] sm:$0x4] %v5810_v10  ;;  %v5816_v61 = vsel %vm15349_vm15, %v5750_v0, %v5815_v55  ;;  %v6364_v5 = vld [vmem:[#allocation5 + $0x30] sm:$0x8] }
 0x3a6   : > { %5814 = vst [vmem:[#allocation5 + $0x68] sm:$0x4] %v5813_v27  ;;  %v6148_v49 = vcombine.high %v15456_v26, %v15456_v26  ;;  %5805 = vst [vmem:[#allocation5 + $0x50] sm:$0x4] %v5804_v20  ;;  %v5819_v11 = vsel %vm15349_vm15, %v5754_v3, %v5818_v50  ;;  %v6149_v46 = vcombine.high %v15459_v31, %v15459_v31  ;;  %v6355_v21 = vld [vmem:[#allocation5 + $0x18] sm:$0x8] }
 0x3a7   : > { %5808 = vst [vmem:[#allocation5 + $0x58] sm:$0x4] %v5807_v62  ;;  %5817 = vst [vmem:[#allocation5 + $0x70] sm:$0x4] %v5816_v61  ;;  %v6156_v57 = vrot.slane %v15456_v26, %v14970_v29  ;;  %v6163_v1 = vrot.slane %v15459_v31, %v14970_v29  ;;  %v7278_v13 = vcombine.high %v15425_v43, %v15425_v43  ;;  %v6367_v55 = vld [vmem:[#allocation5 + $0x38] sm:$0x8] }
 0x3a8   : > { %5820 = vst [vmem:[#allocation5 + $0x78] sm:$0x4] %v5819_v11  ;;  %v6170_v58 = vrot.slane %v6148_v49, %v14970_v29  ;;  %v7285_v18 = vrot.slane %v15425_v43, %v14970_v29  ;;  %v15491_v45 = vmul.f32 %v2362_v9, %v14973_v33  ;;  %v6177_v59 = vrot.slane %v6149_v46, %v14970_v29 }
 0x3a9   : > { %v6178_v40 = vcombine.high %v6156_v57, %v6156_v57  ;;  %v6179_v63 = vcombine.high %v6163_v1, %v6163_v1  ;;  %v13206_v26 = vpack.c.bf16 %v6156_v57, %v6156_v57  ;;  %v13210_v31 = vpack.c.bf16 %v6163_v1, %v6163_v1  ;;  %v7408_v57 = vld [vmem:[#allocation5 + $0x4] sm:$0x1] }
 0x3aa   : > { %v6180_v39 = vcombine.high %v6170_v58, %v6170_v58  ;;  %v13207_v2 = vpack.c.bf16 %v6170_v58, %v6170_v58  ;;  %v7292_v24 = vrot.slane %v7278_v13, %v14970_v29  ;;  %v6181_v54 = vcombine.high %v6177_v59, %v6177_v59  ;;  %v7420_v1 = vld [vmem:[#allocation5 + $0x24] sm:$0x1] }
 0x3ab   : > { %v13208_v23 = vpack.c.bf16 %v6178_v40, %v6178_v40  ;;  %v13211_v56 = vpack.c.bf16 %v6177_v59, %v6177_v59  ;;  %v13212_v43 = vpack.c.bf16 %v6179_v63, %v6179_v63  ;;  %v6311_v28 = vrot.slane %v13206_v26, 5  ;;  %v7414_v59 = vld [vmem:[#allocation5 + $0x14] sm:$0x1] }
 0x3ac   : > { %v13209_v15 = vpack.c.bf16 %v6180_v39, %v6180_v39  ;;  %v6312_v38 = vrot.slane %v13207_v2, 5  ;;  %v6315_v6 = vrot.slane %v13210_v31, 5  ;;  %v13213_v51 = vpack.c.bf16 %v6181_v54, %v6181_v54  ;;  %v7423_v31 = vld [vmem:[#allocation5 + $0x2c] sm:$0x1]  ;;  %v7417_v54 = vld [vmem:[#allocation5 + $0x1c] sm:$0x1] }
 0x3ad   : > { %v6313_v16 = vrot.slane %v13208_v23, 5  ;;  %v6316_v17 = vrot.slane %v13211_v56, 5  ;;  %v6317_v52 = vrot.slane %v13212_v43, 5  ;;  %v6347_v36 = vsel %vm15497_vm7, %v6311_v28, %v6346_v44  ;;  %v7426_v44 = vld [vmem:[#allocation5 + $0x34] sm:$0x1] }
 0x3ae   : > { %v6314_v35 = vrot.slane %v13209_v15, 5  ;;  %v6350_v12 = vsel %vm15497_vm7, %v6312_v38, %v6349_v47  ;;  %v6359_v34 = vsel %vm15497_vm7, %v6315_v6, %v6358_v42  ;;  %v6318_v22 = vrot.slane %v13213_v51, 5  ;;  %6348 = vst [vmem:[#allocation5] sm:$0x8] %v6347_v36  ;;  %v7429_v56 = vld [vmem:[#allocation5 + $0x3c] sm:$0x1] }
 0x3af   : > { %6351 = vst [vmem:[#allocation5 + $0x8] sm:$0x8] %v6350_v12  ;;  %v6353_v25 = vsel %vm15497_vm7, %v6313_v16, %v6352_v4  ;;  %6360 = vst [vmem:[#allocation5 + $0x20] sm:$0x8] %v6359_v34  ;;  %v6362_v0 = vsel %vm15497_vm7, %v6316_v17, %v6361_v30  ;;  %v6365_v8 = vsel %vm15497_vm7, %v6317_v52, %v6364_v5 }
 0x3b0   : > { %6354 = vst [vmem:[#allocation5 + $0x10] sm:$0x8] %v6353_v25  ;;  %v6356_v50 = vsel %vm15497_vm7, %v6314_v35, %v6355_v21  ;;  %6363 = vst [vmem:[#allocation5 + $0x28] sm:$0x8] %v6362_v0  ;;  %v7293_v3 = vcombine.high %v7285_v18, %v7285_v18  ;;  %v7294_v41 = vcombine.high %v7292_v24, %v7292_v24 }
 0x3b1   : > { %6366 = vst [vmem:[#allocation5 + $0x30] sm:$0x8] %v6365_v8  ;;  %v7301_v10 = vrot.slane %v7285_v18, %v14970_v29  ;;  %6357 = vst [vmem:[#allocation5 + $0x18] sm:$0x8] %v6356_v50  ;;  %v6368_v27 = vsel %vm15497_vm7, %v6318_v22, %v6367_v55  ;;  %v7308_v9 = vrot.slane %v7292_v24, %v14970_v29  ;;  %v7411_v18 = vld [vmem:[#allocation5 + $0xc] sm:$0x1] }
 0x3b2   : > { %v6658_v20 = vcombine.high %v15491_v45, %v15491_v45  ;;  %v6665_v62 = vrot.slane %v15491_v45, %v14970_v29  ;;  %6369 = vst [vmem:[#allocation5 + $0x38] sm:$0x8] %v6368_v27  ;;  %v7315_v61 = vrot.slane %v7293_v3, %v14970_v29  ;;  %v7322_v49 = vrot.slane %v7294_v41, %v14970_v29 }
 0x3b3   : > { %v7323_v11 = vcombine.high %v7301_v10, %v7301_v10  ;;  %v7392_v46 = vpack.c.bf16 %v7301_v10, %v7301_v10  ;;  %v7324_v58 = vcombine.high %v7308_v9, %v7308_v9  ;;  %v7396_v13 = vpack.c.bf16 %v7308_v9, %v7308_v9  ;;  %v2405_v10 = vpop.f32.mrf.mxu1 }
 0x3b4   : > { %v6672_v40 = vrot.slane %v6658_v20, %v14970_v29  ;;  %v6673_v63 = vcombine.high %v6665_v62, %v6665_v62  ;;  %v7325_v26 = vcombine.high %v7315_v61, %v7315_v61  ;;  %v7326_v39 = vcombine.high %v7322_v49, %v7322_v49 }
 0x3b5   : > { %v7393_v2 = vpack.c.bf16 %v7315_v61, %v7315_v61  ;;  %v7394_v45 = vpack.c.bf16 %v7323_v11, %v7323_v11  ;;  %v7397_v47 = vpack.c.bf16 %v7322_v49, %v7322_v49  ;;  %v7398_v4 = vpack.c.bf16 %v7324_v58, %v7324_v58  ;;  %v6918_v3 = vld [vmem:[#allocation5] sm:$0x8] }
 0x3b6   : > { %v7409_v24 = vsel %vm15020_vm13, %v7392_v46, %v7408_v57  ;;  %v7421_v23 = vsel %vm15020_vm13, %v7396_v13, %v7420_v1  ;;  %v7395_v43 = vpack.c.bf16 %v7325_v26, %v7325_v26  ;;  %v7399_v42 = vpack.c.bf16 %v7326_v39, %v7326_v39  ;;  %v6921_v41 = vld [vmem:[#allocation5 + $0x8] sm:$0x8]  ;;  %v6930_v11 = vld [vmem:[#allocation5 + $0x20] sm:$0x8]  ;;  %v2364_v46 = vpop.f32.mrf.mxu0 }
 0x3b7   : > { %7410 = vst [vmem:[#allocation5 + $0x4] sm:$0x1] %v7409_v24  ;;  %v7412_v30 = vsel %vm15020_vm13, %v7393_v2, %v7411_v18  ;;  %v7415_v15 = vsel %vm15020_vm13, %v7394_v45, %v7414_v59  ;;  %7422 = vst [vmem:[#allocation5 + $0x24] sm:$0x1] %v7421_v23  ;;  %v7424_v28 = vsel %vm15020_vm13, %v7397_v47, %v7423_v31  ;;  %v6924_v49 = vld [vmem:[#allocation5 + $0x10] sm:$0x8] }
 0x3b8   : > { %7413 = vst [vmem:[#allocation5 + $0xc] sm:$0x1] %v7412_v30  ;;  %7416 = vst [vmem:[#allocation5 + $0x14] sm:$0x1] %v7415_v15  ;;  %v7427_v38 = vsel %vm15020_vm13, %v7398_v4, %v7426_v44  ;;  %v6674_v6 = vcombine.high %v6672_v40, %v6672_v40  ;;  %v6681_v5 = vrot.slane %v6665_v62, %v14970_v29  ;;  %v6933_v18 = vld [vmem:[#allocation5 + $0x28] sm:$0x8]  ;;  %v2407_v4 = vpop.f32.mrf.mxu1 }
 0x3b9   : > { %v7418_v51 = vsel %vm15020_vm13, %v7395_v43, %v7417_v54  ;;  %7425 = vst [vmem:[#allocation5 + $0x2c] sm:$0x1] %v7424_v28  ;;  %7428 = vst [vmem:[#allocation5 + $0x34] sm:$0x1] %v7427_v38  ;;  %v7430_v16 = vsel %vm15020_vm13, %v7399_v42, %v7429_v56  ;;  %v6688_v17 = vrot.slane %v6672_v40, %v14970_v29  ;;  %v6936_v39 = vld [vmem:[#allocation5 + $0x30] sm:$0x8]  ;;  %v2366_v42 = vpop.f32.mrf.mxu0 }
 0x3ba   : > { %v6695_v52 = vrot.slane %v6673_v63, %v14970_v29  ;;  %7419 = vst [vmem:[#allocation5 + $0x1c] sm:$0x1] %v7418_v51  ;;  %7431 = vst [vmem:[#allocation5 + $0x3c] sm:$0x1] %v7430_v16  ;;  %v6702_v21 = vrot.slane %v6674_v6, %v14970_v29  ;;  %v6703_v35 = vcombine.high %v6681_v5, %v6681_v5  ;;  %v6927_v47 = vld [vmem:[#allocation5 + $0x18] sm:$0x8] }
 0x3bb   : > { %v13238_v36 = vpack.c.bf16 %v6681_v5, %v6681_v5  ;;  %v6704_v12 = vcombine.high %v6688_v17, %v6688_v17  ;;  %v13242_v22 = vpack.c.bf16 %v6688_v17, %v6688_v17  ;;  %v6939_v43 = vld [vmem:[#allocation5 + $0x38] sm:$0x8]  ;;  %v7636_v38 = vmul.f32 %v2405_v10, %v14973_v33 }
 0x3bc   : > { %v6705_v34 = vcombine.high %v6695_v52, %v6695_v52  ;;  %v13239_v55 = vpack.c.bf16 %v6695_v52, %v6695_v52  ;;  %v6706_v25 = vcombine.high %v6702_v21, %v6702_v21  ;;  %v13240_v0 = vpack.c.bf16 %v6703_v35, %v6703_v35 }
 0x3bd   : > { %v13243_v8 = vpack.c.bf16 %v6702_v21, %v6702_v21  ;;  %v6837_v50 = vshll.u32 %v13238_v36, 16  ;;  %v13244_v9 = vpack.c.bf16 %v6704_v12, %v6704_v12  ;;  %v6853_v62 = vshll.u32 %v13242_v22, 16 }
 0x3be   : > { %v13241_v27 = vpack.c.bf16 %v6705_v34, %v6705_v34  ;;  %v6841_v20 = vshll.u32 %v13239_v55, 16  ;;  %v13245_v57 = vpack.c.bf16 %v6706_v25, %v6706_v25  ;;  %v6845_v58 = vshll.u32 %v13240_v0, 16 }
 0x3bf   : > { %v6839_v1 = vrot.slane %v6837_v50, 5  ;;  %v6857_v13 = vshll.u32 %v13243_v8, 16  ;;  %v6855_v63 = vrot.slane %v6853_v62, 5  ;;  %v6861_v26 = vshll.u32 %v13244_v9, 16 }
 0x3c0   : > { %v6843_v59 = vrot.slane %v6841_v20, 5  ;;  %v6849_v40 = vshll.u32 %v13241_v27, 16  ;;  %v6847_v2 = vrot.slane %v6845_v58, 5  ;;  %v6865_v31 = vshll.u32 %v13245_v57, 16 }
 0x3c1   : > { %v6859_v45 = vrot.slane %v6857_v13, 5  ;;  %v6919_v44 = vsel %vm15548_vm1, %v6839_v1, %v6918_v3  ;;  %v6863_v54 = vrot.slane %v6861_v26, 5  ;;  %v6931_v56 = vsel %vm15548_vm1, %v6855_v63, %v6930_v11 }
 0x3c2   : > { %v6851_v24 = vrot.slane %v6849_v40, 5  ;;  %6920 = vst [vmem:[#allocation5] sm:$0x8] %v6919_v44  ;;  %v6922_v23 = vsel %vm15548_vm1, %v6843_v59, %v6921_v41  ;;  %v6867_v30 = vrot.slane %v6865_v31, 5  ;;  %v6925_v15 = vsel %vm15548_vm1, %v6847_v2, %v6924_v49  ;;  %6932 = vst [vmem:[#allocation5 + $0x20] sm:$0x8] %v6931_v56 }
 0x3c3   : > { %6923 = vst [vmem:[#allocation5 + $0x8] sm:$0x8] %v6922_v23  ;;  %v6934_v28 = vsel %vm15548_vm1, %v6859_v45, %v6933_v18  ;;  %6926 = vst [vmem:[#allocation5 + $0x10] sm:$0x8] %v6925_v15  ;;  %v6937_v5 = vsel %vm15548_vm1, %v6863_v54, %v6936_v39  ;;  %v6130_v51 = vmul.f32 %v2364_v46, %v14998_v32  ;;  %v7882_v59 = vld [vmem:[#allocation5 + $0x4] sm:$0x1] }
 0x3c4   : > { %v6928_v6 = vsel %vm15548_vm1, %v6851_v24, %v6927_v47  ;;  %6935 = vst [vmem:[#allocation5 + $0x28] sm:$0x8] %v6934_v28  ;;  %v7275_v16 = vmul.f32 %v2407_v4, %v14998_v32  ;;  %6938 = vst [vmem:[#allocation5 + $0x30] sm:$0x8] %v6937_v5  ;;  %v6940_v17 = vsel %vm15548_vm1, %v6867_v30, %v6939_v43  ;;  %v7885_v39 = vld [vmem:[#allocation5 + $0xc] sm:$0x1] }
 0x3c5   : > { %6929 = vst [vmem:[#allocation5 + $0x18] sm:$0x8] %v6928_v6  ;;  %v7640_v52 = vcombine.high %v7636_v38, %v7636_v38  ;;  %v7647_v21 = vrot.slane %v7636_v38, %v14970_v29  ;;  %v15573_v35 = vmul.f32 %v2366_v42, %v14998_v32  ;;  %6941 = vst [vmem:[#allocation5 + $0x38] sm:$0x8] %v6940_v17  ;;  %v7888_v2 = vld [vmem:[#allocation5 + $0x14] sm:$0x1] }
 0x3c6   : > { %v6182_v36 = vcombine.high %v6130_v51, %v6130_v51  ;;  %v6189_v12 = vrot.slane %v6130_v51, %v14970_v29  ;;  %v7327_v34 = vcombine.high %v7275_v16, %v7275_v16  ;;  %v15577_v55 = vrot.slane %v7275_v16, %v14970_v29  ;;  %v7891_v24 = vld [vmem:[#allocation5 + $0x1c] sm:$0x1]  ;;  %v7894_v54 = vld [vmem:[#allocation5 + $0x24] sm:$0x1]  ;;  %v7897_v23 = vld [vmem:[#allocation5 + $0x2c] sm:$0x1] }
 0x3c7   : > { %v7654_v22 = vrot.slane %v7640_v52, %v14970_v29  ;;  %v7655_v25 = vcombine.high %v7647_v21, %v7647_v21  ;;  %v7663_v0 = vrot.slane %v7647_v21, %v14970_v29  ;;  %v6707_v8 = vcombine.high %v15573_v35, %v15573_v35  ;;  %v7900_v15 = vld [vmem:[#allocation5 + $0x34] sm:$0x1]  ;;  %v7903_v52 = vld [vmem:[#allocation5 + $0x3c] sm:$0x1] }
 0x3c8   : > { %v6196_v50 = vrot.slane %v6182_v36, %v14970_v29  ;;  %v6197_v3 = vcombine.high %v6189_v12, %v6189_v12  ;;  %v15585_v41 = vrot.slane %v6189_v12, %v14970_v29  ;;  %v15588_v10 = vrot.slane %v7327_v34, %v14970_v29 }
 0x3c9   : > { %v7656_v27 = vcombine.high %v7654_v22, %v7654_v22  ;;  %v7670_v9 = vrot.slane %v7654_v22, %v14970_v29  ;;  %v7677_v20 = vrot.slane %v7655_v25, %v14970_v29  ;;  %v7685_v62 = vcombine.high %v7663_v0, %v7663_v0 }
 0x3ca   : > { %v13270_v49 = vpack.c.bf16 %v7663_v0, %v7663_v0  ;;  %v6198_v11 = vcombine.high %v6196_v50, %v6196_v50  ;;  %v15593_v46 = vrot.slane %v6196_v50, %v14970_v29  ;;  %v15596_v57 = vrot.slane %v6197_v3, %v14970_v29 }
 0x3cb   : > { %v7684_v1 = vrot.slane %v7656_v27, %v14970_v29  ;;  %v7686_v58 = vcombine.high %v7670_v9, %v7670_v9  ;;  %v7687_v13 = vcombine.high %v7677_v20, %v7677_v20  ;;  %v13271_v18 = vpack.c.bf16 %v7677_v20, %v7677_v20  ;;  %v6370_v27 = vld [vmem:[#allocation5 + $0x40] sm:$0x8] }
 0x3cc   : > { %v13272_v40 = vpack.c.bf16 %v7685_v62, %v7685_v62  ;;  %v13274_v63 = vpack.c.bf16 %v7670_v9, %v7670_v9  ;;  %v7819_v26 = vshll.u32 %v13270_v49, 16  ;;  %v6226_v45 = vrot.slane %v6198_v11, %v14970_v29  ;;  %v6373_v11 = vld [vmem:[#allocation5 + $0x48] sm:$0x8] }
 0x3cd   : > { %v7688_v31 = vcombine.high %v7684_v1, %v7684_v1  ;;  %v13273_v44 = vpack.c.bf16 %v7687_v13, %v7687_v13  ;;  %v13275_v47 = vpack.c.bf16 %v7684_v1, %v7684_v1  ;;  %v13276_v4 = vpack.c.bf16 %v7686_v58, %v7686_v58  ;;  %v6376_v1 = vld [vmem:[#allocation5 + $0x50] sm:$0x8]  ;;  %v6379_v58 = vld [vmem:[#allocation5 + $0x58] sm:$0x8] }
 0x3ce   : > { %v7822_v56 = vshll.u32 %v13271_v18, 16  ;;  %v7825_v43 = vshll.u32 %v13272_v40, 16  ;;  %v7831_v42 = vshll.u32 %v13274_v63, 16  ;;  %v7883_v30 = vsel %vm15054_vm14, %v7819_v26, %v7882_v59  ;;  %v6385_v63 = vld [vmem:[#allocation5 + $0x68] sm:$0x8] }
 0x3cf   : > { %v13277_v28 = vpack.c.bf16 %v7688_v31, %v7688_v31  ;;  %v7828_v38 = vshll.u32 %v13273_v44, 16  ;;  %v7834_v6 = vshll.u32 %v13275_v47, 16  ;;  %v7837_v5 = vshll.u32 %v13276_v4, 16  ;;  %7884 = vst [vmem:[#allocation5 + $0x4] sm:$0x1] %v7883_v30 }
 0x3d0   : > { %v7886_v51 = vsel %vm15054_vm14, %v7822_v56, %v7885_v39  ;;  %v7889_v16 = vsel %vm15054_vm14, %v7825_v43, %v7888_v2  ;;  %v7895_v17 = vsel %vm15054_vm14, %v7831_v42, %v7894_v54  ;;  %v6227_v21 = vcombine.high %v15585_v41, %v15585_v41  ;;  %v6388_v26 = vld [vmem:[#allocation5 + $0x70] sm:$0x8]  ;;  %v2409_v43 = vpop.f32.mrf.mxu1  ;;  %v2446_v42 = vpop.f32.mrf.mxu0 }
 0x3d1   : > { %v7840_v36 = vshll.u32 %v13277_v28, 16  ;;  %7887 = vst [vmem:[#allocation5 + $0xc] sm:$0x1] %v7886_v51  ;;  %7890 = vst [vmem:[#allocation5 + $0x14] sm:$0x1] %v7889_v16  ;;  %v7892_v12 = vsel %vm15054_vm14, %v7828_v38, %v7891_v24  ;;  %v7898_v34 = vsel %vm15054_vm14, %v7834_v6, %v7897_v23  ;;  %v7901_v22 = vsel %vm15054_vm14, %v7837_v5, %v7900_v15 }
 0x3d2   : > { %7896 = vst [vmem:[#allocation5 + $0x24] sm:$0x1] %v7895_v17  ;;  %7893 = vst [vmem:[#allocation5 + $0x1c] sm:$0x1] %v7892_v12  ;;  %v6228_v25 = vcombine.high %v15593_v46, %v15593_v46  ;;  %v6229_v0 = vcombine.high %v15596_v57, %v15596_v57  ;;  %v6230_v50 = vcombine.high %v6226_v45, %v6226_v45 }
 0x3d3   : > { %7899 = vst [vmem:[#allocation5 + $0x2c] sm:$0x1] %v7898_v34  ;;  %7902 = vst [vmem:[#allocation5 + $0x34] sm:$0x1] %v7901_v22  ;;  %v13214_v3 = vpack.c.bf16 %v15585_v41, %v15585_v41  ;;  %v7904_v9 = vsel %vm15054_vm14, %v7840_v36, %v7903_v52  ;;  %v13215_v20 = vpack.c.bf16 %v15596_v57, %v15596_v57  ;;  %v6382_v41 = vld [vmem:[#allocation5 + $0x60] sm:$0x8] }
 0x3d4   : > { %v13216_v62 = vpack.c.bf16 %v6227_v21, %v6227_v21  ;;  %v13218_v49 = vpack.c.bf16 %v15593_v46, %v15593_v46  ;;  %7905 = vst [vmem:[#allocation5 + $0x3c] sm:$0x1] %v7904_v9  ;;  %v13217_v13 = vpack.c.bf16 %v6229_v0, %v6229_v0  ;;  %v13219_v18 = vpack.c.bf16 %v6226_v45, %v6226_v45  ;;  %v6391_v57 = vld [vmem:[#allocation5 + $0x78] sm:$0x8]  ;;  %v7432_v22 = vld [vmem:[#allocation5 + $0x44] sm:$0x1] }
 0x3d5   : > { %v13220_v59 = vpack.c.bf16 %v6228_v25, %v6228_v25  ;;  %v13221_v40 = vpack.c.bf16 %v6230_v50, %v6230_v50  ;;  %v6319_v39 = vrot.slane %v13214_v3, 5  ;;  %v6320_v2 = vrot.slane %v13215_v20, 5  ;;  %v7444_v25 = vld [vmem:[#allocation5 + $0x64] sm:$0x1]  ;;  %v7435_v3 = vld [vmem:[#allocation5 + $0x4c] sm:$0x1] }
 0x3d6   : > { %v6321_v31 = vrot.slane %v13216_v62, 5  ;;  %v6323_v44 = vrot.slane %v13218_v49, 5  ;;  %v6322_v47 = vrot.slane %v13217_v13, 5  ;;  %v6324_v4 = vrot.slane %v13219_v18, 5 }
 0x3d7   : > { %v6325_v24 = vrot.slane %v13220_v59, 5  ;;  %v6326_v46 = vrot.slane %v13221_v40, 5  ;;  %v6371_v54 = vsel %vm15497_vm7, %v6319_v39, %v6370_v27  ;;  %v6374_v45 = vsel %vm15497_vm7, %v6320_v2, %v6373_v11  ;;  %v7438_v27 = vld [vmem:[#allocation5 + $0x54] sm:$0x1]  ;;  %v7447_v11 = vld [vmem:[#allocation5 + $0x6c] sm:$0x1] }
 0x3d8   : > { %v6377_v23 = vsel %vm15497_vm7, %v6321_v31, %v6376_v1  ;;  %v6383_v56 = vsel %vm15497_vm7, %v6323_v44, %v6382_v41  ;;  %6372 = vst [vmem:[#allocation5 + $0x40] sm:$0x8] %v6371_v54  ;;  %6375 = vst [vmem:[#allocation5 + $0x48] sm:$0x8] %v6374_v45  ;;  %v6380_v30 = vsel %vm15497_vm7, %v6322_v47, %v6379_v58  ;;  %v7450_v1 = vld [vmem:[#allocation5 + $0x74] sm:$0x1] }
 0x3d9   : > { %6378 = vst [vmem:[#allocation5 + $0x50] sm:$0x8] %v6377_v23  ;;  %6384 = vst [vmem:[#allocation5 + $0x60] sm:$0x8] %v6383_v56  ;;  %v6386_v15 = vsel %vm15497_vm7, %v6324_v4, %v6385_v63  ;;  %v6389_v28 = vsel %vm15497_vm7, %v6325_v24, %v6388_v26  ;;  %v6392_v38 = vsel %vm15497_vm7, %v6326_v46, %v6391_v57  ;;  %v7441_v59 = vld [vmem:[#allocation5 + $0x5c] sm:$0x1] }
 0x3da   : > { %6381 = vst [vmem:[#allocation5 + $0x58] sm:$0x8] %v6380_v30  ;;  %6387 = vst [vmem:[#allocation5 + $0x68] sm:$0x8] %v6386_v15  ;;  %v7342_v6 = vcombine.high %v15577_v55, %v15577_v55  ;;  %v7343_v5 = vcombine.high %v15588_v10, %v15588_v10  ;;  %v7350_v51 = vrot.slane %v15577_v55, %v14970_v29  ;;  %v7453_v41 = vld [vmem:[#allocation5 + $0x7c] sm:$0x1] }
 0x3db   : > { %6390 = vst [vmem:[#allocation5 + $0x70] sm:$0x8] %v6389_v28  ;;  %6393 = vst [vmem:[#allocation5 + $0x78] sm:$0x8] %v6392_v38  ;;  %v7357_v16 = vrot.slane %v15588_v10, %v14970_v29  ;;  %v6714_v17 = vrot.slane %v15573_v35, %v14970_v29  ;;  %v6721_v52 = vrot.slane %v6707_v8, %v14970_v29 }
 0x3dc   : > { %v15659_v21 = vmul.f32 %v2409_v43, %v14998_v32  ;;  %v15662_v36 = vmul.f32 %v2446_v42, %v14973_v33  ;;  %v7364_v12 = vrot.slane %v7342_v6, %v14970_v29  ;;  %v7371_v55 = vrot.slane %v7343_v5, %v14970_v29 }
 0x3dd   : > { %v7372_v34 = vcombine.high %v7350_v51, %v7350_v51  ;;  %v7373_v10 = vcombine.high %v7357_v16, %v7357_v16  ;;  %v7400_v0 = vpack.c.bf16 %v7350_v51, %v7350_v51  ;;  %v7404_v50 = vpack.c.bf16 %v7357_v16, %v7357_v16 }
 0x3de   : > { %v6722_v35 = vcombine.high %v6714_v17, %v6714_v17  ;;  %v6723_v8 = vcombine.high %v6721_v52, %v6721_v52  ;;  %v7374_v9 = vcombine.high %v7364_v12, %v7364_v12  ;;  %v7375_v20 = vcombine.high %v7371_v55, %v7371_v55 }
 0x3df   : > { %v7401_v62 = vpack.c.bf16 %v7364_v12, %v7364_v12  ;;  %v7402_v49 = vpack.c.bf16 %v7372_v34, %v7372_v34  ;;  %v7405_v58 = vpack.c.bf16 %v7371_v55, %v7371_v55  ;;  %v7406_v13 = vpack.c.bf16 %v7373_v10, %v7373_v10  ;;  %v6942_v16 = vld [vmem:[#allocation5 + $0x40] sm:$0x8] }
 0x3e0   : > { %v7433_v18 = vsel %vm15020_vm13, %v7400_v0, %v7432_v22  ;;  %v7445_v40 = vsel %vm15020_vm13, %v7404_v50, %v7444_v25  ;;  %v7403_v63 = vpack.c.bf16 %v7374_v9, %v7374_v9  ;;  %v7407_v26 = vpack.c.bf16 %v7375_v20, %v7375_v20  ;;  %v6948_v10 = vld [vmem:[#allocation5 + $0x50] sm:$0x8]  ;;  %v6954_v22 = vld [vmem:[#allocation5 + $0x60] sm:$0x8] }
 0x3e1   : > { %7434 = vst [vmem:[#allocation5 + $0x44] sm:$0x1] %v7433_v18  ;;  %v7436_v39 = vsel %vm15020_vm13, %v7401_v62, %v7435_v3  ;;  %v7439_v2 = vsel %vm15020_vm13, %v7402_v49, %v7438_v27  ;;  %7446 = vst [vmem:[#allocation5 + $0x64] sm:$0x1] %v7445_v40  ;;  %v7448_v31 = vsel %vm15020_vm13, %v7405_v58, %v7447_v11  ;;  %v6957_v27 = vld [vmem:[#allocation5 + $0x68] sm:$0x8] }
 0x3e2   : > { %7437 = vst [vmem:[#allocation5 + $0x4c] sm:$0x1] %v7436_v39  ;;  %7440 = vst [vmem:[#allocation5 + $0x54] sm:$0x1] %v7439_v2  ;;  %v7451_v44 = vsel %vm15020_vm13, %v7406_v13, %v7450_v1  ;;  %v6730_v57 = vrot.slane %v6714_v17, %v14970_v29  ;;  %v6737_v47 = vrot.slane %v6721_v52, %v14970_v29  ;;  %v6945_v17 = vld [vmem:[#allocation5 + $0x48] sm:$0x8] }
 0x3e3   : > { %v7442_v4 = vsel %vm15020_vm13, %v7403_v63, %v7441_v59  ;;  %7449 = vst [vmem:[#allocation5 + $0x6c] sm:$0x1] %v7448_v31  ;;  %7452 = vst [vmem:[#allocation5 + $0x74] sm:$0x1] %v7451_v44  ;;  %v7454_v24 = vsel %vm15020_vm13, %v7407_v26, %v7453_v41  ;;  %v6744_v46 = vrot.slane %v6722_v35, %v14970_v29  ;;  %v6960_v62 = vld [vmem:[#allocation5 + $0x70] sm:$0x8]  ;;  %v2489_v26 = vpop.f32.mrf.mxu1 }
 0x3e4   : > { %v6751_v54 = vrot.slane %v6723_v8, %v14970_v29  ;;  %7443 = vst [vmem:[#allocation5 + $0x5c] sm:$0x1] %v7442_v4  ;;  %7455 = vst [vmem:[#allocation5 + $0x7c] sm:$0x1] %v7454_v24  ;;  %v6752_v45 = vcombine.high %v6730_v57, %v6730_v57  ;;  %v6753_v23 = vcombine.high %v6737_v47, %v6737_v47  ;;  %v6951_v58 = vld [vmem:[#allocation5 + $0x58] sm:$0x8] }
 0x3e5   : > { %v13246_v56 = vpack.c.bf16 %v6730_v57, %v6730_v57  ;;  %v13250_v43 = vpack.c.bf16 %v6737_v47, %v6737_v47  ;;  %v6754_v42 = vcombine.high %v6744_v46, %v6744_v46  ;;  %v13247_v15 = vpack.c.bf16 %v6744_v46, %v6744_v46  ;;  %v6963_v18 = vld [vmem:[#allocation5 + $0x78] sm:$0x8]  ;;  %v2448_v57 = vpop.f32.mrf.mxu0 }
 0x3e6   : > { %v6755_v30 = vcombine.high %v6751_v54, %v6751_v54  ;;  %v13251_v28 = vpack.c.bf16 %v6751_v54, %v6751_v54  ;;  %v13248_v38 = vpack.c.bf16 %v6752_v45, %v6752_v45  ;;  %v13252_v6 = vpack.c.bf16 %v6753_v23, %v6753_v23 }
 0x3e7   : > { %v6869_v5 = vshll.u32 %v13246_v56, 16  ;;  %v6885_v51 = vshll.u32 %v13250_v43, 16  ;;  %v13249_v52 = vpack.c.bf16 %v6754_v42, %v6754_v42  ;;  %v6873_v55 = vshll.u32 %v13247_v15, 16 }
 0x3e8   : > { %v13253_v12 = vpack.c.bf16 %v6755_v30, %v6755_v30  ;;  %v6889_v34 = vshll.u32 %v13251_v28, 16  ;;  %v6877_v0 = vshll.u32 %v13248_v38, 16  ;;  %v6893_v3 = vshll.u32 %v13252_v6, 16 }
 0x3e9   : > { %v6871_v25 = vrot.slane %v6869_v5, 5  ;;  %v6887_v50 = vrot.slane %v6885_v51, 5  ;;  %v6875_v35 = vrot.slane %v6873_v55, 5  ;;  %v6881_v8 = vshll.u32 %v13249_v52, 16 }
 0x3ea   : > { %v6891_v9 = vrot.slane %v6889_v34, 5  ;;  %v6897_v20 = vshll.u32 %v13253_v12, 16  ;;  %v6879_v49 = vrot.slane %v6877_v0, 5  ;;  %v6895_v11 = vrot.slane %v6893_v3, 5  ;;  %v7906_v34 = vld [vmem:[#allocation5 + $0x44] sm:$0x1] }
 0x3eb   : > { %v6943_v1 = vsel %vm15548_vm1, %v6871_v25, %v6942_v16  ;;  %v6955_v13 = vsel %vm15548_vm1, %v6887_v50, %v6954_v22  ;;  %v6883_v59 = vrot.slane %v6881_v8, 5  ;;  %v6946_v41 = vsel %vm15548_vm1, %v6875_v35, %v6945_v17  ;;  %v7909_v0 = vld [vmem:[#allocation5 + $0x4c] sm:$0x1]  ;;  %v7912_v50 = vld [vmem:[#allocation5 + $0x54] sm:$0x1] }
 0x3ec   : > { %v6899_v40 = vrot.slane %v6897_v20, 5  ;;  %6944 = vst [vmem:[#allocation5 + $0x40] sm:$0x8] %v6943_v1  ;;  %6956 = vst [vmem:[#allocation5 + $0x60] sm:$0x8] %v6955_v13  ;;  %v6958_v63 = vsel %vm15548_vm1, %v6891_v9, %v6957_v27  ;;  %v6949_v39 = vsel %vm15548_vm1, %v6879_v49, %v6948_v10  ;;  %v6961_v2 = vsel %vm15548_vm1, %v6895_v11, %v6960_v62 }
 0x3ed   : > { %6947 = vst [vmem:[#allocation5 + $0x48] sm:$0x8] %v6946_v41  ;;  %6959 = vst [vmem:[#allocation5 + $0x68] sm:$0x8] %v6958_v63  ;;  %v7689_v31 = vcombine.high %v15659_v21, %v15659_v21  ;;  %v7696_v44 = vrot.slane %v15659_v21, %v14970_v29  ;;  %v6952_v47 = vsel %vm15548_vm1, %v6883_v59, %v6951_v58  ;;  %v7915_v20 = vld [vmem:[#allocation5 + $0x5c] sm:$0x1] }
 0x3ee   : > { %6950 = vst [vmem:[#allocation5 + $0x50] sm:$0x8] %v6949_v39  ;;  %6962 = vst [vmem:[#allocation5 + $0x70] sm:$0x8] %v6961_v2  ;;  %v6964_v4 = vsel %vm15548_vm1, %v6899_v40, %v6963_v18  ;;  %v8226_v24 = vcombine.high %v15662_v36, %v15662_v36  ;;  %v8233_v46 = vrot.slane %v15662_v36, %v14970_v29  ;;  %v7918_v62 = vld [vmem:[#allocation5 + $0x64] sm:$0x1] }
 0x3ef   : > { %6953 = vst [vmem:[#allocation5 + $0x58] sm:$0x8] %v6952_v47  ;;  %6965 = vst [vmem:[#allocation5 + $0x78] sm:$0x8] %v6964_v4  ;;  %v7703_v54 = vrot.slane %v7689_v31, %v14970_v29  ;;  %v7704_v21 = vcombine.high %v7696_v44, %v7696_v44  ;;  %v7712_v45 = vrot.slane %v7696_v44, %v14970_v29  ;;  %v7921_v49 = vld [vmem:[#allocation5 + $0x6c] sm:$0x1] }
 0x3f0   : > { %v15713_v23 = vmul.f32 %v2489_v26, %v14973_v33  ;;  %v8240_v56 = vrot.slane %v8226_v24, %v14970_v29  ;;  %v8241_v43 = vcombine.high %v8233_v46, %v8233_v46  ;;  %v15717_v42 = vrot.slane %v8233_v46, %v14970_v29  ;;  %v7924_v18 = vld [vmem:[#allocation5 + $0x74] sm:$0x1]  ;;  %v7927_v31 = vld [vmem:[#allocation5 + $0x7c] sm:$0x1] }
 0x3f1   : > { %v15720_v30 = vmul.f32 %v2448_v57, %v14973_v33  ;;  %v7705_v36 = vcombine.high %v7703_v54, %v7703_v54  ;;  %v7719_v15 = vrot.slane %v7703_v54, %v14970_v29  ;;  %v7726_v28 = vrot.slane %v7704_v21, %v14970_v29 }
 0x3f2   : > { %v7734_v38 = vcombine.high %v7712_v45, %v7712_v45  ;;  %v13278_v6 = vpack.c.bf16 %v7712_v45, %v7712_v45  ;;  %v8242_v5 = vcombine.high %v8240_v56, %v8240_v56  ;;  %v15725_v51 = vrot.slane %v8240_v56, %v14970_v29  ;;  %v8436_v56 = vld [vmem:[#allocation5 + $0x4] sm:$0x2] }
 0x3f3   : > { %v15728_v16 = vrot.slane %v8241_v43, %v14970_v29  ;;  %v7733_v17 = vrot.slane %v7705_v36, %v14970_v29  ;;  %v7735_v52 = vcombine.high %v7719_v15, %v7719_v15  ;;  %v7736_v12 = vcombine.high %v7726_v28, %v7726_v28 }
 0x3f4   : > { %v13279_v55 = vpack.c.bf16 %v7726_v28, %v7726_v28  ;;  %v13280_v10 = vpack.c.bf16 %v7734_v38, %v7734_v38  ;;  %v13282_v22 = vpack.c.bf16 %v7719_v15, %v7719_v15  ;;  %v7843_v25 = vshll.u32 %v13278_v6, 16  ;;  %v8439_v38 = vld [vmem:[#allocation5 + $0xc] sm:$0x2]  ;;  %v8442_v6 = vld [vmem:[#allocation5 + $0x14] sm:$0x2] }
 0x3f5   : > { %v8270_v3 = vrot.slane %v8242_v5, %v14970_v29  ;;  %v7737_v27 = vcombine.high %v7733_v17, %v7733_v17  ;;  %v13281_v35 = vpack.c.bf16 %v7736_v12, %v7736_v12  ;;  %v13283_v8 = vpack.c.bf16 %v7733_v17, %v7733_v17  ;;  %v8445_v5 = vld [vmem:[#allocation5 + $0x1c] sm:$0x2]  ;;  %v2491_v17 = vpop.f32.mrf.mxu1 }
 0x3f6   : > { %v13284_v9 = vpack.c.bf16 %v7735_v52, %v7735_v52  ;;  %v7846_v11 = vshll.u32 %v13279_v55, 16  ;;  %v7849_v1 = vshll.u32 %v13280_v10, 16  ;;  %v7855_v58 = vshll.u32 %v13282_v22, 16  ;;  %v2450_v52 = vpop.f32.mrf.mxu0  ;;  %v8448_v10 = vld [vmem:[#allocation5 + $0x24] sm:$0x2] }
 0x3f7   : > { %v7907_v13 = vsel %vm15054_vm14, %v7843_v25, %v7906_v34  ;;  %v13285_v59 = vpack.c.bf16 %v7737_v27, %v7737_v27  ;;  %v7852_v40 = vshll.u32 %v13281_v35, 16  ;;  %v7858_v41 = vshll.u32 %v13283_v8, 16  ;;  %v8451_v22 = vld [vmem:[#allocation5 + $0x2c] sm:$0x2]  ;;  %v8454_v25 = vld [vmem:[#allocation5 + $0x34] sm:$0x2] }
 0x3f8   : > { %v7861_v63 = vshll.u32 %v13284_v9, 16  ;;  %7908 = vst [vmem:[#allocation5 + $0x44] sm:$0x1] %v7907_v13  ;;  %v7910_v26 = vsel %vm15054_vm14, %v7846_v11, %v7909_v0  ;;  %v7913_v39 = vsel %vm15054_vm14, %v7849_v1, %v7912_v50  ;;  %v7919_v2 = vsel %vm15054_vm14, %v7855_v58, %v7918_v62  ;;  %v8457_v35 = vld [vmem:[#allocation5 + $0x3c] sm:$0x2]  ;;  %v2493_v1 = vpop.f32.mrf.mxu1  ;;  %v2452_v58 = vpop.f32.mrf.mxu0 }
 0x3f9   : > { %v8271_v44 = vcombine.high %v15717_v42, %v15717_v42  ;;  %v7864_v57 = vshll.u32 %v13285_v59, 16  ;;  %7911 = vst [vmem:[#allocation5 + $0x4c] sm:$0x1] %v7910_v26  ;;  %7914 = vst [vmem:[#allocation5 + $0x54] sm:$0x1] %v7913_v39  ;;  %v7916_v47 = vsel %vm15054_vm14, %v7852_v40, %v7915_v20  ;;  %v7922_v4 = vsel %vm15054_vm14, %v7858_v41, %v7921_v49 }
 0x3fa   : > { %7920 = vst [vmem:[#allocation5 + $0x64] sm:$0x1] %v7919_v2  ;;  %v7925_v24 = vsel %vm15054_vm14, %v7861_v63, %v7924_v18  ;;  %7917 = vst [vmem:[#allocation5 + $0x5c] sm:$0x1] %v7916_v47  ;;  %v8272_v46 = vcombine.high %v15725_v51, %v15725_v51  ;;  %v8273_v54 = vcombine.high %v15728_v16, %v15728_v16 }
 0x3fb   : > { %7923 = vst [vmem:[#allocation5 + $0x6c] sm:$0x1] %v7922_v4  ;;  %7926 = vst [vmem:[#allocation5 + $0x74] sm:$0x1] %v7925_v24  ;;  %v8274_v21 = vcombine.high %v8270_v3, %v8270_v3  ;;  %v13302_v45 = vpack.c.bf16 %v15717_v42, %v15717_v42  ;;  %v7928_v43 = vsel %vm15054_vm14, %v7864_v57, %v7927_v31 }
 0x3fc   : > { %v13303_v36 = vpack.c.bf16 %v15728_v16, %v15728_v16  ;;  %v13304_v15 = vpack.c.bf16 %v8271_v44, %v8271_v44  ;;  %v13306_v28 = vpack.c.bf16 %v15725_v51, %v15725_v51  ;;  %7929 = vst [vmem:[#allocation5 + $0x7c] sm:$0x1] %v7928_v43  ;;  %v13305_v12 = vpack.c.bf16 %v8273_v54, %v8273_v54 }
 0x3fd   : > { %v13307_v55 = vpack.c.bf16 %v8270_v3, %v8270_v3  ;;  %v13308_v42 = vpack.c.bf16 %v8272_v46, %v8272_v46  ;;  %v13309_v34 = vpack.c.bf16 %v8274_v21, %v8274_v21  ;;  %v8404_v0 = vrot.slane %v13302_v45, 7 }
 0x3fe   : > { %v8405_v50 = vrot.slane %v13303_v36, 7  ;;  %v8406_v16 = vrot.slane %v13304_v15, 7  ;;  %v8408_v27 = vrot.slane %v13306_v28, 7  ;;  %v8407_v8 = vrot.slane %v13305_v12, 7 }
 0x3ff   : > { %v8409_v51 = vrot.slane %v13307_v55, 7  ;;  %v8410_v9 = vrot.slane %v13308_v42, 7  ;;  %v8411_v20 = vrot.slane %v13309_v34, 7  ;;  %v8437_v62 = vsel %vm15258_vm11, %v8404_v0, %v8436_v56  ;;  %v9576_v55 = vld [vmem:[#allocation5 + $0x4] sm:$0x4] }
 0x400   : > { %v8440_v3 = vsel %vm15258_vm11, %v8405_v50, %v8439_v38  ;;  %v8443_v49 = vsel %vm15258_vm11, %v8406_v16, %v8442_v6  ;;  %v8449_v11 = vsel %vm15258_vm11, %v8408_v27, %v8448_v10  ;;  %8438 = vst [vmem:[#allocation5 + $0x4] sm:$0x2] %v8437_v62  ;;  %v8446_v13 = vsel %vm15258_vm11, %v8407_v8, %v8445_v5  ;;  %v9585_v8 = vld [vmem:[#allocation5 + $0x1c] sm:$0x4] }
 0x401   : > { %8441 = vst [vmem:[#allocation5 + $0xc] sm:$0x2] %v8440_v3  ;;  %8444 = vst [vmem:[#allocation5 + $0x14] sm:$0x2] %v8443_v49  ;;  %v8452_v18 = vsel %vm15258_vm11, %v8409_v51, %v8451_v22  ;;  %v8455_v59 = vsel %vm15258_vm11, %v8410_v9, %v8454_v25  ;;  %v8458_v40 = vsel %vm15258_vm11, %v8411_v20, %v8457_v35  ;;  %v9579_v22 = vld [vmem:[#allocation5 + $0xc] sm:$0x4] }
 0x402   : > { %8450 = vst [vmem:[#allocation5 + $0x24] sm:$0x2] %v8449_v11  ;;  %8447 = vst [vmem:[#allocation5 + $0x1c] sm:$0x2] %v8446_v13  ;;  %v9366_v41 = vcombine.high %v15713_v23, %v15713_v23  ;;  %v9373_v63 = vrot.slane %v15713_v23, %v14970_v29  ;;  %v8748_v26 = vcombine.high %v15720_v30, %v15720_v30  ;;  %v9582_v25 = vld [vmem:[#allocation5 + $0x14] sm:$0x4] }
 0x403   : > { %8453 = vst [vmem:[#allocation5 + $0x2c] sm:$0x2] %v8452_v18  ;;  %8456 = vst [vmem:[#allocation5 + $0x34] sm:$0x2] %v8455_v59  ;;  %v8755_v39 = vrot.slane %v15720_v30, %v14970_v29  ;;  %v15785_v2 = vmul.f32 %v2491_v17, %v14973_v33  ;;  %v15788_v31 = vmul.f32 %v2450_v52, %v14998_v32  ;;  %v9588_v51 = vld [vmem:[#allocation5 + $0x24] sm:$0x4] }
 0x404   : > { %8459 = vst [vmem:[#allocation5 + $0x3c] sm:$0x2] %v8458_v40  ;;  %v15791_v44 = vmul.f32 %v2493_v1, %v14998_v32  ;;  %v15794_v57 = vmul.f32 %v2452_v58, %v14998_v32  ;;  %v9380_v23 = vrot.slane %v9366_v41, %v14970_v29  ;;  %v9381_v47 = vcombine.high %v9373_v63, %v9373_v63  ;;  %v9591_v9 = vld [vmem:[#allocation5 + $0x2c] sm:$0x4]  ;;  %v9594_v11 = vld [vmem:[#allocation5 + $0x34] sm:$0x4] }
 0x405   : > { %v9389_v4 = vrot.slane %v9373_v63, %v14970_v29  ;;  %v8762_v24 = vrot.slane %v8748_v26, %v14970_v29  ;;  %v8763_v30 = vcombine.high %v8755_v39, %v8755_v39  ;;  %v15800_v46 = vrot.slane %v8755_v39, %v14970_v29  ;;  %v9597_v63 = vld [vmem:[#allocation5 + $0x3c] sm:$0x4] }
 0x406   : > { %v9888_v54 = vcombine.high %v15785_v2, %v15785_v2  ;;  %v15806_v21 = vrot.slane %v15785_v2, %v14970_v29  ;;  %v9382_v45 = vcombine.high %v9380_v23, %v9380_v23  ;;  %v9396_v56 = vrot.slane %v9380_v23, %v14970_v29 }
 0x407   : > { %v9403_v43 = vrot.slane %v9381_v47, %v14970_v29  ;;  %v9411_v36 = vcombine.high %v9389_v4, %v9389_v4  ;;  %v13366_v15 = vpack.c.bf16 %v9389_v4, %v9389_v4  ;;  %v8764_v28 = vcombine.high %v8762_v24, %v8762_v24 }
 0x408   : > { %v15811_v38 = vrot.slane %v8762_v24, %v14970_v29  ;;  %v8785_v6 = vrot.slane %v8763_v30, %v14970_v29  ;;  %v9410_v5 = vrot.slane %v9382_v45, %v14970_v29  ;;  %v9412_v17 = vcombine.high %v9396_v56, %v9396_v56 }
 0x409   : > { %v9413_v52 = vcombine.high %v9403_v43, %v9403_v43  ;;  %v13367_v12 = vpack.c.bf16 %v9403_v43, %v9403_v43  ;;  %v13368_v42 = vpack.c.bf16 %v9411_v36, %v9411_v36  ;;  %v13370_v34 = vpack.c.bf16 %v9396_v56, %v9396_v56 }
 0x40a   : > { %v9544_v10 = vrot.slane %v13366_v15, 6  ;;  %v8792_v0 = vrot.slane %v8764_v28, %v14970_v29  ;;  %v9414_v50 = vcombine.high %v9410_v5, %v9410_v5  ;;  %v13371_v27 = vpack.c.bf16 %v9410_v5, %v9410_v5 }
 0x40b   : > { %v13369_v16 = vpack.c.bf16 %v9413_v52, %v9413_v52  ;;  %v13372_v35 = vpack.c.bf16 %v9412_v17, %v9412_v17  ;;  %v9545_v20 = vrot.slane %v13367_v12, 6  ;;  %v9546_v62 = vrot.slane %v13368_v42, 6  ;;  %v9009_v42 = vld [vmem:[#allocation5 + $0xc] sm:$0x2] }
 0x40c   : > { %v9548_v3 = vrot.slane %v13370_v34, 6  ;;  %v9577_v49 = vsel %vm15285_vm12, %v9544_v10, %v9576_v55  ;;  %v13373_v1 = vpack.c.bf16 %v9414_v50, %v9414_v50  ;;  %v9549_v13 = vrot.slane %v13371_v27, 6  ;;  %v9006_v55 = vld [vmem:[#allocation5 + $0x4] sm:$0x2]  ;;  %v9012_v34 = vld [vmem:[#allocation5 + $0x14] sm:$0x2] }
 0x40d   : > { %v9547_v58 = vrot.slane %v13369_v16, 6  ;;  %v9550_v18 = vrot.slane %v13372_v35, 6  ;;  %9578 = vst [vmem:[#allocation5 + $0x4] sm:$0x4] %v9577_v49  ;;  %v9580_v59 = vsel %vm15285_vm12, %v9545_v20, %v9579_v22  ;;  %v9583_v40 = vsel %vm15285_vm12, %v9546_v62, %v9582_v25  ;;  %v9018_v10 = vld [vmem:[#allocation5 + $0x24] sm:$0x2] }
 0x40e   : > { %v9589_v41 = vsel %vm15285_vm12, %v9548_v3, %v9588_v51  ;;  %v8793_v26 = vcombine.high %v15800_v46, %v15800_v46  ;;  %v9551_v39 = vrot.slane %v13373_v1, 6  ;;  %9581 = vst [vmem:[#allocation5 + $0xc] sm:$0x4] %v9580_v59  ;;  %9584 = vst [vmem:[#allocation5 + $0x14] sm:$0x4] %v9583_v40  ;;  %v9592_v47 = vsel %vm15285_vm12, %v9549_v13, %v9591_v9 }
 0x40f   : > { %v9586_v23 = vsel %vm15285_vm12, %v9547_v58, %v9585_v8  ;;  %9590 = vst [vmem:[#allocation5 + $0x24] sm:$0x4] %v9589_v41  ;;  %v9595_v4 = vsel %vm15285_vm12, %v9550_v18, %v9594_v11  ;;  %9593 = vst [vmem:[#allocation5 + $0x2c] sm:$0x4] %v9592_v47  ;;  %v8794_v24 = vcombine.high %v15811_v38, %v15811_v38  ;;  %v9015_v16 = vld [vmem:[#allocation5 + $0x1c] sm:$0x2] }
 0x410   : > { %9587 = vst [vmem:[#allocation5 + $0x1c] sm:$0x4] %v9586_v23  ;;  %9596 = vst [vmem:[#allocation5 + $0x34] sm:$0x4] %v9595_v4  ;;  %v8795_v30 = vcombine.high %v8785_v6, %v8785_v6  ;;  %v8796_v45 = vcombine.high %v8792_v0, %v8792_v0  ;;  %v13334_v56 = vpack.c.bf16 %v15800_v46, %v15800_v46  ;;  %v9021_v27 = vld [vmem:[#allocation5 + $0x2c] sm:$0x2] }
 0x411   : > { %v9598_v43 = vsel %vm15285_vm12, %v9551_v39, %v9597_v63  ;;  %v13335_v36 = vpack.c.bf16 %v8785_v6, %v8785_v6  ;;  %v13336_v15 = vpack.c.bf16 %v8793_v26, %v8793_v26  ;;  %v13338_v28 = vpack.c.bf16 %v15811_v38, %v15811_v38  ;;  %v9024_v38 = vld [vmem:[#allocation5 + $0x34] sm:$0x2]  ;;  %v9027_v3 = vld [vmem:[#allocation5 + $0x3c] sm:$0x2] }
 0x412   : > { %9599 = vst [vmem:[#allocation5 + $0x3c] sm:$0x4] %v9598_v43  ;;  %v13337_v5 = vpack.c.bf16 %v8795_v30, %v8795_v30  ;;  %v13339_v17 = vpack.c.bf16 %v8792_v0, %v8792_v0  ;;  %v13340_v52 = vpack.c.bf16 %v8794_v24, %v8794_v24  ;;  %v13341_v12 = vpack.c.bf16 %v8796_v45, %v8796_v45 }
 0x413   : > { %v8927_v22 = vshll.u32 %v13334_v56, 16  ;;  %v8931_v25 = vshll.u32 %v13335_v36, 16  ;;  %v8935_v46 = vshll.u32 %v13336_v15, 16  ;;  %v8943_v50 = vshll.u32 %v13338_v28, 16 }
 0x414   : > { %v8939_v6 = vshll.u32 %v13337_v5, 16  ;;  %v8947_v35 = vshll.u32 %v13339_v17, 16  ;;  %v8951_v8 = vshll.u32 %v13340_v52, 16  ;;  %v8955_v51 = vshll.u32 %v13341_v12, 16 }
 0x415   : > { %v8929_v9 = vrot.slane %v8927_v22, 7  ;;  %v8933_v20 = vrot.slane %v8931_v25, 7  ;;  %v8937_v0 = vrot.slane %v8935_v46, 7  ;;  %v8945_v62 = vrot.slane %v8943_v50, 7 }
 0x416   : > { %v8941_v49 = vrot.slane %v8939_v6, 7  ;;  %v8949_v11 = vrot.slane %v8947_v35, 7  ;;  %v8953_v1 = vrot.slane %v8951_v8, 7  ;;  %v8957_v58 = vrot.slane %v8955_v51, 7  ;;  %v10149_v6 = vld [vmem:[#allocation5 + $0xc] sm:$0x4] }
 0x417   : > { %v9007_v13 = vsel %vm15318_vm10, %v8929_v9, %v9006_v55  ;;  %v9010_v18 = vsel %vm15318_vm10, %v8933_v20, %v9009_v42  ;;  %v9013_v59 = vsel %vm15318_vm10, %v8937_v0, %v9012_v34  ;;  %v9019_v40 = vsel %vm15318_vm10, %v8945_v62, %v9018_v10  ;;  %v10152_v35 = vld [vmem:[#allocation5 + $0x14] sm:$0x4]  ;;  %v10155_v20 = vld [vmem:[#allocation5 + $0x1c] sm:$0x4]  ;;  %v10158_v0 = vld [vmem:[#allocation5 + $0x24] sm:$0x4] }
 0x418   : > { %9008 = vst [vmem:[#allocation5 + $0x4] sm:$0x2] %v9007_v13  ;;  %9011 = vst [vmem:[#allocation5 + $0xc] sm:$0x2] %v9010_v18  ;;  %v9016_v41 = vsel %vm15318_vm10, %v8941_v49, %v9015_v16  ;;  %v9022_v63 = vsel %vm15318_vm10, %v8949_v11, %v9021_v27  ;;  %v9025_v26 = vsel %vm15318_vm10, %v8953_v1, %v9024_v38  ;;  %v10146_v27 = vld [vmem:[#allocation5 + $0x4] sm:$0x4] }
 0x419   : > { %9014 = vst [vmem:[#allocation5 + $0x14] sm:$0x2] %v9013_v59  ;;  %9020 = vst [vmem:[#allocation5 + $0x24] sm:$0x2] %v9019_v40  ;;  %v9028_v39 = vsel %vm15318_vm10, %v8957_v58, %v9027_v3  ;;  %v9902_v23 = vrot.slane %v9888_v54, %v14970_v29  ;;  %v9903_v47 = vcombine.high %v15806_v21, %v15806_v21  ;;  %v10161_v1 = vld [vmem:[#allocation5 + $0x2c] sm:$0x4] }
 0x41a   : > { %9017 = vst [vmem:[#allocation5 + $0x1c] sm:$0x2] %v9016_v41  ;;  %9023 = vst [vmem:[#allocation5 + $0x2c] sm:$0x2] %v9022_v63  ;;  %v9911_v4 = vrot.slane %v15806_v21, %v14970_v29  ;;  %v8275_v24 = vcombine.high %v15788_v31, %v15788_v31  ;;  %v15868_v30 = vrot.slane %v15788_v31, %v14970_v29  ;;  %v10164_v40 = vld [vmem:[#allocation5 + $0x34] sm:$0x4] }
 0x41b   : > { %9026 = vst [vmem:[#allocation5 + $0x34] sm:$0x2] %v9025_v26  ;;  %9029 = vst [vmem:[#allocation5 + $0x3c] sm:$0x2] %v9028_v39  ;;  %v9415_v45 = vcombine.high %v15791_v44, %v15791_v44  ;;  %v15874_v2 = vrot.slane %v15791_v44, %v14970_v29  ;;  %v8797_v54 = vcombine.high %v15794_v57, %v15794_v57  ;;  %v8478_v44 = vld [vmem:[#allocation5 + $0x74] sm:$0x2] }
 0x41c   : > { %v9904_v56 = vcombine.high %v9902_v23, %v9902_v23  ;;  %v9918_v21 = vrot.slane %v9902_v23, %v14970_v29  ;;  %v9925_v43 = vrot.slane %v9903_v47, %v14970_v29  ;;  %v9933_v36 = vcombine.high %v9911_v4, %v9911_v4 }
 0x41d   : > { %v13398_v15 = vpack.c.bf16 %v9911_v4, %v9911_v4  ;;  %v8289_v31 = vrot.slane %v8275_v24, %v14970_v29  ;;  %v8290_v28 = vcombine.high %v15868_v30, %v15868_v30  ;;  %v15885_v5 = vrot.slane %v15868_v30, %v14970_v29  ;;  %v10167_v24 = vld [vmem:[#allocation5 + $0x3c] sm:$0x4] }
 0x41e   : > { %v9932_v17 = vrot.slane %v9904_v56, %v14970_v29  ;;  %v9934_v52 = vcombine.high %v9918_v21, %v9918_v21  ;;  %v9935_v12 = vcombine.high %v9925_v43, %v9925_v43  ;;  %v13399_v55 = vpack.c.bf16 %v9925_v43, %v9925_v43 }
 0x41f   : > { %v13400_v42 = vpack.c.bf16 %v9933_v36, %v9933_v36  ;;  %v13402_v34 = vpack.c.bf16 %v9918_v21, %v9918_v21  ;;  %v10067_v10 = vshll.u32 %v13398_v15, 16  ;;  %v8291_v22 = vcombine.high %v8289_v31, %v8289_v31 }
 0x420   : > { %v9936_v25 = vcombine.high %v9932_v17, %v9932_v17  ;;  %v13401_v46 = vpack.c.bf16 %v9935_v12, %v9935_v12  ;;  %v13403_v50 = vpack.c.bf16 %v9932_v17, %v9932_v17  ;;  %v13404_v16 = vpack.c.bf16 %v9934_v52, %v9934_v52 }
 0x421   : > { %v10069_v8 = vrot.slane %v10067_v10, 6  ;;  %v10071_v51 = vshll.u32 %v13399_v55, 16  ;;  %v10075_v38 = vshll.u32 %v13400_v42, 16  ;;  %v10083_v9 = vshll.u32 %v13402_v34, 16 }
 0x422   : > { %v13405_v62 = vpack.c.bf16 %v9936_v25, %v9936_v25  ;;  %v10079_v3 = vshll.u32 %v13401_v46, 16  ;;  %v10087_v49 = vshll.u32 %v13403_v50, 16  ;;  %v10091_v11 = vshll.u32 %v13404_v16, 16  ;;  %v8460_v46 = vld [vmem:[#allocation5 + $0x44] sm:$0x2] }
 0x423   : > { %v10073_v58 = vrot.slane %v10071_v51, 6  ;;  %v10077_v13 = vrot.slane %v10075_v38, 6  ;;  %v10085_v18 = vrot.slane %v10083_v9, 6  ;;  %v10147_v59 = vsel %vm15349_vm15, %v10069_v8, %v10146_v27  ;;  %v8472_v50 = vld [vmem:[#allocation5 + $0x64] sm:$0x2] }
 0x424   : > { %v10081_v41 = vrot.slane %v10079_v3, 6  ;;  %v10089_v63 = vrot.slane %v10087_v49, 6  ;;  %v10093_v26 = vrot.slane %v10091_v11, 6  ;;  %v10095_v39 = vshll.u32 %v13405_v62, 16  ;;  %10148 = vst [vmem:[#allocation5 + $0x4] sm:$0x4] %v10147_v59 }
 0x425   : > { %v10150_v23 = vsel %vm15349_vm15, %v10073_v58, %v10149_v6  ;;  %v10153_v47 = vsel %vm15349_vm15, %v10077_v13, %v10152_v35  ;;  %v10159_v4 = vsel %vm15349_vm15, %v10085_v18, %v10158_v0  ;;  %v8305_v30 = vrot.slane %v8289_v31, %v14970_v29  ;;  %v8463_v8 = vld [vmem:[#allocation5 + $0x4c] sm:$0x2]  ;;  %v8466_v51 = vld [vmem:[#allocation5 + $0x54] sm:$0x2]  ;;  %v8469_v49 = vld [vmem:[#allocation5 + $0x5c] sm:$0x2] }
 0x426   : > { %v10097_v56 = vrot.slane %v10095_v39, 6  ;;  %10151 = vst [vmem:[#allocation5 + $0xc] sm:$0x4] %v10150_v23  ;;  %10154 = vst [vmem:[#allocation5 + $0x14] sm:$0x4] %v10153_v47  ;;  %v10156_v21 = vsel %vm15349_vm15, %v10081_v41, %v10155_v20  ;;  %v10162_v43 = vsel %vm15349_vm15, %v10089_v63, %v10161_v1  ;;  %v10165_v36 = vsel %vm15349_vm15, %v10093_v26, %v10164_v40 }
 0x427   : > { %10160 = vst [vmem:[#allocation5 + $0x24] sm:$0x4] %v10159_v4  ;;  %10157 = vst [vmem:[#allocation5 + $0x1c] sm:$0x4] %v10156_v21  ;;  %v8312_v15 = vrot.slane %v8290_v28, %v14970_v29  ;;  %v8319_v31 = vrot.slane %v8291_v22, %v14970_v29  ;;  %v8320_v17 = vcombine.high %v15885_v5, %v15885_v5  ;;  %v8475_v0 = vld [vmem:[#allocation5 + $0x6c] sm:$0x2] }
 0x428   : > { %10163 = vst [vmem:[#allocation5 + $0x2c] sm:$0x4] %v10162_v43  ;;  %10166 = vst [vmem:[#allocation5 + $0x34] sm:$0x4] %v10165_v36  ;;  %v8321_v52 = vcombine.high %v8305_v30, %v8305_v30  ;;  %v10168_v12 = vsel %vm15349_vm15, %v10097_v56, %v10167_v24  ;;  %v13310_v55 = vpack.c.bf16 %v15885_v5, %v15885_v5  ;;  %v8481_v1 = vld [vmem:[#allocation5 + $0x7c] sm:$0x2] }
 0x429   : > { %v13314_v42 = vpack.c.bf16 %v8305_v30, %v8305_v30  ;;  %v9429_v34 = vrot.slane %v9415_v45, %v14970_v29  ;;  %10169 = vst [vmem:[#allocation5 + $0x3c] sm:$0x4] %v10168_v12  ;;  %v8322_v28 = vcombine.high %v8312_v15, %v8312_v15  ;;  %v8323_v10 = vcombine.high %v8319_v31, %v8319_v31 }
 0x42a   : > { %v13311_v22 = vpack.c.bf16 %v8312_v15, %v8312_v15  ;;  %v13312_v25 = vpack.c.bf16 %v8320_v17, %v8320_v17  ;;  %v13315_v16 = vpack.c.bf16 %v8319_v31, %v8319_v31  ;;  %v13316_v27 = vpack.c.bf16 %v8321_v52, %v8321_v52 }
 0x42b   : > { %v8412_v6 = vrot.slane %v13310_v55, 7  ;;  %v8416_v35 = vrot.slane %v13314_v42, 7  ;;  %v13313_v5 = vpack.c.bf16 %v8322_v28, %v8322_v28  ;;  %v13317_v38 = vpack.c.bf16 %v8323_v10, %v8323_v10  ;;  %v9600_v55 = vld [vmem:[#allocation5 + $0x44] sm:$0x4] }
 0x42c   : > { %v8413_v9 = vrot.slane %v13311_v22, 7  ;;  %v8414_v20 = vrot.slane %v13312_v25, 7  ;;  %v8417_v45 = vrot.slane %v13315_v16, 7  ;;  %v8418_v62 = vrot.slane %v13316_v27, 7  ;;  %v9612_v42 = vld [vmem:[#allocation5 + $0x64] sm:$0x4] }
 0x42d   : > { %v8461_v3 = vsel %vm15258_vm11, %v8412_v6, %v8460_v46  ;;  %v8473_v11 = vsel %vm15258_vm11, %v8416_v35, %v8472_v50  ;;  %v8415_v58 = vrot.slane %v13313_v5, 7  ;;  %v8419_v13 = vrot.slane %v13317_v38, 7  ;;  %v9603_v25 = vld [vmem:[#allocation5 + $0x4c] sm:$0x4]  ;;  %v9606_v27 = vld [vmem:[#allocation5 + $0x54] sm:$0x4] }
 0x42e   : > { %8462 = vst [vmem:[#allocation5 + $0x44] sm:$0x2] %v8461_v3  ;;  %v8464_v18 = vsel %vm15258_vm11, %v8413_v9, %v8463_v8  ;;  %v8467_v59 = vsel %vm15258_vm11, %v8414_v20, %v8466_v51  ;;  %8474 = vst [vmem:[#allocation5 + $0x64] sm:$0x2] %v8473_v11  ;;  %v8476_v40 = vsel %vm15258_vm11, %v8417_v45, %v8475_v0  ;;  %v9615_v46 = vld [vmem:[#allocation5 + $0x6c] sm:$0x4]  ;;  %v2532_v3 = vpop.f32.mrf.mxu0 }
 0x42f   : > { %8465 = vst [vmem:[#allocation5 + $0x4c] sm:$0x2] %v8464_v18  ;;  %8468 = vst [vmem:[#allocation5 + $0x54] sm:$0x2] %v8467_v59  ;;  %v8479_v41 = vsel %vm15258_vm11, %v8418_v62, %v8478_v44  ;;  %v9430_v63 = vcombine.high %v15874_v2, %v15874_v2  ;;  %v9431_v26 = vcombine.high %v9429_v34, %v9429_v34  ;;  %v9618_v6 = vld [vmem:[#allocation5 + $0x74] sm:$0x4]  ;;  %v2495_v62 = vpop.f32.mrf.mxu1 }
 0x430   : > { %v8470_v39 = vsel %vm15258_vm11, %v8415_v58, %v8469_v49  ;;  %8477 = vst [vmem:[#allocation5 + $0x6c] sm:$0x2] %v8476_v40  ;;  %8480 = vst [vmem:[#allocation5 + $0x74] sm:$0x2] %v8479_v41  ;;  %v8482_v23 = vsel %vm15258_vm11, %v8419_v13, %v8481_v1  ;;  %v9438_v47 = vrot.slane %v15874_v2, %v14970_v29  ;;  %v9609_v5 = vld [vmem:[#allocation5 + $0x5c] sm:$0x4] }
 0x431   : > { %v9445_v4 = vrot.slane %v9429_v34, %v14970_v29  ;;  %8471 = vst [vmem:[#allocation5 + $0x5c] sm:$0x2] %v8470_v39  ;;  %8483 = vst [vmem:[#allocation5 + $0x7c] sm:$0x2] %v8482_v23  ;;  %v9452_v24 = vrot.slane %v9430_v63, %v14970_v29  ;;  %v9459_v30 = vrot.slane %v9431_v26, %v14970_v29  ;;  %v9621_v9 = vld [vmem:[#allocation5 + $0x7c] sm:$0x4] }
 0x432   : > { %v8804_v56 = vrot.slane %v15794_v57, %v14970_v29  ;;  %v8811_v21 = vrot.slane %v8797_v54, %v14970_v29  ;;  %v9460_v43 = vcombine.high %v9438_v47, %v9438_v47  ;;  %v13374_v15 = vpack.c.bf16 %v9438_v47, %v9438_v47 }
 0x433   : > { %v9461_v36 = vcombine.high %v9445_v4, %v9445_v4  ;;  %v13378_v2 = vpack.c.bf16 %v9445_v4, %v9445_v4  ;;  %v9462_v31 = vcombine.high %v9452_v24, %v9452_v24  ;;  %v9463_v17 = vcombine.high %v9459_v30, %v9459_v30 }
 0x434   : > { %v13375_v52 = vpack.c.bf16 %v9452_v24, %v9452_v24  ;;  %v13379_v12 = vpack.c.bf16 %v9459_v30, %v9459_v30  ;;  %v13376_v34 = vpack.c.bf16 %v9460_v43, %v9460_v43  ;;  %v9552_v10 = vrot.slane %v13374_v15, 6 }
 0x435   : > { %v13380_v28 = vpack.c.bf16 %v9461_v36, %v9461_v36  ;;  %v9556_v22 = vrot.slane %v13378_v2, 6  ;;  %v13377_v50 = vpack.c.bf16 %v9462_v31, %v9462_v31  ;;  %v13381_v16 = vpack.c.bf16 %v9463_v17, %v9463_v17  ;;  %v9030_v17 = vld [vmem:[#allocation5 + $0x44] sm:$0x2] }
 0x436   : > { %v9553_v57 = vrot.slane %v13375_v52, 6  ;;  %v9557_v54 = vrot.slane %v13379_v12, 6  ;;  %v9554_v35 = vrot.slane %v13376_v34, 6  ;;  %v9601_v51 = vsel %vm15285_vm12, %v9552_v10, %v9600_v55  ;;  %v9042_v52 = vld [vmem:[#allocation5 + $0x64] sm:$0x2] }
 0x437   : > { %v9558_v8 = vrot.slane %v13380_v28, 6  ;;  %v9613_v38 = vsel %vm15285_vm12, %v9556_v22, %v9612_v42  ;;  %v9555_v20 = vrot.slane %v13377_v50, 6  ;;  %v9559_v0 = vrot.slane %v13381_v16, 6  ;;  %9602 = vst [vmem:[#allocation5 + $0x44] sm:$0x4] %v9601_v51 }
 0x438   : > { %v9604_v44 = vsel %vm15285_vm12, %v9553_v57, %v9603_v25  ;;  %9614 = vst [vmem:[#allocation5 + $0x64] sm:$0x4] %v9613_v38  ;;  %v9616_v45 = vsel %vm15285_vm12, %v9557_v54, %v9615_v46  ;;  %v9607_v49 = vsel %vm15285_vm12, %v9554_v35, %v9606_v27  ;;  %v8812_v1 = vcombine.high %v8804_v56, %v8804_v56  ;;  %v9033_v28 = vld [vmem:[#allocation5 + $0x4c] sm:$0x2]  ;;  %v9036_v10 = vld [vmem:[#allocation5 + $0x54] sm:$0x2] }
 0x439   : > { %9605 = vst [vmem:[#allocation5 + $0x4c] sm:$0x4] %v9604_v44  ;;  %9617 = vst [vmem:[#allocation5 + $0x6c] sm:$0x4] %v9616_v45  ;;  %v9619_v11 = vsel %vm15285_vm12, %v9558_v8, %v9618_v6  ;;  %v8813_v58 = vcombine.high %v8811_v21, %v8811_v21  ;;  %v9610_v13 = vsel %vm15285_vm12, %v9555_v20, %v9609_v5  ;;  %v9045_v16 = vld [vmem:[#allocation5 + $0x6c] sm:$0x2] }
 0x43a   : > { %9608 = vst [vmem:[#allocation5 + $0x54] sm:$0x4] %v9607_v49  ;;  %9620 = vst [vmem:[#allocation5 + $0x74] sm:$0x4] %v9619_v11  ;;  %v9622_v18 = vsel %vm15285_vm12, %v9559_v0, %v9621_v9  ;;  %v8820_v59 = vrot.slane %v8804_v56, %v14970_v29  ;;  %v8827_v40 = vrot.slane %v8811_v21, %v14970_v29  ;;  %v9048_v35 = vld [vmem:[#allocation5 + $0x74] sm:$0x2] }
 0x43b   : > { %9611 = vst [vmem:[#allocation5 + $0x5c] sm:$0x4] %v9610_v13  ;;  %9623 = vst [vmem:[#allocation5 + $0x7c] sm:$0x4] %v9622_v18  ;;  %v8834_v41 = vrot.slane %v8812_v1, %v14970_v29  ;;  %v8841_v63 = vrot.slane %v8813_v58, %v14970_v29  ;;  %v9885_v26 = vmul.f32 %v2495_v62, %v14998_v32  ;;  %v9039_v38 = vld [vmem:[#allocation5 + $0x5c] sm:$0x2] }
 0x43c   : > { %v15966_v39 = vmul.f32 %v2532_v3, %v14973_v33  ;;  %v8842_v23 = vcombine.high %v8820_v59, %v8820_v59  ;;  %v8843_v47 = vcombine.high %v8827_v40, %v8827_v40  ;;  %v13342_v4 = vpack.c.bf16 %v8820_v59, %v8820_v59  ;;  %v9051_v20 = vld [vmem:[#allocation5 + $0x7c] sm:$0x2]  ;;  %v15976_v3 = vpop.f32.mrf.mxu1 }
 0x43d   : > { %v13346_v24 = vpack.c.bf16 %v8827_v40, %v8827_v40  ;;  %v8844_v30 = vcombine.high %v8834_v41, %v8834_v41  ;;  %v8845_v43 = vcombine.high %v8841_v63, %v8841_v63  ;;  %v13343_v56 = vpack.c.bf16 %v8834_v41, %v8834_v41 }
 0x43e   : > { %v13347_v36 = vpack.c.bf16 %v8841_v63, %v8841_v63  ;;  %v13344_v21 = vpack.c.bf16 %v8842_v23, %v8842_v23  ;;  %v13348_v15 = vpack.c.bf16 %v8843_v47, %v8843_v47  ;;  %v8959_v2 = vshll.u32 %v13342_v4, 16 }
 0x43f   : > { %v8975_v31 = vshll.u32 %v13346_v24, 16  ;;  %v13345_v12 = vpack.c.bf16 %v8844_v30, %v8844_v30  ;;  %v13349_v55 = vpack.c.bf16 %v8845_v43, %v8845_v43  ;;  %v8963_v42 = vshll.u32 %v13343_v56, 16 }
 0x440   : > { %v8979_v34 = vshll.u32 %v13347_v36, 16  ;;  %v8961_v22 = vrot.slane %v8959_v2, 7  ;;  %v8967_v25 = vshll.u32 %v13344_v21, 16  ;;  %v8983_v50 = vshll.u32 %v13348_v15, 16 }
 0x441   : > { %v8977_v46 = vrot.slane %v8975_v31, 7  ;;  %v8965_v57 = vrot.slane %v8963_v42, 7  ;;  %v8971_v54 = vshll.u32 %v13345_v12, 16  ;;  %v8987_v6 = vshll.u32 %v13349_v55, 16 }
 0x442   : > { %v8981_v27 = vrot.slane %v8979_v34, 7  ;;  %v8969_v8 = vrot.slane %v8967_v25, 7  ;;  %v8985_v51 = vrot.slane %v8983_v50, 7  ;;  %v9031_v5 = vsel %vm15318_vm10, %v8961_v22, %v9030_v17 }
 0x443   : > { %v9043_v9 = vsel %vm15318_vm10, %v8977_v46, %v9042_v52  ;;  %v8973_v0 = vrot.slane %v8971_v54, 7  ;;  %v8989_v44 = vrot.slane %v8987_v6, 7  ;;  %9032 = vst [vmem:[#allocation5 + $0x44] sm:$0x2] %v9031_v5  ;;  %v9034_v45 = vsel %vm15318_vm10, %v8965_v57, %v9033_v28  ;;  %v10173_v57 = vld [vmem:[#allocation5 + $0x4c] sm:$0x4] }
 0x444   : > { %9044 = vst [vmem:[#allocation5 + $0x64] sm:$0x2] %v9043_v9  ;;  %v9046_v62 = vsel %vm15318_vm10, %v8981_v27, %v9045_v16  ;;  %9035 = vst [vmem:[#allocation5 + $0x4c] sm:$0x2] %v9034_v45  ;;  %v9037_v49 = vsel %vm15318_vm10, %v8969_v8, %v9036_v10  ;;  %v9049_v11 = vsel %vm15318_vm10, %v8985_v51, %v9048_v35  ;;  %v10170_v10 = vld [vmem:[#allocation5 + $0x44] sm:$0x4] }
 0x445   : > { %9047 = vst [vmem:[#allocation5 + $0x6c] sm:$0x2] %v9046_v62  ;;  %v9937_v1 = vcombine.high %v9885_v26, %v9885_v26  ;;  %v9944_v58 = vrot.slane %v9885_v26, %v14970_v29  ;;  %9038 = vst [vmem:[#allocation5 + $0x54] sm:$0x2] %v9037_v49  ;;  %v9040_v13 = vsel %vm15318_vm10, %v8973_v0, %v9039_v38  ;;  %v10176_v54 = vld [vmem:[#allocation5 + $0x54] sm:$0x4] }
 0x446   : > { %9050 = vst [vmem:[#allocation5 + $0x74] sm:$0x2] %v9049_v11  ;;  %v9052_v18 = vsel %vm15318_vm10, %v8989_v44, %v9051_v20  ;;  %v10506_v59 = vcombine.high %v15966_v39, %v15966_v39  ;;  %v10513_v40 = vrot.slane %v15966_v39, %v14970_v29  ;;  %9041 = vst [vmem:[#allocation5 + $0x5c] sm:$0x2] %v9040_v13  ;;  %v10182_v27 = vld [vmem:[#allocation5 + $0x64] sm:$0x4] }
 0x447   : > { %9053 = vst [vmem:[#allocation5 + $0x7c] sm:$0x2] %v9052_v18  ;;  %v9951_v41 = vrot.slane %v9937_v1, %v14970_v29  ;;  %v9952_v63 = vcombine.high %v9944_v58, %v9944_v58  ;;  %v9960_v26 = vrot.slane %v9944_v58, %v14970_v29  ;;  %v3073_v23 = vcombine.high %v15976_v3, %v15976_v3  ;;  %v10179_v5 = vld [vmem:[#allocation5 + $0x5c] sm:$0x4]  ;;  %v10185_v44 = vld [vmem:[#allocation5 + $0x6c] sm:$0x4] }
 0x448   : > { %v10520_v47 = vrot.slane %v10506_v59, %v14970_v29  ;;  %v10521_v4 = vcombine.high %v10513_v40, %v10513_v40  ;;  %v15997_v24 = vrot.slane %v10513_v40, %v14970_v29  ;;  %v16001_v30 = vrot.slane %v15976_v3, %v14970_v29  ;;  %v10188_v1 = vld [vmem:[#allocation5 + $0x74] sm:$0x4] }
 0x449   : > { %v9953_v39 = vcombine.high %v9951_v41, %v9951_v41  ;;  %v9967_v43 = vrot.slane %v9951_v41, %v14970_v29  ;;  %v9974_v56 = vrot.slane %v9952_v63, %v14970_v29  ;;  %v9982_v36 = vcombine.high %v9960_v26, %v9960_v26 }
 0x44a   : > { %v13406_v21 = vpack.c.bf16 %v9960_v26, %v9960_v26  ;;  %v10522_v15 = vcombine.high %v10520_v47, %v10520_v47  ;;  %v16006_v2 = vrot.slane %v10520_v47, %v14970_v29  ;;  %v16009_v31 = vrot.slane %v10521_v4, %v14970_v29  ;;  %v10191_v26 = vld [vmem:[#allocation5 + $0x7c] sm:$0x4] }
 0x44b   : > { %v9981_v17 = vrot.slane %v9953_v39, %v14970_v29  ;;  %v9983_v52 = vcombine.high %v9967_v43, %v9967_v43  ;;  %v9984_v12 = vcombine.high %v9974_v56, %v9974_v56  ;;  %v13407_v55 = vpack.c.bf16 %v9974_v56, %v9974_v56 }
 0x44c   : > { %v13408_v42 = vpack.c.bf16 %v9982_v36, %v9982_v36  ;;  %v13410_v34 = vpack.c.bf16 %v9967_v43, %v9967_v43  ;;  %v10099_v28 = vshll.u32 %v13406_v21, 16  ;;  %v16013_v22 = vrot.slane %v10522_v15, %v14970_v29 }
 0x44d   : > { %v9985_v25 = vcombine.high %v9981_v17, %v9981_v17  ;;  %v13409_v46 = vpack.c.bf16 %v9984_v12, %v9984_v12  ;;  %v13411_v50 = vpack.c.bf16 %v9981_v17, %v9981_v17  ;;  %v13412_v16 = vpack.c.bf16 %v9983_v52, %v9983_v52  ;;  %v10716_v52 = vld [vmem:[#allocation5 + $0x4] sm:$0x8] }
 0x44e   : > { %v10101_v6 = vrot.slane %v10099_v28, 6  ;;  %v10103_v35 = vshll.u32 %v13407_v55, 16  ;;  %v10107_v8 = vshll.u32 %v13408_v42, 16  ;;  %v10115_v51 = vshll.u32 %v13410_v34, 16  ;;  %v10719_v28 = vld [vmem:[#allocation5 + $0xc] sm:$0x8] }
 0x44f   : > { %v13413_v38 = vpack.c.bf16 %v9985_v25, %v9985_v25  ;;  %v10111_v9 = vshll.u32 %v13409_v46, 16  ;;  %v10119_v20 = vshll.u32 %v13411_v50, 16  ;;  %v10123_v0 = vshll.u32 %v13412_v16, 16  ;;  %v10725_v25 = vld [vmem:[#allocation5 + $0x1c] sm:$0x8]  ;;  %v2534_v46 = vpop.f32.mrf.mxu0  ;;  %v2578_v50 = vpop.f32.mrf.mxu1 }
 0x450   : > { %v10105_v45 = vrot.slane %v10103_v35, 6  ;;  %v10109_v62 = vrot.slane %v10107_v8, 6  ;;  %v10117_v49 = vrot.slane %v10115_v51, 6  ;;  %v10171_v11 = vsel %vm15349_vm15, %v10101_v6, %v10170_v10  ;;  %v10722_v10 = vld [vmem:[#allocation5 + $0x14] sm:$0x8] }
 0x451   : > { %v10113_v58 = vrot.slane %v10111_v9, 6  ;;  %v10121_v13 = vrot.slane %v10119_v20, 6  ;;  %v10125_v18 = vrot.slane %v10123_v0, 6  ;;  %v10127_v59 = vshll.u32 %v13413_v38, 16  ;;  %10172 = vst [vmem:[#allocation5 + $0x44] sm:$0x4] %v10171_v11  ;;  %v16055_v11 = vpop.f32.mrf.mxu1 }
 0x452   : > { %v10174_v40 = vsel %vm15349_vm15, %v10105_v45, %v10173_v57  ;;  %v10177_v41 = vsel %vm15349_vm15, %v10109_v62, %v10176_v54  ;;  %v10183_v63 = vsel %vm15349_vm15, %v10117_v49, %v10182_v27  ;;  %v10551_v47 = vcombine.high %v15997_v24, %v15997_v24  ;;  %v10728_v27 = vld [vmem:[#allocation5 + $0x24] sm:$0x8]  ;;  %v10731_v6 = vld [vmem:[#allocation5 + $0x2c] sm:$0x8]  ;;  %v10734_v35 = vld [vmem:[#allocation5 + $0x34] sm:$0x8]  ;;  %v2536_v49 = vpop.f32.mrf.mxu0 }
 0x453   : > { %v10129_v4 = vrot.slane %v10127_v59, 6  ;;  %10175 = vst [vmem:[#allocation5 + $0x4c] sm:$0x4] %v10174_v40  ;;  %10178 = vst [vmem:[#allocation5 + $0x54] sm:$0x4] %v10177_v41  ;;  %v10180_v39 = vsel %vm15349_vm15, %v10113_v58, %v10179_v5  ;;  %v10186_v43 = vsel %vm15349_vm15, %v10121_v13, %v10185_v44  ;;  %v10189_v56 = vsel %vm15349_vm15, %v10125_v18, %v10188_v1 }
 0x454   : > { %10184 = vst [vmem:[#allocation5 + $0x64] sm:$0x4] %v10183_v63  ;;  %10181 = vst [vmem:[#allocation5 + $0x5c] sm:$0x4] %v10180_v39  ;;  %v10552_v36 = vcombine.high %v16006_v2, %v16006_v2  ;;  %v10553_v21 = vcombine.high %v16009_v31, %v16009_v31  ;;  %v10554_v15 = vcombine.high %v16013_v22, %v16013_v22 }
 0x455   : > { %10187 = vst [vmem:[#allocation5 + $0x6c] sm:$0x4] %v10186_v43  ;;  %10190 = vst [vmem:[#allocation5 + $0x74] sm:$0x4] %v10189_v56  ;;  %v13430_v17 = vpack.c.bf16 %v15997_v24, %v15997_v24  ;;  %v10192_v12 = vsel %vm15349_vm15, %v10129_v4, %v10191_v26  ;;  %v13431_v55 = vpack.c.bf16 %v16009_v31, %v16009_v31 }
 0x456   : > { %v13432_v42 = vpack.c.bf16 %v10551_v47, %v10551_v47  ;;  %v13434_v34 = vpack.c.bf16 %v16006_v2, %v16006_v2  ;;  %10193 = vst [vmem:[#allocation5 + $0x7c] sm:$0x4] %v10192_v12  ;;  %v13433_v16 = vpack.c.bf16 %v10553_v21, %v10553_v21  ;;  %v13435_v24 = vpack.c.bf16 %v16013_v22, %v16013_v22  ;;  %v10737_v2 = vld [vmem:[#allocation5 + $0x3c] sm:$0x8] }
 0x457   : > { %v13436_v57 = vpack.c.bf16 %v10552_v36, %v10552_v36  ;;  %v13437_v54 = vpack.c.bf16 %v10554_v15, %v10554_v15  ;;  %v10684_v31 = vrot.slane %v13430_v17, 5  ;;  %v10685_v8 = vrot.slane %v13431_v55, 5  ;;  %v3203_v36 = vld [vmem:[#allocation6] sm:$0x1] }
 0x458   : > { %v10686_v51 = vrot.slane %v13432_v42, 5  ;;  %v10688_v5 = vrot.slane %v13434_v34, 5  ;;  %v10687_v38 = vrot.slane %v13433_v16, 5  ;;  %v10689_v9 = vrot.slane %v13435_v24, 5  ;;  %v3206_v42 = vld [vmem:[#allocation6 + $0x8] sm:$0x1] }
 0x459   : > { %v10690_v20 = vrot.slane %v13436_v57, 5  ;;  %v10691_v0 = vrot.slane %v13437_v54, 5  ;;  %v10717_v44 = vsel %vm15497_vm7, %v10684_v31, %v10716_v52  ;;  %v10720_v22 = vsel %vm15497_vm7, %v10685_v8, %v10719_v28  ;;  %v3209_v34 = vld [vmem:[#allocation6 + $0x10] sm:$0x1]  ;;  %v3215_v28 = vld [vmem:[#allocation6 + $0x20] sm:$0x1] }
 0x45a   : > { %v10723_v45 = vsel %vm15497_vm7, %v10686_v51, %v10722_v10  ;;  %v10729_v62 = vsel %vm15497_vm7, %v10688_v5, %v10728_v27  ;;  %10718 = vst [vmem:[#allocation5 + $0x4] sm:$0x8] %v10717_v44  ;;  %10721 = vst [vmem:[#allocation5 + $0xc] sm:$0x8] %v10720_v22  ;;  %v10726_v1 = vsel %vm15497_vm7, %v10687_v38, %v10725_v25  ;;  %v3218_v16 = vld [vmem:[#allocation6 + $0x28] sm:$0x1] }
 0x45b   : > { %10724 = vst [vmem:[#allocation5 + $0x14] sm:$0x8] %v10723_v45  ;;  %10730 = vst [vmem:[#allocation5 + $0x24] sm:$0x8] %v10729_v62  ;;  %v10732_v58 = vsel %vm15497_vm7, %v10689_v9, %v10731_v6  ;;  %v10735_v13 = vsel %vm15497_vm7, %v10690_v20, %v10734_v35  ;;  %v10738_v18 = vsel %vm15497_vm7, %v10691_v0, %v10737_v2  ;;  %v3221_v24 = vld [vmem:[#allocation6 + $0x30] sm:$0x1] }
 0x45c   : > { %10727 = vst [vmem:[#allocation5 + $0x1c] sm:$0x8] %v10726_v1  ;;  %10733 = vst [vmem:[#allocation5 + $0x2c] sm:$0x8] %v10732_v58  ;;  %v3087_v59 = vrot.slane %v3073_v23, %v14970_v29  ;;  %v3088_v40 = vcombine.high %v16001_v30, %v16001_v30  ;;  %v3096_v41 = vrot.slane %v16001_v30, %v14970_v29  ;;  %v3224_v5 = vld [vmem:[#allocation6 + $0x38] sm:$0x1] }
 0x45d   : > { %10736 = vst [vmem:[#allocation5 + $0x34] sm:$0x8] %v10735_v13  ;;  %10739 = vst [vmem:[#allocation5 + $0x3c] sm:$0x8] %v10738_v18  ;;  %v11024_v63 = vmul.f32 %v2534_v46, %v14973_v33  ;;  %v3549_v26 = vcombine.high %v2578_v50, %v2578_v50  ;;  %v16075_v47 = vrot.slane %v2578_v50, %v14970_v29  ;;  %v3212_v50 = vld [vmem:[#allocation6 + $0x18] sm:$0x1] }
 0x45e   : > { %v16078_v4 = vmul.f32 %v2536_v49, %v14998_v32  ;;  %v3122_v39 = vcombine.high %v16055_v11, %v16055_v11  ;;  %v3089_v3 = vcombine.high %v3087_v59, %v3087_v59  ;;  %v3103_v23 = vrot.slane %v3087_v59, %v14970_v29 }
 0x45f   : > { %v3110_v43 = vrot.slane %v3088_v40, %v14970_v29  ;;  %v3118_v56 = vcombine.high %v3096_v41, %v3096_v41  ;;  %v3187_v30 = vpack.c.bf16 %v3096_v41, %v3096_v41  ;;  %v11028_v21 = vcombine.high %v11024_v63, %v11024_v63 }
 0x460   : > { %v11035_v33 = vrot.slane %v11024_v63, %v14970_v29  ;;  %v16086_v15 = vrot.slane %v3549_v26, %v14970_v29  ;;  %v3117_v17 = vrot.slane %v3089_v3, %v14970_v29  ;;  %v3119_v52 = vcombine.high %v3103_v23, %v3103_v23 }
 0x461   : > { %v3120_v12 = vcombine.high %v3110_v43, %v3110_v43  ;;  %v3188_v55 = vpack.c.bf16 %v3110_v43, %v3110_v43  ;;  %v3189_v10 = vpack.c.bf16 %v3118_v56, %v3118_v56  ;;  %v3191_v25 = vpack.c.bf16 %v3103_v23, %v3103_v23 }
 0x462   : > { %v3204_v46 = vsel %vm15020_vm13, %v3187_v30, %v3203_v36  ;;  %v11042_v57 = vrot.slane %v11028_v21, %v14970_v29  ;;  %v3121_v54 = vcombine.high %v3117_v17, %v3117_v17  ;;  %v3192_v6 = vpack.c.bf16 %v3117_v17, %v3117_v17  ;;  %v11286_v21 = vld [vmem:[#allocation5 + $0x4] sm:$0x8] }
 0x463   : > { %v3190_v27 = vpack.c.bf16 %v3120_v12, %v3120_v12  ;;  %v3193_v35 = vpack.c.bf16 %v3119_v52, %v3119_v52  ;;  %3205 = vst [vmem:[#allocation6] sm:$0x1] %v3204_v46  ;;  %v3207_v31 = vsel %vm15020_vm13, %v3188_v55, %v3206_v42  ;;  %v3210_v8 = vsel %vm15020_vm13, %v3189_v10, %v3209_v34  ;;  %v11292_v55 = vld [vmem:[#allocation5 + $0x14] sm:$0x8]  ;;  %v11295_v42 = vld [vmem:[#allocation5 + $0x1c] sm:$0x8] }
 0x464   : > { %v3216_v51 = vsel %vm15020_vm13, %v3191_v25, %v3215_v28  ;;  %v11043_v2 = vcombine.high %v11035_v33, %v11035_v33  ;;  %v3194_v38 = vpack.c.bf16 %v3121_v54, %v3121_v54  ;;  %3208 = vst [vmem:[#allocation6 + $0x8] sm:$0x1] %v3207_v31  ;;  %3211 = vst [vmem:[#allocation6 + $0x10] sm:$0x1] %v3210_v8  ;;  %v11298_v46 = vld [vmem:[#allocation5 + $0x24] sm:$0x8] }
 0x465   : > { %v3213_v9 = vsel %vm15020_vm13, %v3190_v27, %v3212_v50  ;;  %3217 = vst [vmem:[#allocation6 + $0x20] sm:$0x1] %v3216_v51  ;;  %v3219_v20 = vsel %vm15020_vm13, %v3192_v6, %v3218_v16  ;;  %v3222_v0 = vsel %vm15020_vm13, %v3193_v35, %v3221_v24  ;;  %v11044_v44 = vcombine.high %v11042_v57, %v11042_v57  ;;  %v11304_v31 = vld [vmem:[#allocation5 + $0x34] sm:$0x8] }
 0x466   : > { %3214 = vst [vmem:[#allocation6 + $0x18] sm:$0x1] %v3213_v9  ;;  %3220 = vst [vmem:[#allocation6 + $0x28] sm:$0x1] %v3219_v20  ;;  %v11051_v22 = vrot.slane %v11035_v33, %v14970_v29  ;;  %v11058_v45 = vrot.slane %v11042_v57, %v14970_v29  ;;  %v11065_v62 = vrot.slane %v11043_v2, %v14970_v29  ;;  %v11289_v33 = vld [vmem:[#allocation5 + $0xc] sm:$0x8] }
 0x467   : > { %3223 = vst [vmem:[#allocation6 + $0x30] sm:$0x1] %v3222_v0  ;;  %v3225_v49 = vsel %vm15020_vm13, %v3194_v38, %v3224_v5  ;;  %v3564_v1 = vcombine.high %v16075_v47, %v16075_v47  ;;  %v3565_v58 = vcombine.high %v16086_v15, %v16086_v15  ;;  %v16115_v13 = vrot.slane %v16075_v47, %v14970_v29  ;;  %v11301_v57 = vld [vmem:[#allocation5 + $0x2c] sm:$0x8]  ;;  %v11307_v38 = vld [vmem:[#allocation5 + $0x3c] sm:$0x8] }
 0x468   : > { %3226 = vst [vmem:[#allocation6 + $0x38] sm:$0x1] %v3225_v49  ;;  %v11072_v18 = vrot.slane %v11044_v44, %v14970_v29  ;;  %v11073_v59 = vcombine.high %v11051_v22, %v11051_v22  ;;  %v11074_v40 = vcombine.high %v11058_v45, %v11058_v45  ;;  %v11075_v41 = vcombine.high %v11065_v62, %v11065_v62 }
 0x469   : > { %v13462_v63 = vpack.c.bf16 %v11051_v22, %v11051_v22  ;;  %v13463_v26 = vpack.c.bf16 %v11065_v62, %v11065_v62  ;;  %v13466_v3 = vpack.c.bf16 %v11058_v45, %v11058_v45  ;;  %v3579_v23 = vrot.slane %v16086_v15, %v14970_v29 }
 0x46a   : > { %v11076_v43 = vcombine.high %v11072_v18, %v11072_v18  ;;  %v13464_v56 = vpack.c.bf16 %v11073_v59, %v11073_v59  ;;  %v13465_v36 = vpack.c.bf16 %v11075_v41, %v11075_v41  ;;  %v13467_v30 = vpack.c.bf16 %v11072_v18, %v11072_v18 }
 0x46b   : > { %v13468_v47 = vpack.c.bf16 %v11074_v40, %v11074_v40  ;;  %v11207_v17 = vshll.u32 %v13462_v63, 16  ;;  %v11211_v52 = vshll.u32 %v13463_v26, 16  ;;  %v11223_v12 = vshll.u32 %v13466_v3, 16 }
 0x46c   : > { %v13469_v34 = vpack.c.bf16 %v11076_v43, %v11076_v43  ;;  %v11215_v28 = vshll.u32 %v13464_v56, 16  ;;  %v11219_v10 = vshll.u32 %v13465_v36, 16  ;;  %v11227_v25 = vshll.u32 %v13467_v30, 16  ;;  %v3803_v56 = vld [vmem:[#allocation6 + $0x20] sm:$0x1] }
 0x46d   : > { %v11209_v50 = vrot.slane %v11207_v17, 5  ;;  %v11213_v16 = vrot.slane %v11211_v52, 5  ;;  %v11225_v15 = vrot.slane %v11223_v12, 5  ;;  %v11231_v24 = vshll.u32 %v13468_v47, 16  ;;  %v3797_v47 = vld [vmem:[#allocation6 + $0x10] sm:$0x1] }
 0x46e   : > { %v11217_v54 = vrot.slane %v11215_v28, 5  ;;  %v11221_v27 = vrot.slane %v11219_v10, 5  ;;  %v11229_v6 = vrot.slane %v11227_v25, 5  ;;  %v11235_v35 = vshll.u32 %v13469_v34, 16  ;;  %v3800_v10 = vld [vmem:[#allocation6 + $0x18] sm:$0x1] }
 0x46f   : > { %v11233_v8 = vrot.slane %v11231_v24, 5  ;;  %v11287_v51 = vsel %vm15548_vm1, %v11209_v50, %v11286_v21  ;;  %v11290_v5 = vsel %vm15548_vm1, %v11213_v16, %v11289_v33  ;;  %v11299_v2 = vsel %vm15548_vm1, %v11225_v15, %v11298_v46  ;;  %v3794_v33 = vld [vmem:[#allocation6 + $0x8] sm:$0x1]  ;;  %v3812_v46 = vld [vmem:[#allocation6 + $0x38] sm:$0x1] }
 0x470   : > { %v11237_v9 = vrot.slane %v11235_v35, 5  ;;  %11288 = vst [vmem:[#allocation5 + $0x4] sm:$0x8] %v11287_v51  ;;  %11291 = vst [vmem:[#allocation5 + $0xc] sm:$0x8] %v11290_v5  ;;  %v11293_v20 = vsel %vm15548_vm1, %v11217_v54, %v11292_v55  ;;  %v11296_v0 = vsel %vm15548_vm1, %v11221_v27, %v11295_v42  ;;  %v11302_v44 = vsel %vm15548_vm1, %v11229_v6, %v11301_v57  ;;  %v2538_v57 = vpop.f32.mrf.mxu0 }
 0x471   : > { %11300 = vst [vmem:[#allocation5 + $0x24] sm:$0x8] %v11299_v2  ;;  %11294 = vst [vmem:[#allocation5 + $0x14] sm:$0x8] %v11293_v20  ;;  %v11305_v22 = vsel %vm15548_vm1, %v11233_v8, %v11304_v31  ;;  %v3586_v45 = vrot.slane %v3564_v1, %v14970_v29  ;;  %v3593_v62 = vrot.slane %v3565_v58, %v14970_v29  ;;  %v3791_v1 = vld [vmem:[#allocation6] sm:$0x1] }
 0x472   : > { %11297 = vst [vmem:[#allocation5 + $0x1c] sm:$0x8] %v11296_v0  ;;  %11303 = vst [vmem:[#allocation5 + $0x2c] sm:$0x8] %v11302_v44  ;;  %v3594_v49 = vcombine.high %v16115_v13, %v16115_v13  ;;  %v11308_v18 = vsel %vm15548_vm1, %v11237_v9, %v11307_v38  ;;  %v3595_v59 = vcombine.high %v3579_v23, %v3579_v23  ;;  %v3806_v42 = vld [vmem:[#allocation6 + $0x28] sm:$0x1] }
 0x473   : > { %11306 = vst [vmem:[#allocation5 + $0x34] sm:$0x8] %v11305_v22  ;;  %v13062_v40 = vpack.c.bf16 %v16115_v13, %v16115_v13  ;;  %v13066_v41 = vpack.c.bf16 %v3579_v23, %v3579_v23  ;;  %11309 = vst [vmem:[#allocation5 + $0x3c] sm:$0x8] %v11308_v18  ;;  %v3596_v63 = vcombine.high %v3586_v45, %v3586_v45  ;;  %v3809_v13 = vld [vmem:[#allocation6 + $0x30] sm:$0x1] }
 0x474   : > { %v3597_v26 = vcombine.high %v3593_v62, %v3593_v62  ;;  %v13063_v3 = vpack.c.bf16 %v3586_v45, %v3586_v45  ;;  %v13064_v43 = vpack.c.bf16 %v3594_v49, %v3594_v49  ;;  %v13067_v58 = vpack.c.bf16 %v3593_v62, %v3593_v62 }
 0x475   : > { %v13068_v36 = vpack.c.bf16 %v3595_v59, %v3595_v59  ;;  %v3728_v30 = vshll.u32 %v13062_v40, 16  ;;  %v3740_v21 = vshll.u32 %v13066_v41, 16  ;;  %v13065_v17 = vpack.c.bf16 %v3596_v63, %v3596_v63 }
 0x476   : > { %v13069_v52 = vpack.c.bf16 %v3597_v26, %v3597_v26  ;;  %v3731_v12 = vshll.u32 %v13063_v3, 16  ;;  %v3734_v55 = vshll.u32 %v13064_v43, 16  ;;  %v3743_v23 = vshll.u32 %v13067_v58, 16  ;;  %v10740_v3 = vld [vmem:[#allocation5 + $0x44] sm:$0x8] }
 0x477   : > { %v3746_v34 = vshll.u32 %v13068_v36, 16  ;;  %v3792_v28 = vsel %vm15054_vm14, %v3728_v30, %v3791_v1  ;;  %v3804_v25 = vsel %vm15054_vm14, %v3740_v21, %v3803_v56  ;;  %v3737_v50 = vshll.u32 %v13065_v17, 16  ;;  %v10743_v58 = vld [vmem:[#allocation5 + $0x4c] sm:$0x8]  ;;  %v10746_v36 = vld [vmem:[#allocation5 + $0x54] sm:$0x8] }
 0x478   : > { %v3749_v16 = vshll.u32 %v13069_v52, 16  ;;  %3793 = vst [vmem:[#allocation6] sm:$0x1] %v3792_v28  ;;  %v3795_v15 = vsel %vm15054_vm14, %v3731_v12, %v3794_v33  ;;  %v3798_v24 = vsel %vm15054_vm14, %v3734_v55, %v3797_v47  ;;  %3805 = vst [vmem:[#allocation6 + $0x20] sm:$0x1] %v3804_v25  ;;  %v3807_v54 = vsel %vm15054_vm14, %v3743_v23, %v3806_v42 }
 0x479   : > { %3796 = vst [vmem:[#allocation6 + $0x8] sm:$0x1] %v3795_v15  ;;  %3799 = vst [vmem:[#allocation6 + $0x10] sm:$0x1] %v3798_v24  ;;  %v3810_v27 = vsel %vm15054_vm14, %v3746_v34, %v3809_v13  ;;  %v10555_v6 = vcombine.high %v16078_v4, %v16078_v4  ;;  %v10562_v35 = vrot.slane %v16078_v4, %v14970_v29  ;;  %v10749_v52 = vld [vmem:[#allocation5 + $0x5c] sm:$0x8] }
 0x47a   : > { %v3801_v31 = vsel %vm15054_vm14, %v3737_v50, %v3800_v10  ;;  %3808 = vst [vmem:[#allocation6 + $0x28] sm:$0x1] %v3807_v54  ;;  %3811 = vst [vmem:[#allocation6 + $0x30] sm:$0x1] %v3810_v27  ;;  %v3813_v8 = vsel %vm15054_vm14, %v3749_v16, %v3812_v46  ;;  %v3129_v51 = vrot.slane %v16055_v11, %v14970_v29  ;;  %v10752_v12 = vld [vmem:[#allocation5 + $0x64] sm:$0x8] }
 0x47b   : > { %v3136_v5 = vrot.slane %v3122_v39, %v14970_v29  ;;  %3802 = vst [vmem:[#allocation6 + $0x18] sm:$0x1] %v3801_v31  ;;  %3814 = vst [vmem:[#allocation6 + $0x38] sm:$0x1] %v3813_v8  ;;  %v10569_v4 = vrot.slane %v10555_v6, %v14970_v29  ;;  %v10570_v2 = vcombine.high %v10562_v35, %v10562_v35  ;;  %v10755_v55 = vld [vmem:[#allocation5 + $0x6c] sm:$0x8] }
 0x47c   : > { %v10578_v38 = vrot.slane %v10562_v35, %v14970_v29  ;;  %v16171_v9 = vmul.f32 %v2538_v57, %v14998_v32  ;;  %v3137_v20 = vcombine.high %v3129_v51, %v3129_v51  ;;  %v16174_v44 = vrot.slane %v3129_v51, %v14970_v29  ;;  %v10758_v28 = vld [vmem:[#allocation5 + $0x74] sm:$0x8]  ;;  %v10761_v57 = vld [vmem:[#allocation5 + $0x7c] sm:$0x8]  ;;  %v3227_v27 = vld [vmem:[#allocation6 + $0x40] sm:$0x1] }
 0x47d   : > { %v3138_v0 = vcombine.high %v3136_v5, %v3136_v5  ;;  %v16177_v22 = vrot.slane %v3136_v5, %v14970_v29  ;;  %v10571_v11 = vcombine.high %v10569_v4, %v10569_v4  ;;  %v10585_v39 = vrot.slane %v10569_v4, %v14970_v29  ;;  %v3230_v51 = vld [vmem:[#allocation6 + $0x48] sm:$0x1]  ;;  %v3233_v5 = vld [vmem:[#allocation6 + $0x50] sm:$0x1] }
 0x47e   : > { %v10592_v45 = vrot.slane %v10570_v2, %v14970_v29  ;;  %v10600_v62 = vcombine.high %v10578_v38, %v10578_v38  ;;  %v13438_v49 = vpack.c.bf16 %v10578_v38, %v10578_v38  ;;  %v16182_v18 = vrot.slane %v3137_v20, %v14970_v29 }
 0x47f   : > { %v16185_v32 = vrot.slane %v3138_v0, %v14970_v29  ;;  %v16189_v59 = vcombine.high %v16174_v44, %v16174_v44  ;;  %v10599_v40 = vrot.slane %v10571_v11, %v14970_v29  ;;  %v10601_v41 = vcombine.high %v10585_v39, %v10585_v39  ;;  %v3236_v0 = vld [vmem:[#allocation6 + $0x58] sm:$0x1]  ;;  %v3239_v11 = vld [vmem:[#allocation6 + $0x60] sm:$0x1] }
 0x480   : > { %v10602_v63 = vcombine.high %v10592_v45, %v10592_v45  ;;  %v13439_v26 = vpack.c.bf16 %v10592_v45, %v10592_v45  ;;  %v13440_v43 = vpack.c.bf16 %v10600_v62, %v10600_v62  ;;  %v13442_v1 = vpack.c.bf16 %v10585_v39, %v10585_v39  ;;  %v3242_v39 = vld [vmem:[#allocation6 + $0x68] sm:$0x1] }
 0x481   : > { %v10692_v56 = vrot.slane %v13438_v49, 5  ;;  %v16194_v30 = vcombine.high %v16177_v22, %v16177_v22  ;;  %v10603_v21 = vcombine.high %v10599_v40, %v10599_v40  ;;  %v13443_v47 = vpack.c.bf16 %v10599_v40, %v10599_v40 }
 0x482   : > { %v13441_v33 = vpack.c.bf16 %v10602_v63, %v10602_v63  ;;  %v13444_v17 = vpack.c.bf16 %v10601_v41, %v10601_v41  ;;  %v10693_v42 = vrot.slane %v13439_v26, 5  ;;  %v10694_v13 = vrot.slane %v13440_v43, 5  ;;  %v3248_v41 = vld [vmem:[#allocation6 + $0x78] sm:$0x1]  ;;  %v2582_v63 = vpop.f32.mrf.mxu1  ;;  %v2619_v43 = vpop.f32.mrf.mxu0 }
 0x483   : > { %v10696_v23 = vrot.slane %v13442_v1, 5  ;;  %v10741_v34 = vsel %vm15497_vm7, %v10692_v56, %v10740_v3  ;;  %v13445_v10 = vpack.c.bf16 %v10603_v21, %v10603_v21  ;;  %v10697_v46 = vrot.slane %v13443_v47, 5 }
 0x484   : > { %v10695_v25 = vrot.slane %v13441_v33, 5  ;;  %v10698_v50 = vrot.slane %v13444_v17, 5  ;;  %10742 = vst [vmem:[#allocation5 + $0x44] sm:$0x8] %v10741_v34  ;;  %v10744_v16 = vsel %vm15497_vm7, %v10693_v42, %v10743_v58  ;;  %v10747_v15 = vsel %vm15497_vm7, %v10694_v13, %v10746_v36  ;;  %v16240_v58 = vpop.f32.mrf.mxu1 }
 0x485   : > { %v10753_v24 = vsel %vm15497_vm7, %v10696_v23, %v10752_v12  ;;  %v3169_v54 = vcombine.high %v16182_v18, %v16182_v18  ;;  %v10699_v6 = vrot.slane %v13445_v10, 5  ;;  %10745 = vst [vmem:[#allocation5 + $0x4c] sm:$0x8] %v10744_v16  ;;  %10748 = vst [vmem:[#allocation5 + $0x54] sm:$0x8] %v10747_v15  ;;  %v10756_v31 = vsel %vm15497_vm7, %v10697_v46, %v10755_v55 }
 0x486   : > { %v10750_v35 = vsel %vm15497_vm7, %v10695_v25, %v10749_v52  ;;  %10754 = vst [vmem:[#allocation5 + $0x64] sm:$0x8] %v10753_v24  ;;  %v10759_v8 = vsel %vm15497_vm7, %v10698_v50, %v10758_v28  ;;  %10757 = vst [vmem:[#allocation5 + $0x6c] sm:$0x8] %v10756_v31  ;;  %v3170_v4 = vcombine.high %v16185_v32, %v16185_v32 }
 0x487   : > { %10751 = vst [vmem:[#allocation5 + $0x5c] sm:$0x8] %v10750_v35  ;;  %10760 = vst [vmem:[#allocation5 + $0x74] sm:$0x8] %v10759_v8  ;;  %v3195_v2 = vpack.c.bf16 %v16174_v44, %v16174_v44  ;;  %v3196_v38 = vpack.c.bf16 %v16182_v18, %v16182_v18  ;;  %v3197_v20 = vpack.c.bf16 %v16189_v59, %v16189_v59  ;;  %v3245_v44 = vld [vmem:[#allocation6 + $0x70] sm:$0x1] }
 0x488   : > { %v10762_v45 = vsel %vm15497_vm7, %v10699_v6, %v10761_v57  ;;  %v3198_v62 = vpack.c.bf16 %v3169_v54, %v3169_v54  ;;  %v3199_v49 = vpack.c.bf16 %v16177_v22, %v16177_v22  ;;  %v3200_v40 = vpack.c.bf16 %v16185_v32, %v16185_v32 }
 0x489   : > { %10763 = vst [vmem:[#allocation5 + $0x7c] sm:$0x8] %v10762_v45  ;;  %v3201_v18 = vpack.c.bf16 %v16194_v30, %v16194_v30  ;;  %v3202_v59 = vpack.c.bf16 %v3170_v4, %v3170_v4  ;;  %v3228_v26 = vsel %vm15020_vm13, %v3195_v2, %v3227_v27  ;;  %v3231_v3 = vsel %vm15020_vm13, %v3196_v38, %v3230_v51 }
 0x48a   : > { %3229 = vst [vmem:[#allocation6 + $0x40] sm:$0x1] %v3228_v26  ;;  %3232 = vst [vmem:[#allocation6 + $0x48] sm:$0x1] %v3231_v3  ;;  %v3234_v22 = vsel %vm15020_vm13, %v3197_v20, %v3233_v5  ;;  %v3237_v32 = vsel %vm15020_vm13, %v3198_v62, %v3236_v0  ;;  %v3240_v1 = vsel %vm15020_vm13, %v3199_v49, %v3239_v11 }
 0x48b   : > { %v3243_v56 = vsel %vm15020_vm13, %v3200_v40, %v3242_v39  ;;  %3235 = vst [vmem:[#allocation6 + $0x50] sm:$0x1] %v3234_v22  ;;  %3238 = vst [vmem:[#allocation6 + $0x58] sm:$0x1] %v3237_v32  ;;  %v3246_v36 = vsel %vm15020_vm13, %v3201_v18, %v3245_v44  ;;  %v3249_v30 = vsel %vm15020_vm13, %v3202_v59, %v3248_v41  ;;  %v11310_v4 = vld [vmem:[#allocation5 + $0x44] sm:$0x8] }
 0x48c   : > { %3241 = vst [vmem:[#allocation6 + $0x60] sm:$0x1] %v3240_v1  ;;  %3244 = vst [vmem:[#allocation6 + $0x68] sm:$0x1] %v3243_v56  ;;  %v11077_v21 = vcombine.high %v16171_v9, %v16171_v9  ;;  %v11084_v33 = vrot.slane %v16171_v9, %v14970_v29  ;;  %v3598_v47 = vcombine.high %v2582_v63, %v2582_v63  ;;  %v11313_v39 = vld [vmem:[#allocation5 + $0x4c] sm:$0x8] }
 0x48d   : > { %3247 = vst [vmem:[#allocation6 + $0x70] sm:$0x1] %v3246_v36  ;;  %3250 = vst [vmem:[#allocation6 + $0x78] sm:$0x1] %v3249_v30  ;;  %v3605_v17 = vrot.slane %v2582_v63, %v14970_v29  ;;  %v4106_v52 = vcombine.high %v2619_v43, %v2619_v43  ;;  %v16252_v12 = vrot.slane %v2619_v43, %v14970_v29  ;;  %v11316_v45 = vld [vmem:[#allocation5 + $0x54] sm:$0x8] }
 0x48e   : > { %v11091_v55 = vrot.slane %v11077_v21, %v14970_v29  ;;  %v11092_v42 = vcombine.high %v11084_v33, %v11084_v33  ;;  %v11100_v13 = vrot.slane %v11084_v33, %v14970_v29  ;;  %v5251_v23 = vcombine.high %v16240_v58, %v16240_v58  ;;  %v11322_v62 = vld [vmem:[#allocation5 + $0x64] sm:$0x8]  ;;  %v11319_v63 = vld [vmem:[#allocation5 + $0x5c] sm:$0x8]  ;;  %v11325_v43 = vld [vmem:[#allocation5 + $0x6c] sm:$0x8] }
 0x48f   : > { %v3612_v34 = vrot.slane %v3598_v47, %v14970_v29  ;;  %v3613_v9 = vcombine.high %v3605_v17, %v3605_v17  ;;  %v16260_v28 = vrot.slane %v3605_v17, %v14970_v29  ;;  %v16263_v10 = vrot.slane %v4106_v52, %v14970_v29  ;;  %v11328_v36 = vld [vmem:[#allocation5 + $0x74] sm:$0x8] }
 0x490   : > { %v11093_v25 = vcombine.high %v11091_v55, %v11091_v55  ;;  %v11107_v46 = vrot.slane %v11091_v55, %v14970_v29  ;;  %v11114_v50 = vrot.slane %v11092_v42, %v14970_v29  ;;  %v11122_v16 = vcombine.high %v11100_v13, %v11100_v13  ;;  %v11331_v42 = vld [vmem:[#allocation5 + $0x7c] sm:$0x8] }
 0x491   : > { %v13470_v15 = vpack.c.bf16 %v11100_v13, %v11100_v13  ;;  %v3614_v24 = vcombine.high %v3612_v34, %v3612_v34  ;;  %v16268_v57 = vrot.slane %v3612_v34, %v14970_v29  ;;  %v16271_v54 = vrot.slane %v3613_v9, %v14970_v29 }
 0x492   : > { %v11121_v27 = vrot.slane %v11093_v25, %v14970_v29  ;;  %v11123_v6 = vcombine.high %v11107_v46, %v11107_v46  ;;  %v11124_v35 = vcombine.high %v11114_v50, %v11114_v50  ;;  %v13471_v31 = vpack.c.bf16 %v11114_v50, %v11114_v50 }
 0x493   : > { %v13472_v8 = vpack.c.bf16 %v11122_v16, %v11122_v16  ;;  %v13474_v51 = vpack.c.bf16 %v11107_v46, %v11107_v46  ;;  %v11239_v5 = vshll.u32 %v13470_v15, 16  ;;  %v16275_v2 = vrot.slane %v3614_v24, %v14970_v29 }
 0x494   : > { %v11125_v38 = vcombine.high %v11121_v27, %v11121_v27  ;;  %v13473_v20 = vpack.c.bf16 %v11124_v35, %v11124_v35  ;;  %v13475_v0 = vpack.c.bf16 %v11121_v27, %v11121_v27  ;;  %v13476_v11 = vpack.c.bf16 %v11123_v6, %v11123_v6  ;;  %v3815_v27 = vld [vmem:[#allocation6 + $0x40] sm:$0x1] }
 0x495   : > { %v11241_v49 = vrot.slane %v11239_v5, 5  ;;  %v11243_v40 = vshll.u32 %v13471_v31, 16  ;;  %v11247_v44 = vshll.u32 %v13472_v8, 16  ;;  %v11255_v41 = vshll.u32 %v13474_v51, 16  ;;  %v3818_v51 = vld [vmem:[#allocation6 + $0x48] sm:$0x1] }
 0x496   : > { %v13477_v18 = vpack.c.bf16 %v11125_v38, %v11125_v38  ;;  %v11251_v59 = vshll.u32 %v13473_v20, 16  ;;  %v11259_v26 = vshll.u32 %v13475_v0, 16  ;;  %v11263_v3 = vshll.u32 %v13476_v11, 16  ;;  %v3821_v5 = vld [vmem:[#allocation6 + $0x50] sm:$0x1] }
 0x497   : > { %v11245_v22 = vrot.slane %v11243_v40, 5  ;;  %v11249_v32 = vrot.slane %v11247_v44, 5  ;;  %v11257_v1 = vrot.slane %v11255_v41, 5  ;;  %v11311_v56 = vsel %vm15548_vm1, %v11241_v49, %v11310_v4  ;;  %v3824_v4 = vld [vmem:[#allocation6 + $0x58] sm:$0x1] }
 0x498   : > { %v11253_v30 = vrot.slane %v11251_v59, 5  ;;  %v11261_v21 = vrot.slane %v11259_v26, 5  ;;  %v11265_v33 = vrot.slane %v11263_v3, 5  ;;  %v11267_v47 = vshll.u32 %v13477_v18, 16  ;;  %11312 = vst [vmem:[#allocation5 + $0x44] sm:$0x8] %v11311_v56 }
 0x499   : > { %v11314_v17 = vsel %vm15548_vm1, %v11245_v22, %v11313_v39  ;;  %v11317_v52 = vsel %vm15548_vm1, %v11249_v32, %v11316_v45  ;;  %v11323_v55 = vsel %vm15548_vm1, %v11257_v1, %v11322_v62  ;;  %v3643_v13 = vcombine.high %v16260_v28, %v16260_v28  ;;  %v3827_v11 = vld [vmem:[#allocation6 + $0x60] sm:$0x1]  ;;  %v3830_v39 = vld [vmem:[#allocation6 + $0x68] sm:$0x1]  ;;  %v3833_v45 = vld [vmem:[#allocation6 + $0x70] sm:$0x1] }
 0x49a   : > { %v11269_v34 = vrot.slane %v11267_v47, 5  ;;  %11315 = vst [vmem:[#allocation5 + $0x4c] sm:$0x8] %v11314_v17  ;;  %11318 = vst [vmem:[#allocation5 + $0x54] sm:$0x8] %v11317_v52  ;;  %v11320_v9 = vsel %vm15548_vm1, %v11253_v30, %v11319_v63  ;;  %v11326_v25 = vsel %vm15548_vm1, %v11261_v21, %v11325_v43  ;;  %v11329_v46 = vsel %vm15548_vm1, %v11265_v33, %v11328_v36  ;;  %v16317_v43 = vpop.f32.mrf.mxu0 }
 0x49b   : > { %11324 = vst [vmem:[#allocation5 + $0x64] sm:$0x8] %v11323_v55  ;;  %11321 = vst [vmem:[#allocation5 + $0x5c] sm:$0x8] %v11320_v9  ;;  %v3644_v50 = vcombine.high %v16268_v57, %v16268_v57  ;;  %v3645_v16 = vcombine.high %v16271_v54, %v16271_v54  ;;  %v3646_v15 = vcombine.high %v16275_v2, %v16275_v2  ;;  %v3836_v44 = vld [vmem:[#allocation6 + $0x78] sm:$0x1] }
 0x49c   : > { %11327 = vst [vmem:[#allocation5 + $0x6c] sm:$0x8] %v11326_v25  ;;  %11330 = vst [vmem:[#allocation5 + $0x74] sm:$0x8] %v11329_v46  ;;  %v13070_v24 = vpack.c.bf16 %v16260_v28, %v16260_v28  ;;  %v11332_v6 = vsel %vm15548_vm1, %v11269_v34, %v11331_v42  ;;  %v13071_v35 = vpack.c.bf16 %v16271_v54, %v16271_v54 }
 0x49d   : > { %v13072_v31 = vpack.c.bf16 %v3643_v13, %v3643_v13  ;;  %v13074_v8 = vpack.c.bf16 %v16268_v57, %v16268_v57  ;;  %11333 = vst [vmem:[#allocation5 + $0x7c] sm:$0x8] %v11332_v6  ;;  %v13073_v38 = vpack.c.bf16 %v3645_v16, %v3645_v16  ;;  %v13075_v20 = vpack.c.bf16 %v16275_v2, %v16275_v2 }
 0x49e   : > { %v13076_v28 = vpack.c.bf16 %v3644_v50, %v3644_v50  ;;  %v13077_v0 = vpack.c.bf16 %v3646_v15, %v3646_v15  ;;  %v3752_v62 = vshll.u32 %v13070_v24, 16  ;;  %v3755_v49 = vshll.u32 %v13071_v35, 16  ;;  %v4316_v15 = vld [vmem:[#allocation6] sm:$0x2] }
 0x49f   : > { %v3758_v54 = vshll.u32 %v13072_v31, 16  ;;  %v3764_v40 = vshll.u32 %v13074_v8, 16  ;;  %v3761_v41 = vshll.u32 %v13073_v38, 16  ;;  %v3767_v57 = vshll.u32 %v13075_v20, 16  ;;  %v4328_v24 = vld [vmem:[#allocation6 + $0x20] sm:$0x2] }
 0x4a0   : > { %v3770_v63 = vshll.u32 %v13076_v28, 16  ;;  %v3773_v18 = vshll.u32 %v13077_v0, 16  ;;  %v3816_v59 = vsel %vm15054_vm14, %v3752_v62, %v3815_v27  ;;  %v3819_v2 = vsel %vm15054_vm14, %v3755_v49, %v3818_v51  ;;  %v4319_v8 = vld [vmem:[#allocation6 + $0x8] sm:$0x2]  ;;  %v4322_v51 = vld [vmem:[#allocation6 + $0x10] sm:$0x2] }
 0x4a1   : > { %v3822_v26 = vsel %vm15054_vm14, %v3758_v54, %v3821_v5  ;;  %v3828_v3 = vsel %vm15054_vm14, %v3764_v40, %v3827_v11  ;;  %3817 = vst [vmem:[#allocation6 + $0x40] sm:$0x1] %v3816_v59  ;;  %3820 = vst [vmem:[#allocation6 + $0x48] sm:$0x1] %v3819_v2  ;;  %v3825_v22 = vsel %vm15054_vm14, %v3761_v41, %v3824_v4  ;;  %v4331_v28 = vld [vmem:[#allocation6 + $0x28] sm:$0x2] }
 0x4a2   : > { %3823 = vst [vmem:[#allocation6 + $0x50] sm:$0x1] %v3822_v26  ;;  %3829 = vst [vmem:[#allocation6 + $0x60] sm:$0x1] %v3828_v3  ;;  %v3831_v32 = vsel %vm15054_vm14, %v3767_v57, %v3830_v39  ;;  %v3834_v1 = vsel %vm15054_vm14, %v3770_v63, %v3833_v45  ;;  %v3837_v56 = vsel %vm15054_vm14, %v3773_v18, %v3836_v44  ;;  %v4334_v0 = vld [vmem:[#allocation6 + $0x30] sm:$0x2] }
 0x4a3   : > { %3826 = vst [vmem:[#allocation6 + $0x58] sm:$0x1] %v3825_v22  ;;  %3832 = vst [vmem:[#allocation6 + $0x68] sm:$0x1] %v3831_v32  ;;  %v4121_v36 = vcombine.high %v16252_v12, %v16252_v12  ;;  %v4122_v30 = vcombine.high %v16263_v10, %v16263_v10  ;;  %v4129_v21 = vrot.slane %v16252_v12, %v14970_v29  ;;  %v4325_v62 = vld [vmem:[#allocation6 + $0x18] sm:$0x2] }
 0x4a4   : > { %3835 = vst [vmem:[#allocation6 + $0x70] sm:$0x1] %v3834_v1  ;;  %3838 = vst [vmem:[#allocation6 + $0x78] sm:$0x1] %v3837_v56  ;;  %v4136_v33 = vrot.slane %v16263_v10, %v14970_v29  ;;  %v5258_v47 = vrot.slane %v16240_v58, %v14970_v29  ;;  %v5265_v17 = vrot.slane %v5251_v23, %v14970_v29  ;;  %v4337_v54 = vld [vmem:[#allocation6 + $0x38] sm:$0x2] }
 0x4a5   : > { %v4678_v52 = vcombine.high %v16317_v43, %v16317_v43  ;;  %v16345_v55 = vrot.slane %v16317_v43, %v14970_v29  ;;  %v4143_v12 = vrot.slane %v4121_v36, %v14970_v29  ;;  %v4150_v42 = vrot.slane %v4122_v30, %v14970_v29 }
 0x4a6   : > { %v4151_v10 = vcombine.high %v4129_v21, %v4129_v21  ;;  %v4152_v13 = vcombine.high %v4136_v33, %v4136_v33  ;;  %v13094_v34 = vpack.c.bf16 %v4129_v21, %v4129_v21  ;;  %v13098_v9 = vpack.c.bf16 %v4136_v33, %v4136_v33 }
 0x4a7   : > { %v5266_v25 = vcombine.high %v5258_v47, %v5258_v47  ;;  %v5267_v46 = vcombine.high %v5265_v17, %v5265_v17  ;;  %v4153_v50 = vcombine.high %v4143_v12, %v4143_v12  ;;  %v4154_v58 = vcombine.high %v4150_v42, %v4150_v42 }
 0x4a8   : > { %v13095_v23 = vpack.c.bf16 %v4143_v12, %v4143_v12  ;;  %v13096_v16 = vpack.c.bf16 %v4151_v10, %v4151_v10  ;;  %v13099_v27 = vpack.c.bf16 %v4150_v42, %v4150_v42  ;;  %v13100_v6 = vpack.c.bf16 %v4152_v13, %v4152_v13  ;;  %v5461_v12 = vld [vmem:[#allocation6] sm:$0x4] }
 0x4a9   : > { %v4284_v35 = vrot.slane %v13094_v34, 7  ;;  %v4288_v31 = vrot.slane %v13098_v9, 7  ;;  %v13097_v5 = vpack.c.bf16 %v4153_v50, %v4153_v50  ;;  %v13101_v4 = vpack.c.bf16 %v4154_v58, %v4154_v58  ;;  %v5473_v42 = vld [vmem:[#allocation6 + $0x20] sm:$0x4]  ;;  %v5464_v50 = vld [vmem:[#allocation6 + $0x8] sm:$0x4] }
 0x4aa   : > { %v4285_v38 = vrot.slane %v13095_v23, 7  ;;  %v4286_v20 = vrot.slane %v13096_v16, 7  ;;  %v4289_v11 = vrot.slane %v13099_v27, 7  ;;  %v4290_v39 = vrot.slane %v13100_v6, 7 }
 0x4ab   : > { %v4317_v45 = vsel %vm15258_vm11, %v4284_v35, %v4316_v15  ;;  %v4329_v49 = vsel %vm15258_vm11, %v4288_v31, %v4328_v24  ;;  %v4287_v40 = vrot.slane %v13097_v5, 7  ;;  %v4291_v44 = vrot.slane %v13101_v4, 7  ;;  %v5467_v15 = vld [vmem:[#allocation6 + $0x10] sm:$0x4]  ;;  %v5470_v31 = vld [vmem:[#allocation6 + $0x18] sm:$0x4]  ;;  %v2664_v5 = vpop.f32.mrf.mxu1 }
 0x4ac   : > { %4318 = vst [vmem:[#allocation6] sm:$0x2] %v4317_v45  ;;  %v4320_v41 = vsel %vm15258_vm11, %v4285_v38, %v4319_v8  ;;  %v4323_v57 = vsel %vm15258_vm11, %v4286_v20, %v4322_v51  ;;  %4330 = vst [vmem:[#allocation6 + $0x20] sm:$0x2] %v4329_v49  ;;  %v4332_v63 = vsel %vm15258_vm11, %v4289_v11, %v4331_v28  ;;  %v5479_v24 = vld [vmem:[#allocation6 + $0x30] sm:$0x4] }
 0x4ad   : > { %4321 = vst [vmem:[#allocation6 + $0x8] sm:$0x2] %v4320_v41  ;;  %4324 = vst [vmem:[#allocation6 + $0x10] sm:$0x2] %v4323_v57  ;;  %v4335_v18 = vsel %vm15258_vm11, %v4290_v39, %v4334_v0  ;;  %v5274_v59 = vrot.slane %v5258_v47, %v14970_v29  ;;  %v5281_v2 = vrot.slane %v5265_v17, %v14970_v29  ;;  %v5482_v51 = vld [vmem:[#allocation6 + $0x38] sm:$0x4] }
 0x4ae   : > { %v4326_v26 = vsel %vm15258_vm11, %v4287_v40, %v4325_v62  ;;  %4333 = vst [vmem:[#allocation6 + $0x28] sm:$0x2] %v4332_v63  ;;  %4336 = vst [vmem:[#allocation6 + $0x30] sm:$0x2] %v4335_v18  ;;  %v4338_v3 = vsel %vm15258_vm11, %v4291_v44, %v4337_v54  ;;  %v5288_v22 = vrot.slane %v5266_v25, %v14970_v29  ;;  %v5476_v25 = vld [vmem:[#allocation6 + $0x28] sm:$0x4]  ;;  %v16387_v62 = vpop.f32.mrf.mxu0 }
 0x4af   : > { %v5295_v32 = vrot.slane %v5267_v46, %v14970_v29  ;;  %4327 = vst [vmem:[#allocation6 + $0x18] sm:$0x2] %v4326_v26  ;;  %4339 = vst [vmem:[#allocation6 + $0x38] sm:$0x2] %v4338_v3  ;;  %v5296_v1 = vcombine.high %v5274_v59, %v5274_v59  ;;  %v5297_v56 = vcombine.high %v5281_v2, %v5281_v2 }
 0x4b0   : > { %v13158_v36 = vpack.c.bf16 %v5274_v59, %v5274_v59  ;;  %v13162_v30 = vpack.c.bf16 %v5281_v2, %v5281_v2  ;;  %v5298_v21 = vcombine.high %v5288_v22, %v5288_v22  ;;  %v13159_v47 = vpack.c.bf16 %v5288_v22, %v5288_v22 }
 0x4b1   : > { %v5299_v33 = vcombine.high %v5295_v32, %v5295_v32  ;;  %v13163_v17 = vpack.c.bf16 %v5295_v32, %v5295_v32  ;;  %v13160_v10 = vpack.c.bf16 %v5296_v1, %v5296_v1  ;;  %v13164_v13 = vpack.c.bf16 %v5297_v56, %v5297_v56 }
 0x4b2   : > { %v5429_v34 = vrot.slane %v13158_v36, 6  ;;  %v5433_v9 = vrot.slane %v13162_v30, 6  ;;  %v13161_v58 = vpack.c.bf16 %v5298_v21, %v5298_v21  ;;  %v5430_v23 = vrot.slane %v13159_v47, 6 }
 0x4b3   : > { %v13165_v46 = vpack.c.bf16 %v5299_v33, %v5299_v33  ;;  %v5434_v16 = vrot.slane %v13163_v17, 6  ;;  %v5431_v27 = vrot.slane %v13160_v10, 6  ;;  %v5435_v6 = vrot.slane %v13164_v13, 6  ;;  %v4936_v36 = vld [vmem:[#allocation6] sm:$0x2] }
 0x4b4   : > { %v5462_v35 = vsel %vm15285_vm12, %v5429_v34, %v5461_v12  ;;  %v5474_v8 = vsel %vm15285_vm12, %v5433_v9, %v5473_v42  ;;  %v5432_v4 = vrot.slane %v13161_v58, 6  ;;  %v5465_v20 = vsel %vm15285_vm12, %v5430_v23, %v5464_v50  ;;  %v4939_v12 = vld [vmem:[#allocation6 + $0x8] sm:$0x2]  ;;  %v4942_v42 = vld [vmem:[#allocation6 + $0x10] sm:$0x2] }
 0x4b5   : > { %v5436_v38 = vrot.slane %v13165_v46, 6  ;;  %5463 = vst [vmem:[#allocation6] sm:$0x4] %v5462_v35  ;;  %5475 = vst [vmem:[#allocation6 + $0x20] sm:$0x4] %v5474_v8  ;;  %v5477_v28 = vsel %vm15285_vm12, %v5434_v16, %v5476_v25  ;;  %v5468_v0 = vsel %vm15285_vm12, %v5431_v27, %v5467_v15  ;;  %v5480_v11 = vsel %vm15285_vm12, %v5435_v6, %v5479_v24 }
 0x4b6   : > { %5466 = vst [vmem:[#allocation6 + $0x8] sm:$0x4] %v5465_v20  ;;  %5478 = vst [vmem:[#allocation6 + $0x28] sm:$0x4] %v5477_v28  ;;  %v4692_v39 = vrot.slane %v4678_v52, %v14970_v29  ;;  %v4693_v45 = vcombine.high %v16345_v55, %v16345_v55  ;;  %v5471_v49 = vsel %vm15285_vm12, %v5432_v4, %v5470_v31  ;;  %v4948_v10 = vld [vmem:[#allocation6 + $0x20] sm:$0x2] }
 0x4b7   : > { %5469 = vst [vmem:[#allocation6 + $0x10] sm:$0x4] %v5468_v0  ;;  %5481 = vst [vmem:[#allocation6 + $0x30] sm:$0x4] %v5480_v11  ;;  %v5483_v54 = vsel %vm15285_vm12, %v5436_v38, %v5482_v51  ;;  %v4701_v40 = vrot.slane %v16345_v55, %v14970_v29  ;;  %v5823_v44 = vcombine.high %v2664_v5, %v2664_v5  ;;  %v4951_v25 = vld [vmem:[#allocation6 + $0x28] sm:$0x2] }
 0x4b8   : > { %5472 = vst [vmem:[#allocation6 + $0x18] sm:$0x4] %v5471_v49  ;;  %5484 = vst [vmem:[#allocation6 + $0x38] sm:$0x4] %v5483_v54  ;;  %v4694_v43 = vcombine.high %v4692_v39, %v4692_v39  ;;  %v4708_v52 = vrot.slane %v4692_v39, %v14970_v29  ;;  %v4715_v41 = vrot.slane %v4693_v45, %v14970_v29  ;;  %v4954_v15 = vld [vmem:[#allocation6 + $0x30] sm:$0x2]  ;;  %v16410_v39 = vpop.f32.mrf.mxu1 }
 0x4b9   : > { %v5830_v57 = vrot.slane %v2664_v5, %v14970_v29  ;;  %v4723_v63 = vcombine.high %v4701_v40, %v4701_v40  ;;  %v13126_v18 = vpack.c.bf16 %v4701_v40, %v4701_v40  ;;  %v5837_v59 = vrot.slane %v5823_v44, %v14970_v29  ;;  %v4945_v31 = vld [vmem:[#allocation6 + $0x18] sm:$0x2] }
 0x4ba   : > { %v4155_v2 = vcombine.high %v16387_v62, %v16387_v62  ;;  %v4722_v26 = vrot.slane %v4694_v43, %v14970_v29  ;;  %v4724_v55 = vcombine.high %v4708_v52, %v4708_v52  ;;  %v4725_v3 = vcombine.high %v4715_v41, %v4715_v41  ;;  %v4957_v0 = vld [vmem:[#allocation6 + $0x38] sm:$0x2] }
 0x4bb   : > { %v13127_v22 = vpack.c.bf16 %v4715_v41, %v4715_v41  ;;  %v13128_v32 = vpack.c.bf16 %v4723_v63, %v4723_v63  ;;  %v13130_v1 = vpack.c.bf16 %v4708_v52, %v4708_v52  ;;  %v4857_v56 = vshll.u32 %v13126_v18, 16 }
 0x4bc   : > { %v5838_v30 = vcombine.high %v5830_v57, %v5830_v57  ;;  %v4726_v21 = vcombine.high %v4722_v26, %v4722_v26  ;;  %v13129_v33 = vpack.c.bf16 %v4725_v3, %v4725_v3  ;;  %v13131_v47 = vpack.c.bf16 %v4722_v26, %v4722_v26 }
 0x4bd   : > { %v13132_v17 = vpack.c.bf16 %v4724_v55, %v4724_v55  ;;  %v4859_v13 = vrot.slane %v4857_v56, 7  ;;  %v4861_v34 = vshll.u32 %v13127_v22, 16  ;;  %v4865_v9 = vshll.u32 %v13128_v32, 16 }
 0x4be   : > { %v4873_v50 = vshll.u32 %v13130_v1, 16  ;;  %v13133_v58 = vpack.c.bf16 %v4726_v21, %v4726_v21  ;;  %v4869_v46 = vshll.u32 %v13129_v33, 16  ;;  %v4877_v23 = vshll.u32 %v13131_v47, 16  ;;  %v6081_v47 = vld [vmem:[#allocation6] sm:$0x4] }
 0x4bf   : > { %v4881_v16 = vshll.u32 %v13132_v17, 16  ;;  %v4863_v24 = vrot.slane %v4861_v34, 7  ;;  %v4867_v27 = vrot.slane %v4865_v9, 7  ;;  %v4937_v35 = vsel %vm15318_vm10, %v4859_v13, %v4936_v36  ;;  %v6084_v17 = vld [vmem:[#allocation6 + $0x8] sm:$0x4] }
 0x4c0   : > { %v4875_v6 = vrot.slane %v4873_v50, 7  ;;  %v4871_v8 = vrot.slane %v4869_v46, 7  ;;  %v4879_v51 = vrot.slane %v4877_v23, 7  ;;  %v4885_v4 = vshll.u32 %v13133_v58, 16  ;;  %4938 = vst [vmem:[#allocation6] sm:$0x2] %v4937_v35 }
 0x4c1   : > { %v4883_v5 = vrot.slane %v4881_v16, 7  ;;  %v4940_v38 = vsel %vm15318_vm10, %v4863_v24, %v4939_v12  ;;  %v4943_v20 = vsel %vm15318_vm10, %v4867_v27, %v4942_v42  ;;  %v5839_v11 = vcombine.high %v5837_v59, %v5837_v59  ;;  %v6087_v34 = vld [vmem:[#allocation6 + $0x10] sm:$0x4]  ;;  %v6090_v9 = vld [vmem:[#allocation6 + $0x18] sm:$0x4] }
 0x4c2   : > { %v4949_v28 = vsel %vm15318_vm10, %v4875_v6, %v4948_v10  ;;  %v4887_v45 = vrot.slane %v4885_v4, 7  ;;  %4941 = vst [vmem:[#allocation6 + $0x8] sm:$0x2] %v4940_v38  ;;  %4944 = vst [vmem:[#allocation6 + $0x10] sm:$0x2] %v4943_v20  ;;  %v4946_v49 = vsel %vm15318_vm10, %v4871_v8, %v4945_v31  ;;  %v4952_v54 = vsel %vm15318_vm10, %v4879_v51, %v4951_v25 }
 0x4c3   : > { %4950 = vst [vmem:[#allocation6 + $0x20] sm:$0x2] %v4949_v28  ;;  %v4955_v40 = vsel %vm15318_vm10, %v4883_v5, %v4954_v15  ;;  %4947 = vst [vmem:[#allocation6 + $0x18] sm:$0x2] %v4946_v49  ;;  %v5846_v44 = vrot.slane %v5830_v57, %v14970_v29  ;;  %v5853_v43 = vrot.slane %v5837_v59, %v14970_v29  ;;  %v6096_v50 = vld [vmem:[#allocation6 + $0x28] sm:$0x4] }
 0x4c4   : > { %4953 = vst [vmem:[#allocation6 + $0x28] sm:$0x2] %v4952_v54  ;;  %4956 = vst [vmem:[#allocation6 + $0x30] sm:$0x2] %v4955_v40  ;;  %v5860_v52 = vrot.slane %v5838_v30, %v14970_v29  ;;  %v5867_v41 = vrot.slane %v5839_v11, %v14970_v29  ;;  %v4958_v63 = vsel %vm15318_vm10, %v4887_v45, %v4957_v0  ;;  %v6099_v16 = vld [vmem:[#allocation6 + $0x30] sm:$0x4]  ;;  %v16441_v0 = vpop.f32.mrf.mxu0 }
 0x4c5   : > { %v16426_v18 = vrot.slane %v16387_v62, %v14970_v29  ;;  %v16429_v26 = vrot.slane %v4155_v2, %v14970_v29  ;;  %v5300_v55 = vcombine.high %v16410_v39, %v16410_v39  ;;  %4959 = vst [vmem:[#allocation6 + $0x38] sm:$0x2] %v4958_v63  ;;  %v5868_v57 = vcombine.high %v5846_v44, %v5846_v44  ;;  %v6093_v2 = vld [vmem:[#allocation6 + $0x20] sm:$0x4]  ;;  %v6102_v35 = vld [vmem:[#allocation6 + $0x38] sm:$0x4] }
 0x4c6   : > { %v5869_v59 = vcombine.high %v5853_v43, %v5853_v43  ;;  %v5870_v3 = vcombine.high %v5860_v52, %v5860_v52  ;;  %v5871_v22 = vcombine.high %v5867_v41, %v5867_v41  ;;  %v13190_v32 = vpack.c.bf16 %v5846_v44, %v5846_v44 }
 0x4c7   : > { %v13191_v1 = vpack.c.bf16 %v5860_v52, %v5860_v52  ;;  %v13194_v56 = vpack.c.bf16 %v5853_v43, %v5853_v43  ;;  %v13195_v36 = vpack.c.bf16 %v5867_v41, %v5867_v41  ;;  %v13192_v30 = vpack.c.bf16 %v5868_v57, %v5868_v57 }
 0x4c8   : > { %v13193_v21 = vpack.c.bf16 %v5870_v3, %v5870_v3  ;;  %v13196_v33 = vpack.c.bf16 %v5869_v59, %v5869_v59  ;;  %v13197_v62 = vpack.c.bf16 %v5871_v22, %v5871_v22  ;;  %v6002_v12 = vshll.u32 %v13190_v32, 16 }
 0x4c9   : > { %v6006_v42 = vshll.u32 %v13191_v1, 16  ;;  %v6018_v10 = vshll.u32 %v13194_v56, 16  ;;  %v6022_v13 = vshll.u32 %v13195_v36, 16  ;;  %v6010_v25 = vshll.u32 %v13192_v30, 16 }
 0x4ca   : > { %v6014_v58 = vshll.u32 %v13193_v21, 16  ;;  %v6026_v46 = vshll.u32 %v13196_v33, 16  ;;  %v6030_v23 = vshll.u32 %v13197_v62, 16  ;;  %v6004_v15 = vrot.slane %v6002_v12, 6  ;;  %v4340_v33 = vld [vmem:[#allocation6 + $0x40] sm:$0x2] }
 0x4cb   : > { %v6008_v24 = vrot.slane %v6006_v42, 6  ;;  %v6020_v27 = vrot.slane %v6018_v10, 6  ;;  %v6024_v6 = vrot.slane %v6022_v13, 6  ;;  %v6012_v31 = vrot.slane %v6010_v25, 6  ;;  %v4352_v62 = vld [vmem:[#allocation6 + $0x60] sm:$0x2] }
 0x4cc   : > { %v6016_v8 = vrot.slane %v6014_v58, 6  ;;  %v6028_v51 = vrot.slane %v6026_v46, 6  ;;  %v6032_v5 = vrot.slane %v6030_v23, 6  ;;  %v6082_v4 = vsel %vm15349_vm15, %v6004_v15, %v6081_v47  ;;  %v4343_v42 = vld [vmem:[#allocation6 + $0x48] sm:$0x2] }
 0x4cd   : > { %v6085_v38 = vsel %vm15349_vm15, %v6008_v24, %v6084_v17  ;;  %v6094_v20 = vsel %vm15349_vm15, %v6020_v27, %v6093_v2  ;;  %v6097_v28 = vsel %vm15349_vm15, %v6024_v6, %v6096_v50  ;;  %6083 = vst [vmem:[#allocation6] sm:$0x4] %v6082_v4  ;;  %v6088_v11 = vsel %vm15349_vm15, %v6012_v31, %v6087_v34  ;;  %v4346_v10 = vld [vmem:[#allocation6 + $0x50] sm:$0x2]  ;;  %v4355_v25 = vld [vmem:[#allocation6 + $0x68] sm:$0x2] }
 0x4ce   : > { %6086 = vst [vmem:[#allocation6 + $0x8] sm:$0x4] %v6085_v38  ;;  %v6091_v45 = vsel %vm15349_vm15, %v6016_v8, %v6090_v9  ;;  %6095 = vst [vmem:[#allocation6 + $0x20] sm:$0x4] %v6094_v20  ;;  %v6100_v49 = vsel %vm15349_vm15, %v6028_v51, %v6099_v16  ;;  %v6103_v54 = vsel %vm15349_vm15, %v6032_v5, %v6102_v35  ;;  %v4358_v58 = vld [vmem:[#allocation6 + $0x70] sm:$0x2] }
 0x4cf   : > { %6098 = vst [vmem:[#allocation6 + $0x28] sm:$0x4] %v6097_v28  ;;  %6089 = vst [vmem:[#allocation6 + $0x10] sm:$0x4] %v6088_v11  ;;  %v4170_v40 = vcombine.high %v16426_v18, %v16426_v18  ;;  %v4171_v44 = vcombine.high %v16429_v26, %v16429_v26  ;;  %v4178_v43 = vrot.slane %v16426_v18, %v14970_v29  ;;  %v4349_v15 = vld [vmem:[#allocation6 + $0x58] sm:$0x2] }
 0x4d0   : > { %6092 = vst [vmem:[#allocation6 + $0x18] sm:$0x4] %v6091_v45  ;;  %6101 = vst [vmem:[#allocation6 + $0x30] sm:$0x4] %v6100_v49  ;;  %v4185_v52 = vrot.slane %v16429_v26, %v14970_v29  ;;  %v5307_v41 = vrot.slane %v16410_v39, %v14970_v29  ;;  %v5314_v63 = vrot.slane %v5300_v55, %v14970_v29  ;;  %v4361_v27 = vld [vmem:[#allocation6 + $0x78] sm:$0x2] }
 0x4d1   : > { %6104 = vst [vmem:[#allocation6 + $0x38] sm:$0x4] %v6103_v54  ;;  %v4727_v57 = vcombine.high %v16441_v0, %v16441_v0  ;;  %v16466_v59 = vrot.slane %v16441_v0, %v14970_v29  ;;  %v4192_v3 = vrot.slane %v4170_v40, %v14970_v29  ;;  %v4199_v22 = vrot.slane %v4171_v44, %v14970_v29 }
 0x4d2   : > { %v4200_v18 = vcombine.high %v4178_v43, %v4178_v43  ;;  %v4201_v32 = vcombine.high %v4185_v52, %v4185_v52  ;;  %v13102_v1 = vpack.c.bf16 %v4178_v43, %v4178_v43  ;;  %v13106_v26 = vpack.c.bf16 %v4185_v52, %v4185_v52 }
 0x4d3   : > { %v5315_v56 = vcombine.high %v5307_v41, %v5307_v41  ;;  %v5316_v36 = vcombine.high %v5314_v63, %v5314_v63  ;;  %v4202_v39 = vcombine.high %v4192_v3, %v4192_v3  ;;  %v4203_v30 = vcombine.high %v4199_v22, %v4199_v22 }
 0x4d4   : > { %v13103_v55 = vpack.c.bf16 %v4192_v3, %v4192_v3  ;;  %v13104_v21 = vpack.c.bf16 %v4200_v18, %v4200_v18  ;;  %v13107_v47 = vpack.c.bf16 %v4199_v22, %v4199_v22  ;;  %v13108_v17 = vpack.c.bf16 %v4201_v32, %v4201_v32  ;;  %v5485_v3 = vld [vmem:[#allocation6 + $0x40] sm:$0x4] }
 0x4d5   : > { %v4292_v2 = vrot.slane %v13102_v1, 7  ;;  %v4296_v12 = vrot.slane %v13106_v26, 7  ;;  %v13105_v13 = vpack.c.bf16 %v4202_v39, %v4202_v39  ;;  %v13109_v34 = vpack.c.bf16 %v4203_v30, %v4203_v30  ;;  %v5497_v22 = vld [vmem:[#allocation6 + $0x60] sm:$0x4]  ;;  %v5488_v39 = vld [vmem:[#allocation6 + $0x48] sm:$0x4] }
 0x4d6   : > { %v4293_v9 = vrot.slane %v13103_v55, 7  ;;  %v4294_v50 = vrot.slane %v13104_v21, 7  ;;  %v4297_v46 = vrot.slane %v13107_v47, 7  ;;  %v4298_v23 = vrot.slane %v13108_v17, 7 }
 0x4d7   : > { %v4341_v16 = vsel %vm15258_vm11, %v4292_v2, %v4340_v33  ;;  %v4353_v24 = vsel %vm15258_vm11, %v4296_v12, %v4352_v62  ;;  %v4295_v6 = vrot.slane %v13105_v13, 7  ;;  %v4299_v35 = vrot.slane %v13109_v34, 7  ;;  %v5491_v33 = vld [vmem:[#allocation6 + $0x50] sm:$0x4]  ;;  %v5494_v12 = vld [vmem:[#allocation6 + $0x58] sm:$0x4]  ;;  %v2668_v13 = vpop.f32.mrf.mxu1 }
 0x4d8   : > { %4342 = vst [vmem:[#allocation6 + $0x40] sm:$0x2] %v4341_v16  ;;  %v4344_v31 = vsel %vm15258_vm11, %v4293_v9, %v4343_v42  ;;  %v4347_v8 = vsel %vm15258_vm11, %v4294_v50, %v4346_v10  ;;  %4354 = vst [vmem:[#allocation6 + $0x60] sm:$0x2] %v4353_v24  ;;  %v4356_v51 = vsel %vm15258_vm11, %v4297_v46, %v4355_v25  ;;  %v5503_v62 = vld [vmem:[#allocation6 + $0x70] sm:$0x4] }
 0x4d9   : > { %4345 = vst [vmem:[#allocation6 + $0x48] sm:$0x2] %v4344_v31  ;;  %4348 = vst [vmem:[#allocation6 + $0x50] sm:$0x2] %v4347_v8  ;;  %v4359_v5 = vsel %vm15258_vm11, %v4298_v23, %v4358_v58  ;;  %v5323_v4 = vrot.slane %v5307_v41, %v14970_v29  ;;  %v5330_v38 = vrot.slane %v5314_v63, %v14970_v29  ;;  %v5506_v10 = vld [vmem:[#allocation6 + $0x78] sm:$0x4] }
 0x4da   : > { %v4350_v20 = vsel %vm15258_vm11, %v4295_v6, %v4349_v15  ;;  %4357 = vst [vmem:[#allocation6 + $0x68] sm:$0x2] %v4356_v51  ;;  %4360 = vst [vmem:[#allocation6 + $0x70] sm:$0x2] %v4359_v5  ;;  %v4362_v28 = vsel %vm15258_vm11, %v4299_v35, %v4361_v27  ;;  %v5337_v11 = vrot.slane %v5315_v56, %v14970_v29  ;;  %v5500_v56 = vld [vmem:[#allocation6 + $0x68] sm:$0x4]  ;;  %v16508_v15 = vpop.f32.mrf.mxu0 }
 0x4db   : > { %v5344_v45 = vrot.slane %v5316_v36, %v14970_v29  ;;  %4351 = vst [vmem:[#allocation6 + $0x58] sm:$0x2] %v4350_v20  ;;  %4363 = vst [vmem:[#allocation6 + $0x78] sm:$0x2] %v4362_v28  ;;  %v5345_v49 = vcombine.high %v5323_v4, %v5323_v4  ;;  %v5346_v54 = vcombine.high %v5330_v38, %v5330_v38 }
 0x4dc   : > { %v13166_v40 = vpack.c.bf16 %v5323_v4, %v5323_v4  ;;  %v13170_v44 = vpack.c.bf16 %v5330_v38, %v5330_v38  ;;  %v5347_v43 = vcombine.high %v5337_v11, %v5337_v11  ;;  %v13167_v41 = vpack.c.bf16 %v5337_v11, %v5337_v11 }
 0x4dd   : > { %v5348_v52 = vcombine.high %v5344_v45, %v5344_v45  ;;  %v13171_v63 = vpack.c.bf16 %v5344_v45, %v5344_v45  ;;  %v13168_v18 = vpack.c.bf16 %v5345_v49, %v5345_v49  ;;  %v13172_v32 = vpack.c.bf16 %v5346_v54, %v5346_v54 }
 0x4de   : > { %v5437_v1 = vrot.slane %v13166_v40, 6  ;;  %v5441_v26 = vrot.slane %v13170_v44, 6  ;;  %v13169_v30 = vpack.c.bf16 %v5347_v43, %v5347_v43  ;;  %v5438_v55 = vrot.slane %v13167_v41, 6 }
 0x4df   : > { %v13173_v36 = vpack.c.bf16 %v5348_v52, %v5348_v52  ;;  %v5442_v21 = vrot.slane %v13171_v63, 6  ;;  %v5439_v47 = vrot.slane %v13168_v18, 6  ;;  %v5443_v17 = vrot.slane %v13172_v32, 6  ;;  %v4960_v40 = vld [vmem:[#allocation6 + $0x40] sm:$0x2] }
 0x4e0   : > { %v5486_v2 = vsel %vm15285_vm12, %v5437_v1, %v5485_v3  ;;  %v5498_v42 = vsel %vm15285_vm12, %v5441_v26, %v5497_v22  ;;  %v5440_v34 = vrot.slane %v13169_v30, 6  ;;  %v5489_v50 = vsel %vm15285_vm12, %v5438_v55, %v5488_v39  ;;  %v4963_v3 = vld [vmem:[#allocation6 + $0x48] sm:$0x2]  ;;  %v4966_v22 = vld [vmem:[#allocation6 + $0x50] sm:$0x2] }
 0x4e1   : > { %v5444_v9 = vrot.slane %v13173_v36, 6  ;;  %5487 = vst [vmem:[#allocation6 + $0x40] sm:$0x4] %v5486_v2  ;;  %5499 = vst [vmem:[#allocation6 + $0x60] sm:$0x4] %v5498_v42  ;;  %v5501_v25 = vsel %vm15285_vm12, %v5442_v21, %v5500_v56  ;;  %v5492_v58 = vsel %vm15285_vm12, %v5439_v47, %v5491_v33  ;;  %v5504_v46 = vsel %vm15285_vm12, %v5443_v17, %v5503_v62 }
 0x4e2   : > { %5490 = vst [vmem:[#allocation6 + $0x48] sm:$0x4] %v5489_v50  ;;  %5502 = vst [vmem:[#allocation6 + $0x68] sm:$0x4] %v5501_v25  ;;  %v4741_v23 = vrot.slane %v4727_v57, %v14970_v29  ;;  %v4742_v16 = vcombine.high %v16466_v59, %v16466_v59  ;;  %v5495_v24 = vsel %vm15285_vm12, %v5440_v34, %v5494_v12  ;;  %v4972_v18 = vld [vmem:[#allocation6 + $0x60] sm:$0x2] }
 0x4e3   : > { %5493 = vst [vmem:[#allocation6 + $0x50] sm:$0x4] %v5492_v58  ;;  %5505 = vst [vmem:[#allocation6 + $0x70] sm:$0x4] %v5504_v46  ;;  %v5507_v27 = vsel %vm15285_vm12, %v5444_v9, %v5506_v10  ;;  %v4750_v6 = vrot.slane %v16466_v59, %v14970_v29  ;;  %v5872_v35 = vcombine.high %v2668_v13, %v2668_v13  ;;  %v4975_v56 = vld [vmem:[#allocation6 + $0x68] sm:$0x2] }
 0x4e4   : > { %5496 = vst [vmem:[#allocation6 + $0x58] sm:$0x4] %v5495_v24  ;;  %5508 = vst [vmem:[#allocation6 + $0x78] sm:$0x4] %v5507_v27  ;;  %v4743_v0 = vcombine.high %v4741_v23, %v4741_v23  ;;  %v4757_v57 = vrot.slane %v4741_v23, %v14970_v29  ;;  %v4764_v31 = vrot.slane %v4742_v16, %v14970_v29  ;;  %v4978_v33 = vld [vmem:[#allocation6 + $0x70] sm:$0x2]  ;;  %v16531_v23 = vpop.f32.mrf.mxu1 }
 0x4e5   : > { %v5879_v8 = vrot.slane %v2668_v13, %v14970_v29  ;;  %v4772_v51 = vcombine.high %v4750_v6, %v4750_v6  ;;  %v13134_v5 = vpack.c.bf16 %v4750_v6, %v4750_v6  ;;  %v5886_v4 = vrot.slane %v5872_v35, %v14970_v29  ;;  %v4969_v12 = vld [vmem:[#allocation6 + $0x58] sm:$0x2] }
 0x4e6   : > { %v6396_v38 = vcombine.high %v16508_v15, %v16508_v15  ;;  %v4771_v20 = vrot.slane %v4743_v0, %v14970_v29  ;;  %v4773_v59 = vcombine.high %v4757_v57, %v4757_v57  ;;  %v4774_v28 = vcombine.high %v4764_v31, %v4764_v31  ;;  %v4981_v58 = vld [vmem:[#allocation6 + $0x78] sm:$0x2] }
 0x4e7   : > { %v13135_v11 = vpack.c.bf16 %v4764_v31, %v4764_v31  ;;  %v13136_v45 = vpack.c.bf16 %v4772_v51, %v4772_v51  ;;  %v13138_v49 = vpack.c.bf16 %v4757_v57, %v4757_v57  ;;  %v4889_v54 = vshll.u32 %v13134_v5, 16 }
 0x4e8   : > { %v5887_v44 = vcombine.high %v5879_v8, %v5879_v8  ;;  %v4775_v43 = vcombine.high %v4771_v20, %v4771_v20  ;;  %v13137_v52 = vpack.c.bf16 %v4774_v28, %v4774_v28  ;;  %v13139_v41 = vpack.c.bf16 %v4771_v20, %v4771_v20 }
 0x4e9   : > { %v13140_v63 = vpack.c.bf16 %v4773_v59, %v4773_v59  ;;  %v4891_v32 = vrot.slane %v4889_v54, 7  ;;  %v4893_v1 = vshll.u32 %v13135_v11, 16  ;;  %v4897_v26 = vshll.u32 %v13136_v45, 16 }
 0x4ea   : > { %v4905_v39 = vshll.u32 %v13138_v49, 16  ;;  %v13141_v30 = vpack.c.bf16 %v4775_v43, %v4775_v43  ;;  %v4901_v36 = vshll.u32 %v13137_v52, 16  ;;  %v4909_v55 = vshll.u32 %v13139_v41, 16  ;;  %v6105_v41 = vld [vmem:[#allocation6 + $0x40] sm:$0x4] }
 0x4eb   : > { %v4913_v21 = vshll.u32 %v13140_v63, 16  ;;  %v4895_v62 = vrot.slane %v4893_v1, 7  ;;  %v4899_v47 = vrot.slane %v4897_v26, 7  ;;  %v4961_v2 = vsel %vm15318_vm10, %v4891_v32, %v4960_v40  ;;  %v6108_v63 = vld [vmem:[#allocation6 + $0x48] sm:$0x4] }
 0x4ec   : > { %v4907_v17 = vrot.slane %v4905_v39, 7  ;;  %v4903_v42 = vrot.slane %v4901_v36, 7  ;;  %v4911_v10 = vrot.slane %v4909_v55, 7  ;;  %v4917_v34 = vshll.u32 %v13141_v30, 16  ;;  %4962 = vst [vmem:[#allocation6 + $0x40] sm:$0x2] %v4961_v2 }
 0x4ed   : > { %v4915_v13 = vrot.slane %v4913_v21, 7  ;;  %v4964_v9 = vsel %vm15318_vm10, %v4895_v62, %v4963_v3  ;;  %v4967_v50 = vsel %vm15318_vm10, %v4899_v47, %v4966_v22  ;;  %v5888_v46 = vcombine.high %v5886_v4, %v5886_v4  ;;  %v6111_v1 = vld [vmem:[#allocation6 + $0x50] sm:$0x4]  ;;  %v6114_v26 = vld [vmem:[#allocation6 + $0x58] sm:$0x4] }
 0x4ee   : > { %v4973_v25 = vsel %vm15318_vm10, %v4907_v17, %v4972_v18  ;;  %v4919_v16 = vrot.slane %v4917_v34, 7  ;;  %4965 = vst [vmem:[#allocation6 + $0x48] sm:$0x2] %v4964_v9  ;;  %4968 = vst [vmem:[#allocation6 + $0x50] sm:$0x2] %v4967_v50  ;;  %v4970_v24 = vsel %vm15318_vm10, %v4903_v42, %v4969_v12  ;;  %v4976_v27 = vsel %vm15318_vm10, %v4911_v10, %v4975_v56 }
 0x4ef   : > { %4974 = vst [vmem:[#allocation6 + $0x60] sm:$0x2] %v4973_v25  ;;  %v4979_v6 = vsel %vm15318_vm10, %v4915_v13, %v4978_v33  ;;  %4971 = vst [vmem:[#allocation6 + $0x58] sm:$0x2] %v4970_v24  ;;  %v5895_v35 = vrot.slane %v5879_v8, %v14970_v29  ;;  %v5902_v0 = vrot.slane %v5886_v4, %v14970_v29  ;;  %v6120_v39 = vld [vmem:[#allocation6 + $0x68] sm:$0x4] }
 0x4f0   : > { %4977 = vst [vmem:[#allocation6 + $0x68] sm:$0x2] %v4976_v27  ;;  %4980 = vst [vmem:[#allocation6 + $0x70] sm:$0x2] %v4979_v6  ;;  %v5909_v57 = vrot.slane %v5887_v44, %v14970_v29  ;;  %v5916_v31 = vrot.slane %v5888_v46, %v14970_v29  ;;  %v4982_v51 = vsel %vm15318_vm10, %v4919_v16, %v4981_v58  ;;  %v6123_v21 = vld [vmem:[#allocation6 + $0x70] sm:$0x4]  ;;  %v16562_v58 = vpop.f32.mrf.mxu0 }
 0x4f1   : > { %v16547_v5 = vrot.slane %v16508_v15, %v14970_v29  ;;  %v16550_v20 = vrot.slane %v6396_v38, %v14970_v29  ;;  %v7458_v59 = vcombine.high %v16531_v23, %v16531_v23  ;;  %4983 = vst [vmem:[#allocation6 + $0x78] sm:$0x2] %v4982_v51  ;;  %v5917_v8 = vcombine.high %v5895_v35, %v5895_v35  ;;  %v6117_v38 = vld [vmem:[#allocation6 + $0x60] sm:$0x4]  ;;  %v6126_v2 = vld [vmem:[#allocation6 + $0x78] sm:$0x4] }
 0x4f2   : > { %v5918_v4 = vcombine.high %v5902_v0, %v5902_v0  ;;  %v5919_v28 = vcombine.high %v5909_v57, %v5909_v57  ;;  %v5920_v11 = vcombine.high %v5916_v31, %v5916_v31  ;;  %v13198_v45 = vpack.c.bf16 %v5895_v35, %v5895_v35 }
 0x4f3   : > { %v13199_v49 = vpack.c.bf16 %v5909_v57, %v5909_v57  ;;  %v13202_v54 = vpack.c.bf16 %v5902_v0, %v5902_v0  ;;  %v13203_v40 = vpack.c.bf16 %v5916_v31, %v5916_v31  ;;  %v13200_v44 = vpack.c.bf16 %v5917_v8, %v5917_v8 }
 0x4f4   : > { %v13201_v43 = vpack.c.bf16 %v5919_v28, %v5919_v28  ;;  %v13204_v52 = vpack.c.bf16 %v5918_v4, %v5918_v4  ;;  %v13205_v15 = vpack.c.bf16 %v5920_v11, %v5920_v11  ;;  %v6034_v3 = vshll.u32 %v13198_v45, 16 }
 0x4f5   : > { %v6038_v22 = vshll.u32 %v13199_v49, 16  ;;  %v6050_v18 = vshll.u32 %v13202_v54, 16  ;;  %v6054_v32 = vshll.u32 %v13203_v40, 16  ;;  %v6042_v56 = vshll.u32 %v13200_v44, 16 }
 0x4f6   : > { %v6046_v30 = vshll.u32 %v13201_v43, 16  ;;  %v6058_v36 = vshll.u32 %v13204_v52, 16  ;;  %v6062_v55 = vshll.u32 %v13205_v15, 16  ;;  %v6036_v33 = vrot.slane %v6034_v3, 6  ;;  %v6606_v52 = vld [vmem:[#allocation6] sm:$0x8] }
 0x4f7   : > { %v6040_v62 = vrot.slane %v6038_v22, 6  ;;  %v6052_v47 = vrot.slane %v6050_v18, 6  ;;  %v6056_v17 = vrot.slane %v6054_v32, 6  ;;  %v6044_v12 = vrot.slane %v6042_v56, 6  ;;  %v6618_v15 = vld [vmem:[#allocation6 + $0x20] sm:$0x8] }
 0x4f8   : > { %v6048_v42 = vrot.slane %v6046_v30, 6  ;;  %v6060_v10 = vrot.slane %v6058_v36, 6  ;;  %v6064_v13 = vrot.slane %v6062_v55, 6  ;;  %v6106_v34 = vsel %vm15349_vm15, %v6036_v33, %v6105_v41  ;;  %v6609_v22 = vld [vmem:[#allocation6 + $0x8] sm:$0x8] }
 0x4f9   : > { %v6109_v9 = vsel %vm15349_vm15, %v6040_v62, %v6108_v63  ;;  %v6118_v50 = vsel %vm15349_vm15, %v6052_v47, %v6117_v38  ;;  %v6121_v25 = vsel %vm15349_vm15, %v6056_v17, %v6120_v39  ;;  %6107 = vst [vmem:[#allocation6 + $0x40] sm:$0x4] %v6106_v34  ;;  %v6112_v46 = vsel %vm15349_vm15, %v6044_v12, %v6111_v1  ;;  %v6612_v18 = vld [vmem:[#allocation6 + $0x10] sm:$0x8]  ;;  %v6621_v56 = vld [vmem:[#allocation6 + $0x28] sm:$0x8] }
 0x4fa   : > { %6110 = vst [vmem:[#allocation6 + $0x48] sm:$0x4] %v6109_v9  ;;  %v6115_v16 = vsel %vm15349_vm15, %v6048_v42, %v6114_v26  ;;  %6119 = vst [vmem:[#allocation6 + $0x60] sm:$0x4] %v6118_v50  ;;  %v6124_v24 = vsel %vm15349_vm15, %v6060_v10, %v6123_v21  ;;  %v6127_v27 = vsel %vm15349_vm15, %v6064_v13, %v6126_v2  ;;  %v6624_v30 = vld [vmem:[#allocation6 + $0x30] sm:$0x8] }
 0x4fb   : > { %6122 = vst [vmem:[#allocation6 + $0x68] sm:$0x4] %v6121_v25  ;;  %6113 = vst [vmem:[#allocation6 + $0x50] sm:$0x4] %v6112_v46  ;;  %v6411_v6 = vcombine.high %v16547_v5, %v16547_v5  ;;  %v6412_v35 = vcombine.high %v16550_v20, %v16550_v20  ;;  %v6419_v0 = vrot.slane %v16547_v5, %v14970_v29  ;;  %v6615_v33 = vld [vmem:[#allocation6 + $0x18] sm:$0x8] }
 0x4fc   : > { %6116 = vst [vmem:[#allocation6 + $0x58] sm:$0x4] %v6115_v16  ;;  %6125 = vst [vmem:[#allocation6 + $0x70] sm:$0x4] %v6124_v24  ;;  %v6426_v57 = vrot.slane %v16550_v20, %v14970_v29  ;;  %v7465_v31 = vrot.slane %v16531_v23, %v14970_v29  ;;  %v7472_v51 = vrot.slane %v7458_v59, %v14970_v29  ;;  %v6627_v47 = vld [vmem:[#allocation6 + $0x38] sm:$0x8] }
 0x4fd   : > { %6128 = vst [vmem:[#allocation6 + $0x78] sm:$0x4] %v6127_v27  ;;  %v6968_v8 = vcombine.high %v16562_v58, %v16562_v58  ;;  %v16587_v4 = vrot.slane %v16562_v58, %v14970_v29  ;;  %v6433_v28 = vrot.slane %v6411_v6, %v14970_v29  ;;  %v6440_v11 = vrot.slane %v6412_v35, %v14970_v29  ;;  %v7588_v24 = vld [vmem:[#allocation6 + $0x4] sm:$0x1] }
 0x4fe   : > { %v6441_v5 = vcombine.high %v6419_v0, %v6419_v0  ;;  %v6442_v45 = vcombine.high %v6426_v57, %v6426_v57  ;;  %v13222_v49 = vpack.c.bf16 %v6419_v0, %v6419_v0  ;;  %v13226_v20 = vpack.c.bf16 %v6426_v57, %v6426_v57  ;;  %v7600_v27 = vld [vmem:[#allocation6 + $0x24] sm:$0x1] }
 0x4ff   : > { %v7473_v54 = vcombine.high %v7465_v31, %v7465_v31  ;;  %v7474_v40 = vcombine.high %v7472_v51, %v7472_v51  ;;  %v6443_v23 = vcombine.high %v6433_v28, %v6433_v28  ;;  %v6444_v44 = vcombine.high %v6440_v11, %v6440_v11 }
 0x500   : > { %v13223_v59 = vpack.c.bf16 %v6433_v28, %v6433_v28  ;;  %v13224_v43 = vpack.c.bf16 %v6441_v5, %v6441_v5  ;;  %v13227_v41 = vpack.c.bf16 %v6440_v11, %v6440_v11  ;;  %v13228_v63 = vpack.c.bf16 %v6442_v45, %v6442_v45 }
 0x501   : > { %v6574_v38 = vrot.slane %v13222_v49, 5  ;;  %v6578_v3 = vrot.slane %v13226_v20, 5  ;;  %v13225_v32 = vpack.c.bf16 %v6443_v23, %v6443_v23  ;;  %v13229_v1 = vpack.c.bf16 %v6444_v44, %v6444_v44  ;;  %v7594_v49 = vld [vmem:[#allocation6 + $0x14] sm:$0x1]  ;;  %v7597_v44 = vld [vmem:[#allocation6 + $0x1c] sm:$0x1] }
 0x502   : > { %v6575_v26 = vrot.slane %v13223_v59, 5  ;;  %v6576_v39 = vrot.slane %v13224_v43, 5  ;;  %v6579_v36 = vrot.slane %v13227_v41, 5  ;;  %v6580_v55 = vrot.slane %v13228_v63, 5  ;;  %v7606_v20 = vld [vmem:[#allocation6 + $0x34] sm:$0x1] }
 0x503   : > { %v6607_v21 = vsel %vm15497_vm7, %v6574_v38, %v6606_v52  ;;  %v6619_v62 = vsel %vm15497_vm7, %v6578_v3, %v6618_v15  ;;  %v6577_v17 = vrot.slane %v13225_v32, 5  ;;  %v6581_v2 = vrot.slane %v13229_v1, 5  ;;  %v7609_v43 = vld [vmem:[#allocation6 + $0x3c] sm:$0x1]  ;;  %v2750_v52 = vpop.f32.mrf.mxu1  ;;  %v16629_v1 = vpop.f32.mrf.mxu0 }
 0x504   : > { %6608 = vst [vmem:[#allocation6] sm:$0x8] %v6607_v21  ;;  %v6610_v12 = vsel %vm15497_vm7, %v6575_v26, %v6609_v22  ;;  %v6613_v42 = vsel %vm15497_vm7, %v6576_v39, %v6612_v18  ;;  %6620 = vst [vmem:[#allocation6 + $0x20] sm:$0x8] %v6619_v62  ;;  %v6622_v10 = vsel %vm15497_vm7, %v6579_v36, %v6621_v56 }
 0x505   : > { %6611 = vst [vmem:[#allocation6 + $0x8] sm:$0x8] %v6610_v12  ;;  %6614 = vst [vmem:[#allocation6 + $0x10] sm:$0x8] %v6613_v42  ;;  %v6625_v13 = vsel %vm15497_vm7, %v6580_v55, %v6624_v30  ;;  %v7481_v34 = vrot.slane %v7465_v31, %v14970_v29  ;;  %v7488_v9 = vrot.slane %v7472_v51, %v14970_v29  ;;  %v7591_v31 = vld [vmem:[#allocation6 + $0xc] sm:$0x1] }
 0x506   : > { %v6616_v50 = vsel %vm15497_vm7, %v6577_v17, %v6615_v33  ;;  %6623 = vst [vmem:[#allocation6 + $0x28] sm:$0x8] %v6622_v10  ;;  %6626 = vst [vmem:[#allocation6 + $0x30] sm:$0x8] %v6625_v13  ;;  %v6628_v25 = vsel %vm15497_vm7, %v6581_v2, %v6627_v47  ;;  %v7495_v46 = vrot.slane %v7473_v54, %v14970_v29  ;;  %v7603_v51 = vld [vmem:[#allocation6 + $0x2c] sm:$0x1] }
 0x507   : > { %v7502_v16 = vrot.slane %v7474_v40, %v14970_v29  ;;  %6617 = vst [vmem:[#allocation6 + $0x18] sm:$0x8] %v6616_v50  ;;  %6629 = vst [vmem:[#allocation6 + $0x38] sm:$0x8] %v6628_v25  ;;  %v7503_v6 = vcombine.high %v7481_v34, %v7481_v34  ;;  %v7504_v35 = vcombine.high %v7488_v9, %v7488_v9 }
 0x508   : > { %v7572_v0 = vpack.c.bf16 %v7481_v34, %v7481_v34  ;;  %v7576_v57 = vpack.c.bf16 %v7488_v9, %v7488_v9  ;;  %v7505_v28 = vcombine.high %v7495_v46, %v7495_v46  ;;  %v7573_v5 = vpack.c.bf16 %v7495_v46, %v7495_v46 }
 0x509   : > { %v7506_v11 = vcombine.high %v7502_v16, %v7502_v16  ;;  %v7577_v45 = vpack.c.bf16 %v7502_v16, %v7502_v16  ;;  %v7574_v23 = vpack.c.bf16 %v7503_v6, %v7503_v6  ;;  %v7578_v54 = vpack.c.bf16 %v7504_v35, %v7504_v35 }
 0x50a   : > { %v7589_v40 = vsel %vm15020_vm13, %v7572_v0, %v7588_v24  ;;  %v7601_v59 = vsel %vm15020_vm13, %v7576_v57, %v7600_v27  ;;  %v7575_v15 = vpack.c.bf16 %v7505_v28, %v7505_v28  ;;  %v7592_v63 = vsel %vm15020_vm13, %v7573_v5, %v7591_v31 }
 0x50b   : > { %v7579_v41 = vpack.c.bf16 %v7506_v11, %v7506_v11  ;;  %7590 = vst [vmem:[#allocation6 + $0x4] sm:$0x1] %v7589_v40  ;;  %7602 = vst [vmem:[#allocation6 + $0x24] sm:$0x1] %v7601_v59  ;;  %v7604_v38 = vsel %vm15020_vm13, %v7577_v45, %v7603_v51  ;;  %v7595_v3 = vsel %vm15020_vm13, %v7574_v23, %v7594_v49  ;;  %v7226_v34 = vld [vmem:[#allocation6] sm:$0x8] }
 0x50c   : > { %7593 = vst [vmem:[#allocation6 + $0xc] sm:$0x1] %v7592_v63  ;;  %7605 = vst [vmem:[#allocation6 + $0x2c] sm:$0x1] %v7604_v38  ;;  %v7607_v22 = vsel %vm15020_vm13, %v7578_v54, %v7606_v20  ;;  %v6982_v18 = vrot.slane %v6968_v8, %v14970_v29  ;;  %v6983_v32 = vcombine.high %v16587_v4, %v16587_v4  ;;  %v7229_v24 = vld [vmem:[#allocation6 + $0x8] sm:$0x8] }
 0x50d   : > { %7596 = vst [vmem:[#allocation6 + $0x14] sm:$0x1] %v7595_v3  ;;  %v7598_v26 = vsel %vm15020_vm13, %v7575_v15, %v7597_v44  ;;  %7608 = vst [vmem:[#allocation6 + $0x34] sm:$0x1] %v7607_v22  ;;  %v7610_v39 = vsel %vm15020_vm13, %v7579_v41, %v7609_v43  ;;  %v6991_v56 = vrot.slane %v16587_v4, %v14970_v29  ;;  %v7232_v27 = vld [vmem:[#allocation6 + $0x10] sm:$0x8] }
 0x50e   : > { %v7932_v30 = vcombine.high %v2750_v52, %v2750_v52  ;;  %7599 = vst [vmem:[#allocation6 + $0x1c] sm:$0x1] %v7598_v26  ;;  %7611 = vst [vmem:[#allocation6 + $0x3c] sm:$0x1] %v7610_v39  ;;  %v6984_v58 = vcombine.high %v6982_v18, %v6982_v18  ;;  %v6998_v8 = vrot.slane %v6982_v18, %v14970_v29  ;;  %v7238_v6 = vld [vmem:[#allocation6 + $0x20] sm:$0x8]  ;;  %v16652_v18 = vpop.f32.mrf.mxu1 }
 0x50f   : > { %v7005_v36 = vrot.slane %v6983_v32, %v14970_v29  ;;  %v7939_v55 = vrot.slane %v2750_v52, %v14970_v29  ;;  %v7013_v21 = vcombine.high %v6991_v56, %v6991_v56  ;;  %v13254_v33 = vpack.c.bf16 %v6991_v56, %v6991_v56  ;;  %v7241_v51 = vld [vmem:[#allocation6 + $0x28] sm:$0x8]  ;;  %v7244_v49 = vld [vmem:[#allocation6 + $0x30] sm:$0x8]  ;;  %v7235_v44 = vld [vmem:[#allocation6 + $0x18] sm:$0x8] }
 0x510   : > { %v7946_v62 = vrot.slane %v7932_v30, %v14970_v29  ;;  %v6445_v47 = vcombine.high %v16629_v1, %v16629_v1  ;;  %v7012_v17 = vrot.slane %v6984_v58, %v14970_v29  ;;  %v7014_v4 = vcombine.high %v6998_v8, %v6998_v8  ;;  %v7247_v3 = vld [vmem:[#allocation6 + $0x38] sm:$0x8] }
 0x511   : > { %v7015_v2 = vcombine.high %v7005_v36, %v7005_v36  ;;  %v13255_v12 = vpack.c.bf16 %v7005_v36, %v7005_v36  ;;  %v13256_v42 = vpack.c.bf16 %v7013_v21, %v7013_v21  ;;  %v13258_v10 = vpack.c.bf16 %v6998_v8, %v6998_v8 }
 0x512   : > { %v7147_v13 = vshll.u32 %v13254_v33, 16  ;;  %v7947_v9 = vcombine.high %v7939_v55, %v7939_v55  ;;  %v7016_v50 = vcombine.high %v7012_v17, %v7012_v17  ;;  %v13259_v46 = vpack.c.bf16 %v7012_v17, %v7012_v17 }
 0x513   : > { %v13257_v25 = vpack.c.bf16 %v7015_v2, %v7015_v2  ;;  %v13260_v16 = vpack.c.bf16 %v7014_v4, %v7014_v4  ;;  %v7151_v0 = vshll.u32 %v13255_v12, 16  ;;  %v7155_v57 = vshll.u32 %v13256_v42, 16  ;;  %v8174_v42 = vld [vmem:[#allocation6 + $0x4] sm:$0x1] }
 0x514   : > { %v7149_v35 = vrot.slane %v7147_v13, 5  ;;  %v7163_v31 = vshll.u32 %v13258_v10, 16  ;;  %v13261_v28 = vpack.c.bf16 %v7016_v50, %v7016_v50  ;;  %v7167_v5 = vshll.u32 %v13259_v46, 16  ;;  %v8177_v50 = vld [vmem:[#allocation6 + $0xc] sm:$0x1] }
 0x515   : > { %v7159_v11 = vshll.u32 %v13257_v25, 16  ;;  %v7171_v45 = vshll.u32 %v13260_v16, 16  ;;  %v7153_v20 = vrot.slane %v7151_v0, 5  ;;  %v7157_v23 = vrot.slane %v7155_v57, 5  ;;  %v8180_v25 = vld [vmem:[#allocation6 + $0x14] sm:$0x1] }
 0x516   : > { %v7165_v54 = vrot.slane %v7163_v31, 5  ;;  %v7227_v40 = vsel %vm15548_vm1, %v7149_v35, %v7226_v34  ;;  %v7169_v43 = vrot.slane %v7167_v5, 5  ;;  %v7175_v15 = vshll.u32 %v13261_v28, 16  ;;  %v8186_v46 = vld [vmem:[#allocation6 + $0x24] sm:$0x1] }
 0x517   : > { %v7161_v59 = vrot.slane %v7159_v11, 5  ;;  %v7173_v52 = vrot.slane %v7171_v45, 5  ;;  %7228 = vst [vmem:[#allocation6] sm:$0x8] %v7227_v40  ;;  %v7230_v41 = vsel %vm15548_vm1, %v7153_v20, %v7229_v24  ;;  %v7233_v63 = vsel %vm15548_vm1, %v7157_v23, %v7232_v27  ;;  %v8183_v27 = vld [vmem:[#allocation6 + $0x1c] sm:$0x1] }
 0x518   : > { %v7239_v38 = vsel %vm15548_vm1, %v7165_v54, %v7238_v6  ;;  %v7948_v22 = vcombine.high %v7946_v62, %v7946_v62  ;;  %v7177_v32 = vrot.slane %v7175_v15, 5  ;;  %7231 = vst [vmem:[#allocation6 + $0x8] sm:$0x8] %v7230_v41  ;;  %7234 = vst [vmem:[#allocation6 + $0x10] sm:$0x8] %v7233_v63  ;;  %v7242_v39 = vsel %vm15548_vm1, %v7169_v43, %v7241_v51 }
 0x519   : > { %v7236_v26 = vsel %vm15548_vm1, %v7161_v59, %v7235_v44  ;;  %7240 = vst [vmem:[#allocation6 + $0x20] sm:$0x8] %v7239_v38  ;;  %v7245_v56 = vsel %vm15548_vm1, %v7173_v52, %v7244_v49  ;;  %7243 = vst [vmem:[#allocation6 + $0x28] sm:$0x8] %v7242_v39  ;;  %v7955_v30 = vrot.slane %v7939_v55, %v14970_v29  ;;  %v8189_v6 = vld [vmem:[#allocation6 + $0x2c] sm:$0x1]  ;;  %v16679_v44 = vpop.f32.mrf.mxu0 }
 0x51a   : > { %7237 = vst [vmem:[#allocation6 + $0x18] sm:$0x8] %v7236_v26  ;;  %7246 = vst [vmem:[#allocation6 + $0x30] sm:$0x8] %v7245_v56  ;;  %v7962_v58 = vrot.slane %v7946_v62, %v14970_v29  ;;  %v7969_v8 = vrot.slane %v7947_v9, %v14970_v29  ;;  %v7976_v36 = vrot.slane %v7948_v22, %v14970_v29  ;;  %v8192_v35 = vld [vmem:[#allocation6 + $0x34] sm:$0x1] }
 0x51b   : > { %v7248_v21 = vsel %vm15548_vm1, %v7177_v32, %v7247_v3  ;;  %v6452_v33 = vrot.slane %v16629_v1, %v14970_v29  ;;  %v6459_v17 = vrot.slane %v6445_v47, %v14970_v29  ;;  %v7507_v4 = vcombine.high %v16652_v18, %v16652_v18  ;;  %v8195_v28 = vld [vmem:[#allocation6 + $0x3c] sm:$0x1] }
 0x51c   : > { %7249 = vst [vmem:[#allocation6 + $0x38] sm:$0x8] %v7248_v21  ;;  %v7977_v2 = vcombine.high %v7955_v30, %v7955_v30  ;;  %v7978_v55 = vcombine.high %v7962_v58, %v7962_v58  ;;  %v7979_v12 = vcombine.high %v7969_v8, %v7969_v8  ;;  %v7980_v62 = vcombine.high %v7976_v36, %v7976_v36 }
 0x51d   : > { %v13286_v10 = vpack.c.bf16 %v7955_v30, %v7955_v30  ;;  %v13287_v13 = vpack.c.bf16 %v7969_v8, %v7969_v8  ;;  %v13290_v34 = vpack.c.bf16 %v7962_v58, %v7962_v58  ;;  %v13291_v9 = vpack.c.bf16 %v7976_v36, %v7976_v36 }
 0x51e   : > { %v13288_v16 = vpack.c.bf16 %v7977_v2, %v7977_v2  ;;  %v13289_v1 = vpack.c.bf16 %v7979_v12, %v7979_v12  ;;  %v13292_v24 = vpack.c.bf16 %v7978_v55, %v7978_v55  ;;  %v13293_v47 = vpack.c.bf16 %v7980_v62, %v7980_v62  ;;  %v6630_v12 = vld [vmem:[#allocation6 + $0x40] sm:$0x8] }
 0x51f   : > { %v8111_v0 = vshll.u32 %v13286_v10, 16  ;;  %v8114_v57 = vshll.u32 %v13287_v13, 16  ;;  %v8123_v31 = vshll.u32 %v13290_v34, 16  ;;  %v8126_v51 = vshll.u32 %v13291_v9, 16  ;;  %v6642_v62 = vld [vmem:[#allocation6 + $0x60] sm:$0x8] }
 0x520   : > { %v8117_v11 = vshll.u32 %v13288_v16, 16  ;;  %v8120_v5 = vshll.u32 %v13289_v1, 16  ;;  %v8129_v45 = vshll.u32 %v13292_v24, 16  ;;  %v8132_v49 = vshll.u32 %v13293_v47, 16  ;;  %v6633_v9 = vld [vmem:[#allocation6 + $0x48] sm:$0x8] }
 0x521   : > { %v8175_v20 = vsel %vm15054_vm14, %v8111_v0, %v8174_v42  ;;  %v8178_v23 = vsel %vm15054_vm14, %v8114_v57, %v8177_v50  ;;  %v8187_v54 = vsel %vm15054_vm14, %v8123_v31, %v8186_v46  ;;  %v8190_v40 = vsel %vm15054_vm14, %v8126_v51, %v8189_v6  ;;  %v6636_v50 = vld [vmem:[#allocation6 + $0x50] sm:$0x8]  ;;  %v6645_v24 = vld [vmem:[#allocation6 + $0x68] sm:$0x8]  ;;  %v6639_v0 = vld [vmem:[#allocation6 + $0x58] sm:$0x8] }
 0x522   : > { %8176 = vst [vmem:[#allocation6 + $0x4] sm:$0x1] %v8175_v20  ;;  %8179 = vst [vmem:[#allocation6 + $0xc] sm:$0x1] %v8178_v23  ;;  %v8181_v59 = vsel %vm15054_vm14, %v8117_v11, %v8180_v25  ;;  %v8184_v43 = vsel %vm15054_vm14, %v8120_v5, %v8183_v27  ;;  %v8193_v52 = vsel %vm15054_vm14, %v8129_v45, %v8192_v35  ;;  %v6648_v47 = vld [vmem:[#allocation6 + $0x70] sm:$0x8] }
 0x523   : > { %8188 = vst [vmem:[#allocation6 + $0x24] sm:$0x1] %v8187_v54  ;;  %8191 = vst [vmem:[#allocation6 + $0x2c] sm:$0x1] %v8190_v40  ;;  %v8196_v15 = vsel %vm15054_vm14, %v8132_v49, %v8195_v28  ;;  %v6460_v41 = vcombine.high %v6452_v33, %v6452_v33  ;;  %v6461_v63 = vcombine.high %v6459_v17, %v6459_v17  ;;  %v6651_v31 = vld [vmem:[#allocation6 + $0x78] sm:$0x8] }
 0x524   : > { %8182 = vst [vmem:[#allocation6 + $0x14] sm:$0x1] %v8181_v59  ;;  %8185 = vst [vmem:[#allocation6 + $0x1c] sm:$0x1] %v8184_v43  ;;  %v6468_v38 = vrot.slane %v6452_v33, %v14970_v29  ;;  %v6475_v3 = vrot.slane %v6459_v17, %v14970_v29  ;;  %v7514_v22 = vrot.slane %v16652_v18, %v14970_v29 }
 0x525   : > { %8194 = vst [vmem:[#allocation6 + $0x34] sm:$0x1] %v8193_v52  ;;  %8197 = vst [vmem:[#allocation6 + $0x3c] sm:$0x1] %v8196_v15  ;;  %v7521_v32 = vrot.slane %v7507_v4, %v14970_v29  ;;  %v7017_v26 = vcombine.high %v16679_v44, %v16679_v44  ;;  %v16698_v39 = vrot.slane %v16679_v44, %v14970_v29  ;;  %v7612_v52 = vld [vmem:[#allocation6 + $0x44] sm:$0x1] }
 0x526   : > { %v6482_v56 = vrot.slane %v6460_v41, %v14970_v29  ;;  %v6489_v30 = vrot.slane %v6461_v63, %v14970_v29  ;;  %v6490_v58 = vcombine.high %v6468_v38, %v6468_v38  ;;  %v6491_v8 = vcombine.high %v6475_v3, %v6475_v3  ;;  %v7624_v15 = vld [vmem:[#allocation6 + $0x64] sm:$0x1] }
 0x527   : > { %v13230_v36 = vpack.c.bf16 %v6468_v38, %v6468_v38  ;;  %v13234_v21 = vpack.c.bf16 %v6475_v3, %v6475_v3  ;;  %v7522_v33 = vcombine.high %v7514_v22, %v7514_v22  ;;  %v7523_v17 = vcombine.high %v7521_v32, %v7521_v32 }
 0x528   : > { %v6492_v18 = vcombine.high %v6482_v56, %v6482_v56  ;;  %v6493_v2 = vcombine.high %v6489_v30, %v6489_v30  ;;  %v13231_v4 = vpack.c.bf16 %v6482_v56, %v6482_v56  ;;  %v13232_v55 = vpack.c.bf16 %v6490_v58, %v6490_v58 }
 0x529   : > { %v13235_v42 = vpack.c.bf16 %v6489_v30, %v6489_v30  ;;  %v13236_v10 = vpack.c.bf16 %v6491_v8, %v6491_v8  ;;  %v6582_v13 = vrot.slane %v13230_v36, 5  ;;  %v6586_v34 = vrot.slane %v13234_v21, 5  ;;  %v7618_v36 = vld [vmem:[#allocation6 + $0x54] sm:$0x1] }
 0x52a   : > { %v13233_v25 = vpack.c.bf16 %v6492_v18, %v6492_v18  ;;  %v13237_v46 = vpack.c.bf16 %v6493_v2, %v6493_v2  ;;  %v6583_v16 = vrot.slane %v13231_v4, 5  ;;  %v6584_v1 = vrot.slane %v13232_v55, 5  ;;  %v7630_v21 = vld [vmem:[#allocation6 + $0x74] sm:$0x1]  ;;  %v7621_v2 = vld [vmem:[#allocation6 + $0x5c] sm:$0x1] }
 0x52b   : > { %v6587_v27 = vrot.slane %v13235_v42, 5  ;;  %v6588_v6 = vrot.slane %v13236_v10, 5  ;;  %v6631_v35 = vsel %vm15497_vm7, %v6582_v13, %v6630_v12  ;;  %v6643_v57 = vsel %vm15497_vm7, %v6586_v34, %v6642_v62  ;;  %v7633_v55 = vld [vmem:[#allocation6 + $0x7c] sm:$0x1]  ;;  %v2754_v12 = vpop.f32.mrf.mxu1 }
 0x52c   : > { %v6585_v51 = vrot.slane %v13233_v25, 5  ;;  %v6589_v28 = vrot.slane %v13237_v46, 5  ;;  %6632 = vst [vmem:[#allocation6 + $0x40] sm:$0x8] %v6631_v35  ;;  %v6634_v11 = vsel %vm15497_vm7, %v6583_v16, %v6633_v9  ;;  %v6637_v5 = vsel %vm15497_vm7, %v6584_v1, %v6636_v50  ;;  %6644 = vst [vmem:[#allocation6 + $0x60] sm:$0x8] %v6643_v57  ;;  %v16740_v46 = vpop.f32.mrf.mxu0 }
 0x52d   : > { %6635 = vst [vmem:[#allocation6 + $0x48] sm:$0x8] %v6634_v11  ;;  %6638 = vst [vmem:[#allocation6 + $0x50] sm:$0x8] %v6637_v5  ;;  %v6646_v45 = vsel %vm15497_vm7, %v6587_v27, %v6645_v24  ;;  %v6649_v49 = vsel %vm15497_vm7, %v6588_v6, %v6648_v47  ;;  %v7530_v20 = vrot.slane %v7514_v22, %v14970_v29  ;;  %v7615_v22 = vld [vmem:[#allocation6 + $0x4c] sm:$0x1] }
 0x52e   : > { %v7537_v23 = vrot.slane %v7521_v32, %v14970_v29  ;;  %v6640_v54 = vsel %vm15497_vm7, %v6585_v51, %v6639_v0  ;;  %6647 = vst [vmem:[#allocation6 + $0x68] sm:$0x8] %v6646_v45  ;;  %6650 = vst [vmem:[#allocation6 + $0x70] sm:$0x8] %v6649_v49  ;;  %v6652_v40 = vsel %vm15497_vm7, %v6589_v28, %v6651_v31  ;;  %v7627_v32 = vld [vmem:[#allocation6 + $0x6c] sm:$0x1] }
 0x52f   : > { %v7544_v59 = vrot.slane %v7522_v33, %v14970_v29  ;;  %v7551_v43 = vrot.slane %v7523_v17, %v14970_v29  ;;  %6641 = vst [vmem:[#allocation6 + $0x58] sm:$0x8] %v6640_v54  ;;  %6653 = vst [vmem:[#allocation6 + $0x78] sm:$0x8] %v6652_v40  ;;  %v7552_v41 = vcombine.high %v7530_v20, %v7530_v20 }
 0x530   : > { %v7553_v63 = vcombine.high %v7537_v23, %v7537_v23  ;;  %v7580_v38 = vpack.c.bf16 %v7530_v20, %v7530_v20  ;;  %v7584_v3 = vpack.c.bf16 %v7537_v23, %v7537_v23  ;;  %v7031_v50 = vrot.slane %v7017_v26, %v14970_v29 }
 0x531   : > { %v7554_v56 = vcombine.high %v7544_v59, %v7544_v59  ;;  %v7555_v30 = vcombine.high %v7551_v43, %v7551_v43  ;;  %v7581_v58 = vpack.c.bf16 %v7544_v59, %v7544_v59  ;;  %v7585_v8 = vpack.c.bf16 %v7551_v43, %v7551_v43 }
 0x532   : > { %v7582_v18 = vpack.c.bf16 %v7552_v41, %v7552_v41  ;;  %v7586_v33 = vpack.c.bf16 %v7553_v63, %v7553_v63  ;;  %v7613_v17 = vsel %vm15020_vm13, %v7580_v38, %v7612_v52  ;;  %v7625_v4 = vsel %vm15020_vm13, %v7584_v3, %v7624_v15 }
 0x533   : > { %v7583_v62 = vpack.c.bf16 %v7554_v56, %v7554_v56  ;;  %v7587_v42 = vpack.c.bf16 %v7555_v30, %v7555_v30  ;;  %7614 = vst [vmem:[#allocation6 + $0x44] sm:$0x1] %v7613_v17  ;;  %v7616_v10 = vsel %vm15020_vm13, %v7581_v58, %v7615_v22  ;;  %7626 = vst [vmem:[#allocation6 + $0x64] sm:$0x1] %v7625_v4  ;;  %v7250_v49 = vld [vmem:[#allocation6 + $0x40] sm:$0x8] }
 0x534   : > { %v7628_v13 = vsel %vm15020_vm13, %v7585_v8, %v7627_v32  ;;  %7617 = vst [vmem:[#allocation6 + $0x4c] sm:$0x1] %v7616_v10  ;;  %v7619_v34 = vsel %vm15020_vm13, %v7582_v18, %v7618_v36  ;;  %v7631_v9 = vsel %vm15020_vm13, %v7586_v33, %v7630_v21  ;;  %v7032_v25 = vcombine.high %v16698_v39, %v16698_v39  ;;  %v7253_v43 = vld [vmem:[#allocation6 + $0x48] sm:$0x8]  ;;  %v7256_v52 = vld [vmem:[#allocation6 + $0x50] sm:$0x8] }
 0x535   : > { %7629 = vst [vmem:[#allocation6 + $0x6c] sm:$0x1] %v7628_v13  ;;  %7620 = vst [vmem:[#allocation6 + $0x54] sm:$0x1] %v7619_v34  ;;  %v7622_v16 = vsel %vm15020_vm13, %v7583_v62, %v7621_v2  ;;  %v7634_v1 = vsel %vm15020_vm13, %v7587_v42, %v7633_v55  ;;  %v7040_v24 = vrot.slane %v16698_v39, %v14970_v29  ;;  %v7262_v15 = vld [vmem:[#allocation6 + $0x60] sm:$0x8] }
 0x536   : > { %7632 = vst [vmem:[#allocation6 + $0x74] sm:$0x1] %v7631_v9  ;;  %v7981_v47 = vcombine.high %v2754_v12, %v2754_v12  ;;  %7623 = vst [vmem:[#allocation6 + $0x5c] sm:$0x1] %v7622_v16  ;;  %v7033_v44 = vcombine.high %v7031_v50, %v7031_v50  ;;  %v7047_v26 = vrot.slane %v7031_v50, %v14970_v29  ;;  %v7265_v22 = vld [vmem:[#allocation6 + $0x68] sm:$0x8]  ;;  %v16763_v9 = vpop.f32.mrf.mxu1 }
 0x537   : > { %7635 = vst [vmem:[#allocation6 + $0x7c] sm:$0x1] %v7634_v1  ;;  %v7054_v27 = vrot.slane %v7032_v25, %v14970_v29  ;;  %v7988_v6 = vrot.slane %v2754_v12, %v14970_v29  ;;  %v7062_v35 = vcombine.high %v7040_v24, %v7040_v24  ;;  %v13262_v0 = vpack.c.bf16 %v7040_v24, %v7040_v24  ;;  %v7268_v8 = vld [vmem:[#allocation6 + $0x70] sm:$0x8]  ;;  %v7259_v17 = vld [vmem:[#allocation6 + $0x58] sm:$0x8] }
 0x538   : > { %v7995_v57 = vrot.slane %v7981_v47, %v14970_v29  ;;  %v8486_v60 = vcombine.high %v16740_v46, %v16740_v46  ;;  %v7061_v31 = vrot.slane %v7033_v44, %v14970_v29  ;;  %v7063_v39 = vcombine.high %v7047_v26, %v7047_v26  ;;  %v7271_v13 = vld [vmem:[#allocation6 + $0x78] sm:$0x8] }
 0x539   : > { %v7064_v51 = vcombine.high %v7054_v27, %v7054_v27  ;;  %v13263_v28 = vpack.c.bf16 %v7054_v27, %v7054_v27  ;;  %v13264_v11 = vpack.c.bf16 %v7062_v35, %v7062_v35  ;;  %v13266_v5 = vpack.c.bf16 %v7047_v26, %v7047_v26 }
 0x53a   : > { %v7179_v45 = vshll.u32 %v13262_v0, 16  ;;  %v7996_v20 = vcombine.high %v7988_v6, %v7988_v6  ;;  %v7065_v23 = vcombine.high %v7061_v31, %v7061_v31  ;;  %v13267_v40 = vpack.c.bf16 %v7061_v31, %v7061_v31 }
 0x53b   : > { %v13265_v54 = vpack.c.bf16 %v7064_v51, %v7064_v51  ;;  %v13268_v59 = vpack.c.bf16 %v7063_v39, %v7063_v39  ;;  %v7183_v63 = vshll.u32 %v13263_v28, 16  ;;  %v7187_v38 = vshll.u32 %v13264_v11, 16  ;;  %v8198_v28 = vld [vmem:[#allocation6 + $0x44] sm:$0x1] }
 0x53c   : > { %v7181_v41 = vrot.slane %v7179_v45, 5  ;;  %v7195_v3 = vshll.u32 %v13266_v5, 16  ;;  %v13269_v32 = vpack.c.bf16 %v7065_v23, %v7065_v23  ;;  %v7199_v30 = vshll.u32 %v13267_v40, 16  ;;  %v8204_v23 = vld [vmem:[#allocation6 + $0x54] sm:$0x1] }
 0x53d   : > { %v7191_v56 = vshll.u32 %v13265_v54, 16  ;;  %v7203_v58 = vshll.u32 %v13268_v59, 16  ;;  %v7185_v36 = vrot.slane %v7183_v63, 5  ;;  %v7189_v21 = vrot.slane %v7187_v38, 5  ;;  %v8210_v54 = vld [vmem:[#allocation6 + $0x64] sm:$0x1] }
 0x53e   : > { %v7197_v18 = vrot.slane %v7195_v3, 5  ;;  %v7251_v33 = vsel %vm15548_vm1, %v7181_v41, %v7250_v49  ;;  %v7201_v4 = vrot.slane %v7199_v30, 5  ;;  %v7207_v12 = vshll.u32 %v13269_v32, 16 }
 0x53f   : > { %v7193_v2 = vrot.slane %v7191_v56, 5  ;;  %v7205_v55 = vrot.slane %v7203_v58, 5  ;;  %7252 = vst [vmem:[#allocation6 + $0x40] sm:$0x8] %v7251_v33  ;;  %v7254_v62 = vsel %vm15548_vm1, %v7185_v36, %v7253_v43  ;;  %v7257_v42 = vsel %vm15548_vm1, %v7189_v21, %v7256_v52  ;;  %v8207_v43 = vld [vmem:[#allocation6 + $0x5c] sm:$0x1] }
 0x540   : > { %v7263_v10 = vsel %vm15548_vm1, %v7197_v18, %v7262_v15  ;;  %v7997_v34 = vcombine.high %v7995_v57, %v7995_v57  ;;  %v7209_v50 = vrot.slane %v7207_v12, 5  ;;  %7255 = vst [vmem:[#allocation6 + $0x48] sm:$0x8] %v7254_v62  ;;  %7258 = vst [vmem:[#allocation6 + $0x50] sm:$0x8] %v7257_v42  ;;  %v7266_v16 = vsel %vm15548_vm1, %v7201_v4, %v7265_v22  ;;  %v16784_v36 = vld [vmem:[#allocation2 + $0x8] sm:$0xff]  }
 0x541   : > { %v7260_v25 = vsel %vm15548_vm1, %v7193_v2, %v7259_v17  ;;  %7264 = vst [vmem:[#allocation6 + $0x60] sm:$0x8] %v7263_v10  ;;  %v7269_v1 = vsel %vm15548_vm1, %v7205_v55, %v7268_v8  ;;  %7267 = vst [vmem:[#allocation6 + $0x68] sm:$0x8] %v7266_v16  ;;  %v8004_v24 = vrot.slane %v7988_v6, %v14970_v29  ;;  %v8213_v52 = vld [vmem:[#allocation6 + $0x6c] sm:$0x1]  ;;  %v16794_v2 = vpop.f32.mrf.mxu0 }
 0x542   : > { %7261 = vst [vmem:[#allocation6 + $0x58] sm:$0x8] %v7260_v25  ;;  %7270 = vst [vmem:[#allocation6 + $0x70] sm:$0x8] %v7269_v1  ;;  %v8011_v47 = vrot.slane %v7995_v57, %v14970_v29  ;;  %v8018_v44 = vrot.slane %v7996_v20, %v14970_v29  ;;  %v8025_v26 = vrot.slane %v7997_v34, %v14970_v29  ;;  %v8201_v20 = vld [vmem:[#allocation6 + $0x4c] sm:$0x1] }
 0x543   : > { %v7272_v27 = vsel %vm15548_vm1, %v7209_v50, %v7271_v13  ;;  %v8493_v35 = vrot.slane %v16740_v46, %v14970_v29  ;;  %v8500_v0 = vrot.slane %v8486_v60, %v14970_v29  ;;  %v9626_v31 = vcombine.high %v16763_v9, %v16763_v9  ;;  %v8216_v15 = vld [vmem:[#allocation6 + $0x74] sm:$0x1]  ;;  %v8219_v22 = vld [vmem:[#allocation6 + $0x7c] sm:$0x1]  ;;  %v16782_v8 = vld [vmem:[#allocation2] sm:$0xff]  }
 0x544   : > { %7273 = vst [vmem:[#allocation6 + $0x78] sm:$0x8] %v7272_v27  ;;  %v8026_v39 = vcombine.high %v8004_v24, %v8004_v24  ;;  %v8027_v6 = vcombine.high %v8011_v47, %v8011_v47  ;;  %v8028_v51 = vcombine.high %v8018_v44, %v8018_v44  ;;  %v8029_v57 = vcombine.high %v8025_v26, %v8025_v26 }
 0x545   : > { %v13294_v11 = vpack.c.bf16 %v8004_v24, %v8004_v24  ;;  %v13295_v5 = vpack.c.bf16 %v8018_v44, %v8018_v44  ;;  %v13298_v45 = vpack.c.bf16 %v8011_v47, %v8011_v47  ;;  %v13299_v49 = vpack.c.bf16 %v8025_v26, %v8025_v26 }
 0x546   : > { %v13296_v40 = vpack.c.bf16 %v8026_v39, %v8026_v39  ;;  %v13297_v46 = vpack.c.bf16 %v8028_v51, %v8028_v51  ;;  %v13300_v59 = vpack.c.bf16 %v8027_v6, %v8027_v6  ;;  %v13301_v60 = vpack.c.bf16 %v8029_v57, %v8029_v57  ;;  %v8696_v51 = vld [vmem:[#allocation6 + $0x4] sm:$0x2] }
 0x547   : > { %v8135_v41 = vshll.u32 %v13294_v11, 16  ;;  %v8138_v63 = vshll.u32 %v13295_v5, 16  ;;  %v8147_v38 = vshll.u32 %v13298_v45, 16  ;;  %v8150_v3 = vshll.u32 %v13299_v49, 16  ;;  %v8708_v57 = vld [vmem:[#allocation6 + $0x24] sm:$0x2] }
 0x548   : > { %v8141_v32 = vshll.u32 %v13296_v40, 16  ;;  %v8144_v56 = vshll.u32 %v13297_v46, 16  ;;  %v8153_v30 = vshll.u32 %v13300_v59, 16  ;;  %v8156_v58 = vshll.u32 %v13301_v60, 16  ;;  %v8699_v49 = vld [vmem:[#allocation6 + $0xc] sm:$0x2] }
 0x549   : > { %v8199_v21 = vsel %vm15054_vm14, %v8135_v41, %v8198_v28  ;;  %v8202_v18 = vsel %vm15054_vm14, %v8138_v63, %v8201_v20  ;;  %v8211_v33 = vsel %vm15054_vm14, %v8147_v38, %v8210_v54  ;;  %v8214_v17 = vsel %vm15054_vm14, %v8150_v3, %v8213_v52  ;;  %v8702_v20 = vld [vmem:[#allocation6 + $0x14] sm:$0x2]  ;;  %v8711_v59 = vld [vmem:[#allocation6 + $0x2c] sm:$0x2]  ;;  %v8705_v41 = vld [vmem:[#allocation6 + $0x1c] sm:$0x2] }
 0x54a   : > { %8200 = vst [vmem:[#allocation6 + $0x44] sm:$0x1] %v8199_v21  ;;  %8203 = vst [vmem:[#allocation6 + $0x4c] sm:$0x1] %v8202_v18  ;;  %v8205_v4 = vsel %vm15054_vm14, %v8141_v32, %v8204_v23  ;;  %v8208_v55 = vsel %vm15054_vm14, %v8144_v56, %v8207_v43  ;;  %v8217_v12 = vsel %vm15054_vm14, %v8153_v30, %v8216_v15  ;;  %v8714_v60 = vld [vmem:[#allocation6 + $0x34] sm:$0x2] }
 0x54b   : > { %8212 = vst [vmem:[#allocation6 + $0x64] sm:$0x1] %v8211_v33  ;;  %8215 = vst [vmem:[#allocation6 + $0x6c] sm:$0x1] %v8214_v17  ;;  %v8220_v62 = vsel %vm15054_vm14, %v8156_v58, %v8219_v22  ;;  %v8501_v42 = vcombine.high %v8493_v35, %v8493_v35  ;;  %v8502_v10 = vcombine.high %v8500_v0, %v8500_v0  ;;  %v8717_v38 = vld [vmem:[#allocation6 + $0x3c] sm:$0x2] }
 0x54c   : > { %8206 = vst [vmem:[#allocation6 + $0x54] sm:$0x1] %v8205_v4  ;;  %8209 = vst [vmem:[#allocation6 + $0x5c] sm:$0x1] %v8208_v55  ;;  %v8509_v13 = vrot.slane %v8493_v35, %v14970_v29  ;;  %v8516_v34 = vrot.slane %v8500_v0, %v14970_v29  ;;  %v9633_v50 = vrot.slane %v16763_v9, %v14970_v29 }
 0x54d   : > { %8218 = vst [vmem:[#allocation6 + $0x74] sm:$0x1] %v8217_v12  ;;  %8221 = vst [vmem:[#allocation6 + $0x7c] sm:$0x1] %v8220_v62  ;;  %v9640_v25 = vrot.slane %v9626_v31, %v14970_v29  ;;  %v9056_v16 = vcombine.high %v16794_v2, %v16794_v2  ;;  %v16813_v19 = vrot.slane %v16794_v2, %v14970_v29 }
 0x54e   : > { %v8523_v1 = vrot.slane %v8501_v42, %v14970_v29  ;;  %v8530_v24 = vrot.slane %v8502_v10, %v14970_v29  ;;  %v8531_v47 = vcombine.high %v8509_v13, %v8509_v13  ;;  %v8532_v44 = vcombine.high %v8516_v34, %v8516_v34 }
 0x54f   : > { %v13318_v26 = vpack.c.bf16 %v8509_v13, %v8509_v13  ;;  %v13322_v27 = vpack.c.bf16 %v8516_v34, %v8516_v34  ;;  %v9641_v35 = vcombine.high %v9633_v50, %v9633_v50  ;;  %v9642_v0 = vcombine.high %v9640_v25, %v9640_v25 }
 0x550   : > { %v8533_v9 = vcombine.high %v8523_v1, %v8523_v1  ;;  %v8534_v39 = vcombine.high %v8530_v24, %v8530_v24  ;;  %v13319_v31 = vpack.c.bf16 %v8523_v1, %v8523_v1  ;;  %v13320_v6 = vpack.c.bf16 %v8531_v47, %v8531_v47  ;;  %v9836_v1 = vld [vmem:[#allocation6 + $0x4] sm:$0x4] }
 0x551   : > { %v13323_v28 = vpack.c.bf16 %v8530_v24, %v8530_v24  ;;  %v13324_v11 = vpack.c.bf16 %v8532_v44, %v8532_v44  ;;  %v8664_v5 = vrot.slane %v13318_v26, 7  ;;  %v8668_v45 = vrot.slane %v13322_v27, 7  ;;  %v9848_v24 = vld [vmem:[#allocation6 + $0x24] sm:$0x4] }
 0x552   : > { %v13321_v23 = vpack.c.bf16 %v8533_v9, %v8533_v9  ;;  %v13325_v54 = vpack.c.bf16 %v8534_v39, %v8534_v39  ;;  %v8665_v40 = vrot.slane %v13319_v31, 7  ;;  %v8666_v46 = vrot.slane %v13320_v6, 7  ;;  %v9839_v9 = vld [vmem:[#allocation6 + $0xc] sm:$0x4] }
 0x553   : > { %v8669_v43 = vrot.slane %v13323_v28, 7  ;;  %v8670_v52 = vrot.slane %v13324_v11, 7  ;;  %v8697_v15 = vsel %vm15258_vm11, %v8664_v5, %v8696_v51  ;;  %v8709_v63 = vsel %vm15258_vm11, %v8668_v45, %v8708_v57  ;;  %v9842_v51 = vld [vmem:[#allocation6 + $0x14] sm:$0x4]  ;;  %v9845_v45 = vld [vmem:[#allocation6 + $0x1c] sm:$0x4] }
 0x554   : > { %v8667_v3 = vrot.slane %v13321_v23, 7  ;;  %v8671_v22 = vrot.slane %v13325_v54, 7  ;;  %8698 = vst [vmem:[#allocation6 + $0x4] sm:$0x2] %v8697_v15  ;;  %v8700_v32 = vsel %vm15258_vm11, %v8665_v40, %v8699_v49  ;;  %v8703_v56 = vsel %vm15258_vm11, %v8666_v46, %v8702_v20  ;;  %8710 = vst [vmem:[#allocation6 + $0x24] sm:$0x2] %v8709_v63  ;;  %v2836_v23 = vpop.f32.mrf.mxu1 }
 0x555   : > { %8701 = vst [vmem:[#allocation6 + $0xc] sm:$0x2] %v8700_v32  ;;  %8704 = vst [vmem:[#allocation6 + $0x14] sm:$0x2] %v8703_v56  ;;  %v8712_v30 = vsel %vm15258_vm11, %v8669_v43, %v8711_v59  ;;  %v8715_v58 = vsel %vm15258_vm11, %v8670_v52, %v8714_v60  ;;  %v9649_v21 = vrot.slane %v9633_v50, %v14970_v29  ;;  %v9854_v57 = vld [vmem:[#allocation6 + $0x34] sm:$0x4] }
 0x556   : > { %v9656_v18 = vrot.slane %v9640_v25, %v14970_v29  ;;  %v8706_v33 = vsel %vm15258_vm11, %v8667_v3, %v8705_v41  ;;  %8713 = vst [vmem:[#allocation6 + $0x2c] sm:$0x2] %v8712_v30  ;;  %8716 = vst [vmem:[#allocation6 + $0x34] sm:$0x2] %v8715_v58  ;;  %v8718_v17 = vsel %vm15258_vm11, %v8671_v22, %v8717_v38  ;;  %v9857_v20 = vld [vmem:[#allocation6 + $0x3c] sm:$0x4]  ;;  %v16855_v41 = vpop.f32.mrf.mxu0 }
 0x557   : > { %v9663_v4 = vrot.slane %v9641_v35, %v14970_v29  ;;  %v9670_v55 = vrot.slane %v9642_v0, %v14970_v29  ;;  %8707 = vst [vmem:[#allocation6 + $0x1c] sm:$0x2] %v8706_v33  ;;  %8719 = vst [vmem:[#allocation6 + $0x3c] sm:$0x2] %v8718_v17  ;;  %v9671_v12 = vcombine.high %v9649_v21, %v9649_v21  ;;  %v9851_v35 = vld [vmem:[#allocation6 + $0x2c] sm:$0x4] }
 0x558   : > { %v9672_v62 = vcombine.high %v9656_v18, %v9656_v18  ;;  %v13382_v42 = vpack.c.bf16 %v9649_v21, %v9649_v21  ;;  %v13386_v10 = vpack.c.bf16 %v9656_v18, %v9656_v18  ;;  %v9070_v52 = vrot.slane %v9056_v16, %v14970_v29 }
 0x559   : > { %v9673_v13 = vcombine.high %v9663_v4, %v9663_v4  ;;  %v9674_v34 = vcombine.high %v9670_v55, %v9670_v55  ;;  %v13383_v50 = vpack.c.bf16 %v9663_v4, %v9663_v4  ;;  %v13387_v25 = vpack.c.bf16 %v9670_v55, %v9670_v55 }
 0x55a   : > { %v13384_v47 = vpack.c.bf16 %v9671_v12, %v9671_v12  ;;  %v13388_v44 = vpack.c.bf16 %v9672_v62, %v9672_v62  ;;  %v9804_v26 = vrot.slane %v13382_v42, 6  ;;  %v9808_v27 = vrot.slane %v13386_v10, 6 }
 0x55b   : > { %v13385_v39 = vpack.c.bf16 %v9673_v13, %v9673_v13  ;;  %v13389_v0 = vpack.c.bf16 %v9674_v34, %v9674_v34  ;;  %v9805_v31 = vrot.slane %v13383_v50, 6  ;;  %v9809_v6 = vrot.slane %v13387_v25, 6  ;;  %v9314_v42 = vld [vmem:[#allocation6 + $0x4] sm:$0x2] }
 0x55c   : > { %v9806_v28 = vrot.slane %v13384_v47, 6  ;;  %v9810_v11 = vrot.slane %v13388_v44, 6  ;;  %v9837_v5 = vsel %vm15285_vm12, %v9804_v26, %v9836_v1  ;;  %v9849_v49 = vsel %vm15285_vm12, %v9808_v27, %v9848_v24  ;;  %v9317_v1 = vld [vmem:[#allocation6 + $0xc] sm:$0x2]  ;;  %v9320_v24 = vld [vmem:[#allocation6 + $0x14] sm:$0x2] }
 0x55d   : > { %v9807_v54 = vrot.slane %v13385_v39, 6  ;;  %v9811_v40 = vrot.slane %v13389_v0, 6  ;;  %9838 = vst [vmem:[#allocation6 + $0x4] sm:$0x4] %v9837_v5  ;;  %v9840_v46 = vsel %vm15285_vm12, %v9805_v31, %v9839_v9  ;;  %9850 = vst [vmem:[#allocation6 + $0x24] sm:$0x4] %v9849_v49  ;;  %v9852_v59 = vsel %vm15285_vm12, %v9809_v6, %v9851_v35 }
 0x55e   : > { %9841 = vst [vmem:[#allocation6 + $0xc] sm:$0x4] %v9840_v46  ;;  %v9843_v60 = vsel %vm15285_vm12, %v9806_v28, %v9842_v51  ;;  %9853 = vst [vmem:[#allocation6 + $0x2c] sm:$0x4] %v9852_v59  ;;  %v9855_v43 = vsel %vm15285_vm12, %v9810_v11, %v9854_v57  ;;  %v9071_v15 = vcombine.high %v16813_v19, %v16813_v19  ;;  %v9326_v47 = vld [vmem:[#allocation6 + $0x24] sm:$0x2] }
 0x55f   : > { %9844 = vst [vmem:[#allocation6 + $0x14] sm:$0x4] %v9843_v60  ;;  %v9846_v63 = vsel %vm15285_vm12, %v9807_v54, %v9845_v45  ;;  %9856 = vst [vmem:[#allocation6 + $0x34] sm:$0x4] %v9855_v43  ;;  %v9858_v38 = vsel %vm15285_vm12, %v9811_v40, %v9857_v20  ;;  %v9079_v3 = vrot.slane %v16813_v19, %v14970_v29  ;;  %v9329_v35 = vld [vmem:[#allocation6 + $0x2c] sm:$0x2] }
 0x560   : > { %v10196_v22 = vcombine.high %v2836_v23, %v2836_v23  ;;  %9847 = vst [vmem:[#allocation6 + $0x1c] sm:$0x4] %v9846_v63  ;;  %9859 = vst [vmem:[#allocation6 + $0x3c] sm:$0x4] %v9858_v38  ;;  %v9072_v2 = vcombine.high %v9070_v52, %v9070_v52  ;;  %v9086_v16 = vrot.slane %v9070_v52, %v14970_v29  ;;  %v9332_v51 = vld [vmem:[#allocation6 + $0x34] sm:$0x2]  ;;  %v16878_v52 = vpop.f32.mrf.mxu1 }
 0x561   : > { %v9093_v32 = vrot.slane %v9071_v15, %v14970_v29  ;;  %v10203_v56 = vrot.slane %v2836_v23, %v14970_v29  ;;  %v9101_v30 = vcombine.high %v9079_v3, %v9079_v3  ;;  %v13350_v58 = vpack.c.bf16 %v9079_v3, %v9079_v3  ;;  %v9323_v45 = vld [vmem:[#allocation6 + $0x1c] sm:$0x2] }
 0x562   : > { %v10210_v21 = vrot.slane %v10196_v22, %v14970_v29  ;;  %v8535_v18 = vcombine.high %v16855_v41, %v16855_v41  ;;  %v9100_v33 = vrot.slane %v9072_v2, %v14970_v29  ;;  %v9102_v19 = vcombine.high %v9086_v16, %v9086_v16  ;;  %v9335_v60 = vld [vmem:[#allocation6 + $0x3c] sm:$0x2] }
 0x563   : > { %v9103_v17 = vcombine.high %v9093_v32, %v9093_v32  ;;  %v13351_v4 = vpack.c.bf16 %v9093_v32, %v9093_v32  ;;  %v13352_v55 = vpack.c.bf16 %v9101_v30, %v9101_v30  ;;  %v13354_v12 = vpack.c.bf16 %v9086_v16, %v9086_v16 }
 0x564   : > { %v9235_v62 = vshll.u32 %v13350_v58, 16  ;;  %v10211_v10 = vcombine.high %v10203_v56, %v10203_v56  ;;  %v9104_v13 = vcombine.high %v9100_v33, %v9100_v33  ;;  %v13355_v50 = vpack.c.bf16 %v9100_v33, %v9100_v33 }
 0x565   : > { %v13353_v34 = vpack.c.bf16 %v9103_v17, %v9103_v17  ;;  %v13356_v25 = vpack.c.bf16 %v9102_v19, %v9102_v19  ;;  %v9239_v26 = vshll.u32 %v13351_v4, 16  ;;  %v9243_v27 = vshll.u32 %v13352_v55, 16 }
 0x566   : > { %v9237_v44 = vrot.slane %v9235_v62, 7  ;;  %v9251_v9 = vshll.u32 %v13354_v12, 16  ;;  %v13357_v39 = vpack.c.bf16 %v9104_v13, %v9104_v13  ;;  %v9255_v31 = vshll.u32 %v13355_v50, 16  ;;  %v10454_v50 = vld [vmem:[#allocation6 + $0x4] sm:$0x4] }
 0x567   : > { %v9247_v0 = vshll.u32 %v13353_v34, 16  ;;  %v9259_v6 = vshll.u32 %v13356_v25, 16  ;;  %v9241_v57 = vrot.slane %v9239_v26, 7  ;;  %v9245_v28 = vrot.slane %v9243_v27, 7  ;;  %v10457_v25 = vld [vmem:[#allocation6 + $0xc] sm:$0x4] }
 0x568   : > { %v9253_v11 = vrot.slane %v9251_v9, 7  ;;  %v9315_v5 = vsel %vm15318_vm10, %v9237_v44, %v9314_v42  ;;  %v9257_v20 = vrot.slane %v9255_v31, 7  ;;  %v9263_v54 = vshll.u32 %v13357_v39, 16  ;;  %v10460_v26 = vld [vmem:[#allocation6 + $0x14] sm:$0x4] }
 0x569   : > { %v9249_v49 = vrot.slane %v9247_v0, 7  ;;  %v9261_v23 = vrot.slane %v9259_v6, 7  ;;  %9316 = vst [vmem:[#allocation6 + $0x4] sm:$0x2] %v9315_v5  ;;  %v9318_v40 = vsel %vm15318_vm10, %v9241_v57, %v9317_v1  ;;  %v9321_v46 = vsel %vm15318_vm10, %v9245_v28, %v9320_v24  ;;  %v10463_v27 = vld [vmem:[#allocation6 + $0x1c] sm:$0x4] }
 0x56a   : > { %v9327_v59 = vsel %vm15318_vm10, %v9253_v11, %v9326_v47  ;;  %v10212_v43 = vcombine.high %v10210_v21, %v10210_v21  ;;  %v9265_v15 = vrot.slane %v9263_v54, 7  ;;  %9319 = vst [vmem:[#allocation6 + $0xc] sm:$0x2] %v9318_v40  ;;  %9322 = vst [vmem:[#allocation6 + $0x14] sm:$0x2] %v9321_v46  ;;  %v9330_v38 = vsel %vm15318_vm10, %v9257_v20, %v9329_v35 }
 0x56b   : > { %v9324_v63 = vsel %vm15318_vm10, %v9249_v49, %v9323_v45  ;;  %9328 = vst [vmem:[#allocation6 + $0x24] sm:$0x2] %v9327_v59  ;;  %v9333_v3 = vsel %vm15318_vm10, %v9261_v23, %v9332_v51  ;;  %9331 = vst [vmem:[#allocation6 + $0x2c] sm:$0x2] %v9330_v38  ;;  %v10219_v22 = vrot.slane %v10203_v56, %v14970_v29  ;;  %v10469_v9 = vld [vmem:[#allocation6 + $0x2c] sm:$0x4] }
 0x56c   : > { %9325 = vst [vmem:[#allocation6 + $0x1c] sm:$0x2] %v9324_v63  ;;  %9334 = vst [vmem:[#allocation6 + $0x34] sm:$0x2] %v9333_v3  ;;  %v10226_v2 = vrot.slane %v10210_v21, %v14970_v29  ;;  %v10233_v16 = vrot.slane %v10211_v10, %v14970_v29  ;;  %v10240_v32 = vrot.slane %v10212_v43, %v14970_v29  ;;  %v10472_v6 = vld [vmem:[#allocation6 + $0x34] sm:$0x4] }
 0x56d   : > { %v9336_v30 = vsel %vm15318_vm10, %v9265_v15, %v9335_v60  ;;  %v16894_v58 = vrot.slane %v16855_v41, %v14970_v29  ;;  %v16897_v33 = vrot.slane %v8535_v18, %v14970_v29  ;;  %v9675_v19 = vcombine.high %v16878_v52, %v16878_v52  ;;  %v10466_v18 = vld [vmem:[#allocation6 + $0x24] sm:$0x4]  ;;  %v10475_v5 = vld [vmem:[#allocation6 + $0x3c] sm:$0x4]  ;;  %v16909_v60 = vpop.f32.mrf.mxu0 }
 0x56e   : > { %9337 = vst [vmem:[#allocation6 + $0x3c] sm:$0x2] %v9336_v30  ;;  %v10241_v56 = vcombine.high %v10219_v22, %v10219_v22  ;;  %v10242_v21 = vcombine.high %v10226_v2, %v10226_v2  ;;  %v10243_v17 = vcombine.high %v10233_v16, %v10233_v16  ;;  %v10244_v4 = vcombine.high %v10240_v32, %v10240_v32 }
 0x56f   : > { %v13414_v55 = vpack.c.bf16 %v10219_v22, %v10219_v22  ;;  %v13415_v12 = vpack.c.bf16 %v10233_v16, %v10233_v16  ;;  %v13418_v62 = vpack.c.bf16 %v10226_v2, %v10226_v2  ;;  %v13419_v42 = vpack.c.bf16 %v10240_v32, %v10240_v32 }
 0x570   : > { %v13416_v10 = vpack.c.bf16 %v10241_v56, %v10241_v56  ;;  %v13417_v13 = vpack.c.bf16 %v10243_v17, %v10243_v17  ;;  %v13420_v34 = vpack.c.bf16 %v10242_v21, %v10242_v21  ;;  %v13421_v41 = vpack.c.bf16 %v10244_v4, %v10244_v4 }
 0x571   : > { %v10375_v1 = vshll.u32 %v13414_v55, 16  ;;  %v10379_v24 = vshll.u32 %v13415_v12, 16  ;;  %v10391_v47 = vshll.u32 %v13418_v62, 16  ;;  %v10395_v44 = vshll.u32 %v13419_v42, 16 }
 0x572   : > { %v10383_v35 = vshll.u32 %v13416_v10, 16  ;;  %v10387_v39 = vshll.u32 %v13417_v13, 16  ;;  %v10399_v0 = vshll.u32 %v13420_v34, 16  ;;  %v10403_v31 = vshll.u32 %v13421_v41, 16  ;;  %v8720_v34 = vld [vmem:[#allocation6 + $0x44] sm:$0x2] }
 0x573   : > { %v10377_v51 = vrot.slane %v10375_v1, 6  ;;  %v10381_v57 = vrot.slane %v10379_v24, 6  ;;  %v10393_v28 = vrot.slane %v10391_v47, 6  ;;  %v10397_v11 = vrot.slane %v10395_v44, 6  ;;  %v8732_v41 = vld [vmem:[#allocation6 + $0x64] sm:$0x2] }
 0x574   : > { %v10385_v45 = vrot.slane %v10383_v35, 6  ;;  %v10389_v49 = vrot.slane %v10387_v39, 6  ;;  %v10401_v20 = vrot.slane %v10399_v0, 6  ;;  %v10405_v23 = vrot.slane %v10403_v31, 6  ;;  %v8723_v24 = vld [vmem:[#allocation6 + $0x4c] sm:$0x2] }
 0x575   : > { %v10455_v54 = vsel %vm15349_vm15, %v10377_v51, %v10454_v50  ;;  %v10458_v40 = vsel %vm15349_vm15, %v10381_v57, %v10457_v25  ;;  %v10467_v46 = vsel %vm15349_vm15, %v10393_v28, %v10466_v18  ;;  %v10470_v59 = vsel %vm15349_vm15, %v10397_v11, %v10469_v9  ;;  %v8726_v47 = vld [vmem:[#allocation6 + $0x54] sm:$0x2]  ;;  %v8735_v35 = vld [vmem:[#allocation6 + $0x6c] sm:$0x2]  ;;  %v8729_v51 = vld [vmem:[#allocation6 + $0x5c] sm:$0x2] }
 0x576   : > { %10456 = vst [vmem:[#allocation6 + $0x4] sm:$0x4] %v10455_v54  ;;  %10459 = vst [vmem:[#allocation6 + $0xc] sm:$0x4] %v10458_v40  ;;  %v10461_v43 = vsel %vm15349_vm15, %v10385_v45, %v10460_v26  ;;  %v10464_v15 = vsel %vm15349_vm15, %v10389_v49, %v10463_v27  ;;  %v10473_v63 = vsel %vm15349_vm15, %v10401_v20, %v10472_v6  ;;  %v8738_v39 = vld [vmem:[#allocation6 + $0x74] sm:$0x2] }
 0x577   : > { %10468 = vst [vmem:[#allocation6 + $0x24] sm:$0x4] %v10467_v46  ;;  %10471 = vst [vmem:[#allocation6 + $0x2c] sm:$0x4] %v10470_v59  ;;  %v10476_v38 = vsel %vm15349_vm15, %v10405_v23, %v10475_v5  ;;  %v8550_v3 = vcombine.high %v16894_v58, %v16894_v58  ;;  %v8551_v22 = vcombine.high %v16897_v33, %v16897_v33  ;;  %v8741_v28 = vld [vmem:[#allocation6 + $0x7c] sm:$0x2] }
 0x578   : > { %10462 = vst [vmem:[#allocation6 + $0x14] sm:$0x4] %v10461_v43  ;;  %10465 = vst [vmem:[#allocation6 + $0x1c] sm:$0x4] %v10464_v15  ;;  %v8558_v2 = vrot.slane %v16894_v58, %v14970_v29  ;;  %v8565_v16 = vrot.slane %v16897_v33, %v14970_v29  ;;  %v9682_v32 = vrot.slane %v16878_v52, %v14970_v29 }
 0x579   : > { %10474 = vst [vmem:[#allocation6 + $0x34] sm:$0x4] %v10473_v63  ;;  %10477 = vst [vmem:[#allocation6 + $0x3c] sm:$0x4] %v10476_v38  ;;  %v9689_v30 = vrot.slane %v9675_v19, %v14970_v29  ;;  %v9105_v56 = vcombine.high %v16909_v60, %v16909_v60  ;;  %v16934_v21 = vrot.slane %v16909_v60, %v14970_v29 }
 0x57a   : > { %v8572_v17 = vrot.slane %v8550_v3, %v14970_v29  ;;  %v8579_v4 = vrot.slane %v8551_v22, %v14970_v29  ;;  %v8580_v58 = vcombine.high %v8558_v2, %v8558_v2  ;;  %v8581_v55 = vcombine.high %v8565_v16, %v8565_v16 }
 0x57b   : > { %v13326_v12 = vpack.c.bf16 %v8558_v2, %v8558_v2  ;;  %v13330_v33 = vpack.c.bf16 %v8565_v16, %v8565_v16  ;;  %v9690_v62 = vcombine.high %v9682_v32, %v9682_v32  ;;  %v9691_v42 = vcombine.high %v9689_v30, %v9689_v30 }
 0x57c   : > { %v8582_v52 = vcombine.high %v8572_v17, %v8572_v17  ;;  %v8583_v10 = vcombine.high %v8579_v4, %v8579_v4  ;;  %v13327_v19 = vpack.c.bf16 %v8572_v17, %v8572_v17  ;;  %v13328_v13 = vpack.c.bf16 %v8580_v58, %v8580_v58  ;;  %v9860_v17 = vld [vmem:[#allocation6 + $0x44] sm:$0x4] }
 0x57d   : > { %v13331_v50 = vpack.c.bf16 %v8579_v4, %v8579_v4  ;;  %v13332_v25 = vpack.c.bf16 %v8581_v55, %v8581_v55  ;;  %v8672_v18 = vrot.slane %v13326_v12, 7  ;;  %v8676_v1 = vrot.slane %v13330_v33, 7  ;;  %v9872_v4 = vld [vmem:[#allocation6 + $0x64] sm:$0x4]  ;;  %v9863_v33 = vld [vmem:[#allocation6 + $0x4c] sm:$0x4] }
 0x57e   : > { %v13329_v44 = vpack.c.bf16 %v8582_v52, %v8582_v52  ;;  %v13333_v26 = vpack.c.bf16 %v8583_v10, %v8583_v10  ;;  %v8673_v27 = vrot.slane %v13327_v19, 7  ;;  %v8674_v9 = vrot.slane %v13328_v13, 7  ;;  %v9866_v13 = vld [vmem:[#allocation6 + $0x54] sm:$0x4] }
 0x57f   : > { %v8677_v0 = vrot.slane %v13331_v50, 7  ;;  %v8678_v31 = vrot.slane %v13332_v25, 7  ;;  %v8721_v6 = vsel %vm15258_vm11, %v8672_v18, %v8720_v34  ;;  %v8733_v57 = vsel %vm15258_vm11, %v8676_v1, %v8732_v41  ;;  %v9878_v34 = vld [vmem:[#allocation6 + $0x74] sm:$0x4]  ;;  %v9869_v18 = vld [vmem:[#allocation6 + $0x5c] sm:$0x4] }
 0x580   : > { %v8675_v11 = vrot.slane %v13329_v44, 7  ;;  %v8679_v5 = vrot.slane %v13333_v26, 7  ;;  %8722 = vst [vmem:[#allocation6 + $0x44] sm:$0x2] %v8721_v6  ;;  %v8724_v45 = vsel %vm15258_vm11, %v8673_v27, %v8723_v24  ;;  %v8727_v49 = vsel %vm15258_vm11, %v8674_v9, %v8726_v47  ;;  %8734 = vst [vmem:[#allocation6 + $0x64] sm:$0x2] %v8733_v57  ;;  %v2840_v47 = vpop.f32.mrf.mxu1  ;;  %v16976_v6 = vpop.f32.mrf.mxu0 }
 0x581   : > { %8725 = vst [vmem:[#allocation6 + $0x4c] sm:$0x2] %v8724_v45  ;;  %8728 = vst [vmem:[#allocation6 + $0x54] sm:$0x2] %v8727_v49  ;;  %v8736_v20 = vsel %vm15258_vm11, %v8677_v0, %v8735_v35  ;;  %v8739_v23 = vsel %vm15258_vm11, %v8678_v31, %v8738_v39  ;;  %v9698_v54 = vrot.slane %v9682_v32, %v14970_v29  ;;  %v9881_v24 = vld [vmem:[#allocation6 + $0x7c] sm:$0x4] }
 0x582   : > { %v9705_v40 = vrot.slane %v9689_v30, %v14970_v29  ;;  %v8730_v46 = vsel %vm15258_vm11, %v8675_v11, %v8729_v51  ;;  %8737 = vst [vmem:[#allocation6 + $0x6c] sm:$0x2] %v8736_v20  ;;  %8740 = vst [vmem:[#allocation6 + $0x74] sm:$0x2] %v8739_v23  ;;  %v8742_v59 = vsel %vm15258_vm11, %v8679_v5, %v8741_v28 }
 0x583   : > { %v9712_v43 = vrot.slane %v9690_v62, %v14970_v29  ;;  %v9719_v15 = vrot.slane %v9691_v42, %v14970_v29  ;;  %8731 = vst [vmem:[#allocation6 + $0x5c] sm:$0x2] %v8730_v46  ;;  %8743 = vst [vmem:[#allocation6 + $0x7c] sm:$0x2] %v8742_v59  ;;  %v9720_v63 = vcombine.high %v9698_v54, %v9698_v54  ;;  %v9875_v62 = vld [vmem:[#allocation6 + $0x6c] sm:$0x4] }
 0x584   : > { %v9721_v38 = vcombine.high %v9705_v40, %v9705_v40  ;;  %v13390_v3 = vpack.c.bf16 %v9698_v54, %v9698_v54  ;;  %v13394_v22 = vpack.c.bf16 %v9705_v40, %v9705_v40  ;;  %v9119_v0 = vrot.slane %v9105_v56, %v14970_v29 }
 0x585   : > { %v9722_v2 = vcombine.high %v9712_v43, %v9712_v43  ;;  %v9723_v16 = vcombine.high %v9719_v15, %v9719_v15  ;;  %v13391_v32 = vpack.c.bf16 %v9712_v43, %v9712_v43  ;;  %v13395_v30 = vpack.c.bf16 %v9719_v15, %v9719_v15 }
 0x586   : > { %v13392_v58 = vpack.c.bf16 %v9720_v63, %v9720_v63  ;;  %v13396_v55 = vpack.c.bf16 %v9721_v38, %v9721_v38  ;;  %v9812_v37 = vrot.slane %v13390_v3, 6  ;;  %v9816_v12 = vrot.slane %v13394_v22, 6 }
 0x587   : > { %v13393_v52 = vpack.c.bf16 %v9722_v2, %v9722_v2  ;;  %v13397_v42 = vpack.c.bf16 %v9723_v16, %v9723_v16  ;;  %v9813_v10 = vrot.slane %v13391_v32, 6  ;;  %v9817_v19 = vrot.slane %v13395_v30, 6  ;;  %v9338_v63 = vld [vmem:[#allocation6 + $0x44] sm:$0x2] }
 0x588   : > { %v9814_v41 = vrot.slane %v13392_v58, 6  ;;  %v9818_v50 = vrot.slane %v13396_v55, 6  ;;  %v9861_v25 = vsel %vm15285_vm12, %v9812_v37, %v9860_v17  ;;  %v9873_v1 = vsel %vm15285_vm12, %v9816_v12, %v9872_v4  ;;  %v9341_v32 = vld [vmem:[#allocation6 + $0x4c] sm:$0x2]  ;;  %v9344_v30 = vld [vmem:[#allocation6 + $0x54] sm:$0x2] }
 0x589   : > { %v9815_v44 = vrot.slane %v13393_v52, 6  ;;  %v9819_v26 = vrot.slane %v13397_v42, 6  ;;  %9862 = vst [vmem:[#allocation6 + $0x44] sm:$0x4] %v9861_v25  ;;  %v9864_v27 = vsel %vm15285_vm12, %v9813_v10, %v9863_v33  ;;  %9874 = vst [vmem:[#allocation6 + $0x64] sm:$0x4] %v9873_v1  ;;  %v9876_v9 = vsel %vm15285_vm12, %v9817_v19, %v9875_v62 }
 0x58a   : > { %9865 = vst [vmem:[#allocation6 + $0x4c] sm:$0x4] %v9864_v27  ;;  %v9867_v35 = vsel %vm15285_vm12, %v9814_v41, %v9866_v13  ;;  %9877 = vst [vmem:[#allocation6 + $0x6c] sm:$0x4] %v9876_v9  ;;  %v9879_v39 = vsel %vm15285_vm12, %v9818_v50, %v9878_v34  ;;  %v9120_v31 = vcombine.high %v16934_v21, %v16934_v21  ;;  %v9350_v17 = vld [vmem:[#allocation6 + $0x64] sm:$0x2] }
 0x58b   : > { %9868 = vst [vmem:[#allocation6 + $0x54] sm:$0x4] %v9867_v35  ;;  %v9870_v51 = vsel %vm15285_vm12, %v9815_v44, %v9869_v18  ;;  %9880 = vst [vmem:[#allocation6 + $0x74] sm:$0x4] %v9879_v39  ;;  %v9882_v57 = vsel %vm15285_vm12, %v9819_v26, %v9881_v24  ;;  %v9128_v28 = vrot.slane %v16934_v21, %v14970_v29  ;;  %v9353_v12 = vld [vmem:[#allocation6 + $0x6c] sm:$0x2]  ;;  %v16999_v35 = vpop.f32.mrf.mxu0 }
 0x58c   : > { %v10245_v11 = vcombine.high %v2840_v47, %v2840_v47  ;;  %9871 = vst [vmem:[#allocation6 + $0x5c] sm:$0x4] %v9870_v51  ;;  %9883 = vst [vmem:[#allocation6 + $0x7c] sm:$0x4] %v9882_v57  ;;  %v9121_v60 = vcombine.high %v9119_v0, %v9119_v0  ;;  %v9135_v56 = vrot.slane %v9119_v0, %v14970_v29  ;;  %v9356_v10 = vld [vmem:[#allocation6 + $0x74] sm:$0x2] }
 0x58d   : > { %v9142_v5 = vrot.slane %v9120_v31, %v14970_v29  ;;  %v10252_v45 = vrot.slane %v2840_v47, %v14970_v29  ;;  %v9150_v49 = vcombine.high %v9128_v28, %v9128_v28  ;;  %v13358_v20 = vpack.c.bf16 %v9128_v28, %v9128_v28  ;;  %v9347_v50 = vld [vmem:[#allocation6 + $0x5c] sm:$0x2] }
 0x58e   : > { %v10259_v23 = vrot.slane %v10245_v11, %v14970_v29  ;;  %v10766_v7 = vcombine.high %v16976_v6, %v16976_v6  ;;  %v9149_v54 = vrot.slane %v9121_v60, %v14970_v29  ;;  %v9151_v21 = vcombine.high %v9135_v56, %v9135_v56  ;;  %v9359_v27 = vld [vmem:[#allocation6 + $0x7c] sm:$0x2] }
 0x58f   : > { %v9152_v40 = vcombine.high %v9142_v5, %v9142_v5  ;;  %v13359_v46 = vpack.c.bf16 %v9142_v5, %v9142_v5  ;;  %v13360_v59 = vpack.c.bf16 %v9150_v49, %v9150_v49  ;;  %v13362_v43 = vpack.c.bf16 %v9135_v56, %v9135_v56 }
 0x590   : > { %v9267_v15 = vshll.u32 %v13358_v20, 16  ;;  %v10260_v38 = vcombine.high %v10252_v45, %v10252_v45  ;;  %v9153_v3 = vcombine.high %v9149_v54, %v9149_v54  ;;  %v13363_v2 = vpack.c.bf16 %v9149_v54, %v9149_v54 }
 0x591   : > { %v13361_v22 = vpack.c.bf16 %v9152_v40, %v9152_v40  ;;  %v13364_v16 = vpack.c.bf16 %v9151_v21, %v9151_v21  ;;  %v9271_v58 = vshll.u32 %v13359_v46, 16  ;;  %v9275_v55 = vshll.u32 %v13360_v59, 16 }
 0x592   : > { %v9269_v4 = vrot.slane %v9267_v15, 7  ;;  %v9283_v37 = vshll.u32 %v13362_v43, 16  ;;  %v13365_v33 = vpack.c.bf16 %v9153_v3, %v9153_v3  ;;  %v9287_v52 = vshll.u32 %v13363_v2, 16  ;;  %v10481_v3 = vld [vmem:[#allocation6 + $0x4c] sm:$0x4] }
 0x593   : > { %v9279_v62 = vshll.u32 %v13361_v22, 16  ;;  %v9291_v42 = vshll.u32 %v13364_v16, 16  ;;  %v9273_v19 = vrot.slane %v9271_v58, 7  ;;  %v9277_v13 = vrot.slane %v9275_v55, 7 }
 0x594   : > { %v9285_v34 = vrot.slane %v9283_v37, 7  ;;  %v9339_v41 = vsel %vm15318_vm10, %v9269_v4, %v9338_v63  ;;  %v9289_v18 = vrot.slane %v9287_v52, 7  ;;  %v9295_v24 = vshll.u32 %v13365_v33, 16  ;;  %v10493_v4 = vld [vmem:[#allocation6 + $0x6c] sm:$0x4] }
 0x595   : > { %v9281_v25 = vrot.slane %v9279_v62, 7  ;;  %v9293_v1 = vrot.slane %v9291_v42, 7  ;;  %9340 = vst [vmem:[#allocation6 + $0x44] sm:$0x2] %v9339_v41  ;;  %v9342_v47 = vsel %vm15318_vm10, %v9273_v19, %v9341_v32  ;;  %v9345_v44 = vsel %vm15318_vm10, %v9277_v13, %v9344_v30  ;;  %v10484_v30 = vld [vmem:[#allocation6 + $0x54] sm:$0x4] }
 0x596   : > { %v9351_v26 = vsel %vm15318_vm10, %v9285_v34, %v9350_v17  ;;  %v10261_v9 = vcombine.high %v10259_v23, %v10259_v23  ;;  %v9297_v39 = vrot.slane %v9295_v24, 7  ;;  %9343 = vst [vmem:[#allocation6 + $0x4c] sm:$0x2] %v9342_v47  ;;  %9346 = vst [vmem:[#allocation6 + $0x54] sm:$0x2] %v9345_v44  ;;  %v9354_v31 = vsel %vm15318_vm10, %v9289_v18, %v9353_v12  ;;  %v17030_v47 = vpop.f32.mrf.mxu0 }
 0x597   : > { %v9348_v0 = vsel %vm15318_vm10, %v9281_v25, %v9347_v50  ;;  %9352 = vst [vmem:[#allocation6 + $0x64] sm:$0x2] %v9351_v26  ;;  %v9357_v51 = vsel %vm15318_vm10, %v9293_v1, %v9356_v10  ;;  %9355 = vst [vmem:[#allocation6 + $0x6c] sm:$0x2] %v9354_v31  ;;  %v10268_v57 = vrot.slane %v10252_v45, %v14970_v29  ;;  %v10487_v17 = vld [vmem:[#allocation6 + $0x5c] sm:$0x4] }
 0x598   : > { %9349 = vst [vmem:[#allocation6 + $0x5c] sm:$0x2] %v9348_v0  ;;  %9358 = vst [vmem:[#allocation6 + $0x74] sm:$0x2] %v9357_v51  ;;  %v10275_v28 = vrot.slane %v10259_v23, %v14970_v29  ;;  %v10282_v11 = vrot.slane %v10260_v38, %v14970_v29  ;;  %v10289_v60 = vrot.slane %v10261_v9, %v14970_v29  ;;  %v10478_v38 = vld [vmem:[#allocation6 + $0x44] sm:$0x4] }
 0x599   : > { %v9360_v56 = vsel %vm15318_vm10, %v9297_v39, %v9359_v27  ;;  %v17015_v5 = vrot.slane %v16976_v6, %v14970_v29  ;;  %v17018_v49 = vrot.slane %v10766_v7, %v14970_v29  ;;  %v11336_v20 = vcombine.high %v16999_v35, %v16999_v35  ;;  %v10490_v7 = vld [vmem:[#allocation6 + $0x64] sm:$0x4]  ;;  %v10496_v33 = vld [vmem:[#allocation6 + $0x74] sm:$0x4]  ;;  %v10499_v19 = vld [vmem:[#allocation6 + $0x7c] sm:$0x4] }
 0x59a   : > { %9361 = vst [vmem:[#allocation6 + $0x7c] sm:$0x2] %v9360_v56  ;;  %v10290_v45 = vcombine.high %v10268_v57, %v10268_v57  ;;  %v10291_v23 = vcombine.high %v10275_v28, %v10275_v28  ;;  %v10292_v54 = vcombine.high %v10282_v11, %v10282_v11  ;;  %v10293_v21 = vcombine.high %v10289_v60, %v10289_v60 }
 0x59b   : > { %v13422_v40 = vpack.c.bf16 %v10268_v57, %v10268_v57  ;;  %v13423_v46 = vpack.c.bf16 %v10282_v11, %v10282_v11  ;;  %v13426_v59 = vpack.c.bf16 %v10275_v28, %v10275_v28  ;;  %v13427_v53 = vpack.c.bf16 %v10289_v60, %v10289_v60 }
 0x59c   : > { %v13424_v43 = vpack.c.bf16 %v10290_v45, %v10290_v45  ;;  %v13425_v15 = vpack.c.bf16 %v10292_v54, %v10292_v54  ;;  %v13428_v63 = vpack.c.bf16 %v10291_v23, %v10291_v23  ;;  %v13429_v6 = vpack.c.bf16 %v10293_v21, %v10293_v21 }
 0x59d   : > { %v10407_v22 = vshll.u32 %v13422_v40, 16  ;;  %v10411_v2 = vshll.u32 %v13423_v46, 16  ;;  %v10423_v16 = vshll.u32 %v13426_v59, 16  ;;  %v10427_v32 = vshll.u32 %v13427_v53, 16  ;;  %v10976_v59 = vld [vmem:[#allocation6 + $0x4] sm:$0x8] }
 0x59e   : > { %v10415_v58 = vshll.u32 %v13424_v43, 16  ;;  %v10419_v55 = vshll.u32 %v13425_v15, 16  ;;  %v10431_v37 = vshll.u32 %v13428_v63, 16  ;;  %v10435_v12 = vshll.u32 %v13429_v6, 16  ;;  %v10988_v53 = vld [vmem:[#allocation6 + $0x24] sm:$0x8] }
 0x59f   : > { %v10409_v62 = vrot.slane %v10407_v22, 6  ;;  %v10413_v52 = vrot.slane %v10411_v2, 6  ;;  %v10425_v42 = vrot.slane %v10423_v16, 6  ;;  %v10429_v10 = vrot.slane %v10427_v32, 6  ;;  %v10991_v32 = vld [vmem:[#allocation6 + $0x2c] sm:$0x8] }
 0x5a0   : > { %v10417_v13 = vrot.slane %v10415_v58, 6  ;;  %v10421_v34 = vrot.slane %v10419_v55, 6  ;;  %v10433_v41 = vrot.slane %v10431_v37, 6  ;;  %v10437_v50 = vrot.slane %v10435_v12, 6  ;;  %v10985_v55 = vld [vmem:[#allocation6 + $0x1c] sm:$0x8] }
 0x5a1   : > { %v10479_v25 = vsel %vm15349_vm15, %v10409_v62, %v10478_v38  ;;  %v10482_v18 = vsel %vm15349_vm15, %v10413_v52, %v10481_v3  ;;  %v10491_v1 = vsel %vm15349_vm15, %v10425_v42, %v10490_v7  ;;  %v10494_v24 = vsel %vm15349_vm15, %v10429_v10, %v10493_v4  ;;  %v10979_v38 = vld [vmem:[#allocation6 + $0xc] sm:$0x8]  ;;  %v10982_v3 = vld [vmem:[#allocation6 + $0x14] sm:$0x8]  ;;  %v10997_v12 = vld [vmem:[#allocation6 + $0x3c] sm:$0x8] }
 0x5a2   : > { %10480 = vst [vmem:[#allocation6 + $0x44] sm:$0x4] %v10479_v25  ;;  %10483 = vst [vmem:[#allocation6 + $0x4c] sm:$0x4] %v10482_v18  ;;  %v10485_v44 = vsel %vm15349_vm15, %v10417_v13, %v10484_v30  ;;  %v10488_v26 = vsel %vm15349_vm15, %v10421_v34, %v10487_v17  ;;  %v10497_v27 = vsel %vm15349_vm15, %v10433_v41, %v10496_v33  ;;  %v10994_v30 = vld [vmem:[#allocation6 + $0x34] sm:$0x8] }
 0x5a3   : > { %10492 = vst [vmem:[#allocation6 + $0x64] sm:$0x4] %v10491_v1  ;;  %10495 = vst [vmem:[#allocation6 + $0x6c] sm:$0x4] %v10494_v24  ;;  %v10500_v9 = vsel %vm15349_vm15, %v10437_v50, %v10499_v19  ;;  %v10781_v39 = vcombine.high %v17015_v5, %v17015_v5  ;;  %v10782_v0 = vcombine.high %v17018_v49, %v17018_v49 }
 0x5a4   : > { %10486 = vst [vmem:[#allocation6 + $0x54] sm:$0x4] %v10485_v44  ;;  %10489 = vst [vmem:[#allocation6 + $0x5c] sm:$0x4] %v10488_v26  ;;  %v10789_v31 = vrot.slane %v17015_v5, %v14970_v29  ;;  %v10796_v51 = vrot.slane %v17018_v49, %v14970_v29  ;;  %v11343_v48 = vrot.slane %v16999_v35, %v14970_v29 }
 0x5a5   : > { %10498 = vst [vmem:[#allocation6 + $0x74] sm:$0x4] %v10497_v27  ;;  %10501 = vst [vmem:[#allocation6 + $0x7c] sm:$0x4] %v10500_v9  ;;  %v11350_v57 = vrot.slane %v11336_v20, %v14970_v29  ;;  %v10815_v28 = vcombine.high %v17030_v47, %v17030_v47  ;;  %v17055_v11 = vrot.slane %v17030_v47, %v14970_v29 }
 0x5a6   : > { %v10803_v60 = vrot.slane %v10781_v39, %v14970_v29  ;;  %v10810_v56 = vrot.slane %v10782_v0, %v14970_v29  ;;  %v10811_v5 = vcombine.high %v10789_v31, %v10789_v31  ;;  %v10812_v45 = vcombine.high %v10796_v51, %v10796_v51 }
 0x5a7   : > { %v13446_v23 = vpack.c.bf16 %v10789_v31, %v10789_v31  ;;  %v13450_v49 = vpack.c.bf16 %v10796_v51, %v10796_v51  ;;  %v11351_v54 = vcombine.high %v11343_v48, %v11343_v48  ;;  %v11352_v21 = vcombine.high %v11350_v57, %v11350_v57 }
 0x5a8   : > { %v10813_v35 = vcombine.high %v10803_v60, %v10803_v60  ;;  %v10814_v40 = vcombine.high %v10810_v56, %v10810_v56  ;;  %v13447_v20 = vpack.c.bf16 %v10803_v60, %v10803_v60  ;;  %v13448_v46 = vpack.c.bf16 %v10811_v5, %v10811_v5 }
 0x5a9   : > { %v13451_v43 = vpack.c.bf16 %v10810_v56, %v10810_v56  ;;  %v13452_v15 = vpack.c.bf16 %v10812_v45, %v10812_v45  ;;  %v10944_v63 = vrot.slane %v13446_v23, 5  ;;  %v10948_v6 = vrot.slane %v13450_v49, 5 }
 0x5aa   : > { %v13449_v7 = vpack.c.bf16 %v10813_v35, %v10813_v35  ;;  %v13453_v22 = vpack.c.bf16 %v10814_v40, %v10814_v40  ;;  %v10945_v2 = vrot.slane %v13447_v20, 5  ;;  %v10946_v16 = vrot.slane %v13448_v46, 5 }
 0x5ab   : > { %v10949_v17 = vrot.slane %v13451_v43, 5  ;;  %v10950_v4 = vrot.slane %v13452_v15, 5  ;;  %v10977_v58 = vsel %vm15497_vm7, %v10944_v63, %v10976_v59  ;;  %v10989_v37 = vsel %vm15497_vm7, %v10948_v6, %v10988_v53 }
 0x5ac   : > { %v10947_v33 = vrot.slane %v13449_v7, 5  ;;  %v10951_v62 = vrot.slane %v13453_v22, 5  ;;  %10978 = vst [vmem:[#allocation6 + $0x4] sm:$0x8] %v10977_v58  ;;  %v10980_v52 = vsel %vm15497_vm7, %v10945_v2, %v10979_v38  ;;  %v10983_v42 = vsel %vm15497_vm7, %v10946_v16, %v10982_v3  ;;  %10990 = vst [vmem:[#allocation6 + $0x24] sm:$0x8] %v10989_v37  ;;  %v2883_v37 = vpop.f32.mrf.mxu0 }
 0x5ad   : > { %10981 = vst [vmem:[#allocation6 + $0xc] sm:$0x8] %v10980_v52  ;;  %10984 = vst [vmem:[#allocation6 + $0x14] sm:$0x8] %v10983_v42  ;;  %v10992_v10 = vsel %vm15497_vm7, %v10949_v17, %v10991_v32  ;;  %v10995_v19 = vsel %vm15497_vm7, %v10950_v4, %v10994_v30  ;;  %v11359_v13 = vrot.slane %v11343_v48, %v14970_v29 }
 0x5ae   : > { %v11366_v34 = vrot.slane %v11350_v57, %v14970_v29  ;;  %v10986_v41 = vsel %vm15497_vm7, %v10947_v33, %v10985_v55  ;;  %10993 = vst [vmem:[#allocation6 + $0x2c] sm:$0x8] %v10992_v10  ;;  %10996 = vst [vmem:[#allocation6 + $0x34] sm:$0x8] %v10995_v19  ;;  %v10998_v50 = vsel %vm15497_vm7, %v10951_v62, %v10997_v12 }
 0x5af   : > { %v11373_v25 = vrot.slane %v11351_v54, %v14970_v29  ;;  %v11380_v18 = vrot.slane %v11352_v21, %v14970_v29  ;;  %10987 = vst [vmem:[#allocation6 + $0x1c] sm:$0x8] %v10986_v41  ;;  %10999 = vst [vmem:[#allocation6 + $0x3c] sm:$0x8] %v10998_v50  ;;  %v11381_v1 = vcombine.high %v11359_v13, %v11359_v13 }
 0x5b0   : > { %v11382_v24 = vcombine.high %v11366_v34, %v11366_v34  ;;  %v13478_v44 = vpack.c.bf16 %v11359_v13, %v11359_v13  ;;  %v13482_v26 = vpack.c.bf16 %v11366_v34, %v11366_v34  ;;  %v10829_v3 = vrot.slane %v10815_v28, %v14970_v29 }
 0x5b1   : > { %v11383_v27 = vcombine.high %v11373_v25, %v11373_v25  ;;  %v11384_v9 = vcombine.high %v11380_v18, %v11380_v18  ;;  %v13479_v39 = vpack.c.bf16 %v11373_v25, %v11373_v25  ;;  %v13483_v0 = vpack.c.bf16 %v11380_v18, %v11380_v18 }
 0x5b2   : > { %v13480_v31 = vpack.c.bf16 %v11381_v1, %v11381_v1  ;;  %v13484_v51 = vpack.c.bf16 %v11382_v24, %v11382_v24  ;;  %v11515_v48 = vshll.u32 %v13478_v44, 16  ;;  %v11531_v57 = vshll.u32 %v13482_v26, 16  ;;  %v11000_v44 = vld [vmem:[#allocation6 + $0x44] sm:$0x8]  ;;  %v11006_v26 = vld [vmem:[#allocation6 + $0x54] sm:$0x8] }
 0x5b3   : > { %v13481_v60 = vpack.c.bf16 %v11383_v27, %v11383_v27  ;;  %v13485_v56 = vpack.c.bf16 %v11384_v9, %v11384_v9  ;;  %v11519_v5 = vshll.u32 %v13479_v39, 16  ;;  %v11535_v45 = vshll.u32 %v13483_v0, 16  ;;  %v11594_v35 = vld [vmem:[#allocation6 + $0x4] sm:$0x8] }
 0x5b4   : > { %v11517_v23 = vrot.slane %v11515_v48, 5  ;;  %v11523_v49 = vshll.u32 %v13480_v31, 16  ;;  %v11533_v54 = vrot.slane %v11531_v57, 5  ;;  %v11539_v21 = vshll.u32 %v13484_v51, 16  ;;  %v11597_v53 = vld [vmem:[#allocation6 + $0xc] sm:$0x8] }
 0x5b5   : > { %v11521_v40 = vrot.slane %v11519_v5, 5  ;;  %v11527_v20 = vshll.u32 %v13481_v60, 16  ;;  %v11537_v46 = vrot.slane %v11535_v45, 5  ;;  %v11543_v59 = vshll.u32 %v13485_v56, 16  ;;  %v11600_v6 = vld [vmem:[#allocation6 + $0x14] sm:$0x8] }
 0x5b6   : > { %v11525_v43 = vrot.slane %v11523_v49, 5  ;;  %v11541_v15 = vrot.slane %v11539_v21, 5  ;;  %v11595_v63 = vsel %vm15548_vm1, %v11517_v23, %v11594_v35  ;;  %v11606_v38 = vld [vmem:[#allocation6 + $0x24] sm:$0x8]  ;;  %v11603_v16 = vld [vmem:[#allocation6 + $0x1c] sm:$0x8]  ;;  %v10830_v58 = vcombine.high %v17055_v11, %v17055_v11 }
 0x5b7   : > { %v11529_v7 = vrot.slane %v11527_v20, 5  ;;  %v11545_v22 = vrot.slane %v11543_v59, 5  ;;  %11596 = vst [vmem:[#allocation6 + $0x4] sm:$0x8] %v11595_v63  ;;  %v11598_v2 = vsel %vm15548_vm1, %v11521_v40, %v11597_v53  ;;  %v11607_v32 = vsel %vm15548_vm1, %v11533_v54, %v11606_v38  ;;  %v11609_v30 = vld [vmem:[#allocation6 + $0x2c] sm:$0x8] }
 0x5b8   : > { %11599 = vst [vmem:[#allocation6 + $0xc] sm:$0x8] %v11598_v2  ;;  %v11601_v17 = vsel %vm15548_vm1, %v11525_v43, %v11600_v6  ;;  %11608 = vst [vmem:[#allocation6 + $0x24] sm:$0x8] %v11607_v32  ;;  %v11610_v47 = vsel %vm15548_vm1, %v11537_v46, %v11609_v30  ;;  %v11612_v28 = vld [vmem:[#allocation6 + $0x34] sm:$0x8]  ;;  %v10831_v55 = vcombine.high %v10829_v3, %v10829_v3 }
 0x5b9   : > { %v11615_v4 = vld [vmem:[#allocation6 + $0x3c] sm:$0x8]  ;;  %11602 = vst [vmem:[#allocation6 + $0x14] sm:$0x8] %v11601_v17  ;;  %v11604_v12 = vsel %vm15548_vm1, %v11529_v7, %v11603_v16  ;;  %11611 = vst [vmem:[#allocation6 + $0x2c] sm:$0x8] %v11610_v47  ;;  %v11613_v33 = vsel %vm15548_vm1, %v11541_v15, %v11612_v28  ;;  %v10838_v52 = vrot.slane %v17055_v11, %v14970_v29 }
 0x5ba   : > { %v11616_v62 = vsel %vm15548_vm1, %v11545_v22, %v11615_v4  ;;  %11605 = vst [vmem:[#allocation6 + $0x1c] sm:$0x8] %v11604_v12  ;;  %11614 = vst [vmem:[#allocation6 + $0x34] sm:$0x8] %v11613_v33  ;;  %v10845_v42 = vrot.slane %v10829_v3, %v14970_v29  ;;  %v10852_v10 = vrot.slane %v10830_v58, %v14970_v29  ;;  %v11003_v11 = vld [vmem:[#allocation6 + $0x4c] sm:$0x8] }
 0x5bb   : > { %11617 = vst [vmem:[#allocation6 + $0x3c] sm:$0x8] %v11616_v62  ;;  %v10859_v19 = vrot.slane %v10831_v55, %v14970_v29  ;;  %v10860_v13 = vcombine.high %v10838_v52, %v10838_v52  ;;  %v13454_v34 = vpack.c.bf16 %v10838_v52, %v10838_v52  ;;  %v11385_v41 = vcombine.high %v2883_v37, %v2883_v37  ;;  %v11009_v31 = vld [vmem:[#allocation6 + $0x5c] sm:$0x8]  ;;  %v11012_v51 = vld [vmem:[#allocation6 + $0x64] sm:$0x8] }
 0x5bc   : > { %v11392_v50 = vrot.slane %v2883_v37, %v14970_v29  ;;  %v10861_v25 = vcombine.high %v10845_v42, %v10845_v42  ;;  %v10862_v18 = vcombine.high %v10852_v10, %v10852_v10  ;;  %v13455_v24 = vpack.c.bf16 %v10852_v10, %v10852_v10  ;;  %v11015_v5 = vld [vmem:[#allocation6 + $0x6c] sm:$0x8]  ;;  %v11018_v45 = vld [vmem:[#allocation6 + $0x74] sm:$0x8]  ;;  %v11021_v35 = vld [vmem:[#allocation6 + $0x7c] sm:$0x8] }
 0x5bd   : > { %v10863_v1 = vcombine.high %v10859_v19, %v10859_v19  ;;  %v13456_v27 = vpack.c.bf16 %v10860_v13, %v10860_v13  ;;  %v13458_v9 = vpack.c.bf16 %v10845_v42, %v10845_v42  ;;  %v13459_v39 = vpack.c.bf16 %v10859_v19, %v10859_v19 }
 0x5be   : > { %v10952_v0 = vrot.slane %v13454_v34, 5  ;;  %v13457_v48 = vpack.c.bf16 %v10862_v18, %v10862_v18  ;;  %v13460_v57 = vpack.c.bf16 %v10861_v25, %v10861_v25  ;;  %v10953_v56 = vrot.slane %v13455_v24, 5 }
 0x5bf   : > { %v13461_v60 = vpack.c.bf16 %v10863_v1, %v10863_v1  ;;  %v10954_v23 = vrot.slane %v13456_v27, 5  ;;  %v10956_v49 = vrot.slane %v13458_v9, 5  ;;  %v10957_v54 = vrot.slane %v13459_v39, 5 }
 0x5c0   : > { %v11001_v21 = vsel %vm15497_vm7, %v10952_v0, %v11000_v44  ;;  %v10955_v40 = vrot.slane %v13457_v48, 5  ;;  %v10958_v20 = vrot.slane %v13460_v57, 5  ;;  %v11004_v59 = vsel %vm15497_vm7, %v10953_v56, %v11003_v11 }
 0x5c1   : > { %v10959_v46 = vrot.slane %v13461_v60, 5  ;;  %11002 = vst [vmem:[#allocation6 + $0x44] sm:$0x8] %v11001_v21  ;;  %11005 = vst [vmem:[#allocation6 + $0x4c] sm:$0x8] %v11004_v59  ;;  %v11007_v53 = vsel %vm15497_vm7, %v10954_v23, %v11006_v26  ;;  %v11013_v43 = vsel %vm15497_vm7, %v10956_v49, %v11012_v51  ;;  %v11016_v15 = vsel %vm15497_vm7, %v10957_v54, %v11015_v5 }
 0x5c2   : > { %v11399_v63 = vrot.slane %v11385_v41, %v14970_v29  ;;  %11008 = vst [vmem:[#allocation6 + $0x54] sm:$0x8] %v11007_v53  ;;  %v11010_v6 = vsel %vm15497_vm7, %v10955_v40, %v11009_v31  ;;  %11014 = vst [vmem:[#allocation6 + $0x64] sm:$0x8] %v11013_v43  ;;  %v11019_v38 = vsel %vm15497_vm7, %v10958_v20, %v11018_v45 }
 0x5c3   : > { %11017 = vst [vmem:[#allocation6 + $0x6c] sm:$0x8] %v11016_v15  ;;  %v11022_v3 = vsel %vm15497_vm7, %v10959_v46, %v11021_v35  ;;  %v11400_v7 = vcombine.high %v11392_v50, %v11392_v50  ;;  %11011 = vst [vmem:[#allocation6 + $0x5c] sm:$0x8] %v11010_v6  ;;  %v11408_v2 = vrot.slane %v11392_v50, %v14970_v29 }
 0x5c4   : > { %11020 = vst [vmem:[#allocation6 + $0x74] sm:$0x8] %v11019_v38  ;;  %11023 = vst [vmem:[#allocation6 + $0x7c] sm:$0x8] %v11022_v3  ;;  %v11401_v22 = vcombine.high %v11399_v63, %v11399_v63  ;;  %v11415_v16 = vrot.slane %v11399_v63, %v14970_v29 }
 0x5c5   : > { %v11422_v32 = vrot.slane %v11400_v7, %v14970_v29  ;;  %v11430_v17 = vcombine.high %v11408_v2, %v11408_v2  ;;  %v13486_v28 = vpack.c.bf16 %v11408_v2, %v11408_v2 }
 0x5c6   : > { %v11429_v30 = vrot.slane %v11401_v22, %v14970_v29  ;;  %v11431_v47 = vcombine.high %v11415_v16, %v11415_v16  ;;  %v13490_v14 = vpack.c.bf16 %v11415_v16, %v11415_v16 }
 0x5c7   : > { %v11432_v4 = vcombine.high %v11422_v32, %v11422_v32  ;;  %v13487_v58 = vpack.c.bf16 %v11422_v32, %v11422_v32  ;;  %v13488_v37 = vpack.c.bf16 %v11430_v17, %v11430_v17  ;;  %v11547_v42 = vshll.u32 %v13486_v28, 16 }
 0x5c8   : > { %v11433_v55 = vcombine.high %v11429_v30, %v11429_v30  ;;  %v13491_v12 = vpack.c.bf16 %v11429_v30, %v11429_v30  ;;  %v13492_v33 = vpack.c.bf16 %v11431_v47, %v11431_v47  ;;  %v11618_v62 = vld [vmem:[#allocation6 + $0x44] sm:$0x8]  ;;  %v11563_v19 = vshll.u32 %v13490_v14, 16  ;;  %v11621_v13 = vld [vmem:[#allocation6 + $0x4c] sm:$0x8] }
 0x5c9   : > { %v13489_v52 = vpack.c.bf16 %v11432_v4, %v11432_v4  ;;  %v11551_v10 = vshll.u32 %v13487_v58, 16  ;;  %v11555_v41 = vshll.u32 %v13488_v37, 16  ;;  %v11624_v25 = vld [vmem:[#allocation6 + $0x54] sm:$0x8]  ;;  %v11549_v18 = vrot.slane %v11547_v42, 5 }
 0x5ca   : > { %v13493_v34 = vpack.c.bf16 %v11433_v55, %v11433_v55  ;;  %v11567_v50 = vshll.u32 %v13491_v12, 16  ;;  %v11571_v29 = vshll.u32 %v13492_v33, 16  ;;  %v11565_v44 = vrot.slane %v11563_v19, 5  ;;  %v11627_v11 = vld [vmem:[#allocation6 + $0x5c] sm:$0x8] }
 0x5cb   : > { %v11553_v1 = vrot.slane %v11551_v10, 5  ;;  %v11559_v24 = vshll.u32 %v13489_v52, 16  ;;  %v11557_v26 = vrot.slane %v11555_v41, 5  ;;  %v11630_v0 = vld [vmem:[#allocation6 + $0x64] sm:$0x8]  ;;  %v11619_v51 = vsel %vm15548_vm1, %v11549_v18, %v11618_v62 }
 0x5cc   : > { %v11569_v27 = vrot.slane %v11567_v50, 5  ;;  %v11573_v9 = vrot.slane %v11571_v29, 5  ;;  %v11575_v39 = vshll.u32 %v13493_v34, 16  ;;  %v11631_v57 = vsel %vm15548_vm1, %v11565_v44, %v11630_v0  ;;  %v11633_v60 = vld [vmem:[#allocation6 + $0x6c] sm:$0x8] }
 0x5cd   : > { %v11561_v31 = vrot.slane %v11559_v24, 5  ;;  %v11622_v48 = vsel %vm15548_vm1, %v11553_v1, %v11621_v13  ;;  %v11636_v56 = vld [vmem:[#allocation6 + $0x74] sm:$0x8]  ;;  %11620 = vst [vmem:[#allocation6 + $0x44] sm:$0x8] %v11619_v51  ;;  %v11625_v45 = vsel %vm15548_vm1, %v11557_v26, %v11624_v25 }
 0x5ce   : > { %v11577_v5 = vrot.slane %v11575_v39, 5  ;;  %11623 = vst [vmem:[#allocation6 + $0x4c] sm:$0x8] %v11622_v48  ;;  %11632 = vst [vmem:[#allocation6 + $0x64] sm:$0x8] %v11631_v57  ;;  %v11634_v23 = vsel %vm15548_vm1, %v11569_v27, %v11633_v60  ;;  %v11637_v49 = vsel %vm15548_vm1, %v11573_v9, %v11636_v56 }
 0x5cf   : > { %v11639_v54 = vld [vmem:[#allocation6 + $0x7c] sm:$0x8]  ;;  %11626 = vst [vmem:[#allocation6 + $0x54] sm:$0x8] %v11625_v45  ;;  %v11628_v21 = vsel %vm15548_vm1, %v11561_v31, %v11627_v11  ;;  %11635 = vst [vmem:[#allocation6 + $0x6c] sm:$0x8] %v11634_v23 }
 0x5d0   : > { %11638 = vst [vmem:[#allocation6 + $0x74] sm:$0x8] %v11637_v49  ;;  %11629 = vst [vmem:[#allocation6 + $0x5c] sm:$0x8] %v11628_v21  ;;  %v11640_v35 = vsel %vm15548_vm1, %v11577_v5, %v11639_v54 }
 0x5d1   : > { %11641 = vst [vmem:[#allocation6 + $0x7c] sm:$0x8] %v11640_v35 }
 0x5d2 LB: >> { %s13495_s13 = sshll.u32 %s14071_s20, 6  ;;  %vm11918_vm1 = vcmask 1041408   ;;  %s12942_s28 = sshll.u32 %s14071_s20, 3  ;;  %s14071_s20 = sphi %s17150_s20, %s11649_s20   ;;  %v14067_v8 = vphi %v16782_v8, %v17570_v8   ;;  %v14063_v36 = vphi %v16784_v36, %v17569_v36  }
 0x5d3   : >> { %s17158_s22 = scalar_lea.vmem [#allocation4], %s13495_s13  ;;  %s17161_s26 = scalar_lea.vmem [#allocation5], %s13495_s13 }
 0x5d4   : >> { %v13520_v61 = vld [vmem:[%s17158_s22] sm:$0xff]   ;;  %v13615_v20 = vld [vmem:[%s17158_s22 + $0x8] sm:$0xff]   ;;  %s17165_s25 = scalar_lea.vmem [#allocation6], %s13495_s13  ;;  %v13618_v32 = vld [vmem:[%s17158_s22 + $0x10] sm:$0xff]   ;;  %s11925_s14 = scalar_lea.vmem [#allocation7], %s12942_s28 }
 0x5d5   : >> { %v13524_v40 = vld [vmem:[%s17161_s26] sm:$0xff]   ;;  %v13521_v46 = vunpack.c.l.bf16 %v13520_v61  ;;  %v13522_v59 = vunpack.c.h.bf16 %v13520_v61  ;;  %v13616_v38 = vld [vmem:[%s17161_s26 + $0x8] sm:$0xff]   ;;  %v13533_v22 = vunpack.c.l.bf16 %v13615_v20  ;;  %v13534_v2 = vunpack.c.h.bf16 %v13615_v20  ;;  %v13619_v4 = vld [vmem:[%s17161_s26 + $0x10] sm:$0xff]   ;;  %s11649_s20 = sadd.s32 1, %s14071_s20  }
 0x5d6   : >> { %v13525_v53 = vunpack.c.l.bf16 %v13524_v40  ;;  %v13526_v43 = vunpack.c.h.bf16 %v13524_v40  ;;  %v13537_v47 = vunpack.c.l.bf16 %v13616_v38  ;;  %v13538_v28 = vunpack.c.h.bf16 %v13616_v38  ;;  %v13622_v42 = vld [vmem:[%s17161_s26 + $0x18] sm:$0xff]   ;;  %v13624_v1 = vld [vmem:[%s17158_s22 + $0x20] sm:$0xff]   ;;  %v13627_v54 = vld [vmem:[%s17158_s22 + $0x28] sm:$0xff]   ;;  %p11646_p0 = scmp.ge.s32.totalorder %s11649_s20, 2  }
 0x5d7   : >> { %v11660_v3 = vmul.f32 %v14067_v8, %v13521_v46  ;;  %v11661_v7 = vmul.f32 %v14063_v36, %v13522_v59  ;;  %v13545_v37 = vunpack.c.l.bf16 %v13618_v32  ;;  %v13546_v12 = vunpack.c.h.bf16 %v13618_v32  ;;  %v13621_v8 = vld [vmem:[%s17158_s22 + $0x18] sm:$0xff]   ;;  %v13625_v27 = vld [vmem:[%s17161_s26 + $0x20] sm:$0xff]   ;;  %v13628_v20 = vld [vmem:[%s17161_s26 + $0x28] sm:$0xff]   ;;  %s13042_s13 = sshll.u32 (%p11646_p0), %s14047_s21, 2  ;;  %s17579_s21 = sand.u32 (%p11646_p0), 1, %s14035_s18  }
 0x5d8   : >> { %v13528_v15 = vld [vmem:[%s17165_s25] sm:$0xff]   ;;  %v13617_v16 = vld [vmem:[%s17165_s25 + $0x8] sm:$0xff]   ;;  %v13620_v58 = vld [vmem:[%s17165_s25 + $0x10] sm:$0xff]   ;;  %v13549_v19 = vunpack.c.l.bf16 %v13619_v4  ;;  %v13550_v13 = vunpack.c.h.bf16 %v13619_v4  ;;  %v13557_v18 = vunpack.c.l.bf16 %v13621_v8  ;;  %v13558_v24 = vunpack.c.h.bf16 %v13621_v8  ;;  %s14081_s16 = smov (%p11646_p0), [#allocation11]  }
 0x5d9   : >> { %v13529_v63 = vunpack.c.l.bf16 %v13528_v15  ;;  %v13530_v6 = vunpack.c.h.bf16 %v13528_v15  ;;  %v11668_v30 = vadd.f32 %v13525_v53, %v11660_v3  ;;  %v11669_v17 = vadd.f32 %v13526_v43, %v11661_v7  ;;  %v13623_v10 = vld [vmem:[%s17165_s25 + $0x18] sm:$0xff]   ;;  %v13626_v51 = vld [vmem:[%s17165_s25 + $0x20] sm:$0xff]   ;;  %v13629_v15 = vld [vmem:[%s17165_s25 + $0x28] sm:$0xff]   ;;  %s13955_s29 = sshll.u32 (%p11646_p0), %s14081_s16, 4  ;;  %s13956_s29 = int_to_ptr.vmem [resolvable:$false] %s13955_s29 }
 0x5da   : >> { %v13541_v14 = vunpack.c.l.bf16 %v13617_v16  ;;  %v13542_v55 = vunpack.c.h.bf16 %v13617_v16  ;;  %v13553_v34 = vunpack.c.l.bf16 %v13620_v58  ;;  %v13554_v41 = vunpack.c.h.bf16 %v13620_v58  ;;  %v13630_v32 = vld [vmem:[%s17158_s22 + $0x30] sm:$0xff]   ;;  %s13957_s8 = scalar_lea.vmem (%p11646_p0), %s13956_s29, 512 }
 0x5db   : >> { %v11676_v33 = vmul.f32 %v13529_v63, %v11668_v30  ;;  %v11677_v36 = vmul.f32 %v13530_v6, %v11669_v17  ;;  %v11693_v62 = vmul.f32 %v13533_v22, %v11668_v30  ;;  %v11694_v52 = vmul.f32 %v13534_v2, %v11669_v17 }
 0x5dc   : >> { %v13561_v44 = vunpack.c.l.bf16 %v13622_v42  ;;  %v13562_v11 = vunpack.c.h.bf16 %v13622_v42  ;;  %v13565_v26 = vunpack.c.l.bf16 %v13623_v10  ;;  %v13566_v57 = vunpack.c.h.bf16 %v13623_v10 }
 0x5dd   : >> { %v11678_v50 = vadd.f32 %v11677_v36, %v11676_v33  ;;  %v11701_v29 = vadd.f32 %v13537_v47, %v11693_v62  ;;  %v11702_v25 = vadd.f32 %v13538_v28, %v11694_v52  ;;  %v13569_v60 = vunpack.c.l.bf16 %v13624_v1  ;;  %v13632_v62 = vld [vmem:[%s17165_s25 + $0x30] sm:$0xff]  }
 0x5de   : >> { %v13570_v56 = vunpack.c.h.bf16 %v13624_v1  ;;  %v13573_v49 = vunpack.c.l.bf16 %v13625_v27  ;;  %v13574_v35 = vunpack.c.h.bf16 %v13625_v27  ;;  %v13577_v61 = vunpack.c.l.bf16 %v13626_v51  ;;  %v13633_v27 = vld [vmem:[%s17158_s22 + $0x38] sm:$0xff]   ;;  %s12077_s22 = sadd.s32 (%p11646_p0), %s13042_s13, %s14246_s30  ;;  %s17261_s30 = scalar_lea.sflag (%p11646_p0), [#allocation10], %s17579_s21 }
 0x5df   : >> { %v11679_v9 = vrot.slane %v11678_v50, 4  ;;  %v11709_v39 = vmul.f32 %v13541_v14, %v11701_v29  ;;  %v11710_v0 = vmul.f32 %v13542_v55, %v11702_v25  ;;  %v11726_v31 = vmul.f32 %v13545_v37, %v11701_v29  ;;  %v13631_v37 = vld [vmem:[%s17161_s26 + $0x30] sm:$0xff]  }
 0x5e0   : >> { %v11727_v48 = vmul.f32 %v13546_v12, %v11702_v25  ;;  %v13578_v40 = vunpack.c.h.bf16 %v13626_v51  ;;  %v13581_v38 = vunpack.c.l.bf16 %v13627_v54  ;;  %v13582_v3 = vunpack.c.h.bf16 %v13627_v54  ;;  %v13634_v51 = vld [vmem:[%s17161_s26 + $0x38] sm:$0xff]   ;;  %s13043_s26 = sshll.u32 (%p11646_p0), %s12077_s22, 7 }
 0x5e1   : >> { %v11680_v5 = vadd.f32 %v11679_v9, %v11678_v50  ;;  %v11711_v45 = vadd.f32 %v11710_v0, %v11709_v39  ;;  %v11734_v23 = vadd.f32 %v13549_v19, %v11726_v31  ;;  %v13585_v16 = vunpack.c.l.bf16 %v13628_v20  ;;  %s17253_s27 = scalar_lea.hbm (%p11646_p0), %s17323_s11, %s13043_s26 }
 0x5e2   : >> { %v11735_v21 = vadd.f32 %v13550_v13, %v11727_v48  ;;  %v13586_v47 = vunpack.c.h.bf16 %v13628_v20  ;;  %v13589_v28 = vunpack.c.l.bf16 %v13629_v15  ;;  %v13590_v55 = vunpack.c.h.bf16 %v13629_v15 }
 0x5e3   : >> { %v11681_v46 = vrot.slane %v11680_v5, 2  ;;  %v11712_v59 = vrot.slane %v11711_v45, 4  ;;  %v11742_v53 = vmul.f32 %v13553_v34, %v11734_v23  ;;  %v11759_v43 = vmul.f32 %v13557_v18, %v11734_v23 }
 0x5e4   : >> { %v11743_v63 = vmul.f32 %v13554_v41, %v11735_v21  ;;  %v11760_v6 = vmul.f32 %v13558_v24, %v11735_v21  ;;  %v13593_v36 = vunpack.c.l.bf16 %v13630_v32  ;;  %v13594_v19 = vunpack.c.h.bf16 %v13630_v32 }
 0x5e5   : >> { %v11682_v7 = vadd.f32 %v11681_v46, %v11680_v5  ;;  %v11713_v22 = vadd.f32 %v11712_v59, %v11711_v45  ;;  %v11767_v2 = vadd.f32 %v13561_v44, %v11759_v43  ;;  %v13597_v50 = vunpack.c.l.bf16 %v13631_v37 }
 0x5e6   : >> { %v11744_v30 = vadd.f32 %v11743_v63, %v11742_v53  ;;  %v11768_v17 = vadd.f32 %v13562_v11, %v11760_v6  ;;  %v13598_v18 = vunpack.c.h.bf16 %v13631_v37  ;;  %v13601_v1 = vunpack.c.l.bf16 %v13632_v62 }
 0x5e7   : >> { %v11714_v4 = vrot.slane %v11713_v22, 2  ;;  %v11775_v58 = vmul.f32 %v13565_v26, %v11767_v2  ;;  %v11792_v14 = vmul.f32 %v13569_v60, %v11767_v2  ;;  %v11683_v52 = vrot.slane %v11682_v7, 1 }
 0x5e8   : >> { %v11745_v12 = vrot.slane %v11744_v30, 4  ;;  %v11776_v8 = vmul.f32 %v13566_v57, %v11768_v17  ;;  %v11793_v33 = vmul.f32 %v13570_v56, %v11768_v17  ;;  %v13602_v31 = vunpack.c.h.bf16 %v13632_v62 }
 0x5e9   : >> { %v11715_v42 = vadd.f32 %v11714_v4, %v11713_v22  ;;  %v11800_v10 = vadd.f32 %v13573_v49, %v11792_v14  ;;  %v11684_v9 = vadd.f32 %v11683_v52, %v11682_v7  ;;  %v13605_v23 = vunpack.c.l.bf16 %v13633_v27 }
 0x5ea   : >> { %v11746_v13 = vadd.f32 %v11745_v12, %v11744_v30  ;;  %v11777_v34 = vadd.f32 %v11776_v8, %v11775_v58  ;;  %v11801_v41 = vadd.f32 %v13574_v35, %v11793_v33  ;;  %v13606_v49 = vunpack.c.h.bf16 %v13633_v27 }
 0x5eb   : >> { %v11808_v29 = vmul.f32 %v13577_v61, %v11800_v10  ;;  %v11825_v25 = vmul.f32 %v13581_v38, %v11800_v10  ;;  %v11716_v39 = vrot.slane %v11715_v42, 1  ;;  %v13609_v61 = vunpack.c.l.bf16 %v13634_v51 }
 0x5ec   : >> { %v11747_v24 = vrot.slane %v11746_v13, 2  ;;  %v11778_v44 = vrot.slane %v11777_v34, 4  ;;  %v11809_v11 = vmul.f32 %v13578_v40, %v11801_v41  ;;  %v11826_v26 = vmul.f32 %v13582_v3, %v11801_v41  ;;  %v13635_v40 = vld [vmem:[%s17165_s25 + $0x38] sm:$0xff]   ;;  %s12080_s25 = sshll.u32 (%p11646_p0), %s14257_s23, 4  ;;  %s17255_s25 = int_to_ptr.vmem [resolvable:$true] %s12080_s25 }
 0x5ed   : >> { %v11833_v0 = vadd.f32 %v13585_v16, %v11825_v25  ;;  %v11717_v20 = vadd.f32 %v11716_v39, %v11715_v42  ;;  %v13610_v53 = vunpack.c.h.bf16 %v13634_v51  ;;  %v13613_v22 = vunpack.c.l.bf16 %v13635_v40  ;;  %s13951_s15 = scalar_lea.vmem (%p11646_p0), %s17255_s25, 256  ;;  %p13958_p5 = scmp.lt.s32.totalorder (%p11646_p0), %s17255_s25, %s13956_s29 }
 0x5ee   : >> { %v11748_v48 = vadd.f32 %v11747_v24, %v11746_v13  ;;  %v11779_v57 = vadd.f32 %v11778_v44, %v11777_v34  ;;  %v11810_v60 = vadd.f32 %v11809_v11, %v11808_v29  ;;  %v11834_v56 = vadd.f32 %v13586_v47, %v11826_v26  ;;  %p13952_p1 = scmp.ne.s32.totalorder (%p11646_p0), %s17255_s25, %s13951_s15  ;;  %p13959_p6 = scmp.lt.s32.totalorder (%p11646_p0), %s13957_s8, %s13951_s15 }
 0x5ef   : >> { %v11841_v5 = vmul.f32 %v13589_v28, %v11833_v0  ;;  %v11858_v45 = vmul.f32 %v13593_v36, %v11833_v0  ;;  %v13614_v32 = vunpack.c.h.bf16 %v13635_v40  ;;  %v11917_v8 = vsel %vm3020_vm9, %v11684_v9, %v11717_v20  ;;  %v13912_v40 = vld [vmem:[%s17322_s10 + $0x20] sm:$0xff] (%p11646_p0)   ;;  %v13913_v20 = vld [vmem:[%s17322_s10 + $0x18] sm:$0xff] (%p11646_p0)  }
 0x5f0   : >> { %v11780_v54 = vrot.slane %v11779_v57, 2  ;;  %v11811_v21 = vrot.slane %v11810_v60, 4  ;;  %v11842_v35 = vmul.f32 %v13590_v55, %v11834_v56  ;;  %v11859_v46 = vmul.f32 %v13594_v19, %v11834_v56  ;;  %v13909_v56 = vld [vmem:[%s17322_s10 + $0x38] sm:$0xff] (%p11646_p0)   ;;  %p13953_p2 = pnand (%p11646_p0), %p13952_p1, %p14196_p3  ;;  %p13960_p7 = por (%p11646_p0), %p13959_p6, %p13958_p5 }
 0x5f1   : >> { %v11866_v59 = vadd.f32 %v13597_v50, %v11858_v45  ;;  %v11749_v43 = vrot.slane %v11748_v48, 1  ;;  %vm17572_vm13 = vmmov (%p11646_p0), 0   ;;  %v17573_v45 = vld [vmem:[#allocation21_spill] sm:$0xff] (%p11646_p0) }
 0x5f2   : >> { %v11781_v15 = vadd.f32 %v11780_v54, %v11779_v57  ;;  %v11812_v63 = vadd.f32 %v11811_v21, %v11810_v60  ;;  %v11843_v6 = vadd.f32 %v11842_v35, %v11841_v5  ;;  %v11867_v38 = vadd.f32 %v13598_v18, %v11859_v46  ;;  %v13910_v5 = vld [vmem:[%s17322_s10 + $0x30] sm:$0xff] (%p11646_p0)   ;;  %v13911_v21 = vld [vmem:[%s17322_s10 + $0x28] sm:$0xff] (%p11646_p0)   ;;  %p13954_p4 = pneg (%p11646_p0), %p13953_p2 }
 0x5f3   : >> { %v11874_v3 = vmul.f32 %v13601_v1, %v11866_v59  ;;  %v11891_v7 = vmul.f32 %v13605_v23, %v11866_v59  ;;  %v11750_v4 = vadd.f32 %v11749_v43, %v11748_v48  ;;  %v17571_v60 = vmov (%p11646_p0), 0.0   ;;  %v13914_v46 = vld [vmem:[%s17322_s10 + $0x10] sm:$0xff] (%p11646_p0)   ;;  %v13915_v59 = vld [vmem:[%s17322_s10 + $0x8] sm:$0xff] (%p11646_p0)  }
 0x5f4   : >> { %v11813_v2 = vrot.slane %v11812_v63, 2  ;;  %v11844_v16 = vrot.slane %v11843_v6, 4  ;;  %v11782_v30 = vrot.slane %v11781_v15, 1  ;;  %v11875_v17 = vmul.f32 %v13602_v31, %v11867_v38  ;;  %13682 = vmatprep.subr.bf16.mxu1 (%p11646_p0), %v17571_v60  ;;  %13698 = vmatprep.mubr.msk.bf16.mxu1 (%p11646_p0), %vm17572_vm13, %v17571_v60  ;;  %p13961_p9 = pnand (%p11646_p0), %p13960_p7, %p13954_p4 }
 0x5f5   : >> { %v11892_v47 = vmul.f32 %v13606_v49, %v11867_v38  ;;  %v11899_v28 = vadd.f32 %v13609_v61, %v11891_v7   ;;  %v11919_v19 = vsel %vm11918_vm1, %v11917_v8, %v11750_v4  ;;  %13683 = vmatpush3.bf16.msra.mxu1 (%p11646_p0), %v13909_v56  ;;  %v11942_v23 = vsub.f32 (%p11646_p0), 0.0, %v17573_v45  ;;  %v17574_v49 = vld [vmem:[#allocation23_spill] sm:$0xff] (%p11646_p0) }
 0x5f6   : >> { %v11814_v58 = vadd.f32 %v11813_v2, %v11812_v63  ;;  %v11845_v14 = vadd.f32 %v11844_v16, %v11843_v6  ;;  %v11876_v55 = vadd.f32 %v11875_v17, %v11874_v3  ;;  %v11783_v62 = vadd.f32 %v11782_v30, %v11781_v15  ;;  %13684 = vmatprep.subr.bf16.mxu1 (%p11646_p0), %v17571_v60  ;;  %v13916_v6 = vld [vmem:[%s17322_s10] sm:$0xff] (%p11646_p0)   ;;  %v17576_v2 = vld [vmem:[#allocation25_spill] sm:$0xff] (%p11646_p0) }
 0x5f7   : >> { %v11900_v37 = vadd.f32 %v13610_v53, %v11892_v47   ;;  %v11907_v12 = vmul.f32 %v13613_v22, %v11899_v28  ;;  %v17570_v8 = vmov %v11899_v28  ;;  %11927 = vst [vmem:[#allocation2] sm:$0xff] (%p11646_p0), %v11899_v28  ;;  %v11943_v54 = vsub.f32 (%p11646_p0), 0.0, %v17574_v49  ;;  %v13031_v38 = vld [vmem:[%s17321_s9] ss:$0 sm:$0xff] (%p11646_p0)  ;;  %v17575_v3 = vld [vmem:[#allocation24_spill] sm:$0xff] (%p11646_p0) }
 0x5f8   : >> { %v11815_v33 = vrot.slane %v11814_v58, 1  ;;  %v11846_v36 = vrot.slane %v11845_v14, 2  ;;  %v11877_v52 = vrot.slane %v11876_v55, 4  ;;  %v11920_v18 = vsel %vm540_vm2, %v11919_v19, %v11783_v62 }
 0x5f9   : >> { %v11908_v42 = vmul.f32 %v13614_v32, %v11900_v37  ;;  %11928 = vst [vmem:[#allocation2 + $0x8] sm:$0xff] (%p11646_p0), %v11900_v37  ;;  %13685 = vmatpush3.bf16.msra.mxu1 (%p11646_p0), %v13910_v5  ;;  %v11944_v35 = vmul.f32 (%p11646_p0), 1.442695, %v11942_v23  ;;  %v11946_v61 = vmul.f32 (%p11646_p0), 1.442695, %v11943_v54  ;;  %v11938_v7 = vmul.f32 (%p11646_p0), %v13031_v38, %v17575_v3 }
 0x5fa   : >> { %v11847_v10 = vadd.f32 %v11846_v36, %v11845_v14  ;;  %v11878_v13 = vadd.f32 %v11877_v52, %v11876_v55  ;;  %v11816_v41 = vadd.f32 %v11815_v33, %v11814_v58  ;;  %v17569_v36 = vmov %v11900_v37  ;;  %13686 = vmatprep.subr.bf16.mxu1 (%p11646_p0), %v17571_v60 }
 0x5fb   : >> { %v11909_v34 = vadd.f32 %v11908_v42, %v11907_v12  ;;  %13917 = vpow2.f32 (%p11646_p0), %v11944_v35  ;;  %v11939_v16 = vmul.f32 (%p11646_p0), %v13031_v38, %v17576_v2  ;;  %vm17577_vm2 = vcmask (%p11646_p0), 523264  }
 0x5fc   : >> { %v11848_v50 = vrot.slane %v11847_v10, 1  ;;  %v11879_v29 = vrot.slane %v11878_v13, 2  ;;  %v11921_v11 = vsel %vm895_vm6, %v11920_v18, %v11816_v41  ;;  %13919 = vpow2.f32 (%p11646_p0), %v11946_v61 }
 0x5fd   : >> { %v11910_v25 = vrot.slane %v11909_v34, 4  ;;  %13687 = vmatpush3.bf16.msra.mxu1 (%p11646_p0), %v13911_v21 }
 0x5fe   : >> { %v11849_v1 = vadd.f32 %v11848_v50, %v11847_v10  ;;  %v11880_v24 = vadd.f32 %v11879_v29, %v11878_v13  ;;  %13688 = vmatprep.subr.bf16.mxu1 (%p11646_p0), %v17571_v60 }
 0x5ff   : >> { %v11911_v44 = vadd.f32 %v11910_v25, %v11909_v34 }
 0x600   : >> { %v11881_v26 = vrot.slane %v11880_v24, 1  ;;  %v11922_v0 = vsel %vm605_vm5, %v11921_v11, %v11849_v1 }
 0x601   : >> { %v11912_v27 = vrot.slane %v11911_v44, 2  ;;  %13689 = vmatpush3.bf16.msra.mxu1 (%p11646_p0), %v13912_v40 }
 0x602   : >> { %v11882_v9 = vadd.f32 %v11881_v26, %v11880_v24  ;;  %13690 = vmatprep.subr.bf16.mxu1 (%p11646_p0), %v17571_v60 }
 0x603   : >> { %v11913_v39 = vadd.f32 %v11912_v27, %v11911_v44 }
 0x604   : >> { %v11923_v51 = vsel %vm585_vm4, %v11922_v0, %v11882_v9 }
 0x605   : >> { %v11914_v31 = vrot.slane %v11913_v39, 1  ;;  %13691 = vmatpush3.bf16.msra.mxu1 (%p11646_p0), %v13913_v20 }
 0x606   : > { %11648 = sbr.rel (!%p11646_p0) target bundleno = 1490 (0x5d2), region = 140  ;;  %13692 = vmatprep.subr.bf16.mxu1 (%p11646_p0), %v17571_v60 }
 0x607   : >> { %v11915_v48 = vadd.f32 %v11914_v31, %v11913_v39 }
 0x608   : > { %v13918_v53 = vpop.eup (%p11646_p0), %13917 }
 0x609   : >> { %v11924_v57 = vsel %vm565_vm3, %v11923_v51, %v11915_v48  ;;  %13693 = vmatpush3.bf16.msra.mxu1 (%p11646_p0), %v13914_v46  ;;  %v13920_v43 = vpop.eup (%p11646_p0), %13919  ;;  %v11948_v15 = vadd.f32 (%p11646_p0), 1.0, %v13918_v53  ;;  %vm17578_vm3 = vmmov (%p11646_p0), %vm17577_vm2 }
 0x60a   : >> { %11926 = vst [vmem:[%s11925_s14] sm:$0xff] %v11924_v57  ;;  %13694 = vmatprep.subr.bf16.mxu1 (%p11646_p0), %v17571_v60  ;;  %v11949_v63 = vadd.f32 (%p11646_p0), 1.0, %v13920_v43 }
 0x60b   : > { %13921 = vrcp.f32 %v11948_v15 }
 0x60c   : > { %13923 = vrcp.f32 %v11949_v63 }
 0x60d   : > { %13695 = vmatpush3.bf16.msra.mxu1 %v13915_v59 }
 0x60e   : > { %13696 = vmatprep.subr.bf16.mxu1 %v17571_v60 }
 0x611   : > { %13697 = vmatpush3.bf16.msra.mxu1 %v13916_v6  ;;  %v11929_v22 = vld [vmem:[#allocation7] sm:$0xff]  ;;  %v11930_v32 = vld [vmem:[#allocation7 + $0x8] sm:$0xff] }
 0x612   : > { %v11940_v30 = vadd.f32 %v11938_v7, %v11929_v22  ;;  %v11941_v47 = vadd.f32 %v11939_v16, %v11930_v32 }
 0x618   : > { %v13922_v17 = vpop.eup %13921 }
 0x619   : > { %v13924_v28 = vpop.eup %13923  ;;  %v11951_v4 = vmul.f32 %v13922_v17, %v17573_v45 }
 0x61a   : > { %v11953_v58 = vmul.f32 %v13924_v28, %v17574_v49 }
 0x61b   : > { %v11954_v14 = vmul.f32 %v11951_v4, %v11940_v30 }
 0x61c   : > { %v11955_v55 = vmul.f32 %v11953_v58, %v11941_v47 }
 0x61e   : > { %v11956_v37 = vpack.c.bf16 %v11955_v55, %v11954_v14 }
 0x620   : > { %13699 = vmatmul.mubr.bf16.vlgmr.msra.gmra.mxu1 %v11956_v37 }
 0x6e0   : > { %v12055_v12 = vpop.f32.mrf.mxu1 }
 0x6e1   : > { %12062 = vst.msk [vmem:[%s14257_s23] sm:$0xff] %vm17577_vm2, %v12055_v12 }
 0x6e2   : > { %v13700_v8 = vpop.f32.mrf.mxu1 }
 0x6e4   : > { %v12058_v33 = vpop.f32.mrf.mxu1 }
 0x6e5   : > { %12063 = vst.msk [vmem:[%s14257_s23 + $0x8] sm:$0xff] %vm17578_vm3, %v12058_v33 }
 0x6e6   : > { %v13701_v36 = vpop.f32.mrf.mxu1 }
 0x6e7   : > { %13964 = shalt.err (!%p13961_p9)
}
 0x6e8   : > { %s13965_s23 = scalar_lea.hbm %s17253_s27, 256  ;;  %s13969_s22 = scalar_lea.hbm %s17323_s11, 1024 }
 0x6e9   : > { %p13966_p11 = scmp.ne.s32.totalorder %s17253_s27, %s13965_s23  ;;  %p13970_p12 = scmp.lt.s32.totalorder %s17253_s27, %s17323_s11 }
 0x6ea   : > { %p13971_p0 = scmp.lt.s32.totalorder %s13969_s22, %s13965_s23 }
 0x6eb   : > { %p13967_p13 = pnand %p13966_p11, %p14196_p3 }
 0x6ec   : > { %p13972_p1 = por %p13971_p0, %p13970_p12 }
 0x6ed   : > { %p13968_p10 = pneg %p13967_p13 }
 0x6ef   : > { %p13973_p2 = pnand %p13972_p1, %p13968_p10 }
 0x6f1   : > { %13976 = shalt.err (!%p13973_p2)
}
 0x6f2   : > { %s14082_s14 = smov 128   ;;  %s14083_s21 = smov 8  }
 0x6f3   : > { %13706 = dma.vmem_to_hbm [thread:$0]  (%p14196_p3), %s17255_s25, 256, %s17253_s27, %s17261_s30, %s14082_s14, %s14082_s14, %s14083_s21  }
 0x6f4 PF: > { %p13718_p4 = scmp.ge.s32.totalorder %s14059_s24, 2  ;;  %s12095_s16 = sand.u32 1, %s14031_s17  }
 0x6f5   : > { %s12096_s29 = scalar_lea.sflag [#allocation10], %s12095_s16 }
 0x6f6   : > { %p13713_p5 = pnand %p13718_p4, %p14205_p8 }
 0x6f8   : > { %p13714_p6 = pneg %p13713_p5 }
 0x6fa   : > { %14026 = dma.done.wait (%p13714_p6), %s12096_s29, 256  }
 0x6fb   : > { %14028 = vsyncadd (%p13714_p6), %s12096_s29, 4294967040  ;;  %s25_s24 = sadd.s32 1, %s14059_s24   ;;  %s17581_s8 = sld [smem:[#allocation19_spill]] }
 0x6fc   : > { %p22_p7 = scmp.ge.s32.totalorder %s25_s24, 6   ;;  %s17582_s20 = sld [smem:[#allocation14_spill]] }
 0x6fd   : > { %s17583_s21 = sld [smem:[#allocation15_spill]]  ;;  %s17586_s17 = smov %s14035_s18 }
 0x6fe   : > { %s17584_s22 = sld [smem:[#allocation16_spill]]  ;;  %s17587_s18 = smov %s14039_s19 }
 0x6ff   : > { %s17585_s23 = sld [smem:[#allocation17_spill]]  ;;  %24 = sbr.rel (!%p22_p7) target bundleno = 8 (0x8), region = 151 }
 0x701   : > { %s17588_s19 = smov %s17581_s8 }
 0x704   :  { %12101 = vsyncpa [#allocation9], 1 }
 0x705   :  { %12103 = vsyncpa [#allocation9 + $0x1], 1 }
 0x706   :  { %12104 = vsyncpa [#allocation10], 1 }
 0x707   :  { %12106 = vsyncpa [#allocation10 + $0x1], 1 }

</bundles_post_ra>
